<compile_context>
chip_gen: v6e
topology: v6e:2x2x1
jax: 0.10.0
libtpu: 0.0.40
codegen_flags: <defaults>
</compile_context>

<pallas_src>
import math
import numpy as np
import jax
import jax.numpy as jnp
from jax.experimental import pallas as pl
from jax.experimental.pallas import tpu as pltpu

# ------------------------------ configuration -------------------------------
BATCH = 2
SEQ = 256            # number of tokens
D_MODEL = 64
NHEAD = 4
DIM_FF = 256
DIM_HEAD = D_MODEL // NHEAD
SCALE = DIM_HEAD ** (-0.5)
LN_EPS = 1e-5


# --------------------------- in-kernel math helpers --------------------------
def _erf(x):
    # TODO(synk): lax.erf has no guaranteed Mosaic lowering; use the
    # Numerical-Recipes erfc rational approximation (|err| < 1.2e-7), built
    # only from exp / mul / add which lower cleanly (EUP + VPU).
    z = jnp.abs(x)
    t = 1.0 / (1.0 + 0.5 * z)
    poly = -1.26551223 + t * (1.00002368 + t * (0.37409196 + t * (0.09678418 +
           t * (-0.18628806 + t * (0.27886807 + t * (-1.13520398 + t * (1.48851587 +
           t * (-0.82215223 + t * 0.17087277))))))))
    erfc_pos = t * jnp.exp(-z * z + poly)
    return jnp.where(x >= 0.0, 1.0 - erfc_pos, erfc_pos - 1.0)


def _gelu_exact(x):
    # PyTorch F.gelu default = exact erf formulation.
    return x * 0.5 * (1.0 + _erf(x * (1.0 / math.sqrt(2.0))))


def _layernorm(x, g, b):
    mean = jnp.mean(x, axis=-1, keepdims=True)
    xc = x - mean
    var = jnp.mean(xc * xc, axis=-1, keepdims=True)
    return xc * jax.lax.rsqrt(var + LN_EPS) * g + b


def _elu_plus_one(x):
    # F.elu(x, alpha=1) + 1
    return jnp.where(x > 0.0, x + 1.0, jnp.exp(x))


# ------------------------------ fused layer kernel ---------------------------
def _encoder_layer_kernel(src_ref,
                          n1g_ref, n1b_ref,
                          wq_ref, wk_ref, wv_ref,
                          hmask_ref,
                          wo_ref, bo_ref,
                          n2g_ref, n2b_ref,
                          w1_ref, b1_ref,
                          w2_ref, b2_ref,
                          out_ref):
    f32 = jnp.float32
    bf16 = jnp.bfloat16

    x = src_ref[0]                                           # (N, E) f32 residual stream

    # ---------------- self-attention block (pre-norm) ----------------
    h = _layernorm(x, n1g_ref[...], n1b_ref[...])
    hb = h.astype(bf16)
    q = jnp.dot(hb, wq_ref[...], preferred_element_type=f32)   # (N, E), no bias
    k = jnp.dot(hb, wk_ref[...], preferred_element_type=f32)
    v = jnp.dot(hb, wv_ref[...], preferred_element_type=f32)

    qf = _elu_plus_one(q * SCALE)        # q = q*scale then feature_map (matches spec)
    kf = _elu_plus_one(k)

    # All heads at once: full (E,E) contraction, masked to per-head diagonal
    # blocks.  hmask[d,e] = 1 iff d and e belong to the same head.
    ctx = jax.lax.dot_general(kf, v, (((0,), (0,)), ((), ())),
                              preferred_element_type=f32)       # (E, E): Kf^T @ V
    ctx = ctx * hmask_ref[...]
    num = jnp.dot(qf, ctx, preferred_element_type=f32)          # (N, E)

    ksum = jnp.sum(kf, axis=0, keepdims=True)                   # (1, E)  (k.sum over tokens)
    den = jnp.dot(qf * ksum, hmask_ref[...],
                  preferred_element_type=f32) + 1e-8            # (N, E), per-head denom
    attn = num * pl.reciprocal(den, approx=True)                # EUP reciprocal

    y = jnp.dot(attn.astype(bf16), wo_ref[...],
                preferred_element_type=f32) + bo_ref[...]       # to_out Linear
    x = x + y                                                   # residual 1

    # ---------------- feed-forward block (pre-norm) ----------------
    h2 = _layernorm(x, n2g_ref[...], n2b_ref[...])
    f = jnp.dot(h2.astype(bf16), w1_ref[...],
                preferred_element_type=f32) + b1_ref[...]       # (N, FF)
    f = _gelu_exact(f)
    y2 = jnp.dot(f.astype(bf16), w2_ref[...],
                 preferred_element_type=f32) + b2_ref[...]      # (N, E)

    out_ref[0] = x + y2                                         # residual 2


# ---------------------------------- wrapper ----------------------------------
def linear_transformer_encoder_layer(src, params):
    B, N, E = src.shape

    # per-head block mask (E, E): 1 where row/col belong to the same head
    head_ids = np.arange(E) // DIM_HEAD
    hmask = jnp.asarray((head_ids[:, None] == head_ids[None, :]).astype(np.float32))

    bf16 = jnp.bfloat16
    wq = params["qkv_w"][:, :E].astype(bf16)
    wk = params["qkv_w"][:, E:2 * E].astype(bf16)
    wv = params["qkv_w"][:, 2 * E:].astype(bf16)
    wo = params["out_w"].astype(bf16)
    w1 = params["lin1_w"].astype(bf16)
    w2 = params["lin2_w"].astype(bf16)

    row = lambda a: a.reshape(1, -1).astype(jnp.float32)

    inputs = (
        src.astype(jnp.float32),
        row(params["norm1_g"]), row(params["norm1_b"]),
        wq, wk, wv,
        hmask,
        wo, row(params["out_b"]),
        row(params["norm2_g"]), row(params["norm2_b"]),
        w1, row(params["lin1_b"]),
        w2, row(params["lin2_b"]),
    )

    def full_spec(arr):
        # Weight / bias tensors: one block = the whole (2-D) array, identical
        # for every grid step, so they stay resident in VMEM.
        return pl.BlockSpec(arr.shape, lambda b: (0, 0))

    in_specs = [pl.BlockSpec((1, N, E), lambda b: (b, 0, 0))]
    in_specs += [full_spec(a) for a in inputs[1:]]

    return pl.pallas_call(
        _encoder_layer_kernel,
        out_shape=jax.ShapeDtypeStruct((B, N, E), jnp.float32),
        grid=(B,),
        in_specs=in_specs,
        out_specs=pl.BlockSpec((1, N, E), lambda b: (b, 0, 0)),
        compiler_params=pltpu.CompilerParams(
            dimension_semantics=("parallel",)),
    )(*inputs)


# ------------------------------ parameters / reference -----------------------
def init_params(key):
    E, FF = D_MODEL, DIM_FF
    ks = jax.random.split(key, 7)

    def lin_w(k, fan_in, shape):
        bound = 1.0 / math.sqrt(fan_in)
        return jax.random.uniform(k, shape, jnp.float32, -bound, bound)

    return {
        "norm1_g": jnp.ones((E,), jnp.float32), "norm1_b": jnp.zeros((E,), jnp.float32),
        "norm2_g": jnp.ones((E,), jnp.float32), "norm2_b": jnp.zeros((E,), jnp.float32),
        "qkv_w": lin_w(ks[0], E, (E, 3 * E)),      # to_qkv (bias=False), (in, out) layout
        "out_w": lin_w(ks[1], E, (E, E)),
        "out_b": lin_w(ks[2], E, (E,)),
        "lin1_w": lin_w(ks[3], E, (E, FF)),
        "lin1_b": lin_w(ks[4], E, (FF,)),
        "lin2_w": lin_w(ks[5], FF, (FF, E)),
        "lin2_b": lin_w(ks[6], FF, (E,)),
    }


def reference_forward(src, params):
    """Pure-JAX f32 reference translating the PyTorch forward exactly (eval mode)."""
    E = src.shape[-1]
    H, Dh = NHEAD, E // NHEAD

    def ln(x, g, b):
        m = jnp.mean(x, -1, keepdims=True)
        v = jnp.mean((x - m) ** 2, -1, keepdims=True)
        return (x - m) * jax.lax.rsqrt(v + LN_EPS) * g + b

    def fmap(t):
        return jnp.where(t > 0, t + 1.0, jnp.exp(t))

    def sa(x):
        b, n, _ = x.shape
        qkv = x @ params["qkv_w"]
        q, k, v = jnp.split(qkv, 3, axis=-1)
        q = q.reshape(b, n, H, Dh).transpose(0, 2, 1, 3)
        k = k.reshape(b, n, H, Dh).transpose(0, 2, 1, 3)
        v = v.reshape(b, n, H, Dh).transpose(0, 2, 1, 3)
        q = fmap(q * SCALE)
        k = fmap(k)
        k_cumsum = k.sum(axis=-2)
        context = jnp.einsum('bhnd,bhne->bhde', k, v)
        out = jnp.einsum('bhnd,bhde->bhne', q, context)
        den = jnp.einsum('bhnd,bhd->bhn', q, k_cumsum)[..., None] + 1e-8
        out = out / den
        out = out.transpose(0, 2, 1, 3).reshape(b, n, -1)
        return out @ params["out_w"] + params["out_b"]

    def ff(x):
        f = jax.nn.gelu(x @ params["lin1_w"] + params["lin1_b"], approximate=False)
        return f @ params["lin2_w"] + params["lin2_b"]

    x = src
    x = x + sa(ln(x, params["norm1_g"], params["norm1_b"]))
    x = x + ff(ln(x, params["norm2_g"], params["norm2_b"]))
    return x


# ------------------------------------ main -----------------------------------
if __name__ == "__main__":
    key = jax.random.PRNGKey(0)
    kp, kx = jax.random.split(key)
    params = init_params(kp)
    src = jax.random.normal(kx, (BATCH, SEQ, D_MODEL), dtype=jnp.float32)

    out = jax.jit(linear_transformer_encoder_layer)(src, params)
    out = jax.block_until_ready(out)

    assert out.shape == (BATCH, SEQ, D_MODEL), out.shape
    assert bool(jnp.all(jnp.isfinite(out)))

    # Sanity check vs pure-f32 reference (kernel uses bf16 matmul operands and
    # an approximate reciprocal, so allow a few percent of drift).
    ref = reference_forward(src, params)
    max_err = float(jnp.max(jnp.abs(out - ref)))
    mean_err = float(jnp.mean(jnp.abs(out - ref)))
    assert max_err < 4e-1 and mean_err < 8e-2, (max_err, mean_err)

    print("KERNEL_OK")
</pallas_src>

<mosaic_0001>
module attributes {stable_mosaic.version = 11 : i64} {
  func.func @_encoder_layer_kernel(%arg0: i32, %arg1: memref<1x256x64xf32, #tpu.memory_space<vmem>>, %arg2: memref<1x64xf32, #tpu.memory_space<vmem>>, %arg3: memref<1x64xf32, #tpu.memory_space<vmem>>, %arg4: memref<64x64xbf16, #tpu.memory_space<vmem>>, %arg5: memref<64x64xbf16, #tpu.memory_space<vmem>>, %arg6: memref<64x64xbf16, #tpu.memory_space<vmem>>, %arg7: memref<64x64xf32, #tpu.memory_space<vmem>>, %arg8: memref<64x64xbf16, #tpu.memory_space<vmem>>, %arg9: memref<1x64xf32, #tpu.memory_space<vmem>>, %arg10: memref<1x64xf32, #tpu.memory_space<vmem>>, %arg11: memref<1x64xf32, #tpu.memory_space<vmem>>, %arg12: memref<64x256xbf16, #tpu.memory_space<vmem>>, %arg13: memref<1x256xf32, #tpu.memory_space<vmem>>, %arg14: memref<256x64xbf16, #tpu.memory_space<vmem>>, %arg15: memref<1x64xf32, #tpu.memory_space<vmem>>, %arg16: memref<1x256x64xf32, #tpu.memory_space<vmem>>) attributes {dimension_semantics = [#tpu.dimension_semantics<parallel>], iteration_bounds = array<i64: 2>, scalar_prefetch = 0 : i64, scratch_operands = 0 : i64, tpu.core_type = #tpu.core_type<tc>, window_params = [{transform_indices = @transform_0, window_bounds = array<i64: 1, 256, 64>}, {pipeline_mode = #tpu.pipeline_mode<synchronous>, transform_indices = @transform_1, window_bounds = array<i64: 1, 64>}, {pipeline_mode = #tpu.pipeline_mode<synchronous>, transform_indices = @transform_2, window_bounds = array<i64: 1, 64>}, {pipeline_mode = #tpu.pipeline_mode<synchronous>, transform_indices = @transform_3, window_bounds = array<i64: 64, 64>}, {pipeline_mode = #tpu.pipeline_mode<synchronous>, transform_indices = @transform_4, window_bounds = array<i64: 64, 64>}, {pipeline_mode = #tpu.pipeline_mode<synchronous>, transform_indices = @transform_5, window_bounds = array<i64: 64, 64>}, {pipeline_mode = #tpu.pipeline_mode<synchronous>, transform_indices = @transform_6, window_bounds = array<i64: 64, 64>}, {pipeline_mode = #tpu.pipeline_mode<synchronous>, transform_indices = @transform_7, window_bounds = array<i64: 64, 64>}, {pipeline_mode = #tpu.pipeline_mode<synchronous>, transform_indices = @transform_8, window_bounds = array<i64: 1, 64>}, {pipeline_mode = #tpu.pipeline_mode<synchronous>, transform_indices = @transform_9, window_bounds = array<i64: 1, 64>}, {pipeline_mode = #tpu.pipeline_mode<synchronous>, transform_indices = @transform_10, window_bounds = array<i64: 1, 64>}, {pipeline_mode = #tpu.pipeline_mode<synchronous>, transform_indices = @transform_11, window_bounds = array<i64: 64, 256>}, {pipeline_mode = #tpu.pipeline_mode<synchronous>, transform_indices = @transform_12, window_bounds = array<i64: 1, 256>}, {pipeline_mode = #tpu.pipeline_mode<synchronous>, transform_indices = @transform_13, window_bounds = array<i64: 256, 64>}, {pipeline_mode = #tpu.pipeline_mode<synchronous>, transform_indices = @transform_14, window_bounds = array<i64: 1, 64>}, {transform_indices = @transform_15, window_bounds = array<i64: 1, 256, 64>}]} {
    %c0 = arith.constant 0 : index
    %c0_0 = arith.constant 0 : index
    %c0_1 = arith.constant 0 : index
    %0 = vector.load %arg1[%c0, %c0_0, %c0_1] : memref<1x256x64xf32, #tpu.memory_space<vmem>>, vector<1x256x64xf32>
    %1 = vector.shape_cast %0 : vector<1x256x64xf32> to vector<256x64xf32>
    %c0_2 = arith.constant 0 : index
    %c0_3 = arith.constant 0 : index
    %2 = vector.load %arg2[%c0_2, %c0_3] : memref<1x64xf32, #tpu.memory_space<vmem>>, vector<1x64xf32>
    %c0_4 = arith.constant 0 : index
    %c0_5 = arith.constant 0 : index
    %3 = vector.load %arg3[%c0_4, %c0_5] : memref<1x64xf32, #tpu.memory_space<vmem>>, vector<1x64xf32>
    %cst = arith.constant dense<0.000000e+00> : vector<256xf32>
    %4 = vector.multi_reduction <add>, %1, %cst [1] : vector<256x64xf32> to vector<256xf32>
    %5 = vector.shape_cast %4 : vector<256xf32> to vector<256x1xf32>
    %cst_6 = arith.constant 6.400000e+01 : f32
    %6 = vector.broadcast %cst_6 : f32 to vector<256x1xf32>
    %7 = arith.divf %5, %6 : vector<256x1xf32>
    %8 = vector.broadcast %7 : vector<256x1xf32> to vector<256x64xf32>
    %9 = arith.subf %1, %8 : vector<256x64xf32>
    %10 = arith.mulf %9, %9 : vector<256x64xf32>
    %cst_7 = arith.constant dense<0.000000e+00> : vector<256xf32>
    %11 = vector.multi_reduction <add>, %10, %cst_7 [1] : vector<256x64xf32> to vector<256xf32>
    %12 = vector.shape_cast %11 : vector<256xf32> to vector<256x1xf32>
    %cst_8 = arith.constant 6.400000e+01 : f32
    %13 = vector.broadcast %cst_8 : f32 to vector<256x1xf32>
    %14 = arith.divf %12, %13 : vector<256x1xf32>
    %cst_9 = arith.constant 9.99999974E-6 : f32
    %15 = vector.broadcast %cst_9 : f32 to vector<256x1xf32>
    %16 = arith.addf %14, %15 : vector<256x1xf32>
    %17 = math.rsqrt %16 : vector<256x1xf32>
    %18 = vector.broadcast %17 : vector<256x1xf32> to vector<256x64xf32>
    %19 = arith.mulf %9, %18 : vector<256x64xf32>
    %20 = vector.broadcast %2 : vector<1x64xf32> to vector<256x64xf32>
    %21 = arith.mulf %19, %20 : vector<256x64xf32>
    %22 = vector.broadcast %3 : vector<1x64xf32> to vector<256x64xf32>
    %23 = arith.addf %21, %22 : vector<256x64xf32>
    %24 = arith.truncf %23 : vector<256x64xf32> to vector<256x64xbf16>
    %c0_10 = arith.constant 0 : index
    %c0_11 = arith.constant 0 : index
    %25 = vector.load %arg4[%c0_10, %c0_11] : memref<64x64xbf16, #tpu.memory_space<vmem>>, vector<64x64xbf16>
    %cst_12 = arith.constant dense<0.000000e+00> : vector<256x64xf32>
    %26 = tpu.matmul %24, %25, %cst_12 {dimension_numbers = #tpu.dot_dimension_numbers<[1], [0], [0], [1], [0, 0, 1, 1], [], []>} : vector<256x64xbf16>, vector<64x64xbf16>, vector<256x64xf32> -> vector<256x64xf32>
    %c0_13 = arith.constant 0 : index
    %c0_14 = arith.constant 0 : index
    %27 = vector.load %arg5[%c0_13, %c0_14] : memref<64x64xbf16, #tpu.memory_space<vmem>>, vector<64x64xbf16>
    %cst_15 = arith.constant dense<0.000000e+00> : vector<256x64xf32>
    %28 = tpu.matmul %24, %27, %cst_15 {dimension_numbers = #tpu.dot_dimension_numbers<[1], [0], [0], [1], [0, 0, 1, 1], [], []>} : vector<256x64xbf16>, vector<64x64xbf16>, vector<256x64xf32> -> vector<256x64xf32>
    %c0_16 = arith.constant 0 : index
    %c0_17 = arith.constant 0 : index
    %29 = vector.load %arg6[%c0_16, %c0_17] : memref<64x64xbf16, #tpu.memory_space<vmem>>, vector<64x64xbf16>
    %cst_18 = arith.constant dense<0.000000e+00> : vector<256x64xf32>
    %30 = tpu.matmul %24, %29, %cst_18 {dimension_numbers = #tpu.dot_dimension_numbers<[1], [0], [0], [1], [0, 0, 1, 1], [], []>} : vector<256x64xbf16>, vector<64x64xbf16>, vector<256x64xf32> -> vector<256x64xf32>
    %cst_19 = arith.constant 2.500000e-01 : f32
    %31 = vector.broadcast %cst_19 : f32 to vector<256x64xf32>
    %32 = arith.mulf %26, %31 : vector<256x64xf32>
    %cst_20 = arith.constant 0.000000e+00 : f32
    %33 = vector.broadcast %cst_20 : f32 to vector<256x64xf32>
    %34 = arith.cmpf ogt, %32, %33 : vector<256x64xf32>
    %cst_21 = arith.constant 1.000000e+00 : f32
    %35 = vector.broadcast %cst_21 : f32 to vector<256x64xf32>
    %36 = arith.addf %32, %35 : vector<256x64xf32>
    %37 = math.exp %32 : vector<256x64xf32>
    %38 = arith.select %34, %36, %37 : vector<256x64xi1>, vector<256x64xf32>
    %cst_22 = arith.constant 0.000000e+00 : f32
    %39 = vector.broadcast %cst_22 : f32 to vector<256x64xf32>
    %40 = arith.cmpf ogt, %28, %39 : vector<256x64xf32>
    %cst_23 = arith.constant 1.000000e+00 : f32
    %41 = vector.broadcast %cst_23 : f32 to vector<256x64xf32>
    %42 = arith.addf %28, %41 : vector<256x64xf32>
    %43 = math.exp %28 : vector<256x64xf32>
    %44 = arith.select %40, %42, %43 : vector<256x64xi1>, vector<256x64xf32>
    %cst_24 = arith.constant dense<0.000000e+00> : vector<64x64xf32>
    %45 = tpu.matmul %44, %30, %cst_24 {dimension_numbers = #tpu.dot_dimension_numbers<[0], [0], [1], [1], [0, 1, 1, 1], [], []>} : vector<256x64xf32>, vector<256x64xf32>, vector<64x64xf32> -> vector<64x64xf32>
    %c0_25 = arith.constant 0 : index
    %c0_26 = arith.constant 0 : index
    %46 = vector.load %arg7[%c0_25, %c0_26] : memref<64x64xf32, #tpu.memory_space<vmem>>, vector<64x64xf32>
    %47 = arith.mulf %45, %46 : vector<64x64xf32>
    %cst_27 = arith.constant dense<0.000000e+00> : vector<256x64xf32>
    %48 = tpu.matmul %38, %47, %cst_27 {dimension_numbers = #tpu.dot_dimension_numbers<[1], [0], [0], [1], [0, 0, 1, 1], [], []>} : vector<256x64xf32>, vector<64x64xf32>, vector<256x64xf32> -> vector<256x64xf32>
    %cst_28 = arith.constant dense<0.000000e+00> : vector<64xf32>
    %49 = vector.multi_reduction <add>, %44, %cst_28 [0] : vector<256x64xf32> to vector<64xf32>
    %50 = vector.shape_cast %49 : vector<64xf32> to vector<1x64xf32>
    %51 = vector.broadcast %50 : vector<1x64xf32> to vector<256x64xf32>
    %52 = arith.mulf %38, %51 : vector<256x64xf32>
    %c0_29 = arith.constant 0 : index
    %c0_30 = arith.constant 0 : index
    %53 = vector.load %arg7[%c0_29, %c0_30] : memref<64x64xf32, #tpu.memory_space<vmem>>, vector<64x64xf32>
    %cst_31 = arith.constant dense<0.000000e+00> : vector<256x64xf32>
    %54 = tpu.matmul %52, %53, %cst_31 {dimension_numbers = #tpu.dot_dimension_numbers<[1], [0], [0], [1], [0, 0, 1, 1], [], []>} : vector<256x64xf32>, vector<64x64xf32>, vector<256x64xf32> -> vector<256x64xf32>
    %cst_32 = arith.constant 9.99999993E-9 : f32
    %55 = vector.broadcast %cst_32 : f32 to vector<256x64xf32>
    %56 = arith.addf %54, %55 : vector<256x64xf32>
    %57 = tpu.reciprocal %56 {approx = true} : vector<256x64xf32> -> vector<256x64xf32>
    %58 = arith.mulf %48, %57 : vector<256x64xf32>
    %59 = arith.truncf %58 : vector<256x64xf32> to vector<256x64xbf16>
    %c0_33 = arith.constant 0 : index
    %c0_34 = arith.constant 0 : index
    %60 = vector.load %arg8[%c0_33, %c0_34] : memref<64x64xbf16, #tpu.memory_space<vmem>>, vector<64x64xbf16>
    %cst_35 = arith.constant dense<0.000000e+00> : vector<256x64xf32>
    %61 = tpu.matmul %59, %60, %cst_35 {dimension_numbers = #tpu.dot_dimension_numbers<[1], [0], [0], [1], [0, 0, 1, 1], [], []>} : vector<256x64xbf16>, vector<64x64xbf16>, vector<256x64xf32> -> vector<256x64xf32>
    %c0_36 = arith.constant 0 : index
    %c0_37 = arith.constant 0 : index
    %62 = vector.load %arg9[%c0_36, %c0_37] : memref<1x64xf32, #tpu.memory_space<vmem>>, vector<1x64xf32>
    %63 = vector.broadcast %62 : vector<1x64xf32> to vector<256x64xf32>
    %64 = arith.addf %61, %63 : vector<256x64xf32>
    %65 = arith.addf %1, %64 : vector<256x64xf32>
    %c0_38 = arith.constant 0 : index
    %c0_39 = arith.constant 0 : index
    %66 = vector.load %arg10[%c0_38, %c0_39] : memref<1x64xf32, #tpu.memory_space<vmem>>, vector<1x64xf32>
    %c0_40 = arith.constant 0 : index
    %c0_41 = arith.constant 0 : index
    %67 = vector.load %arg11[%c0_40, %c0_41] : memref<1x64xf32, #tpu.memory_space<vmem>>, vector<1x64xf32>
    %cst_42 = arith.constant dense<0.000000e+00> : vector<256xf32>
    %68 = vector.multi_reduction <add>, %65, %cst_42 [1] : vector<256x64xf32> to vector<256xf32>
    %69 = vector.shape_cast %68 : vector<256xf32> to vector<256x1xf32>
    %cst_43 = arith.constant 6.400000e+01 : f32
    %70 = vector.broadcast %cst_43 : f32 to vector<256x1xf32>
    %71 = arith.divf %69, %70 : vector<256x1xf32>
    %72 = vector.broadcast %71 : vector<256x1xf32> to vector<256x64xf32>
    %73 = arith.subf %65, %72 : vector<256x64xf32>
    %74 = arith.mulf %73, %73 : vector<256x64xf32>
    %cst_44 = arith.constant dense<0.000000e+00> : vector<256xf32>
    %75 = vector.multi_reduction <add>, %74, %cst_44 [1] : vector<256x64xf32> to vector<256xf32>
    %76 = vector.shape_cast %75 : vector<256xf32> to vector<256x1xf32>
    %cst_45 = arith.constant 6.400000e+01 : f32
    %77 = vector.broadcast %cst_45 : f32 to vector<256x1xf32>
    %78 = arith.divf %76, %77 : vector<256x1xf32>
    %cst_46 = arith.constant 9.99999974E-6 : f32
    %79 = vector.broadcast %cst_46 : f32 to vector<256x1xf32>
    %80 = arith.addf %78, %79 : vector<256x1xf32>
    %81 = math.rsqrt %80 : vector<256x1xf32>
    %82 = vector.broadcast %81 : vector<256x1xf32> to vector<256x64xf32>
    %83 = arith.mulf %73, %82 : vector<256x64xf32>
    %84 = vector.broadcast %66 : vector<1x64xf32> to vector<256x64xf32>
    %85 = arith.mulf %83, %84 : vector<256x64xf32>
    %86 = vector.broadcast %67 : vector<1x64xf32> to vector<256x64xf32>
    %87 = arith.addf %85, %86 : vector<256x64xf32>
    %88 = arith.truncf %87 : vector<256x64xf32> to vector<256x64xbf16>
    %c0_47 = arith.constant 0 : index
    %c0_48 = arith.constant 0 : index
    %89 = vector.load %arg12[%c0_47, %c0_48] : memref<64x256xbf16, #tpu.memory_space<vmem>>, vector<64x256xbf16>
    %cst_49 = arith.constant dense<0.000000e+00> : vector<256x256xf32>
    %90 = tpu.matmul %88, %89, %cst_49 {dimension_numbers = #tpu.dot_dimension_numbers<[1], [0], [0], [1], [0, 0, 1, 1], [], []>} : vector<256x64xbf16>, vector<64x256xbf16>, vector<256x256xf32> -> vector<256x256xf32>
    %c0_50 = arith.constant 0 : index
    %c0_51 = arith.constant 0 : index
    %91 = vector.load %arg13[%c0_50, %c0_51] : memref<1x256xf32, #tpu.memory_space<vmem>>, vector<1x256xf32>
    %92 = vector.broadcast %91 : vector<1x256xf32> to vector<256x256xf32>
    %93 = arith.addf %90, %92 : vector<256x256xf32>
    %cst_52 = arith.constant 5.000000e-01 : f32
    %94 = vector.broadcast %cst_52 : f32 to vector<256x256xf32>
    %95 = arith.mulf %93, %94 : vector<256x256xf32>
    %cst_53 = arith.constant 0.707106769 : f32
    %96 = vector.broadcast %cst_53 : f32 to vector<256x256xf32>
    %97 = arith.mulf %93, %96 : vector<256x256xf32>
    %98 = math.absf %97 : vector<256x256xf32>
    %cst_54 = arith.constant 5.000000e-01 : f32
    %99 = vector.broadcast %cst_54 : f32 to vector<256x256xf32>
    %100 = arith.mulf %99, %98 : vector<256x256xf32>
    %cst_55 = arith.constant 1.000000e+00 : f32
    %101 = vector.broadcast %cst_55 : f32 to vector<256x256xf32>
    %102 = arith.addf %101, %100 : vector<256x256xf32>
    %cst_56 = arith.constant 1.000000e+00 : f32
    %103 = vector.broadcast %cst_56 : f32 to vector<256x256xf32>
    %104 = arith.divf %103, %102 : vector<256x256xf32>
    %cst_57 = arith.constant 0.170872763 : f32
    %105 = vector.broadcast %cst_57 : f32 to vector<256x256xf32>
    %106 = arith.mulf %104, %105 : vector<256x256xf32>
    %cst_58 = arith.constant -0.822152256 : f32
    %107 = vector.broadcast %cst_58 : f32 to vector<256x256xf32>
    %108 = arith.addf %107, %106 : vector<256x256xf32>
    %109 = arith.mulf %104, %108 : vector<256x256xf32>
    %cst_59 = arith.constant 1.48851585 : f32
    %110 = vector.broadcast %cst_59 : f32 to vector<256x256xf32>
    %111 = arith.addf %110, %109 : vector<256x256xf32>
    %112 = arith.mulf %104, %111 : vector<256x256xf32>
    %cst_60 = arith.constant -1.13520396 : f32
    %113 = vector.broadcast %cst_60 : f32 to vector<256x256xf32>
    %114 = arith.addf %113, %112 : vector<256x256xf32>
    %115 = arith.mulf %104, %114 : vector<256x256xf32>
    %cst_61 = arith.constant 0.278868079 : f32
    %116 = vector.broadcast %cst_61 : f32 to vector<256x256xf32>
    %117 = arith.addf %116, %115 : vector<256x256xf32>
    %118 = arith.mulf %104, %117 : vector<256x256xf32>
    %cst_62 = arith.constant -0.186288059 : f32
    %119 = vector.broadcast %cst_62 : f32 to vector<256x256xf32>
    %120 = arith.addf %119, %118 : vector<256x256xf32>
    %121 = arith.mulf %104, %120 : vector<256x256xf32>
    %cst_63 = arith.constant 0.0967841818 : f32
    %122 = vector.broadcast %cst_63 : f32 to vector<256x256xf32>
    %123 = arith.addf %122, %121 : vector<256x256xf32>
    %124 = arith.mulf %104, %123 : vector<256x256xf32>
    %cst_64 = arith.constant 0.374091953 : f32
    %125 = vector.broadcast %cst_64 : f32 to vector<256x256xf32>
    %126 = arith.addf %125, %124 : vector<256x256xf32>
    %127 = arith.mulf %104, %126 : vector<256x256xf32>
    %cst_65 = arith.constant 1.00002372 : f32
    %128 = vector.broadcast %cst_65 : f32 to vector<256x256xf32>
    %129 = arith.addf %128, %127 : vector<256x256xf32>
    %130 = arith.mulf %104, %129 : vector<256x256xf32>
    %cst_66 = arith.constant -1.26551223 : f32
    %131 = vector.broadcast %cst_66 : f32 to vector<256x256xf32>
    %132 = arith.addf %131, %130 : vector<256x256xf32>
    %cst_67 = arith.constant 0.000000e+00 : f32
    %133 = vector.broadcast %cst_67 : f32 to vector<256x256xf32>
    %134 = arith.subf %133, %98 : vector<256x256xf32>
    %135 = arith.mulf %134, %98 : vector<256x256xf32>
    %136 = arith.addf %135, %132 : vector<256x256xf32>
    %137 = math.exp %136 : vector<256x256xf32>
    %138 = arith.mulf %104, %137 : vector<256x256xf32>
    %cst_68 = arith.constant 0.000000e+00 : f32
    %139 = vector.broadcast %cst_68 : f32 to vector<256x256xf32>
    %140 = arith.cmpf oge, %97, %139 : vector<256x256xf32>
    %cst_69 = arith.constant 1.000000e+00 : f32
    %141 = vector.broadcast %cst_69 : f32 to vector<256x256xf32>
    %142 = arith.subf %141, %138 : vector<256x256xf32>
    %cst_70 = arith.constant 1.000000e+00 : f32
    %143 = vector.broadcast %cst_70 : f32 to vector<256x256xf32>
    %144 = arith.subf %138, %143 : vector<256x256xf32>
    %145 = arith.select %140, %142, %144 : vector<256x256xi1>, vector<256x256xf32>
    %cst_71 = arith.constant 1.000000e+00 : f32
    %146 = vector.broadcast %cst_71 : f32 to vector<256x256xf32>
    %147 = arith.addf %146, %145 : vector<256x256xf32>
    %148 = arith.mulf %95, %147 : vector<256x256xf32>
    %149 = arith.truncf %148 : vector<256x256xf32> to vector<256x256xbf16>
    %c0_72 = arith.constant 0 : index
    %c0_73 = arith.constant 0 : index
    %150 = vector.load %arg14[%c0_72, %c0_73] : memref<256x64xbf16, #tpu.memory_space<vmem>>, vector<256x64xbf16>
    %cst_74 = arith.constant dense<0.000000e+00> : vector<256x64xf32>
    %151 = tpu.matmul %149, %150, %cst_74 {dimension_numbers = #tpu.dot_dimension_numbers<[1], [0], [0], [1], [0, 0, 1, 1], [], []>} : vector<256x256xbf16>, vector<256x64xbf16>, vector<256x64xf32> -> vector<256x64xf32>
    %c0_75 = arith.constant 0 : index
    %c0_76 = arith.constant 0 : index
    %152 = vector.load %arg15[%c0_75, %c0_76] : memref<1x64xf32, #tpu.memory_space<vmem>>, vector<1x64xf32>
    %153 = vector.broadcast %152 : vector<1x64xf32> to vector<256x64xf32>
    %154 = arith.addf %151, %153 : vector<256x64xf32>
    %155 = arith.addf %65, %154 : vector<256x64xf32>
    %c0_77 = arith.constant 0 : index
    %c0_78 = arith.constant 0 : index
    %c0_79 = arith.constant 0 : index
    %156 = vector.load %arg16[%c0_77, %c0_78, %c0_79] : memref<1x256x64xf32, #tpu.memory_space<vmem>>, vector<1x256x64xf32>
    %157 = vector.shape_cast %156 : vector<1x256x64xf32> to vector<256x64xf32>
    %158 = vector.shape_cast %155 : vector<256x64xf32> to vector<1x256x64xf32>
    tpu.vector_store %arg16[%c0_77, %c0_78, %c0_79], %158 {strides = array<i32>} : memref<1x256x64xf32, #tpu.memory_space<vmem>>, vector<1x256x64xf32>,
    return
  }
  func.func @transform_0(%arg0: i32) -> (i32, i32, i32) {
    %c0_i32 = arith.constant 0 : i32
    %c0_i32_0 = arith.constant 0 : i32
    %c0_i32_1 = arith.constant 0 : i32
    return %arg0, %c0_i32, %c0_i32_0 : i32, i32, i32
  }
  func.func @transform_1(%arg0: i32) -> (i32, i32) {
    %c0_i32 = arith.constant 0 : i32
    %c0_i32_0 = arith.constant 0 : i32
    %c0_i32_1 = arith.constant 0 : i32
    return %c0_i32, %c0_i32_0 : i32, i32
  }
  func.func @transform_2(%arg0: i32) -> (i32, i32) {
    %c0_i32 = arith.constant 0 : i32
    %c0_i32_0 = arith.constant 0 : i32
    %c0_i32_1 = arith.constant 0 : i32
    return %c0_i32, %c0_i32_0 : i32, i32
  }
  func.func @transform_3(%arg0: i32) -> (i32, i32) {
    %c0_i32 = arith.constant 0 : i32
    %c0_i32_0 = arith.constant 0 : i32
    %c0_i32_1 = arith.constant 0 : i32
    return %c0_i32, %c0_i32_0 : i32, i32
  }
  func.func @transform_4(%arg0: i32) -> (i32, i32) {
    %c0_i32 = arith.constant 0 : i32
    %c0_i32_0 = arith.constant 0 : i32
    %c0_i32_1 = arith.constant 0 : i32
    return %c0_i32, %c0_i32_0 : i32, i32
  }
  func.func @transform_5(%arg0: i32) -> (i32, i32) {
    %c0_i32 = arith.constant 0 : i32
    %c0_i32_0 = arith.constant 0 : i32
    %c0_i32_1 = arith.constant 0 : i32
    return %c0_i32, %c0_i32_0 : i32, i32
  }
  func.func @transform_6(%arg0: i32) -> (i32, i32) {
    %c0_i32 = arith.constant 0 : i32
    %c0_i32_0 = arith.constant 0 : i32
    %c0_i32_1 = arith.constant 0 : i32
    return %c0_i32, %c0_i32_0 : i32, i32
  }
  func.func @transform_7(%arg0: i32) -> (i32, i32) {
    %c0_i32 = arith.constant 0 : i32
    %c0_i32_0 = arith.constant 0 : i32
    %c0_i32_1 = arith.constant 0 : i32
    return %c0_i32, %c0_i32_0 : i32, i32
  }
  func.func @transform_8(%arg0: i32) -> (i32, i32) {
    %c0_i32 = arith.constant 0 : i32
    %c0_i32_0 = arith.constant 0 : i32
    %c0_i32_1 = arith.constant 0 : i32
    return %c0_i32, %c0_i32_0 : i32, i32
  }
  func.func @transform_9(%arg0: i32) -> (i32, i32) {
    %c0_i32 = arith.constant 0 : i32
    %c0_i32_0 = arith.constant 0 : i32
    %c0_i32_1 = arith.constant 0 : i32
    return %c0_i32, %c0_i32_0 : i32, i32
  }
  func.func @transform_10(%arg0: i32) -> (i32, i32) {
    %c0_i32 = arith.constant 0 : i32
    %c0_i32_0 = arith.constant 0 : i32
    %c0_i32_1 = arith.constant 0 : i32
    return %c0_i32, %c0_i32_0 : i32, i32
  }
  func.func @transform_11(%arg0: i32) -> (i32, i32) {
    %c0_i32 = arith.constant 0 : i32
    %c0_i32_0 = arith.constant 0 : i32
    %c0_i32_1 = arith.constant 0 : i32
    return %c0_i32, %c0_i32_0 : i32, i32
  }
  func.func @transform_12(%arg0: i32) -> (i32, i32) {
    %c0_i32 = arith.constant 0 : i32
    %c0_i32_0 = arith.constant 0 : i32
    %c0_i32_1 = arith.constant 0 : i32
    return %c0_i32, %c0_i32_0 : i32, i32
  }
  func.func @transform_13(%arg0: i32) -> (i32, i32) {
    %c0_i32 = arith.constant 0 : i32
    %c0_i32_0 = arith.constant 0 : i32
    %c0_i32_1 = arith.constant 0 : i32
    return %c0_i32, %c0_i32_0 : i32, i32
  }
  func.func @transform_14(%arg0: i32) -> (i32, i32) {
    %c0_i32 = arith.constant 0 : i32
    %c0_i32_0 = arith.constant 0 : i32
    %c0_i32_1 = arith.constant 0 : i32
    return %c0_i32, %c0_i32_0 : i32, i32
  }
  func.func @transform_15(%arg0: i32) -> (i32, i32, i32) {
    %c0_i32 = arith.constant 0 : i32
    %c0_i32_0 = arith.constant 0 : i32
    %c0_i32_1 = arith.constant 0 : i32
    return %arg0, %c0_i32, %c0_i32_0 : i32, i32, i32
  }
}

</mosaic_0001>

<bundles_post_ra>
// kernel: linear_transformer_encoder_layer.1
= control target key start
LH: loop header
LB: loop body
LE: loop exit
PB: predicated region body
PF: predicated region fallthrough
CT: control target
= control target key end

     0   :  { %s8654_s18 = smov 0   ;;  %s13150_s0 = inlined_call_operand.vmem [shape: f32[2,256,64], index: 0, kind: input, shape index: {}]   ;;  %s13151_s1 = inlined_call_operand.vmem [shape: f32[1,64], index: 1, kind: input, shape index: {}]   ;;  %s13152_s2 = inlined_call_operand.vmem [shape: f32[1,64], index: 2, kind: input, shape index: {}]   ;;  %s13153_s3 = inlined_call_operand.vmem [shape: bf16[64,64], index: 3, kind: input, shape index: {}]   ;;  %s13154_s4 = inlined_call_operand.vmem [shape: bf16[64,64], index: 4, kind: input, shape index: {}]   ;;  %s13155_s5 = inlined_call_operand.vmem [shape: bf16[64,64], index: 5, kind: input, shape index: {}]   ;;  %s13156_s6 = inlined_call_operand.vmem [shape: f32[64,64], index: 6, kind: input, shape index: {}]   ;;  %s13157_s7 = inlined_call_operand.vmem [shape: bf16[64,64], index: 7, kind: input, shape index: {}]   ;;  %s13158_s8 = inlined_call_operand.vmem [shape: f32[1,64], index: 8, kind: input, shape index: {}]   ;;  %s13159_s9 = inlined_call_operand.vmem [shape: f32[1,64], index: 9, kind: input, shape index: {}]   ;;  %s13160_s10 = inlined_call_operand.vmem [shape: f32[1,64], index: 10, kind: input, shape index: {}]   ;;  %s13161_s11 = inlined_call_operand.vmem [shape: bf16[64,256], index: 11, kind: input, shape index: {}]   ;;  %s13162_s12 = inlined_call_operand.vmem [shape: f32[1,256], index: 12, kind: input, shape index: {}]   ;;  %s13163_s13 = inlined_call_operand.vmem [shape: bf16[256,64], index: 13, kind: input, shape index: {}]   ;;  %s13164_s14 = inlined_call_operand.vmem [shape: f32[1,64], index: 14, kind: input, shape index: {}]   ;;  %s13165_s15 = inlined_call_operand.vmem [shape: f32[2,256,64], index: 15, kind: output, shape index: {}]  }
   0x1 LB: > { %s6933_s19 = sadd.s32 4294967295, %s8571_s18   ;;  %p6937_p0 = scmp.ge.s32.totalorder %s8571_s18, 1  ;;  %s8571_s18 = sphi %s8654_s18, %s25_s18  }
   0x2   : > { %p437_p1 = scmp.lt.s32.totalorder %s8571_s18, 3 }
   0x4   : > { %p438_p2 = pnand %p6937_p0, %p437_p1 }
   0x6   : > { %441 = sbr.rel (%p438_p2) target bundleno = 2769 (0xad1), region = 80 }
   0xb   : > { %p485_p3 = scmp.lt.s32.totalorder %s6933_s19, 1  ;;  %vm530_vm0 = vcmask 523264  }
   0xd   : > { %s13473_s19 = smov (!%p485_p3, %s6933_s19), 1 }
   0xe   : > { %s7198_s20 = sshll.u32 %s13473_s19, 8 }
   0xf   : > { %s8670_s23 = scalar_lea.vmem %s13150_s0, %s7198_s20  ;;  %s13008_s26 = scalar_lea.vmem %s13165_s15, %s7198_s20 }
  0x10   : > { %v8673_v0 = vld [vmem:[%s8670_s23] sm:$0xff]  ;;  %v8676_v1 = vld [vmem:[%s8670_s23 + $0x10] sm:$0xff]  ;;  %v8679_v2 = vld [vmem:[%s8670_s23 + $0x8] sm:$0xff] }
  0x11   : > { %v531_v3 = vsel %vm530_vm0, %v8673_v0, 0.0  ;;  %v537_v4 = vsel %vm530_vm0, %v8676_v1, 0.0  ;;  %v8686_v5 = vld [vmem:[%s8670_s23 + $0x18] sm:$0xff]  ;;  %v534_v6 = vsel %vm530_vm0, %v8679_v2, 0.0  ;;  %v8693_v8 = vld [vmem:[%s8670_s23 + $0x20] sm:$0xff]  ;;  %v8696_v9 = vld [vmem:[%s8670_s23 + $0x28] sm:$0xff] }
  0x12   : > { %532 = vadd.xlane.f32.xlu0 %v531_v3  ;;  %538 = vadd.xlane.f32.xlu1 %v537_v4  ;;  %v540_v7 = vsel %vm530_vm0, %v8686_v5, 0.0  ;;  %v543_v10 = vsel %vm530_vm0, %v8693_v8, 0.0  ;;  %v546_v11 = vsel %vm530_vm0, %v8696_v9, 0.0  ;;  %v8703_v12 = vld [vmem:[%s8670_s23 + $0x30] sm:$0xff]  ;;  %v8706_v13 = vld [vmem:[%s8670_s23 + $0x38] sm:$0xff]  ;;  %v8709_v14 = vld [vmem:[%s8670_s23 + $0x40] sm:$0xff] }
  0x13   : > { %v8712_v15 = vld [vmem:[%s8670_s23 + $0x48] sm:$0xff]  ;;  %v8715_v16 = vld [vmem:[%s8670_s23 + $0x50] sm:$0xff]  ;;  %v549_v17 = vsel %vm530_vm0, %v8703_v12, 0.0  ;;  %v552_v18 = vsel %vm530_vm0, %v8706_v13, 0.0  ;;  %v555_v19 = vsel %vm530_vm0, %v8709_v14, 0.0  ;;  %v8728_v22 = vld [vmem:[%s8670_s23 + $0x58] sm:$0xff] }
  0x14   : > { %v558_v20 = vsel %vm530_vm0, %v8712_v15, 0.0  ;;  %v561_v21 = vsel %vm530_vm0, %v8715_v16, 0.0  ;;  %v8731_v23 = vld [vmem:[%s8670_s23 + $0x60] sm:$0xff]  ;;  %v8734_v24 = vld [vmem:[%s8670_s23 + $0x68] sm:$0xff]  ;;  %v8737_v25 = vld [vmem:[%s8670_s23 + $0x70] sm:$0xff]  ;;  %v564_v27 = vsel %vm530_vm0, %v8728_v22, 0.0 }
  0x15   : > { %v8740_v26 = vld [vmem:[%s8670_s23 + $0x78] sm:$0xff]  ;;  %v567_v28 = vsel %vm530_vm0, %v8731_v23, 0.0  ;;  %v570_v29 = vsel %vm530_vm0, %v8734_v24, 0.0  ;;  %v573_v30 = vsel %vm530_vm0, %v8737_v25, 0.0  ;;  %v8753_v32 = vld [vmem:[%s8670_s23 + $0x80] sm:$0xff]  ;;  %v8756_v33 = vld [vmem:[%s8670_s23 + $0x88] sm:$0xff] }
  0x16   : > { %535 = vadd.xlane.f32.xlu0 %v534_v6  ;;  %541 = vadd.xlane.f32.xlu1 %v540_v7  ;;  %v576_v31 = vsel %vm530_vm0, %v8740_v26, 0.0  ;;  %v579_v34 = vsel %vm530_vm0, %v8753_v32, 0.0  ;;  %v582_v35 = vsel %vm530_vm0, %v8756_v33, 0.0  ;;  %v8763_v36 = vld [vmem:[%s8670_s23 + $0x90] sm:$0xff]  ;;  %v8766_v37 = vld [vmem:[%s8670_s23 + $0x98] sm:$0xff]  ;;  %v8773_v40 = vld [vmem:[%s8670_s23 + $0xa0] sm:$0xff] }
  0x17   : > { %v585_v38 = vsel %vm530_vm0, %v8763_v36, 0.0  ;;  %v588_v39 = vsel %vm530_vm0, %v8766_v37, 0.0  ;;  %v8776_v41 = vld [vmem:[%s8670_s23 + $0xa8] sm:$0xff]  ;;  %v591_v42 = vsel %vm530_vm0, %v8773_v40, 0.0  ;;  %v8783_v44 = vld [vmem:[%s8670_s23 + $0xb0] sm:$0xff]  ;;  %v8786_v45 = vld [vmem:[%s8670_s23 + $0xb8] sm:$0xff] }
  0x18   : > { %v594_v43 = vsel %vm530_vm0, %v8776_v41, 0.0  ;;  %v597_v46 = vsel %vm530_vm0, %v8783_v44, 0.0  ;;  %v600_v47 = vsel %vm530_vm0, %v8786_v45, 0.0  ;;  %v8793_v48 = vld [vmem:[%s8670_s23 + $0xc0] sm:$0xff]  ;;  %v8796_v49 = vld [vmem:[%s8670_s23 + $0xc8] sm:$0xff]  ;;  %v8803_v52 = vld [vmem:[%s8670_s23 + $0xd0] sm:$0xff] }
  0x19   : > { %v603_v50 = vsel %vm530_vm0, %v8793_v48, 0.0  ;;  %v606_v51 = vsel %vm530_vm0, %v8796_v49, 0.0  ;;  %v8806_v53 = vld [vmem:[%s8670_s23 + $0xd8] sm:$0xff]  ;;  %v609_v54 = vsel %vm530_vm0, %v8803_v52, 0.0  ;;  %v8813_v56 = vld [vmem:[%s8670_s23 + $0xe0] sm:$0xff]  ;;  %v8816_v57 = vld [vmem:[%s8670_s23 + $0xe8] sm:$0xff] }
  0x1a   : > { %544 = vadd.xlane.f32.xlu0 %v543_v10  ;;  %547 = vadd.xlane.f32.xlu1 %v546_v11  ;;  %v612_v55 = vsel %vm530_vm0, %v8806_v53, 0.0  ;;  %v615_v58 = vsel %vm530_vm0, %v8813_v56, 0.0  ;;  %v618_v59 = vsel %vm530_vm0, %v8816_v57, 0.0  ;;  %v8823_v60 = vld [vmem:[%s8670_s23 + $0xf0] sm:$0xff]  ;;  %v8826_v61 = vld [vmem:[%s8670_s23 + $0xf8] sm:$0xff] }
  0x1b   : > { %v621_v62 = vsel %vm530_vm0, %v8823_v60, 0.0  ;;  %v624_v63 = vsel %vm530_vm0, %v8826_v61, 0.0 }
  0x1e   : > { %550 = vadd.xlane.f32.xlu0 %v549_v17  ;;  %553 = vadd.xlane.f32.xlu1 %v552_v18 }
  0x22   : > { %556 = vadd.xlane.f32.xlu0 %v555_v19  ;;  %559 = vadd.xlane.f32.xlu1 %v558_v20 }
  0x26   : > { %562 = vadd.xlane.f32.xlu0 %v561_v21  ;;  %565 = vadd.xlane.f32.xlu1 %v564_v27 }
  0x2a   : > { %568 = vadd.xlane.f32.xlu0 %v567_v28  ;;  %571 = vadd.xlane.f32.xlu1 %v570_v29 }
  0x2e   : > { %574 = vadd.xlane.f32.xlu0 %v573_v30  ;;  %577 = vadd.xlane.f32.xlu1 %v576_v31 }
  0x32   : > { %580 = vadd.xlane.f32.xlu0 %v579_v34  ;;  %583 = vadd.xlane.f32.xlu1 %v582_v35 }
  0x36   : > { %586 = vadd.xlane.f32.xlu0 %v585_v38  ;;  %589 = vadd.xlane.f32.xlu1 %v588_v39 }
  0x3a   : > { %592 = vadd.xlane.f32.xlu0 %v591_v42  ;;  %595 = vadd.xlane.f32.xlu1 %v594_v43 }
  0x3e   : > { %598 = vadd.xlane.f32.xlu0 %v597_v46  ;;  %601 = vadd.xlane.f32.xlu1 %v600_v47 }
  0x42   : > { %604 = vadd.xlane.f32.xlu0 %v603_v50  ;;  %607 = vadd.xlane.f32.xlu1 %v606_v51 }
  0x46   : > { %610 = vadd.xlane.f32.xlu0 %v609_v54  ;;  %613 = vadd.xlane.f32.xlu1 %v612_v55 }
  0x4a   : > { %616 = vadd.xlane.f32.xlu0 %v615_v58  ;;  %619 = vadd.xlane.f32.xlu1 %v618_v59 }
  0x4e   : > { %622 = vadd.xlane.f32.xlu0 %v621_v62  ;;  %625 = vadd.xlane.f32.xlu1 %v624_v63 }
  0x9b   : > { %v533_v3 = vpop.xlane.xlu0 %532  ;;  %v539_v4 = vpop.xlane.xlu1 %538 }
  0x9c   : > { %v628_v6 = vmul.f32 0.015625, %v533_v3  ;;  %v630_v7 = vmul.f32 0.015625, %v539_v4 }
  0x9e   : > { %v8833_v10 = vsub.f32 %v8673_v0, %v628_v6  ;;  %v8836_v11 = vsub.f32 %v8676_v1, %v630_v7 }
  0x9f   : > { %v536_v17 = vpop.xlane.xlu0 %535  ;;  %v542_v18 = vpop.xlane.xlu1 %541 }
  0xa0   : > { %v629_v19 = vmul.f32 0.015625, %v536_v17  ;;  %v631_v20 = vmul.f32 0.015625, %v542_v18  ;;  %v692_v21 = vmul.f32 %v8833_v10, %v8833_v10  ;;  %v694_v27 = vmul.f32 %v8836_v11, %v8836_v11 }
  0xa2   : > { %v8843_v28 = vsub.f32 %v8679_v2, %v629_v19  ;;  %v8846_v29 = vsub.f32 %v8686_v5, %v631_v20  ;;  %v724_v0 = vsel %vm530_vm0, %v692_v21, 0.0  ;;  %v730_v31 = vsel %vm530_vm0, %v694_v27, 0.0 }
  0xa3   : > { %725 = vadd.xlane.f32.xlu0 %v724_v0  ;;  %v545_v1 = vpop.xlane.xlu0 %544  ;;  %v548_v30 = vpop.xlane.xlu1 %547 }
  0xa4   : > { %v632_v34 = vmul.f32 0.015625, %v545_v1  ;;  %v633_v35 = vmul.f32 0.015625, %v548_v30  ;;  %v693_v38 = vmul.f32 %v8843_v28, %v8843_v28  ;;  %v695_v39 = vmul.f32 %v8846_v29, %v8846_v29 }
  0xa6   : > { %v8855_v2 = vsub.f32 %v8693_v8, %v632_v34  ;;  %v8858_v5 = vsub.f32 %v8696_v9, %v633_v35  ;;  %v727_v42 = vsel %vm530_vm0, %v693_v38, 0.0  ;;  %v733_v47 = vsel %vm530_vm0, %v695_v39, 0.0 }
  0xa7   : > { %731 = vadd.xlane.f32.xlu0 %v730_v31  ;;  %728 = vadd.xlane.f32.xlu1 %v727_v42  ;;  %v551_v43 = vpop.xlane.xlu0 %550  ;;  %v554_v46 = vpop.xlane.xlu1 %553 }
  0xa8   : > { %v634_v50 = vmul.f32 0.015625, %v551_v43  ;;  %v635_v51 = vmul.f32 0.015625, %v554_v46  ;;  %v696_v54 = vmul.f32 %v8855_v2, %v8855_v2  ;;  %v697_v8 = vmul.f32 %v8858_v5, %v8858_v5 }
  0xaa   : > { %v8867_v55 = vsub.f32 %v8703_v12, %v634_v50  ;;  %v8870_v9 = vsub.f32 %v8706_v13, %v635_v51  ;;  %v736_v58 = vsel %vm530_vm0, %v696_v54, 0.0  ;;  %v739_v63 = vsel %vm530_vm0, %v697_v8, 0.0 }
  0xab   : > { %734 = vadd.xlane.f32.xlu1 %v733_v47  ;;  %737 = vadd.xlane.f32.xlu0 %v736_v58  ;;  %v557_v59 = vpop.xlane.xlu0 %556  ;;  %v560_v62 = vpop.xlane.xlu1 %559 }
  0xac   : > { %v636_v3 = vmul.f32 0.015625, %v557_v59  ;;  %v637_v4 = vmul.f32 0.015625, %v560_v62  ;;  %v698_v6 = vmul.f32 %v8867_v55, %v8867_v55  ;;  %v699_v12 = vmul.f32 %v8870_v9, %v8870_v9 }
  0xae   : > { %v8879_v7 = vsub.f32 %v8709_v14, %v636_v3  ;;  %v8882_v13 = vsub.f32 %v8712_v15, %v637_v4  ;;  %v742_v17 = vsel %vm530_vm0, %v698_v6, 0.0  ;;  %v745_v20 = vsel %vm530_vm0, %v699_v12, 0.0 }
  0xaf   : > { %740 = vadd.xlane.f32.xlu1 %v739_v63  ;;  %743 = vadd.xlane.f32.xlu0 %v742_v17  ;;  %v563_v18 = vpop.xlane.xlu0 %562  ;;  %v566_v19 = vpop.xlane.xlu1 %565 }
  0xb0   : > { %v638_v21 = vmul.f32 0.015625, %v563_v18  ;;  %v639_v27 = vmul.f32 0.015625, %v566_v19  ;;  %v700_v0 = vmul.f32 %v8879_v7, %v8879_v7  ;;  %v701_v14 = vmul.f32 %v8882_v13, %v8882_v13 }
  0xb2   : > { %v8891_v1 = vsub.f32 %v8715_v16, %v638_v21  ;;  %v8894_v15 = vsub.f32 %v8728_v22, %v639_v27  ;;  %v748_v30 = vsel %vm530_vm0, %v700_v0, 0.0  ;;  %v751_v35 = vsel %vm530_vm0, %v701_v14, 0.0 }
  0xb3   : > { %746 = vadd.xlane.f32.xlu1 %v745_v20  ;;  %749 = vadd.xlane.f32.xlu0 %v748_v30  ;;  %v569_v31 = vpop.xlane.xlu0 %568  ;;  %v572_v34 = vpop.xlane.xlu1 %571  ;;  %v7905_v20 = vld [vmem:[%s13153_s3 + $0x18] sm:$0xff]  }
  0xb4   : > { %v640_v38 = vmul.f32 0.015625, %v569_v31  ;;  %v641_v39 = vmul.f32 0.015625, %v572_v34  ;;  %v702_v42 = vmul.f32 %v8891_v1, %v8891_v1  ;;  %v703_v16 = vmul.f32 %v8894_v15, %v8894_v15  ;;  %7528 = vmatprep.subr.bf16.mxu0 %v7905_v20 }
  0xb5   : > { %7529 = vmatpush3.bf16.msra.mxu0 %v7905_v20 }
  0xb6   : > { %v8903_v43 = vsub.f32 %v8731_v23, %v640_v38  ;;  %v8906_v22 = vsub.f32 %v8734_v24, %v641_v39  ;;  %v754_v46 = vsel %vm530_vm0, %v702_v42, 0.0  ;;  %v757_v51 = vsel %vm530_vm0, %v703_v16, 0.0  ;;  %v7906_v38 = vld [vmem:[%s13153_s3 + $0x10] sm:$0xff]  }
  0xb7   : > { %752 = vadd.xlane.f32.xlu1 %v751_v35  ;;  %755 = vadd.xlane.f32.xlu0 %v754_v46  ;;  %v575_v47 = vpop.xlane.xlu0 %574  ;;  %v578_v50 = vpop.xlane.xlu1 %577 }
  0xb8   : > { %v642_v54 = vmul.f32 0.015625, %v575_v47  ;;  %v643_v8 = vmul.f32 0.015625, %v578_v50  ;;  %v704_v58 = vmul.f32 %v8903_v43, %v8903_v43  ;;  %v705_v23 = vmul.f32 %v8906_v22, %v8906_v22  ;;  %7530 = vmatprep.subr.bf16.mxu0 %v7906_v38 }
  0xb9   : > { %7531 = vmatpush3.bf16.msra.mxu0 %v7906_v38 }
  0xba   : > { %v8915_v59 = vsub.f32 %v8737_v25, %v642_v54  ;;  %v8918_v24 = vsub.f32 %v8740_v26, %v643_v8  ;;  %v760_v62 = vsel %vm530_vm0, %v704_v58, 0.0  ;;  %v763_v4 = vsel %vm530_vm0, %v705_v23, 0.0  ;;  %v7907_v8 = vld [vmem:[%s13153_s3 + $0x8] sm:$0xff]  }
  0xbb   : > { %758 = vadd.xlane.f32.xlu1 %v757_v51  ;;  %761 = vadd.xlane.f32.xlu0 %v760_v62  ;;  %v581_v63 = vpop.xlane.xlu0 %580  ;;  %v584_v3 = vpop.xlane.xlu1 %583 }
  0xbc   : > { %v644_v6 = vmul.f32 0.015625, %v581_v63  ;;  %v645_v12 = vmul.f32 0.015625, %v584_v3  ;;  %v706_v17 = vmul.f32 %v8915_v59, %v8915_v59  ;;  %v707_v25 = vmul.f32 %v8918_v24, %v8918_v24  ;;  %7532 = vmatprep.subr.bf16.mxu0 %v7907_v8 }
  0xbd   : > { %7533 = vmatpush3.bf16.msra.mxu0 %v7907_v8 }
  0xbe   : > { %v8927_v18 = vsub.f32 %v8753_v32, %v644_v6  ;;  %v8930_v26 = vsub.f32 %v8756_v33, %v645_v12  ;;  %v766_v19 = vsel %vm530_vm0, %v706_v17, 0.0  ;;  %v769_v0 = vsel %vm530_vm0, %v707_v25, 0.0  ;;  %v7908_v17 = vld [vmem:[%s13153_s3] sm:$0xff]  }
  0xbf   : > { %764 = vadd.xlane.f32.xlu1 %v763_v4  ;;  %767 = vadd.xlane.f32.xlu0 %v766_v19  ;;  %v587_v21 = vpop.xlane.xlu0 %586  ;;  %v590_v27 = vpop.xlane.xlu1 %589 }
  0xc0   : > { %v646_v14 = vmul.f32 0.015625, %v587_v21  ;;  %v647_v30 = vmul.f32 0.015625, %v590_v27  ;;  %v708_v32 = vmul.f32 %v8927_v18, %v8927_v18  ;;  %v709_v33 = vmul.f32 %v8930_v26, %v8930_v26  ;;  %7534 = vmatprep.subr.bf16.mxu0 %v7908_v17 }
  0xc1   : > { %7535 = vmatpush3.bf16.msra.mxu0 %v7908_v17 }
  0xc2   : > { %v8942_v31 = vsub.f32 %v8763_v36, %v646_v14  ;;  %v8945_v34 = vsub.f32 %v8766_v37, %v647_v30  ;;  %v772_v35 = vsel %vm530_vm0, %v708_v32, 0.0  ;;  %v775_v16 = vsel %vm530_vm0, %v709_v33, 0.0  ;;  %v8996_v32 = vld [vmem:[%s13154_s4 + $0x18] sm:$0xff]  }
  0xc3   : > { %770 = vadd.xlane.f32.xlu1 %v769_v0  ;;  %773 = vadd.xlane.f32.xlu0 %v772_v35  ;;  %v593_v39 = vpop.xlane.xlu0 %592  ;;  %v596_v42 = vpop.xlane.xlu1 %595 }
  0xc4   : > { %v648_v46 = vmul.f32 0.015625, %v593_v39  ;;  %v649_v47 = vmul.f32 0.015625, %v596_v42  ;;  %v710_v36 = vmul.f32 %v8942_v31, %v8942_v31  ;;  %v711_v37 = vmul.f32 %v8945_v34, %v8945_v34  ;;  %7816 = vmatprep.subr.bf16.mxu1 %v8996_v32  ;;  %7568 = vmatprep.subr.bf16.mxu0 %v8996_v32 }
  0xc5   : > { %7820 = vmatpush3.bf16.msra.mxu1 %v8996_v32 }
  0xc6   : > { %v8957_v50 = vsub.f32 %v8773_v40, %v648_v46  ;;  %v8960_v51 = vsub.f32 %v8776_v41, %v649_v47  ;;  %v778_v54 = vsel %vm530_vm0, %v710_v36, 0.0  ;;  %v781_v62 = vsel %vm530_vm0, %v711_v37, 0.0  ;;  %v9016_v36 = vld [vmem:[%s13154_s4 + $0x10] sm:$0xff]  }
  0xc7   : > { %776 = vadd.xlane.f32.xlu1 %v775_v16  ;;  %779 = vadd.xlane.f32.xlu0 %v778_v54  ;;  %v599_v58 = vpop.xlane.xlu0 %598  ;;  %v602_v23 = vpop.xlane.xlu1 %601 }
  0xc8   : > { %v650_v63 = vmul.f32 0.015625, %v599_v58  ;;  %v651_v3 = vmul.f32 0.015625, %v602_v23  ;;  %v712_v40 = vmul.f32 %v8957_v50, %v8957_v50  ;;  %v713_v41 = vmul.f32 %v8960_v51, %v8960_v51  ;;  %7817 = vmatprep.subr.bf16.mxu1 %v9016_v36 }
  0xc9   : > { %7821 = vmatpush3.bf16.msra.mxu1 %v9016_v36 }
  0xca   : > { %v8972_v4 = vsub.f32 %v8783_v44, %v650_v63  ;;  %v8975_v6 = vsub.f32 %v8786_v45, %v651_v3  ;;  %v784_v12 = vsel %vm530_vm0, %v712_v40, 0.0  ;;  %v787_v20 = vsel %vm530_vm0, %v713_v41, 0.0  ;;  %v9035_v40 = vld [vmem:[%s13154_s4 + $0x8] sm:$0xff]  }
  0xcb   : > { %782 = vadd.xlane.f32.xlu1 %v781_v62  ;;  %785 = vadd.xlane.f32.xlu0 %v784_v12  ;;  %v605_v25 = vpop.xlane.xlu0 %604  ;;  %v608_v19 = vpop.xlane.xlu1 %607 }
  0xcc   : > { %v652_v21 = vmul.f32 0.015625, %v605_v25  ;;  %v653_v27 = vmul.f32 0.015625, %v608_v19  ;;  %v714_v44 = vmul.f32 %v8972_v4, %v8972_v4  ;;  %v715_v45 = vmul.f32 %v8975_v6, %v8975_v6  ;;  %7818 = vmatprep.subr.bf16.mxu1 %v9035_v40 }
  0xcd   : > { %7822 = vmatpush3.bf16.msra.mxu1 %v9035_v40 }
  0xce   : > { %v8987_v0 = vsub.f32 %v8793_v48, %v652_v21  ;;  %v8990_v14 = vsub.f32 %v8796_v49, %v653_v27  ;;  %v790_v30 = vsel %vm530_vm0, %v714_v44, 0.0  ;;  %v793_v38 = vsel %vm530_vm0, %v715_v45, 0.0  ;;  %v9054_v44 = vld [vmem:[%s13154_s4] sm:$0xff]  }
  0xcf   : > { %788 = vadd.xlane.f32.xlu1 %v787_v20  ;;  %791 = vadd.xlane.f32.xlu0 %v790_v30  ;;  %v611_v33 = vpop.xlane.xlu0 %610  ;;  %v614_v35 = vpop.xlane.xlu1 %613 }
  0xd0   : > { %v654_v39 = vmul.f32 0.015625, %v611_v33  ;;  %v655_v42 = vmul.f32 0.015625, %v614_v35  ;;  %v716_v48 = vmul.f32 %v8987_v0, %v8987_v0  ;;  %v717_v49 = vmul.f32 %v8990_v14, %v8990_v14  ;;  %7819 = vmatprep.subr.bf16.mxu1 %v9054_v44 }
  0xd1   : > { %7823 = vmatpush3.bf16.msra.mxu1 %v9054_v44 }
  0xd2   : > { %v9007_v16 = vsub.f32 %v8803_v52, %v654_v39  ;;  %v9010_v46 = vsub.f32 %v8806_v53, %v655_v42  ;;  %v796_v47 = vsel %vm530_vm0, %v716_v48, 0.0  ;;  %v799_v8 = vsel %vm530_vm0, %v717_v49, 0.0 }
  0xd3   : > { %794 = vadd.xlane.f32.xlu1 %v793_v38  ;;  %797 = vadd.xlane.f32.xlu0 %v796_v47  ;;  %v617_v37 = vpop.xlane.xlu0 %616  ;;  %v620_v54 = vpop.xlane.xlu1 %619 }
  0xd4   : > { %v656_v58 = vmul.f32 0.015625, %v617_v37  ;;  %v657_v23 = vmul.f32 0.015625, %v620_v54  ;;  %v718_v52 = vmul.f32 %v9007_v16, %v9007_v16  ;;  %v719_v53 = vmul.f32 %v9010_v46, %v9010_v46 }
  0xd6   : > { %v9026_v62 = vsub.f32 %v8813_v56, %v656_v58  ;;  %v9029_v63 = vsub.f32 %v8816_v57, %v657_v23  ;;  %v802_v3 = vsel %vm530_vm0, %v718_v52, 0.0  ;;  %v805_v17 = vsel %vm530_vm0, %v719_v53, 0.0 }
  0xd7   : > { %800 = vadd.xlane.f32.xlu1 %v799_v8  ;;  %803 = vadd.xlane.f32.xlu0 %v802_v3  ;;  %v623_v41 = vpop.xlane.xlu0 %622  ;;  %v626_v12 = vpop.xlane.xlu1 %625 }
  0xd8   : > { %v658_v25 = vmul.f32 0.015625, %v623_v41  ;;  %v659_v19 = vmul.f32 0.015625, %v626_v12  ;;  %v720_v56 = vmul.f32 %v9026_v62, %v9026_v62  ;;  %v721_v57 = vmul.f32 %v9029_v63, %v9029_v63 }
  0xda   : > { %v9045_v20 = vsub.f32 %v8823_v60, %v658_v25  ;;  %v9048_v21 = vsub.f32 %v8826_v61, %v659_v19  ;;  %v808_v27 = vsel %vm530_vm0, %v720_v56, 0.0  ;;  %v811_v45 = vsel %vm530_vm0, %v721_v57, 0.0 }
  0xdb   : > { %806 = vadd.xlane.f32.xlu1 %v805_v17  ;;  %809 = vadd.xlane.f32.xlu0 %v808_v27 }
  0xdc   : > { %v722_v30 = vmul.f32 %v9045_v20, %v9045_v20  ;;  %v723_v60 = vmul.f32 %v9048_v21, %v9048_v21 }
  0xde   : > { %v814_v61 = vsel %vm530_vm0, %v722_v30, 0.0  ;;  %v817_v33 = vsel %vm530_vm0, %v723_v60, 0.0 }
  0xdf   : > { %812 = vadd.xlane.f32.xlu1 %v811_v45  ;;  %815 = vadd.xlane.f32.xlu0 %v814_v61 }
  0xe3   : > { %818 = vadd.xlane.f32.xlu1 %v817_v33 }
 0x12c   : > { %v726_v35 = vpop.xlane.xlu0 %725 }
 0x12d   : > { %v820_v38 = vmul.f32 0.015625, %v726_v35  ;;  %v9068_v35 = vld [vmem:[%s13151_s1] ss:$0 sm:$0xff] }
 0x12f   : > { %v852_v39 = vadd.f32 1e-05, %v820_v38 }
 0x130   : > { %v729_v42 = vpop.xlane.xlu1 %728  ;;  %v732_v48 = vpop.xlane.xlu0 %731 }
 0x131   : > { %7949 = vrsqrt.f32 %v852_v39  ;;  %v821_v49 = vmul.f32 0.015625, %v729_v42  ;;  %v822_v47 = vmul.f32 0.015625, %v732_v48 }
 0x133   : > { %v853_v37 = vadd.f32 1e-05, %v821_v49  ;;  %v854_v54 = vadd.f32 1e-05, %v822_v47 }
 0x134   : > { %v735_v8 = vpop.xlane.xlu1 %734  ;;  %v738_v58 = vpop.xlane.xlu0 %737 }
 0x135   : > { %7951 = vrsqrt.f32 %v853_v37  ;;  %v823_v23 = vmul.f32 0.015625, %v735_v8  ;;  %v824_v52 = vmul.f32 0.015625, %v738_v58 }
 0x136   : > { %7953 = vrsqrt.f32 %v854_v54 }
 0x137   : > { %v855_v53 = vadd.f32 1e-05, %v823_v23  ;;  %v856_v3 = vadd.f32 1e-05, %v824_v52  ;;  %v9075_v23 = vld [vmem:[%s13152_s2] ss:$0 sm:$0xff] }
 0x138   : > { %v741_v41 = vpop.xlane.xlu1 %740  ;;  %v744_v12 = vpop.xlane.xlu0 %743 }
 0x139   : > { %7955 = vrsqrt.f32 %v855_v53  ;;  %v825_v17 = vmul.f32 0.015625, %v741_v41  ;;  %v826_v25 = vmul.f32 0.015625, %v744_v12 }
 0x13a   : > { %7957 = vrsqrt.f32 %v856_v3 }
 0x13b   : > { %v857_v19 = vadd.f32 1e-05, %v825_v17  ;;  %v858_v56 = vadd.f32 1e-05, %v826_v25 }
 0x13c   : > { %v747_v57 = vpop.xlane.xlu1 %746  ;;  %v750_v27 = vpop.xlane.xlu0 %749 }
 0x13d   : > { %7959 = vrsqrt.f32 %v857_v19  ;;  %v827_v45 = vmul.f32 0.015625, %v747_v57  ;;  %v828_v30 = vmul.f32 0.015625, %v750_v27 }
 0x13e   : > { %v7950_v60 = vpop.eup %7949  ;;  %7961 = vrsqrt.f32 %v858_v56 }
 0x13f   : > { %v859_v61 = vadd.f32 1e-05, %v827_v45  ;;  %v860_v33 = vadd.f32 1e-05, %v828_v30  ;;  %v916_v38 = vmul.f32 %v7950_v60, %v8833_v10 }
 0x140   : > { %v753_v39 = vpop.xlane.xlu1 %752  ;;  %v756_v42 = vpop.xlane.xlu0 %755 }
 0x141   : > { %7963 = vrsqrt.f32 %v859_v61  ;;  %v829_v48 = vmul.f32 0.015625, %v753_v39  ;;  %v830_v49 = vmul.f32 0.015625, %v756_v42  ;;  %v954_v37 = vmul.f32 %v9068_v35, %v916_v38 }
 0x142   : > { %v7952_v47 = vpop.eup %7951  ;;  %7965 = vrsqrt.f32 %v860_v33 }
 0x143   : > { %v7954_v54 = vpop.eup %7953  ;;  %v861_v8 = vadd.f32 1e-05, %v829_v48  ;;  %v862_v58 = vadd.f32 1e-05, %v830_v49  ;;  %v917_v52 = vmul.f32 %v7952_v47, %v8843_v28  ;;  %v992_v19 = vadd.f32 %v9075_v23, %v954_v37 }
 0x144   : > { %v759_v10 = vpop.xlane.xlu1 %758  ;;  %v762_v53 = vpop.xlane.xlu0 %761  ;;  %v918_v3 = vmul.f32 %v7954_v54, %v8836_v11 }
 0x145   : > { %7967 = vrsqrt.f32 %v861_v8  ;;  %v831_v41 = vmul.f32 0.015625, %v759_v10  ;;  %v832_v12 = vmul.f32 0.015625, %v762_v53  ;;  %v955_v17 = vmul.f32 %v9068_v35, %v917_v52 }
 0x146   : > { %v7956_v25 = vpop.eup %7955  ;;  %7969 = vrsqrt.f32 %v862_v58  ;;  %v956_v11 = vmul.f32 %v9068_v35, %v918_v3 }
 0x147   : > { %v7958_v56 = vpop.eup %7957  ;;  %v863_v57 = vadd.f32 1e-05, %v831_v41  ;;  %v864_v27 = vadd.f32 1e-05, %v832_v12  ;;  %v993_v45 = vadd.f32 %v9075_v23, %v955_v17  ;;  %v919_v28 = vmul.f32 %v7956_v25, %v8846_v29 }
 0x148   : > { %v765_v30 = vpop.xlane.xlu1 %764  ;;  %v768_v60 = vpop.xlane.xlu0 %767  ;;  %v920_v61 = vmul.f32 %v7958_v56, %v8855_v2  ;;  %v994_v58 = vadd.f32 %v9075_v23, %v956_v11 }
 0x149   : > { %7971 = vrsqrt.f32 %v863_v57  ;;  %v833_v33 = vmul.f32 0.015625, %v765_v30  ;;  %v834_v38 = vmul.f32 0.015625, %v768_v60  ;;  %v9085_v39 = vpack.c.bf16 %v993_v45, %v992_v19 }
 0x14a   : > { %v7960_v42 = vpop.eup %7959  ;;  %7973 = vrsqrt.f32 %v864_v27  ;;  %v957_v48 = vmul.f32 %v9068_v35, %v919_v28  ;;  %v958_v49 = vmul.f32 %v9068_v35, %v920_v61 }
 0x14b   : > { %v7962_v47 = vpop.eup %7961  ;;  %v865_v37 = vadd.f32 1e-05, %v833_v33  ;;  %v866_v29 = vadd.f32 1e-05, %v834_v38  ;;  %7536 = vmatprep.mubr.msk.bf16.mxu0 %vm530_vm0, %v9085_v39  ;;  %v921_v54 = vmul.f32 %v7960_v42, %v8858_v5 }
 0x14c   : > { %v771_v2 = vpop.xlane.xlu1 %770  ;;  %v774_v8 = vpop.xlane.xlu0 %773  ;;  %v995_v52 = vadd.f32 %v9075_v23, %v957_v48  ;;  %v922_v10 = vmul.f32 %v7962_v47, %v8867_v55  ;;  %v996_v25 = vadd.f32 %v9075_v23, %v958_v49 }
 0x14d   : > { %7975 = vrsqrt.f32 %v865_v37  ;;  %v835_v53 = vmul.f32 0.015625, %v771_v2  ;;  %v836_v3 = vmul.f32 0.015625, %v774_v8  ;;  %v959_v41 = vmul.f32 %v9068_v35, %v921_v54 }
 0x14e   : > { %v7964_v12 = vpop.eup %7963  ;;  %7977 = vrsqrt.f32 %v866_v29  ;;  %v9096_v17 = vpack.c.bf16 %v995_v52, %v994_v58  ;;  %v960_v28 = vmul.f32 %v9068_v35, %v922_v10 }
 0x14f   : > { %v7966_v5 = vpop.eup %7965  ;;  %v867_v19 = vadd.f32 1e-05, %v835_v53  ;;  %v868_v56 = vadd.f32 1e-05, %v836_v3  ;;  %v997_v57 = vadd.f32 %v9075_v23, %v959_v41  ;;  %v923_v27 = vmul.f32 %v7964_v12, %v8870_v9 }
 0x150   : > { %7537 = vmatmul.mubr.msk.bf16.vlgmr.msra.gmra.mxu0 %vm530_vm0, %v9096_v17  ;;  %v777_v55 = vpop.xlane.xlu1 %776  ;;  %v780_v45 = vpop.xlane.xlu0 %779  ;;  %v924_v30 = vmul.f32 %v7966_v5, %v8879_v7 }
 0x151   : > { %7979 = vrsqrt.f32 %v867_v19  ;;  %v837_v60 = vmul.f32 0.015625, %v777_v55  ;;  %v838_v11 = vmul.f32 0.015625, %v780_v45  ;;  %v9105_v61 = vpack.c.bf16 %v997_v57, %v996_v25  ;;  %7569 = vmatpush3.bf16.msra.mxu0 %v8996_v32 }
 0x152   : > { %v7968_v33 = vpop.eup %7967  ;;  %7981 = vrsqrt.f32 %v868_v56  ;;  %v961_v9 = vmul.f32 %v9068_v35, %v923_v27  ;;  %v962_v38 = vmul.f32 %v9068_v35, %v924_v30  ;;  %7570 = vmatprep.subr.bf16.mxu0 %v9016_v36  ;;  %v998_v32 = vadd.f32 %v9075_v23, %v960_v28  ;;  %v9138_v28 = vld [vmem:[%s13155_s5 + $0x18] sm:$0xff]  }
 0x153   : > { %v7970_v42 = vpop.eup %7969  ;;  %v869_v48 = vadd.f32 1e-05, %v837_v60  ;;  %v870_v49 = vadd.f32 1e-05, %v838_v11  ;;  %7540 = vmatprep.mubr.msk.bf16.mxu0 %vm530_vm0, %v9105_v61  ;;  %v925_v7 = vmul.f32 %v7968_v33, %v8882_v13 }
 0x154   : > { %v783_v47 = vpop.xlane.xlu1 %782  ;;  %v786_v37 = vpop.xlane.xlu0 %785  ;;  %v999_v29 = vadd.f32 %v9075_v23, %v961_v9  ;;  %v926_v54 = vmul.f32 %v7970_v42, %v8891_v1  ;;  %v1000_v13 = vadd.f32 %v9075_v23, %v962_v38 }
 0x155   : > { %7983 = vrsqrt.f32 %v869_v48  ;;  %v839_v2 = vmul.f32 0.015625, %v783_v47  ;;  %v840_v8 = vmul.f32 0.015625, %v786_v37  ;;  %v963_v58 = vmul.f32 %v9068_v35, %v925_v7  ;;  %7571 = vmatpush3.bf16.msra.mxu0 %v9016_v36 }
 0x156   : > { %v7972_v52 = vpop.eup %7971  ;;  %7985 = vrsqrt.f32 %v870_v49  ;;  %v9119_v10 = vpack.c.bf16 %v999_v29, %v998_v32  ;;  %7572 = vmatprep.subr.bf16.mxu0 %v9035_v40  ;;  %v964_v5 = vmul.f32 %v9068_v35, %v926_v54 }
 0x157   : > { %v7974_v53 = vpop.eup %7973  ;;  %v871_v3 = vadd.f32 1e-05, %v839_v2  ;;  %v872_v41 = vadd.f32 1e-05, %v840_v8  ;;  %v1001_v1 = vadd.f32 %v9075_v23, %v963_v58  ;;  %v927_v12 = vmul.f32 %v7972_v52, %v8894_v15 }
 0x158   : > { %7541 = vmatmul.mubr.msk.bf16.gmra.mxu0 %vm530_vm0, %v9119_v10  ;;  %v789_v25 = vpop.xlane.xlu1 %788  ;;  %v792_v36 = vpop.xlane.xlu0 %791  ;;  %v928_v19 = vmul.f32 %v7974_v53, %v8903_v43  ;;  %v1002_v9 = vadd.f32 %v9075_v23, %v964_v5 }
 0x159   : > { %7987 = vrsqrt.f32 %v871_v3  ;;  %v841_v56 = vmul.f32 0.015625, %v789_v25  ;;  %v842_v57 = vmul.f32 0.015625, %v792_v36  ;;  %v9129_v27 = vpack.c.bf16 %v1001_v1, %v1000_v13  ;;  %7573 = vmatpush3.bf16.msra.mxu0 %v9035_v40 }
 0x15a   : > { %v7976_v55 = vpop.eup %7975  ;;  %7989 = vrsqrt.f32 %v872_v41  ;;  %v965_v15 = vmul.f32 %v9068_v35, %v927_v12  ;;  %v966_v45 = vmul.f32 %v9068_v35, %v928_v19  ;;  %7574 = vmatprep.subr.bf16.mxu0 %v9054_v44 }
 0x15b   : > { %v7978_v43 = vpop.eup %7977  ;;  %v873_v30 = vadd.f32 1e-05, %v841_v56  ;;  %v874_v60 = vadd.f32 1e-05, %v842_v57  ;;  %7544 = vmatprep.mubr.msk.bf16.mxu0 %vm530_vm0, %v9129_v27  ;;  %7584 = vmatprep.mubr.msk.bf16.mxu1 %vm530_vm0, %v9129_v27  ;;  %v929_v40 = vmul.f32 %v7976_v55, %v8906_v22 }
 0x15c   : > { %v795_v11 = vpop.xlane.xlu1 %794  ;;  %v798_v33 = vpop.xlane.xlu0 %797  ;;  %v1003_v38 = vadd.f32 %v9075_v23, %v965_v15  ;;  %v930_v42 = vmul.f32 %v7978_v43, %v8915_v59  ;;  %v1004_v22 = vadd.f32 %v9075_v23, %v966_v45 }
 0x15d   : > { %7991 = vrsqrt.f32 %v873_v30  ;;  %v843_v48 = vmul.f32 0.015625, %v795_v11  ;;  %v844_v49 = vmul.f32 0.015625, %v798_v33  ;;  %v967_v7 = vmul.f32 %v9068_v35, %v929_v40  ;;  %7575 = vmatpush3.bf16.msra.mxu0 %v9054_v44 }
 0x15e   : > { %v7980_v47 = vpop.eup %7979  ;;  %7993 = vrsqrt.f32 %v874_v60  ;;  %v9150_v37 = vpack.c.bf16 %v1003_v38, %v1002_v9  ;;  %7608 = vmatprep.subr.bf16.mxu0 %v9138_v28  ;;  %v968_v58 = vmul.f32 %v9068_v35, %v930_v42 }
 0x15f   : > { %v7982_v32 = vpop.eup %7981  ;;  %v875_v29 = vadd.f32 1e-05, %v843_v48  ;;  %v876_v54 = vadd.f32 1e-05, %v844_v49  ;;  %v1005_v59 = vadd.f32 %v9075_v23, %v967_v7  ;;  %v931_v2 = vmul.f32 %v7980_v47, %v8918_v24 }
 0x160   : > { %7545 = vmatmul.mubr.msk.bf16.gmra.mxu0 %vm530_vm0, %v9150_v37  ;;  %7585 = vmatmul.mubr.msk.bf16.vlgmr.msra.gmra.mxu1 %vm530_vm0, %v9150_v37  ;;  %v801_v44 = vpop.xlane.xlu1 %800  ;;  %v804_v8 = vpop.xlane.xlu0 %803  ;;  %v932_v52 = vmul.f32 %v7982_v32, %v8927_v18  ;;  %v1006_v56 = vadd.f32 %v9075_v23, %v968_v58 }
 0x161   : > { %7995 = vrsqrt.f32 %v875_v29  ;;  %v845_v13 = vmul.f32 0.015625, %v801_v44  ;;  %v846_v53 = vmul.f32 0.015625, %v804_v8  ;;  %v9162_v3 = vpack.c.bf16 %v1005_v59, %v1004_v22 }
 0x162   : > { %v7984_v41 = vpop.eup %7983  ;;  %7997 = vrsqrt.f32 %v876_v54  ;;  %v969_v24 = vmul.f32 %v9068_v35, %v931_v2  ;;  %v970_v1 = vmul.f32 %v9068_v35, %v932_v52 }
 0x163   : > { %v7986_v12 = vpop.eup %7985  ;;  %v877_v25 = vadd.f32 1e-05, %v845_v13  ;;  %v878_v36 = vadd.f32 1e-05, %v846_v53  ;;  %7548 = vmatprep.mubr.msk.bf16.mxu0 %vm530_vm0, %v9162_v3  ;;  %7588 = vmatprep.mubr.msk.bf16.mxu1 %vm530_vm0, %v9162_v3  ;;  %v933_v18 = vmul.f32 %v7984_v41, %v8930_v26 }
 0x164   : > { %v807_v5 = vpop.xlane.xlu1 %806  ;;  %v810_v19 = vpop.xlane.xlu0 %809  ;;  %v1007_v57 = vadd.f32 %v9075_v23, %v969_v24  ;;  %v934_v55 = vmul.f32 %v7986_v12, %v8942_v31  ;;  %v1008_v40 = vadd.f32 %v9075_v23, %v970_v1 }
 0x165   : > { %7999 = vrsqrt.f32 %v877_v25  ;;  %v847_v15 = vmul.f32 0.015625, %v807_v5  ;;  %v848_v45 = vmul.f32 0.015625, %v810_v19  ;;  %v971_v43 = vmul.f32 %v9068_v35, %v933_v18 }
 0x166   : > { %v7988_v30 = vpop.eup %7987  ;;  %8001 = vrsqrt.f32 %v878_v36  ;;  %v9175_v60 = vpack.c.bf16 %v1007_v57, %v1006_v56  ;;  %v972_v48 = vmul.f32 %v9068_v35, %v934_v55 }
 0x167   : > { %v7990_v26 = vpop.eup %7989  ;;  %v879_v11 = vadd.f32 1e-05, %v847_v15  ;;  %v880_v33 = vadd.f32 1e-05, %v848_v45  ;;  %v1009_v9 = vadd.f32 %v9075_v23, %v971_v43  ;;  %v935_v38 = vmul.f32 %v7988_v30, %v8945_v34 }
 0x168   : > { %7549 = vmatmul.mubr.msk.bf16.gmra.mxu0 %vm530_vm0, %v9175_v60  ;;  %7589 = vmatmul.mubr.msk.bf16.gmra.mxu1 %vm530_vm0, %v9175_v60  ;;  %v813_v31 = vpop.xlane.xlu1 %812  ;;  %v816_v42 = vpop.xlane.xlu0 %815  ;;  %v936_v49 = vmul.f32 %v7990_v26, %v8957_v50  ;;  %v1010_v8 = vadd.f32 %v9075_v23, %v972_v48 }
 0x169   : > { %8003 = vrsqrt.f32 %v879_v11  ;;  %v849_v7 = vmul.f32 0.015625, %v813_v31  ;;  %v850_v47 = vmul.f32 0.015625, %v816_v42  ;;  %v9186_v22 = vpack.c.bf16 %v1009_v9, %v1008_v40 }
 0x16a   : > { %v7992_v32 = vpop.eup %7991  ;;  %8005 = vrsqrt.f32 %v880_v33  ;;  %v973_v34 = vmul.f32 %v9068_v35, %v935_v38  ;;  %v974_v2 = vmul.f32 %v9068_v35, %v936_v49 }
 0x16b   : > { %v7994_v29 = vpop.eup %7993  ;;  %v881_v54 = vadd.f32 1e-05, %v849_v7  ;;  %v882_v59 = vadd.f32 1e-05, %v850_v47  ;;  %7552 = vmatprep.mubr.msk.bf16.mxu0 %vm530_vm0, %v9186_v22  ;;  %7592 = vmatprep.mubr.msk.bf16.mxu1 %vm530_vm0, %v9186_v22  ;;  %v937_v50 = vmul.f32 %v7992_v32, %v8960_v51 }
 0x16c   : > { %v819_v44 = vpop.xlane.xlu1 %818  ;;  %v1011_v58 = vadd.f32 %v9075_v23, %v973_v34  ;;  %v938_v52 = vmul.f32 %v7994_v29, %v8972_v4  ;;  %v1012_v25 = vadd.f32 %v9075_v23, %v974_v2 }
 0x16d   : > { %8007 = vrsqrt.f32 %v881_v54  ;;  %v851_v13 = vmul.f32 0.015625, %v819_v44  ;;  %v975_v53 = vmul.f32 %v9068_v35, %v937_v50 }
 0x16e   : > { %v7996_v41 = vpop.eup %7995  ;;  %8009 = vrsqrt.f32 %v882_v59  ;;  %v9199_v24 = vpack.c.bf16 %v1011_v58, %v1010_v8  ;;  %v976_v1 = vmul.f32 %v9068_v35, %v938_v52 }
 0x16f   : > { %v7998_v51 = vpop.eup %7997  ;;  %v883_v12 = vadd.f32 1e-05, %v851_v13  ;;  %v1013_v36 = vadd.f32 %v9075_v23, %v975_v53  ;;  %v939_v18 = vmul.f32 %v7996_v41, %v8975_v6 }
 0x170   : > { %7553 = vmatmul.mubr.msk.bf16.gmra.mxu0 %vm530_vm0, %v9199_v24  ;;  %7593 = vmatmul.mubr.msk.bf16.gmra.mxu1 %vm530_vm0, %v9199_v24  ;;  %v940_v4 = vmul.f32 %v7998_v51, %v8987_v0  ;;  %v1014_v57 = vadd.f32 %v9075_v23, %v976_v1 }
 0x171   : > { %8011 = vrsqrt.f32 %v883_v12  ;;  %v9210_v5 = vpack.c.bf16 %v1013_v36, %v1012_v25  ;;  %v977_v19 = vmul.f32 %v9068_v35, %v939_v18 }
 0x172   : > { %v8000_v56 = vpop.eup %7999  ;;  %v978_v0 = vmul.f32 %v9068_v35, %v940_v4 }
 0x173   : > { %v8002_v55 = vpop.eup %8001  ;;  %7556 = vmatprep.mubr.msk.bf16.mxu0 %vm530_vm0, %v9210_v5  ;;  %7596 = vmatprep.mubr.msk.bf16.mxu1 %vm530_vm0, %v9210_v5  ;;  %v1015_v6 = vadd.f32 %v9075_v23, %v977_v19  ;;  %v941_v15 = vmul.f32 %v8000_v56, %v8990_v14 }
 0x174   : > { %v942_v45 = vmul.f32 %v8002_v55, %v9007_v16  ;;  %v1016_v33 = vadd.f32 %v9075_v23, %v978_v0 }
 0x175   : > { %v9222_v43 = vpack.c.bf16 %v1015_v6, %v1014_v57  ;;  %v979_v30 = vmul.f32 %v9068_v35, %v941_v15 }
 0x176   : > { %v8004_v40 = vpop.eup %8003  ;;  %v980_v26 = vmul.f32 %v9068_v35, %v942_v45  ;;  %v2195_v45 = vld [vmem:[%s13156_s6 + $0x38] sm:$0xff] }
 0x177   : > { %v8006_v11 = vpop.eup %8005  ;;  %v1017_v9 = vadd.f32 %v9075_v23, %v979_v30  ;;  %v943_v38 = vmul.f32 %v8004_v40, %v9010_v46  ;;  %v2193_v40 = vld [vmem:[%s13156_s6 + $0x28] sm:$0xff] }
 0x178   : > { %7557 = vmatmul.mubr.msk.bf16.gmra.mxu0 %vm530_vm0, %v9222_v43  ;;  %7597 = vmatmul.mubr.msk.bf16.gmra.mxu1 %vm530_vm0, %v9222_v43  ;;  %v944_v14 = vmul.f32 %v8006_v11, %v9026_v62  ;;  %v1018_v48 = vadd.f32 %v9075_v23, %v980_v26 }
 0x179   : > { %v1036_v16 = vpack.c.bf16 %v1017_v9, %v1016_v33  ;;  %v981_v31 = vmul.f32 %v9068_v35, %v943_v38  ;;  %v2192_v33 = vld [vmem:[%s13156_s6 + $0x20] sm:$0xff]  ;;  %v2191_v38 = vld [vmem:[%s13156_s6 + $0x18] sm:$0xff] }
 0x17a   : > { %v8008_v42 = vpop.eup %8007  ;;  %v982_v47 = vmul.f32 %v9068_v35, %v944_v14 }
 0x17b   : > { %v8010_v49 = vpop.eup %8009  ;;  %7560 = vmatprep.mubr.msk.bf16.mxu0 %vm530_vm0, %v1036_v16  ;;  %7600 = vmatprep.mubr.msk.bf16.mxu1 %vm530_vm0, %v1036_v16  ;;  %v1019_v46 = vadd.f32 %v9075_v23, %v981_v31  ;;  %v945_v7 = vmul.f32 %v8008_v42, %v9029_v63  ;;  %v2190_v31 = vld [vmem:[%s13156_s6 + $0x10] sm:$0xff] }
 0x17c   : > { %v946_v32 = vmul.f32 %v8010_v49, %v9045_v20  ;;  %v1020_v54 = vadd.f32 %v9075_v23, %v982_v47 }
 0x17d   : > { %v1037_v62 = vpack.c.bf16 %v1019_v46, %v1018_v48  ;;  %v983_v34 = vmul.f32 %v9068_v35, %v945_v7  ;;  %v2189_v48 = vld [vmem:[%s13156_s6 + $0x8] sm:$0xff]  ;;  %v2188_v7 = vld [vmem:[%s13156_s6] sm:$0xff] }
 0x17e   : > { %v8012_v29 = vpop.eup %8011  ;;  %v984_v2 = vmul.f32 %v9068_v35, %v946_v32 }
 0x17f   : > { %v1021_v59 = vadd.f32 %v9075_v23, %v983_v34  ;;  %v947_v50 = vmul.f32 %v8012_v29, %v9048_v21  ;;  %v7914_v21 = vld [vmem:[%s13155_s5 + $0x10] sm:$0xff]  }
 0x180   : > { %7561 = vmatmul.mubr.msk.bf16.gmra.mxu0 %vm530_vm0, %v1037_v62  ;;  %7601 = vmatmul.mubr.msk.bf16.gmra.mxu1 %vm530_vm0, %v1037_v62  ;;  %v1022_v20 = vadd.f32 %v9075_v23, %v984_v2 }
 0x181   : > { %v1038_v63 = vpack.c.bf16 %v1021_v59, %v1020_v54  ;;  %v985_v44 = vmul.f32 %v9068_v35, %v947_v50  ;;  %v7915_v35 = vld [vmem:[%s13155_s5 + $0x8] sm:$0xff]  }
 0x183   : > { %7564 = vmatprep.mubr.msk.bf16.mxu0 %vm530_vm0, %v1038_v63  ;;  %7604 = vmatprep.mubr.msk.bf16.mxu1 %vm530_vm0, %v1038_v63  ;;  %v1023_v8 = vadd.f32 %v9075_v23, %v985_v44  ;;  %v7916_v23 = vld [vmem:[%s13155_s5] sm:$0xff]  }
 0x185   : > { %v1039_v58 = vpack.c.bf16 %v1023_v8, %v1022_v20 }
 0x188   : > { %7565 = vmatmul.mubr.msk.bf16.gmra.mxu0 %vm530_vm0, %v1039_v58  ;;  %7605 = vmatmul.mubr.msk.bf16.gmra.mxu1 %vm530_vm0, %v1039_v58 }
 0x189   : > { %7576 = vmatprep.mubr.msk.bf16.mxu0 %vm530_vm0, %v9085_v39 }
 0x190   : > { %7577 = vmatmul.mubr.msk.bf16.vlgmr.msra.gmra.mxu0 %vm530_vm0, %v9096_v17 }
 0x191   : > { %7580 = vmatprep.mubr.msk.bf16.mxu0 %vm530_vm0, %v9105_v61  ;;  %7609 = vmatpush3.bf16.msra.mxu0 %v9138_v28 }
 0x192   : > { %7610 = vmatprep.subr.bf16.mxu0 %v7914_v21 }
 0x195   : > { %7611 = vmatpush3.bf16.msra.mxu0 %v7914_v21 }
 0x196   : > { %7612 = vmatprep.subr.bf16.mxu0 %v7915_v35 }
 0x198   : > { %7581 = vmatmul.mubr.msk.bf16.gmra.mxu0 %vm530_vm0, %v9119_v10 }
 0x199   : > { %7613 = vmatpush3.bf16.msra.mxu0 %v7915_v35  ;;  %7616 = vmatprep.mubr.msk.bf16.mxu0 %vm530_vm0, %v9085_v39 }
 0x19a   : > { %7614 = vmatprep.subr.bf16.mxu0 %v7916_v23 }
 0x19d   : > { %7615 = vmatpush3.bf16.msra.mxu0 %v7916_v23 }
 0x19e   : > { %7712 = vmatprep.subr.mxu0 %v2195_v45 }
 0x1a0   : > { %7617 = vmatmul.mubr.msk.bf16.vlgmr.msra.gmra.mxu0 %vm530_vm0, %v9096_v17 }
 0x1a1   : > { %7620 = vmatprep.mubr.msk.bf16.mxu0 %vm530_vm0, %v9105_v61  ;;  %7713 = vmatpush3.msra.mxu0 %v2195_v45 }
 0x1a8   : > { %7621 = vmatmul.mubr.msk.bf16.gmra.mxu0 %vm530_vm0, %v9119_v10 }
 0x1a9   : > { %7624 = vmatprep.mubr.msk.bf16.mxu0 %vm530_vm0, %v9129_v27 }
 0x1b0   : > { %7625 = vmatmul.mubr.msk.bf16.gmra.mxu0 %vm530_vm0, %v9150_v37 }
 0x1b1   : > { %7628 = vmatprep.mubr.msk.bf16.mxu0 %vm530_vm0, %v9162_v3 }
 0x1b8   : > { %7629 = vmatmul.mubr.msk.bf16.gmra.mxu0 %vm530_vm0, %v9175_v60 }
 0x1b9   : > { %7632 = vmatprep.mubr.msk.bf16.mxu0 %vm530_vm0, %v9186_v22 }
 0x1c0   : > { %7633 = vmatmul.mubr.msk.bf16.gmra.mxu0 %vm530_vm0, %v9199_v24 }
 0x1c1   : > { %7636 = vmatprep.mubr.msk.bf16.mxu0 %vm530_vm0, %v9210_v5 }
 0x1c8   : > { %7637 = vmatmul.mubr.msk.bf16.gmra.mxu0 %vm530_vm0, %v9222_v43  ;;  %v2194_v43 = vld [vmem:[%s13156_s6 + $0x30] sm:$0xff] }
 0x1c9   : > { %7640 = vmatprep.mubr.msk.bf16.mxu0 %vm530_vm0, %v1036_v16  ;;  %7714 = vmatprep.subr.mxu0 %v2194_v43 }
 0x1ca   : > { %7715 = vmatpush3.msra.mxu0 %v2194_v43 }
 0x1cb   : > { %7716 = vmatprep.subr.mxu0 %v2193_v40 }
 0x1cc   : > { %7717 = vmatpush3.msra.mxu0 %v2193_v40 }
 0x1cd   : > { %7718 = vmatprep.subr.mxu0 %v2192_v33 }
 0x1ce   : > { %7719 = vmatpush3.msra.mxu0 %v2192_v33 }
 0x1cf   : > { %7720 = vmatprep.subr.mxu0 %v2191_v38 }
 0x1d0   : > { %7641 = vmatmul.mubr.msk.bf16.gmra.mxu0 %vm530_vm0, %v1037_v62 }
 0x1d1   : > { %7644 = vmatprep.mubr.msk.bf16.mxu0 %vm530_vm0, %v1038_v63  ;;  %7721 = vmatpush3.msra.mxu0 %v2191_v38 }
 0x1d2   : > { %7722 = vmatprep.subr.mxu0 %v2190_v31 }
 0x1d3   : > { %7723 = vmatpush3.msra.mxu0 %v2190_v31 }
 0x1d4   : > { %7724 = vmatprep.subr.mxu0 %v2189_v48 }
 0x1d5   : > { %7725 = vmatpush3.msra.mxu0 %v2189_v48 }
 0x1d6   : > { %7726 = vmatprep.subr.mxu0 %v2188_v7 }
 0x1d7   : > { %7727 = vmatpush3.msra.mxu0 %v2188_v7 }
 0x1d8   : > { %7645 = vmatmul.mubr.msk.bf16.gmra.mxu0 %vm530_vm0, %v1039_v58 }
 0x210   : > { %v9302_v39 = vpop.f32.mrf.mxu0 }
 0x212   : > { %v9304_v17 = vpop.f32.mrf.mxu0 }
 0x214   : > { %v9306_v61 = vpop.f32.mrf.mxu0 }
 0x216   : > { %v9308_v10 = vpop.f32.mrf.mxu0 }
 0x218   : > { %v9310_v27 = vpop.f32.mrf.mxu0 }
 0x21a   : > { %v9312_v28 = vpop.f32.mrf.mxu0 }
 0x21c   : > { %v9314_v37 = vpop.f32.mrf.mxu0 }
 0x21d   : > { %13240 = vst [vmem:[#allocation2_spill] sm:$0xff] %v9314_v37 }
 0x21e   : > { %v9316_v3 = vpop.f32.mrf.mxu0 }
 0x21f   : > { %13241 = vst [vmem:[#allocation3_spill] sm:$0xff] %v9316_v3 }
 0x220   : > { %v9318_v60 = vpop.f32.mrf.mxu0  ;;  %v9334_v51 = vpop.f32.mrf.mxu1 }
 0x221   : > { %13242 = vst [vmem:[#allocation4_spill] sm:$0xff] %v9318_v60  ;;  %v1943_v44 = vmul.f32 1.442695, %v9334_v51 }
 0x222   : > { %v9320_v22 = vpop.f32.mrf.mxu0  ;;  %v9340_v36 = vpop.f32.mrf.mxu1 }
 0x223   : > { %13243 = vst [vmem:[#allocation5_spill] sm:$0xff] %v9320_v22  ;;  %v1939_v20 = vmul.f32 1.442695, %v9340_v36  ;;  %8013 = vpow2.f32 %v1943_v44  ;;  %vm1867_vm7 = vcmp.gt.f32.partialorder %v9340_v36, 0.0 }
 0x224   : > { %v9322_v52 = vpop.f32.mrf.mxu0  ;;  %v9346_v5 = vpop.f32.mrf.mxu1 }
 0x225   : > { %13244 = vst [vmem:[#allocation6_spill] sm:$0xff] %v9322_v52  ;;  %v1945_v21 = vmul.f32 1.442695, %v9346_v5  ;;  %8015 = vpow2.f32 %v1939_v20 }
 0x226   : > { %v9324_v13 = vpop.f32.mrf.mxu0  ;;  %v9352_v57 = vpop.f32.mrf.mxu1 }
 0x227   : > { %13245 = vst [vmem:[#allocation7_spill] sm:$0xff] %v9324_v13  ;;  %8017 = vpow2.f32 %v1945_v21  ;;  %v1941_v7 = vmul.f32 1.442695, %v9352_v57  ;;  %vm1868_vm14 = vcmp.gt.f32.partialorder %v9352_v57, 0.0 }
 0x228   : > { %v9326_v53 = vpop.f32.mrf.mxu0  ;;  %v9358_v15 = vpop.f32.mrf.mxu1 }
 0x229   : > { %13246 = vst [vmem:[#allocation8_spill] sm:$0xff] %v9326_v53 }
 0x22a   : > { %v9328_v41 = vpop.f32.mrf.mxu0  ;;  %v9373_v26 = vpop.f32.mrf.mxu1 }
 0x22b   : > { %13247 = vst [vmem:[#allocation9_spill] sm:$0xff] %v9328_v41 }
 0x22c   : > { %v9330_v24 = vpop.f32.mrf.mxu0  ;;  %v9385_v14 = vpop.f32.mrf.mxu1 }
 0x22d   : > { %13248 = vst [vmem:[#allocation10_spill] sm:$0xff] %v9330_v24 }
 0x22e   : > { %v9332_v1 = vpop.f32.mrf.mxu0  ;;  %v9397_v49 = vpop.f32.mrf.mxu1 }
 0x22f   : > { %13249 = vst [vmem:[#allocation11_spill] sm:$0xff] %v9332_v1 }
 0x230   : > { %v9336_v12 = vpop.f32.mrf.mxu0  ;;  %v9406_v32 = vpop.f32.mrf.mxu1 }
 0x231   : > { %13250 = vst [vmem:[#allocation12_spill] sm:$0xff] %v9336_v12  ;;  %vm1877_vm10 = vcmp.gt.f32.partialorder %v9406_v32, 0.0 }
 0x232   : > { %v9338_v25 = vpop.f32.mrf.mxu0  ;;  %v9412_v29 = vpop.f32.mrf.mxu1 }
 0x233   : > { %13251 = vst [vmem:[#allocation13_spill] sm:$0xff] %v9338_v25  ;;  %v1955_v35 = vmul.f32 1.442695, %v9412_v29  ;;  %vm1875_vm1 = vcmp.gt.f32.partialorder %v9412_v29, 0.0 }
 0x234   : > { %v9342_v18 = vpop.f32.mrf.mxu0  ;;  %v9418_v50 = vpop.f32.mrf.mxu1 }
 0x235   : > { %13252 = vst [vmem:[#allocation14_spill] sm:$0xff] %v9342_v18  ;;  %8019 = vpow2.f32 %v1955_v35  ;;  %vm1878_vm12 = vcmp.gt.f32.partialorder %v9418_v50, 0.0 }
 0x236   : > { %v9344_v4 = vpop.f32.mrf.mxu0  ;;  %v9426_v8 = vpop.f32.mrf.mxu1 }
 0x237   : > { %13253 = vst [vmem:[#allocation15_spill] sm:$0xff] %v9344_v4  ;;  %v1957_v45 = vmul.f32 1.442695, %v9426_v8  ;;  %vm1876_vm2 = vcmp.gt.f32.partialorder %v9426_v8, 0.0 }
 0x238   : > { %v9348_v19 = vpop.f32.mrf.mxu0  ;;  %v9437_v40 = vpop.f32.mrf.mxu1 }
 0x239   : > { %13254 = vst [vmem:[#allocation16_spill] sm:$0xff] %v9348_v19  ;;  %8021 = vpow2.f32 %v1957_v45  ;;  %v1951_v45 = vmul.f32 1.442695, %v9358_v15  ;;  %v1967_v25 = vmul.f32 1.442695, %v9437_v40 }
 0x23a   : > { %v9350_v56 = vpop.f32.mrf.mxu0  ;;  %v9448_v21 = vpop.f32.mrf.mxu1 }
 0x23b   : > { %13255 = vst [vmem:[#allocation17_spill] sm:$0xff] %v9350_v56  ;;  %v1949_v56 = vmul.f32 1.442695, %v9397_v49  ;;  %vm1879_vm15 = vcmp.gt.f32.partialorder %v9448_v21, 0.0 }
 0x23c   : > { %v9354_v55 = vpop.f32.mrf.mxu0 }
 0x23d   : > { %13256 = vst [vmem:[#allocation18_spill] sm:$0xff] %v9354_v55 }
 0x23e   : > { %v9356_v6 = vpop.f32.mrf.mxu0 }
 0x23f   : > { %13257 = vst [vmem:[#allocation19_spill] sm:$0xff] %v9356_v6 }
 0x240   : > { %v9360_v0 = vpop.f32.mrf.mxu0 }
 0x241   : > { %13258 = vst [vmem:[#allocation20_spill] sm:$0xff] %v9360_v0 }
 0x242   : > { %v9368_v30 = vpop.f32.mrf.mxu0 }
 0x243   : > { %13259 = vst [vmem:[#allocation21_spill] sm:$0xff] %v9368_v30 }
 0x244   : > { %v9375_v11 = vpop.f32.mrf.mxu0 }
 0x245   : > { %13260 = vst [vmem:[#allocation22_spill] sm:$0xff] %v9375_v11 }
 0x246   : > { %v9380_v9 = vpop.f32.mrf.mxu0 }
 0x247   : > { %13261 = vst [vmem:[#allocation23_spill] sm:$0xff] %v9380_v9 }
 0x248   : > { %v9387_v16 = vpop.f32.mrf.mxu0 }
 0x249   : > { %13262 = vst [vmem:[#allocation24_spill] sm:$0xff] %v9387_v16 }
 0x24a   : > { %v9392_v42 = vpop.f32.mrf.mxu0 }
 0x24b   : > { %13263 = vst [vmem:[#allocation25_spill] sm:$0xff] %v9392_v42  ;;  %v9458_v42 = vpop.f32.mrf.mxu1 }
 0x24c   : > { %v9399_v46 = vpop.f32.mrf.mxu0 }
 0x24d   : > { %13264 = vst [vmem:[#allocation26_spill] sm:$0xff] %v9399_v46  ;;  %v1959_v46 = vmul.f32 1.442695, %v9406_v32  ;;  %v9472_v55 = vpop.f32.mrf.mxu1 }
 0x24e   : > { %v9404_v47 = vpop.f32.mrf.mxu0  ;;  %v1965_v18 = vmul.f32 1.442695, %v9472_v55 }
 0x24f   : > { %13265 = vst [vmem:[#allocation27_spill] sm:$0xff] %v9404_v47  ;;  %v9492_v24 = vpop.f32.mrf.mxu1 }
 0x250   : > { %v9408_v62 = vpop.f32.mrf.mxu0 }
 0x251   : > { %v1927_v33 = vmul.f32 1.442695, %v9408_v62  ;;  %v1893_v41 = vadd.f32 1.0, %v9408_v62  ;;  %vm1861_vm4 = vcmp.gt.f32.partialorder %v9408_v62, 0.0 }
 0x252   : > { %v9410_v34 = vpop.f32.mrf.mxu0 }
 0x253   : > { %v1923_v38 = vmul.f32 1.442695, %v9410_v34  ;;  %8023 = vpow2.f32 %v1927_v33  ;;  %vm1859_vm3 = vcmp.gt.f32.partialorder %v9410_v34, 0.0 }
 0x254   : > { %v9414_v54 = vpop.f32.mrf.mxu0 }
 0x255   : > { %v1929_v48 = vmul.f32 1.442695, %v9414_v54  ;;  %8025 = vpow2.f32 %v1923_v38  ;;  %v1961_v38 = vmul.f32 1.442695, %v9418_v50  ;;  %v1894_v60 = vadd.f32 1.0, %v9414_v54 }
 0x256   : > { %v9416_v59 = vpop.f32.mrf.mxu0  ;;  %vm1862_vm6 = vcmp.gt.f32.partialorder %v9414_v54, 0.0 }
 0x257   : > { %v1925_v44 = vmul.f32 1.442695, %v9416_v59  ;;  %8027 = vpow2.f32 %v1929_v48  ;;  %vm1860_vm5 = vcmp.gt.f32.partialorder %v9416_v59, 0.0 }
 0x258   : > { %v9420_v2 = vpop.f32.mrf.mxu0 }
 0x259   : > { %8029 = vpow2.f32 %v1925_v44  ;;  %v1935_v11 = vmul.f32 1.442695, %v9420_v2  ;;  %v1947_v44 = vmul.f32 1.442695, %v9373_v26  ;;  %vm1865_vm11 = vcmp.gt.f32.partialorder %v9420_v2, 0.0 }
 0x25a   : > { %v9422_v63 = vpop.f32.mrf.mxu0  ;;  %8031 = vpow2.f32 %v1941_v7  ;;  %v9465_v7 = vpop.eup %8013 }
 0x25b   : > { %v1931_v35 = vmul.f32 1.442695, %v9422_v63  ;;  %v9470_v30 = vpop.eup %8015  ;;  %vm1863_vm8 = vcmp.gt.f32.partialorder %v9422_v63, 0.0 }
 0x25c   : > { %v9428_v58 = vpop.f32.mrf.mxu0 }
 0x25d   : > { %8033 = vpow2.f32 %v1931_v35  ;;  %v1937_v9 = vmul.f32 1.442695, %v9428_v58  ;;  %v1963_v35 = vmul.f32 1.442695, %v9448_v21  ;;  %vm1866_vm13 = vcmp.gt.f32.partialorder %v9428_v58, 0.0 }
 0x25e   : > { %v9432_v23 = vpop.f32.mrf.mxu0  ;;  %8035 = vpow2.f32 %v1959_v46  ;;  %v9474_v46 = vpop.eup %8017 }
 0x25f   : > { %v1933_v33 = vmul.f32 1.442695, %v9432_v23  ;;  %vm1864_vm9 = vcmp.gt.f32.partialorder %v9432_v23, 0.0 }
 0x260   : > { %v9435_v43 = vpop.f32.mrf.mxu0 }
 0x261   : > { %13266 = vst [vmem:[#allocation28_spill] sm:$0xff] %v9435_v43  ;;  %8037 = vpow2.f32 %v1933_v33  ;;  %v8020_v33 = vpop.eup %8019 }
 0x262   : > { %v9441_v31 = vpop.f32.mrf.mxu0  ;;  %8039 = vpow2.f32 %v1951_v45  ;;  %v8022_v6 = vpop.eup %8021  ;;  %v9480_v45 = vmul.f32 1.442695, %v9385_v14 }
 0x263   : > { %13267 = vst [vmem:[#allocation29_spill] sm:$0xff] %v9441_v31  ;;  %8041 = vpow2.f32 %v1935_v11  ;;  %v8024_v11 = vpop.eup %8023 }
 0x264   : > { %v9446_v20 = vpop.f32.mrf.mxu0  ;;  %8043 = vpow2.f32 %v1961_v38  ;;  %v1907_v38 = vadd.f32 1.0, %v9412_v29  ;;  %v8026_v4 = vpop.eup %8025  ;;  %v1892_v29 = vadd.f32 1.0, %v9416_v59  ;;  %v1989_v13 = vsel %vm1861_vm4, %v1893_v41, %v8024_v11 }
 0x265   : > { %13268 = vst [vmem:[#allocation30_spill] sm:$0xff] %v9446_v20  ;;  %8045 = vpow2.f32 %v1937_v9  ;;  %v1891_v9 = vadd.f32 1.0, %v9410_v34  ;;  %v8028_v1 = vpop.eup %8027  ;;  %vm1871_vm4 = vcmp.gt.f32.partialorder %v9373_v26, 0.0 }
 0x266   : > { %v9452_v47 = vpop.f32.mrf.mxu0  ;;  %8047 = vpow2.f32 %v1947_v44  ;;  %v1908_v44 = vadd.f32 1.0, %v9426_v8  ;;  %v9499_v52 = vsel %vm1875_vm1, %v1907_v38, %v8020_v33  ;;  %v1896_v8 = vadd.f32 1.0, %v9432_v23 }
 0x267   : > { %13269 = vst [vmem:[#allocation31_spill] sm:$0xff] %v9452_v47  ;;  %8049 = vpow2.f32 %v1963_v35  ;;  %v1987_v31 = vsel %vm1859_vm3, %v1891_v9, %v8026_v4  ;;  %v8030_v47 = vpop.eup %8029  ;;  %vm1869_vm1 = vcmp.gt.f32.partialorder %v9334_v51, 0.0  ;;  %vm1880_vm3 = vcmp.gt.f32.partialorder %v9472_v55, 0.0 }
 0x268   : > { %v9456_v16 = vpop.f32.mrf.mxu0  ;;  %8051 = vpow2.f32 %v1965_v18  ;;  %v7833_v35 = vpack.i.bf16 %v1987_v31, %v9499_v52  ;;  %v9506_v34 = vpop.eup %8031  ;;  %v1988_v20 = vsel %vm1860_vm5, %v1892_v29, %v8030_v47  ;;  %v9511_v4 = vsel %vm1876_vm2, %v1908_v44, %v8022_v6 }
 0x269   : > { %v9513_v18 = vpop.f32.mrf.mxu1  ;;  %v2525_v62 = vsel %vm530_vm0, %v1987_v31, 0.0  ;;  %v2526_v59 = vsel %vm530_vm0, %v1988_v20, 0.0  ;;  %v7835_v38 = vpack.i.bf16 %v1988_v20, %v9511_v4  ;;  %v9522_v47 = vsel %vm1862_vm6, %v1894_v60, %v8028_v1 }
 0x26a   : > { %v9462_v48 = vpop.f32.mrf.mxu0  ;;  %v8034_v33 = vpop.eup %8033  ;;  %7834 = vxpose.xlu0.b32.start [1/16] (narrow) %v7833_v35, 64  ;;  %v1895_v6 = vadd.f32 1.0, %v9422_v63  ;;  %v2527_v9 = vadd.f32 %v2526_v59, %v2525_v62  ;;  %8053 = vpow2.f32 %v1949_v56  ;;  %v2528_v31 = vsel %vm530_vm0, %v1989_v13, 0.0 }
 0x26b   : > { %13270 = vst [vmem:[#allocation32_spill] sm:$0xff] %v9462_v48  ;;  %v8036_v11 = vpop.eup %8035  ;;  %v1909_v60 = vadd.f32 1.0, %v9406_v32  ;;  %v1910_v56 = vadd.f32 1.0, %v9418_v50  ;;  %8055 = vpow2.f32 %v1967_v25  ;;  %v9540_v63 = vpop.f32.mrf.mxu1  ;;  %v2530_v23 = vsel %vm530_vm0, %v9522_v47, 0.0 }
 0x26c   : > { %v9468_v0 = vpop.f32.mrf.mxu0  ;;  %v9534_v1 = vsel %vm1863_vm8, %v1895_v6, %v8034_v33  ;;  %v2529_v35 = vadd.f32 %v2528_v31, %v2527_v9  ;;  %v1969_v33 = vmul.f32 1.442695, %v9458_v42  ;;  %v1897_v6 = vadd.f32 1.0, %v9420_v2 }
 0x26d   : > { %v9548_v9 = vsel %vm1877_vm10, %v1909_v60, %v8036_v11  ;;  %v2532_v25 = vsel %vm530_vm0, %v9534_v1, 0.0  ;;  %v1971_v37 = vmul.f32 1.442695, %v9513_v18  ;;  %v1898_v11 = vadd.f32 1.0, %v9428_v58 }
 0x26e   : > { %v9477_v19 = vpop.f32.mrf.mxu0  ;;  %v8038_v54 = vpop.eup %8037  ;;  %7836 = vxpose.xlu0.b32.cont [2/16] (narrow) %v7835_v38, 64  ;;  %v7837_v38 = vpack.i.bf16 %v1989_v13, %v9548_v9  ;;  %v1899_v2 = vadd.f32 1.0, %v9340_v36  ;;  %8057 = vpow2.f32 %v9480_v45  ;;  %v1900_v50 = vadd.f32 1.0, %v9352_v57 }
 0x26f   : > { %13271 = vst [vmem:[#allocation33_spill] sm:$0xff] %v9477_v19  ;;  %v9531_v44 = vpop.eup %8039  ;;  %v9536_v29 = vsel %vm1864_vm9, %v1896_v8, %v8038_v54  ;;  %v2531_v8 = vadd.f32 %v2530_v23, %v2529_v35  ;;  %v9565_v35 = vpop.f32.mrf.mxu1  ;;  %8059 = vpow2.f32 %v1969_v33  ;;  %v1901_v36 = vadd.f32 1.0, %v9334_v51 }
 0x270   : > { %v9484_v12 = vpop.f32.mrf.mxu0  ;;  %v8042_v62 = vpop.eup %8041  ;;  %v2534_v54 = vsel %vm530_vm0, %v9536_v29, 0.0  ;;  %v9577_v45 = vsel %vm1867_vm7, %v1899_v2, %v9470_v30  ;;  %8061 = vpow2.f32 %v1971_v37  ;;  %v9599_v37 = vsel %vm1868_vm14, %v1900_v50, %v9506_v34 }
 0x271   : > { %v8044_v22 = vpop.eup %8043  ;;  %v9559_v19 = vsel %vm1865_vm11, %v1897_v6, %v8042_v62  ;;  %v2533_v60 = vadd.f32 %v2532_v25, %v2531_v8  ;;  %v9591_v30 = vpop.f32.mrf.mxu1  ;;  %v9604_v57 = vsel %vm1869_vm1, %v1901_v36, %v9465_v7  ;;  %v1912_v34 = vadd.f32 1.0, %v9472_v55 }
 0x272   : > { %v9495_v53 = vpop.f32.mrf.mxu0  ;;  %v8046_v32 = vpop.eup %8045  ;;  %7838 = vxpose.xlu0.b32.cont [3/16] (narrow) %v7837_v38, 64  ;;  %v9572_v3 = vsel %vm1878_vm12, %v1910_v56, %v8044_v22  ;;  %v2536_v58 = vsel %vm530_vm0, %v9559_v19, 0.0  ;;  %v1973_v22 = vmul.f32 1.442695, %v9565_v35  ;;  %v1975_v50 = vmul.f32 1.442695, %v9492_v24 }
 0x273   : > { %v8048_v48 = vpop.eup %8047  ;;  %v9570_v62 = vsel %vm1866_vm13, %v1898_v11, %v8046_v32  ;;  %v2535_v6 = vadd.f32 %v2534_v54, %v2533_v60  ;;  %v7839_v8 = vpack.i.bf16 %v9522_v47, %v9572_v3  ;;  %v1911_v32 = vadd.f32 1.0, %v9448_v21 }
 0x274   : > { %v9504_v43 = vpop.f32.mrf.mxu0  ;;  %v8050_v23 = vpop.eup %8049  ;;  %v2538_v47 = vsel %vm530_vm0, %v9570_v62, 0.0  ;;  %v2540_v21 = vsel %vm530_vm0, %v9577_v45, 0.0  ;;  %v1902_v60 = vadd.f32 1.0, %v9346_v5  ;;  %8063 = vpow2.f32 %v1973_v22 }
 0x275   : > { %v8052_v33 = vpop.eup %8051  ;;  %v2537_v56 = vadd.f32 %v2536_v58, %v2535_v6  ;;  %v9601_v11 = vsel %vm1879_vm15, %v1911_v32, %v8050_v23  ;;  %vm1870_vm2 = vcmp.gt.f32.partialorder %v9346_v5, 0.0  ;;  %v2542_v7 = vsel %vm530_vm0, %v9599_v37, 0.0 }
 0x276   : > { %v9519_v41 = vpop.f32.mrf.mxu0  ;;  %7840 = vxpose.xlu0.b32.cont [4/16] (narrow) %v7839_v8, 64  ;;  %v7841_v2 = vpack.i.bf16 %v9534_v1, %v9601_v11  ;;  %v1903_v58 = vadd.f32 1.0, %v9373_v26  ;;  %v9620_v8 = vpop.f32.mrf.mxu1  ;;  %v9628_v5 = vsel %vm1880_vm3, %v1912_v34, %v8052_v33  ;;  %v2544_v36 = vsel %vm530_vm0, %v9604_v57, 0.0 }
 0x277   : > { %v2539_v38 = vadd.f32 %v2538_v47, %v2537_v56  ;;  %v8054_v51 = vpop.eup %8053  ;;  %v9625_v56 = vsel %vm1870_vm2, %v1902_v60, %v9474_v46  ;;  %v1904_v55 = vadd.f32 1.0, %v9397_v49  ;;  %v1913_v46 = vadd.f32 1.0, %v9437_v40 }
 0x278   : > { %v9529_v20 = vpop.f32.mrf.mxu0  ;;  %v8056_v32 = vpop.eup %8055  ;;  %v9632_v47 = vsel %vm1871_vm4, %v1903_v58, %v8048_v48  ;;  %8065 = vpow2.f32 %v1975_v50  ;;  %v1977_v26 = vmul.f32 1.442695, %v9540_v63  ;;  %v2546_v33 = vsel %vm530_vm0, %v9625_v56, 0.0 }
 0x279   : > { %v2541_v23 = vadd.f32 %v2540_v21, %v2539_v38  ;;  %v7843_v38 = vpack.i.bf16 %v9536_v29, %v9628_v5  ;;  %vm1872_vm5 = vcmp.gt.f32.partialorder %v9397_v49, 0.0  ;;  %vm1881_vm6 = vcmp.gt.f32.partialorder %v9437_v40, 0.0  ;;  %v9646_v48 = vpop.f32.mrf.mxu1 }
 0x27a   : > { %v9544_v59 = vpop.f32.mrf.mxu0  ;;  %7842 = vxpose.xlu0.b32.cont [5/16] (narrow) %v7841_v2, 64  ;;  %v1905_v2 = vadd.f32 1.0, %v9358_v15  ;;  %vm1873_vm7 = vcmp.gt.f32.partialorder %v9358_v15, 0.0  ;;  %v9651_v50 = vsel %vm1872_vm5, %v1904_v55, %v8054_v51  ;;  %v2548_v49 = vsel %vm530_vm0, %v9632_v47, 0.0 }
 0x27b   : > { %v2543_v22 = vadd.f32 %v2542_v7, %v2541_v23  ;;  %v8058_v34 = vpop.eup %8057  ;;  %v9653_v7 = vsel %vm1881_vm6, %v1913_v46, %v8056_v32  ;;  %v1906_v40 = vadd.f32 1.0, %v9385_v14  ;;  %v1914_v15 = vadd.f32 1.0, %v9458_v42  ;;  %v9671_v46 = vpop.f32.mrf.mxu1 }
 0x27c   : > { %v9556_v31 = vpop.f32.mrf.mxu0  ;;  %v8060_v58 = vpop.eup %8059  ;;  %8067 = vpow2.f32 %v1977_v26  ;;  %v1979_v51 = vmul.f32 1.442695, %v9620_v8  ;;  %vm1874_vm8 = vcmp.gt.f32.partialorder %v9385_v14, 0.0  ;;  %vm1882_vm9 = vcmp.gt.f32.partialorder %v9458_v42, 0.0 }
 0x27d   : > { %v2545_v60 = vadd.f32 %v2544_v36, %v2543_v22  ;;  %v9656_v22 = vsel %vm1873_vm7, %v1905_v2, %v9531_v44  ;;  %v7845_v36 = vpack.i.bf16 %v9559_v19, %v9653_v7  ;;  %v8062_v55 = vpop.eup %8061  ;;  %v2550_v44 = vsel %vm530_vm0, %v9651_v50, 0.0 }
 0x27e   : > { %v9568_v13 = vpop.f32.mrf.mxu0  ;;  %7844 = vxpose.xlu0.b32.cont [6/16] (narrow) %v7843_v38, 64  ;;  %v1915_v26 = vadd.f32 1.0, %v9513_v18  ;;  %v9678_v2 = vsel %vm1882_vm9, %v1914_v15, %v8060_v58  ;;  %v2552_v14 = vsel %vm530_vm0, %v9656_v22, 0.0  ;;  %vm1883_vm10 = vcmp.gt.f32.partialorder %v9513_v18, 0.0 }
 0x27f   : > { %v2547_v23 = vadd.f32 %v2546_v33, %v2545_v60  ;;  %v9675_v60 = vsel %vm1874_vm8, %v1906_v40, %v8058_v34  ;;  %v7847_v42 = vpack.i.bf16 %v9570_v62, %v9678_v2  ;;  %8069 = vpow2.f32 %v1979_v51 }
 0x280   : > { %v9584_v25 = vpop.f32.mrf.mxu0  ;;  %v9688_v40 = vsel %vm1883_vm10, %v1915_v26, %v8062_v55  ;;  %v2554_v58 = vsel %vm530_vm0, %v9675_v60, 0.0  ;;  %v1916_v18 = vadd.f32 1.0, %v9565_v35  ;;  %vm1884_vm11 = vcmp.gt.f32.partialorder %v9565_v35, 0.0 }
 0x281   : > { %v2549_v32 = vadd.f32 %v2548_v49, %v2547_v23  ;;  %v1981_v49 = vmul.f32 1.442695, %v9671_v46  ;;  %v2556_v62 = vsel %vm530_vm0, %v9499_v52, 0.0  ;;  %v7849_v51 = vpack.i.bf16 %v9577_v45, %v9688_v40 }
 0x282   : > { %v9595_v54 = vpop.f32.mrf.mxu0  ;;  %7846 = vxpose.xlu0.b32.cont [7/16] (narrow) %v7845_v36, 64  ;;  %v8064_v36 = vpop.eup %8063  ;;  %v1917_v35 = vadd.f32 1.0, %v9492_v24  ;;  %vm1885_vm12 = vcmp.gt.f32.partialorder %v9492_v24, 0.0  ;;  %v2560_v52 = vsel %vm530_vm0, %v9548_v9, 0.0  ;;  %vm1886_vm13 = vcmp.gt.f32.partialorder %v9540_v63, 0.0 }
 0x283   : > { %v2551_v33 = vadd.f32 %v2550_v44, %v2549_v32  ;;  %v1983_v44 = vmul.f32 1.442695, %v9591_v30  ;;  %8071 = vpow2.f32 %v1981_v49  ;;  %v2564_v9 = vsel %vm530_vm0, %v9601_v11, 0.0 }
 0x284   : > { %v9611_v6 = vpop.f32.mrf.mxu0  ;;  %vm1887_vm14 = vcmp.gt.f32.partialorder %v9620_v8, 0.0  ;;  %v2568_v11 = vsel %vm530_vm0, %v9653_v7, 0.0  ;;  %vm1888_vm15 = vcmp.gt.f32.partialorder %v9671_v46, 0.0  ;;  %vm1889_vm1 = vcmp.gt.f32.partialorder %v9591_v30, 0.0 }
 0x285   : > { %v2553_v34 = vadd.f32 %v2552_v14, %v2551_v33  ;;  %v2012_v33 = vsel %vm1884_vm11, %v1916_v18, %v8064_v36  ;;  %v8066_v14 = vpop.eup %8065  ;;  %8073 = vpow2.f32 %v1983_v44  ;;  %v1985_v36 = vmul.f32 1.442695, %v9646_v48 }
 0x286   : > { %v9622_v1 = vpop.f32.mrf.mxu0  ;;  %7848 = vxpose.xlu0.b32.cont [8/16] (narrow) %v7847_v42, 64  ;;  %v2558_v42 = vsel %vm530_vm0, %v9511_v4, 0.0  ;;  %v7851_v45 = vpack.i.bf16 %v9599_v37, %v2012_v33  ;;  %vm1890_vm2 = vcmp.gt.f32.partialorder %v9646_v48, 0.0 }
 0x287   : > { %v2555_v32 = vadd.f32 %v2554_v58, %v2553_v34  ;;  %8075 = vpow2.f32 %v1985_v36 }
 0x288   : > { %v9637_v21 = vpop.f32.mrf.mxu0 }
 0x289   : > { %v2557_v26 = vadd.f32 %v2556_v62, %v2555_v32  ;;  %v2013_v32 = vsel %vm1885_vm12, %v1917_v35, %v8066_v14  ;;  %v8068_v4 = vpop.eup %8067  ;;  %v2562_v62 = vsel %vm530_vm0, %v9572_v3, 0.0  ;;  %v2566_v3 = vsel %vm530_vm0, %v9628_v5, 0.0 }
 0x28a   : > { %v9648_v29 = vpop.f32.mrf.mxu0  ;;  %7850 = vxpose.xlu0.b32.cont [9/16] (narrow) %v7849_v51, 64  ;;  %v7853_v37 = vpack.i.bf16 %v9604_v57, %v2013_v32 }
 0x28b   : > { %v2559_v58 = vadd.f32 %v2558_v42, %v2557_v26  ;;  %v1918_v26 = vadd.f32 1.0, %v9540_v63 }
 0x28c   : > { %v9663_v38 = vpop.f32.mrf.mxu0  ;;  %v8070_v35 = vpop.eup %8069 }
 0x28d   : > { %v2561_v18 = vadd.f32 %v2560_v52, %v2559_v58  ;;  %v2014_v14 = vsel %vm1886_vm13, %v1918_v26, %v8068_v4  ;;  %v1919_v58 = vadd.f32 1.0, %v9620_v8  ;;  %v1920_v8 = vadd.f32 1.0, %v9671_v46 }
 0x28e   : > { %v9673_v19 = vpop.f32.mrf.mxu0  ;;  %7852 = vxpose.xlu0.b32.cont [10/16] (narrow) %v7851_v45, 64  ;;  %v7855_v57 = vpack.i.bf16 %v9625_v56, %v2014_v14  ;;  %v2572_v56 = vsel %vm530_vm0, %v9688_v40, 0.0  ;;  %v2574_v4 = vsel %vm530_vm0, %v2012_v33, 0.0  ;;  %v1921_v46 = vadd.f32 1.0, %v9591_v30 }
 0x28f   : > { %v2563_v24 = vadd.f32 %v2562_v62, %v2561_v18  ;;  %v2015_v36 = vsel %vm1887_vm14, %v1919_v58, %v8070_v35  ;;  %v9752_v33 = vmul.f32 0.25, %v9302_v39  ;;  %v1922_v30 = vadd.f32 1.0, %v9646_v48  ;;  %v13276_v35 = vld [vmem:[#allocation5_spill] sm:$0xff] }
 0x290   : > { %v9685_v23 = vpop.f32.mrf.mxu0  ;;  %v8072_v5 = vpop.eup %8071 }
 0x291   : > { %v2565_v42 = vadd.f32 %v2564_v9, %v2563_v24  ;;  %v2016_v18 = vsel %vm1888_vm15, %v1920_v8, %v8072_v5  ;;  %v1767_v26 = vmul.f32 1.442695, %v9752_v33  ;;  %v13272_v24 = vld [vmem:[#allocation3_spill] sm:$0xff]  ;;  %v13280_v5 = vld [vmem:[#allocation28_spill] sm:$0xff]  ;;  %vm1701_vm3 = vcmp.gt.f32.partialorder %v9752_v33, 0.0 }
 0x292   : > { %v9692_v15 = vpop.f32.mrf.mxu0  ;;  %7854 = vxpose.xlu0.b32.cont [11/16] (narrow) %v7853_v37, 64  ;;  %v7859_v40 = vpack.i.bf16 %v9651_v50, %v2016_v18  ;;  %v2582_v48 = vsel %vm530_vm0, %v2016_v18, 0.0  ;;  %v9783_v9 = vmul.f32 0.25, %v13272_v24  ;;  %v13273_v37 = vld [vmem:[#allocation33_spill] sm:$0xff]  ;;  %v13281_v8 = vld [vmem:[#allocation31_spill] sm:$0xff]  ;;  %v13287_v24 = vld [vmem:[#allocation10_spill] sm:$0xff] }
 0x293   : > { %v2567_v63 = vadd.f32 %v2566_v3, %v2565_v42  ;;  %v9797_v3 = vmul.f32 0.25, %v13276_v35 }
 0x294   : > { %v7643_v55 = vpop.f32.mrf.mxu0  ;;  %vm1704_vm9 = vcmp.gt.f32.partialorder %v9783_v9, 0.0 }
 0x295   : > { %v2569_v45 = vadd.f32 %v2568_v11, %v2567_v63  ;;  %v13277_v63 = vld [vmem:[#allocation30_spill] sm:$0xff]  ;;  %vm1707_vm11 = vcmp.gt.f32.partialorder %v9797_v3, 0.0 }
 0x296   : > { %v9703_v34 = vpop.f32.mrf.mxu0  ;;  %7856 = vxpose.xlu0.b32.cont [12/16] (narrow) %v7855_v57, 64 }
 0x298   : > { %v7646_v49 = vpop.f32.mrf.mxu0 }
 0x29a   : > { %v1652_v51 = vpop.f32.mrf.mxu0 }
 0x29c   : > { %v7647_v44 = vpop.f32.mrf.mxu0 }
 0x29d   : > { %7260 = vmatprep.subr.mxu1 %v7647_v44 }
 0x29e   : > { %7261 = vmatpush3.msra.mxu1 %v9556_v31  ;;  %v1655_v52 = vpop.f32.mrf.mxu0  ;;  %v2570_v31 = vsel %vm530_vm0, %v9678_v2, 0.0  ;;  %v8074_v2 = vpop.eup %8073 }
 0x29f   : > { %7262 = vmatprep.subr.mxu1 %v7646_v49  ;;  %v2571_v49 = vadd.f32 %v2570_v31, %v2569_v45  ;;  %v13279_v45 = vld [vmem:[#allocation7_spill] sm:$0xff] }
 0x2a0   : > { %7263 = vmatpush3.msra.mxu1 %v9529_v20  ;;  %v7857_v20 = vpack.i.bf16 %v9632_v47, %v2015_v36  ;;  %v9744_v47 = vmul.f32 0.25, %v9308_v10 }
 0x2a1   : > { %7264 = vmatprep.subr.mxu1 %v1655_v52  ;;  %v2573_v7 = vadd.f32 %v2572_v56, %v2571_v49 }
 0x2a2   : > { %7265 = vmatpush3.msra.mxu1 %v9568_v13  ;;  %7858 = vxpose.xlu0.b32.cont [13/16] (narrow) %v7857_v20, 64  ;;  %v9739_v13 = vmul.f32 0.25, %v9304_v17  ;;  %v8076_v17 = vpop.eup %8075  ;;  %v13282_v20 = vld [vmem:[#allocation6_spill] sm:$0xff]  ;;  %vm1700_vm5 = vcmp.gt.f32.partialorder %v9744_v47, 0.0 }
 0x2a3   : > { %7266 = vmatprep.subr.mxu1 %v1652_v51  ;;  %v2575_v62 = vadd.f32 %v2574_v4, %v2573_v7  ;;  %v2018_v51 = vsel %vm1890_vm2, %v1922_v30, %v8076_v17  ;;  %v9816_v7 = vmul.f32 0.25, %v13282_v20 }
 0x2a4   : > { %7267 = vmatpush3.msra.mxu1 %v9544_v59  ;;  %v2576_v59 = vsel %vm530_vm0, %v2013_v32, 0.0  ;;  %v1763_v10 = vmul.f32 1.442695, %v9739_v13  ;;  %v9765_v32 = vmul.f32 0.25, %v9306_v61  ;;  %v9776_v61 = vmul.f32 0.25, %v9310_v27 }
 0x2a5   : > { %7268 = vmatprep.subr.mxu1 %v7643_v55  ;;  %v2017_v55 = vsel %vm1889_vm1, %v1921_v46, %v8074_v2  ;;  %v2586_v27 = vsel %vm530_vm0, %v2018_v51, 0.0  ;;  %v13283_v2 = vld [vmem:[#allocation29_spill] sm:$0xff]  ;;  %vm1699_vm4 = vcmp.gt.f32.partialorder %v9739_v13, 0.0  ;;  %vm1710_vm14 = vcmp.gt.f32.partialorder %v9816_v7, 0.0 }
 0x2a6   : > { %7269 = vmatpush3.msra.mxu1 %v9504_v43  ;;  %v2577_v43 = vadd.f32 %v2576_v59, %v2575_v62  ;;  %7860 = vxpose.xlu0.b32.cont [14/16] (narrow) %v7859_v40, 64  ;;  %v7861_v39 = vpack.i.bf16 %v9656_v22, %v2017_v55  ;;  %8077 = vpow2.f32 %v1763_v10  ;;  %v13284_v46 = vld [vmem:[#allocation9_spill] sm:$0xff]  ;;  %v1733_v59 = vadd.f32 1.0, %v9752_v33 }
 0x2a7   : > { %7270 = vmatprep.subr.mxu1 %v9685_v23  ;;  %v2578_v23 = vsel %vm530_vm0, %v2014_v14, 0.0  ;;  %v13275_v14 = vld [vmem:[#allocation32_spill] sm:$0xff]  ;;  %v1732_v40 = vadd.f32 1.0, %v9744_v47  ;;  %v1785_v10 = vmul.f32 1.442695, %v9816_v7  ;;  %vm1702_vm6 = vcmp.gt.f32.partialorder %v9765_v32, 0.0 }
 0x2a8   : > { %7271 = vmatpush3.msra.mxu1 %v9484_v12  ;;  %v2579_v50 = vadd.f32 %v2578_v23, %v2577_v43  ;;  %v1765_v12 = vmul.f32 1.442695, %v9744_v47  ;;  %vm1705_vm8 = vcmp.gt.f32.partialorder %v9776_v61, 0.0 }
 0x2a9   : > { %7272 = vmatprep.subr.mxu1 %v9703_v34  ;;  %v2580_v34 = vsel %vm530_vm0, %v2015_v36, 0.0  ;;  %v9807_v36 = vmul.f32 0.25, %v13279_v45  ;;  %v13290_v45 = vld [vmem:[#allocation12_spill] sm:$0xff] }
 0x2aa   : > { %7273 = vmatpush3.msra.mxu1 %v9519_v41  ;;  %v2581_v41 = vadd.f32 %v2580_v34, %v2579_v50  ;;  %7862 = vxpose.xlu0.b32.cont [15/16] (narrow) %v7861_v39, 64  ;;  %8079 = vpow2.f32 %v1765_v12  ;;  %v13285_v50 = vld [vmem:[#allocation11_spill] sm:$0xff] }
 0x2ab   : > { %7274 = vmatprep.subr.mxu1 %v9692_v15  ;;  %v9770_v15 = vmul.f32 0.25, %v9312_v28  ;;  %v1769_v28 = vmul.f32 1.442695, %v9765_v32  ;;  %8081 = vpow2.f32 %v1767_v26  ;;  %v1781_v18 = vmul.f32 1.442695, %v9807_v36 }
 0x2ac   : > { %7275 = vmatpush3.msra.mxu1 %v9495_v53  ;;  %v2583_v22 = vadd.f32 %v2582_v48, %v2581_v41  ;;  %v2584_v53 = vsel %vm530_vm0, %v2017_v55, 0.0  ;;  %v9838_v12 = vmul.f32 0.25, %v13285_v50  ;;  %v13286_v41 = vld [vmem:[#allocation8_spill] sm:$0xff]  ;;  %v1734_v48 = vadd.f32 1.0, %v9765_v32 }
 0x2ad   : > { %7276 = vmatprep.subr.mxu1 %v9663_v38  ;;  %v7863_v38 = vpack.i.bf16 %v9675_v60, %v2018_v51  ;;  %v13274_v60 = vld [vmem:[#allocation2_spill] sm:$0xff]  ;;  %8083 = vpow2.f32 %v1769_v28  ;;  %v9849_v51 = vmul.f32 0.25, %v13286_v41  ;;  %vm1703_vm7 = vcmp.gt.f32.partialorder %v9770_v15, 0.0  ;;  %v13294_v41 = vld [vmem:[#allocation16_spill] sm:$0xff] }
 0x2ae   : > { %7277 = vmatpush3.msra.mxu1 %v9468_v0  ;;  %v2585_v0 = vadd.f32 %v2584_v53, %v2583_v22  ;;  %v9792_v42 = vmul.f32 0.25, %v13274_v60  ;;  %v1737_v53 = vadd.f32 1.0, %v9776_v61  ;;  %v1735_v33 = vadd.f32 1.0, %v9770_v15 }
 0x2af   : > { %7278 = vmatprep.subr.mxu1 %v9637_v21  ;;  %v1771_v21 = vmul.f32 1.442695, %v9770_v15  ;;  %7864 = vxpose.xlu0.b32.end [16/16] (narrow) %v7863_v38, 64  ;;  %v9863_v32 = vmul.f32 0.25, %v13287_v24  ;;  %v13288_v15 = vld [vmem:[#allocation13_spill] sm:$0xff]  ;;  %v1736_v60 = vadd.f32 1.0, %v9783_v9 }
 0x2b0   : > { %7279 = vmatpush3.msra.mxu1 %v9456_v16  ;;  %v2587_v44 = vadd.f32 %v2586_v27, %v2585_v0  ;;  %v1775_v16 = vmul.f32 1.442695, %v9776_v61  ;;  %v1777_v52 = vmul.f32 1.442695, %v9792_v42  ;;  %v1789_v0 = vmul.f32 1.442695, %v9838_v12 }
 0x2b1   : > { %7280 = vmatprep.subr.mxu1 %v9673_v19  ;;  %v1773_v19 = vmul.f32 1.442695, %v9783_v9  ;;  %8085 = vpow2.f32 %v1771_v21  ;;  %v1738_v35 = vadd.f32 1.0, %v9792_v42  ;;  %vm1706_vm10 = vcmp.gt.f32.partialorder %v9792_v42, 0.0  ;;  %v13295_v24 = vld [vmem:[#allocation18_spill] sm:$0xff] }
 0x2b2   : > { %7281 = vmatpush3.msra.mxu1 %v13273_v37  ;;  %v2588_v58 = vrot.slane %v2587_v44, 4  ;;  %8087 = vpow2.f32 %v1775_v16  ;;  %v1791_v37 = vmul.f32 1.442695, %v9849_v51  ;;  %vm1708_vm13 = vcmp.gt.f32.partialorder %v9807_v36, 0.0 }
 0x2b3   : > { %7282 = vmatprep.subr.mxu1 %v9648_v29  ;;  %v13278_v29 = vld [vmem:[#allocation4_spill] sm:$0xff]  ;;  %8089 = vpow2.f32 %v1773_v19  ;;  %vm1713_vm1 = vcmp.gt.f32.partialorder %v9849_v51, 0.0  ;;  %vm1712_vm2 = vcmp.gt.f32.partialorder %v9838_v12, 0.0 }
 0x2b4   : > { %7283 = vmatpush3.msra.mxu1 %v13275_v14  ;;  %v9802_v11 = vmul.f32 0.25, %v13278_v29  ;;  %v2589_v57 = vadd.f32 %v2588_v58, %v2587_v44  ;;  %8091 = vpow2.f32 %v1777_v52  ;;  %v9871_v44 = vmul.f32 0.25, %v13288_v15  ;;  %v13289_v29 = vld [vmem:[#allocation15_spill] sm:$0xff]  ;;  %v13296_v15 = vld [vmem:[#allocation21_spill] sm:$0xff] }
 0x2b5   : > { %7284 = vmatprep.subr.mxu1 %v9611_v6  ;;  %v1779_v6 = vmul.f32 1.442695, %v9797_v3 }
 0x2b6   : > { %7285 = vmatpush3.msra.mxu1 %v13277_v63  ;;  %v2590_v31 = vrot.slane %v2589_v57, 2  ;;  %v1783_v49 = vmul.f32 1.442695, %v9802_v11  ;;  %v1793_v63 = vmul.f32 1.442695, %v9863_v32  ;;  %vm1709_vm12 = vcmp.gt.f32.partialorder %v9802_v11, 0.0 }
 0x2b7   : > { %7286 = vmatprep.subr.mxu1 %v9584_v25  ;;  %v8078_v25 = vpop.eup %8077  ;;  %8093 = vpow2.f32 %v1779_v6  ;;  %v1795_v9 = vmul.f32 1.442695, %v9871_v44 }
 0x2b8   : > { %7287 = vmatpush3.msra.mxu1 %v13280_v5  ;;  %v2591_v56 = vadd.f32 %v2590_v31, %v2589_v57  ;;  %v8080_v4 = vpop.eup %8079  ;;  %8095 = vpow2.f32 %v1783_v49  ;;  %v9886_v57 = vmul.f32 0.25, %v13289_v29  ;;  %v9892_v5 = vmul.f32 0.25, %v13290_v45  ;;  %v13298_v45 = vld [vmem:[#allocation23_spill] sm:$0xff] }
 0x2b9   : > { %7288 = vmatprep.subr.mxu1 %v9622_v1  ;;  %v9821_v1 = vmul.f32 0.25, %v13284_v46  ;;  %v8082_v43 = vpop.eup %8081  ;;  %v9833_v23 = vsel %vm1700_vm5, %v1732_v40, %v8080_v4  ;;  %8097 = vpow2.f32 %v1781_v18  ;;  %v1739_v31 = vadd.f32 1.0, %v9797_v3 }
 0x2ba   : > { %7289 = vmatpush3.msra.mxu1 %v13281_v8  ;;  %v2592_v62 = vrot.slane %v2591_v56, 1  ;;  %v8084_v34 = vpop.eup %8083  ;;  %v9846_v39 = vsel %vm1701_vm3, %v1733_v59, %v8082_v43  ;;  %8099 = vpow2.f32 %v1785_v10  ;;  %v1797_v4 = vmul.f32 1.442695, %v9886_v57 }
 0x2bb   : > { %7290 = vmatprep.subr.mxu1 %v9595_v54  ;;  %v1731_v54 = vadd.f32 1.0, %v9739_v13  ;;  %v1787_v30 = vmul.f32 1.442695, %v9821_v1  ;;  %v9860_v28 = vsel %vm1702_vm6, %v1734_v48, %v8084_v34  ;;  %v1799_v46 = vmul.f32 1.442695, %v9892_v5 }
 0x2bc   : > { %7291 = vmatpush3.msra.mxu1 %v13283_v2  ;;  %v9829_v55 = vadd.f32 %v2592_v62, %v2591_v56  ;;  %v13291_v2 = vld [vmem:[#allocation14_spill] sm:$0xff]  ;;  %v13292_v62 = vld [vmem:[#allocation17_spill] sm:$0xff]  ;;  %v1742_v10 = vadd.f32 1.0, %v9816_v7  ;;  %vm1711_vm15 = vcmp.gt.f32.partialorder %v9821_v1, 0.0  ;;  %vm1714_vm3 = vcmp.gt.f32.partialorder %v9863_v32, 0.0 }
 0x2bd   : > { %v9831_v17 = vsel %vm1699_vm4, %v1731_v54, %v8078_v25  ;;  %8101 = vpow2.f32 %v1787_v30  ;;  %v1741_v25 = vadd.f32 1.0, %v9802_v11  ;;  %v9909_v42 = vmul.f32 0.25, %v13291_v2 }
 0x2be   : > { %v2595_v13 = vmul.f32 %v9829_v55, %v9833_v23  ;;  %v2594_v47 = vmul.f32 %v9829_v55, %v9831_v17  ;;  %v8086_v26 = vpop.eup %8085  ;;  %v2596_v22 = vmul.f32 %v9829_v55, %v9846_v39  ;;  %v2597_v16 = vmul.f32 %v9829_v55, %v9860_v28 }
 0x2bf   : > { %v8088_v38 = vpop.eup %8087  ;;  %v9867_v27 = vsel %vm1703_vm7, %v1735_v33, %v8086_v26  ;;  %8103 = vpow2.f32 %v1789_v0  ;;  %v9915_v59 = vmul.f32 0.25, %v13292_v62  ;;  %v1740_v54 = vadd.f32 1.0, %v9807_v36 }
 0x2c0   : > { %7728 = vmatprep.mubr.msk.f32.mxu0 %vm530_vm0, %v2594_v47  ;;  %v8090_v21 = vpop.eup %8089  ;;  %v2598_v14 = vmul.f32 %v9829_v55, %v9867_v27  ;;  %v9879_v19 = vsel %vm1705_vm8, %v1737_v53, %v8088_v38  ;;  %8105 = vpow2.f32 %v1791_v37  ;;  %v1801_v50 = vmul.f32 1.442695, %v9909_v42 }
 0x2c1   : > { %7729 = vmatmul.mubr.msk.f32.vlgmr.msra.gmra.mxu0 %vm530_vm0, %v2595_v13  ;;  %v8092_v58 = vpop.eup %8091  ;;  %v9889_v61 = vsel %vm1704_vm9, %v1736_v60, %v8090_v21  ;;  %v2600_v8 = vmul.f32 %v9829_v55, %v9879_v19  ;;  %8107 = vpow2.f32 %v1793_v63  ;;  %v13293_v13 = vld [vmem:[#allocation19_spill] sm:$0xff]  ;;  %v9936_v26 = vmul.f32 0.25, %v13294_v41  ;;  %v13297_v63 = vld [vmem:[#allocation20_spill] sm:$0xff] }
 0x2c2   : > { %7731 = vmatprep.mubr.msk.f32.mxu0 %vm530_vm0, %v2596_v22  ;;  %v2599_v6 = vmul.f32 %v9829_v55, %v9889_v61  ;;  %v9901_v56 = vsel %vm1706_vm10, %v1738_v35, %v8092_v58  ;;  %8109 = vpow2.f32 %v1795_v9  ;;  %v9930_v47 = vmul.f32 0.25, %v13293_v13 }
 0x2c3   : > { %v2601_v3 = vmul.f32 %v9829_v55, %v9901_v56  ;;  %8111 = vpow2.f32 %v1797_v4  ;;  %v1803_v36 = vmul.f32 1.442695, %v9915_v59  ;;  %v1743_v22 = vadd.f32 1.0, %v9821_v1 }
 0x2c4   : > { %v8094_v52 = vpop.eup %8093  ;;  %8113 = vpow2.f32 %v1799_v46  ;;  %v9952_v0 = vmul.f32 0.25, %v13295_v24  ;;  %v1805_v21 = vmul.f32 1.442695, %v9930_v47  ;;  %v1807_v37 = vmul.f32 1.442695, %v9936_v26  ;;  %v13299_v46 = vld [vmem:[#allocation22_spill] sm:$0xff] }
 0x2c5   : > { %7732 = vmatmul.mubr.msk.f32.gmra.mxu0 %vm530_vm0, %v2597_v16  ;;  %v8096_v49 = vpop.eup %8095  ;;  %v9906_v18 = vsel %vm1707_vm11, %v1739_v31, %v8094_v52  ;;  %8115 = vpow2.f32 %v1801_v50  ;;  %v9958_v16 = vmul.f32 0.25, %v13296_v15  ;;  %v1745_v58 = vadd.f32 1.0, %v9849_v51  ;;  %v13302_v24 = vld [vmem:[#allocation27_spill] sm:$0xff] }
 0x2c6   : > { %7734 = vmatprep.mubr.msk.f32.mxu0 %vm530_vm0, %v2598_v14  ;;  %v8098_v20 = vpop.eup %8097  ;;  %v2602_v40 = vmul.f32 %v9829_v55, %v9906_v18  ;;  %v9923_v43 = vsel %vm1709_vm12, %v1741_v25, %v8096_v49  ;;  %8117 = vpow2.f32 %v1803_v36  ;;  %v1744_v14 = vadd.f32 1.0, %v9838_v12 }
 0x2c7   : > { %v8100_v30 = vpop.eup %8099  ;;  %v9933_v11 = vsel %vm1708_vm13, %v1740_v54, %v8098_v20  ;;  %v2604_v53 = vmul.f32 %v9829_v55, %v9923_v43  ;;  %v9969_v29 = vmul.f32 0.25, %v13297_v63  ;;  %v1809_v52 = vmul.f32 1.442695, %v9952_v0  ;;  %v13303_v63 = vld [vmem:[#allocation26_spill] sm:$0xff] }
 0x2c8   : > { %v2603_v48 = vmul.f32 %v9829_v55, %v9933_v11  ;;  %v9945_v33 = vsel %vm1710_vm14, %v1742_v10, %v8100_v30  ;;  %8119 = vpow2.f32 %v1805_v21  ;;  %v9974_v9 = vmul.f32 0.25, %v13298_v45 }
 0x2c9   : > { %7735 = vmatmul.mubr.msk.f32.gmra.mxu0 %vm530_vm0, %v2599_v6  ;;  %v2605_v1 = vmul.f32 %v9829_v55, %v9945_v33  ;;  %8121 = vpow2.f32 %v1807_v37  ;;  %v1811_v12 = vmul.f32 1.442695, %v9958_v16  ;;  %v1746_v25 = vadd.f32 1.0, %v9863_v32  ;;  %v13300_v32 = vld [vmem:[#allocation25_spill] sm:$0xff] }
 0x2ca   : > { %7737 = vmatprep.mubr.msk.f32.mxu0 %vm530_vm0, %v2600_v8  ;;  %v8102_v34 = vpop.eup %8101  ;;  %vm1715_vm4 = vcmp.gt.f32.partialorder %v9871_v44, 0.0  ;;  %v1747_v2 = vadd.f32 1.0, %v9871_v44  ;;  %v1815_v4 = vmul.f32 1.442695, %v9969_v29  ;;  %v9992_v62 = vmul.f32 0.25, %v13299_v46 }
 0x2cb   : > { %v9949_v38 = vsel %vm1711_vm15, %v1743_v22, %v8102_v34  ;;  %8123 = vpow2.f32 %v1809_v52  ;;  %v1813_v54 = vmul.f32 1.442695, %v9974_v9  ;;  %vm1717_vm5 = vcmp.gt.f32.partialorder %v9892_v5, 0.0 }
 0x2cc   : > { %v8104_v7 = vpop.eup %8103  ;;  %v2606_v35 = vmul.f32 %v9829_v55, %v9949_v38  ;;  %8125 = vpow2.f32 %v1811_v12  ;;  %v1749_v13 = vadd.f32 1.0, %v9892_v5  ;;  %v1748_v34 = vadd.f32 1.0, %v9886_v57 }
 0x2cd   : > { %7738 = vmatmul.mubr.msk.f32.gmra.mxu0 %vm530_vm0, %v2601_v3  ;;  %v8106_v60 = vpop.eup %8105  ;;  %v9977_v6 = vsel %vm1712_vm2, %v1744_v14, %v8104_v7  ;;  %vm1716_vm6 = vcmp.gt.f32.partialorder %v9886_v57, 0.0  ;;  %8127 = vpow2.f32 %v1815_v4  ;;  %v1817_v36 = vmul.f32 1.442695, %v9992_v62 }
 0x2ce   : > { %7740 = vmatprep.mubr.msk.f32.mxu0 %vm530_vm0, %v2602_v40  ;;  %v8108_v31 = vpop.eup %8107  ;;  %v9979_v8 = vsel %vm1713_vm1, %v1745_v58, %v8106_v60  ;;  %v2607_v51 = vmul.f32 %v9829_v55, %v9977_v6  ;;  %v9999_v40 = vmul.f32 0.25, %v13300_v32  ;;  %8129 = vpow2.f32 %v1813_v54 }
 0x2cf   : > { %v8110_v49 = vpop.eup %8109  ;;  %v2608_v20 = vmul.f32 %v9829_v55, %v9979_v8  ;;  %v9995_v3 = vsel %vm1714_vm3, %v1746_v25, %v8108_v31  ;;  %v10019_v5 = vmul.f32 0.25, %v13302_v24  ;;  %vm1718_vm7 = vcmp.gt.f32.partialorder %v9909_v42, 0.0 }
 0x2d0   : > { %v8112_v10 = vpop.eup %8111  ;;  %v10002_v30 = vsel %vm1715_vm4, %v1747_v2, %v8110_v49  ;;  %v2609_v44 = vmul.f32 %v9829_v55, %v9995_v3  ;;  %vm1719_vm8 = vcmp.gt.f32.partialorder %v9915_v59, 0.0  ;;  %v1751_v14 = vadd.f32 1.0, %v9915_v59 }
 0x2d1   : > { %7741 = vmatmul.mubr.msk.f32.gmra.mxu0 %vm530_vm0, %v2603_v48  ;;  %v8114_v50 = vpop.eup %8113  ;;  %v2610_v41 = vmul.f32 %v9829_v55, %v10002_v30  ;;  %v13301_v48 = vld [vmem:[#allocation24_spill] sm:$0xff]  ;;  %v10022_v21 = vsel %vm1716_vm6, %v1748_v34, %v8112_v10  ;;  %8131 = vpow2.f32 %v1817_v36  ;;  %v10039_v52 = vmul.f32 0.25, %v13303_v63 }
 0x2d2   : > { %7743 = vmatprep.mubr.msk.f32.mxu0 %vm530_vm0, %v2604_v53  ;;  %v10014_v22 = vmul.f32 0.25, %v13301_v48  ;;  %v1819_v53 = vmul.f32 1.442695, %v9999_v40  ;;  %v8116_v7 = vpop.eup %8115  ;;  %v10024_v57 = vsel %vm1717_vm5, %v1749_v13, %v8114_v50  ;;  %v2611_v37 = vmul.f32 %v9829_v55, %v10022_v21 }
 0x2d3   : > { %v8118_v15 = vpop.eup %8117  ;;  %v2612_v60 = vmul.f32 %v9829_v55, %v10024_v57  ;;  %v1753_v25 = vadd.f32 1.0, %v9936_v26  ;;  %vm1720_vm9 = vcmp.gt.f32.partialorder %v9930_v47, 0.0  ;;  %vm1721_vm10 = vcmp.gt.f32.partialorder %v9936_v26, 0.0 }
 0x2d4   : > { %8133 = vpow2.f32 %v1819_v53  ;;  %v10043_v31 = vsel %vm1719_vm8, %v1751_v14, %v8118_v15  ;;  %vm1722_vm11 = vcmp.gt.f32.partialorder %v9952_v0, 0.0  ;;  %v1755_v26 = vadd.f32 1.0, %v9958_v16 }
 0x2d5   : > { %7744 = vmatmul.mubr.msk.f32.gmra.mxu0 %vm530_vm0, %v2605_v1  ;;  %v1750_v1 = vadd.f32 1.0, %v9909_v42  ;;  %v1821_v42 = vmul.f32 1.442695, %v10019_v5  ;;  %v8120_v45 = vpop.eup %8119  ;;  %v2614_v49 = vmul.f32 %v9829_v55, %v10043_v31  ;;  %vm1723_vm12 = vcmp.gt.f32.partialorder %v9958_v16, 0.0 }
 0x2d6   : > { %7746 = vmatprep.mubr.msk.f32.mxu0 %vm530_vm0, %v2606_v35  ;;  %v1823_v35 = vmul.f32 1.442695, %v10014_v22  ;;  %v8122_v12 = vpop.eup %8121  ;;  %v1756_v36 = vadd.f32 1.0, %v9974_v9  ;;  %vm1725_vm13 = vcmp.gt.f32.partialorder %v9969_v29, 0.0  ;;  %vm1724_vm14 = vcmp.gt.f32.partialorder %v9974_v9, 0.0 }
 0x2d7   : > { %v10036_v58 = vsel %vm1718_vm7, %v1750_v1, %v8116_v7  ;;  %v10058_v46 = vsel %vm1721_vm10, %v1753_v25, %v8122_v12  ;;  %v1759_v15 = vadd.f32 1.0, %v9999_v40  ;;  %vm1726_vm15 = vcmp.gt.f32.partialorder %v9992_v62, 0.0 }
 0x2d8   : > { %v2613_v59 = vmul.f32 %v9829_v55, %v10036_v58  ;;  %8135 = vpow2.f32 %v1823_v35  ;;  %v8124_v4 = vpop.eup %8123  ;;  %v2616_v10 = vmul.f32 %v9829_v55, %v10058_v46  ;;  %vm1727_vm1 = vcmp.gt.f32.partialorder %v9999_v40, 0.0 }
 0x2d9   : > { %7747 = vmatmul.mubr.msk.f32.gmra.mxu0 %vm530_vm0, %v2607_v51  ;;  %v1752_v51 = vadd.f32 1.0, %v9930_v47  ;;  %8137 = vpow2.f32 %v1821_v42  ;;  %v8126_v32 = vpop.eup %8125  ;;  %v1754_v47 = vadd.f32 1.0, %v9952_v0  ;;  %v1757_v0 = vadd.f32 1.0, %v9969_v29 }
 0x2da   : > { %7749 = vmatprep.mubr.msk.f32.mxu0 %vm530_vm0, %v2608_v20  ;;  %v1825_v20 = vmul.f32 1.442695, %v10039_v52  ;;  %v10072_v34 = vsel %vm1723_vm12, %v1755_v26, %v8126_v32  ;;  %v1760_v12 = vadd.f32 1.0, %v10019_v5  ;;  %vm1729_vm2 = vcmp.gt.f32.partialorder %v10014_v22, 0.0 }
 0x2db   : > { %v10056_v2 = vsel %vm1720_vm9, %v1752_v51, %v8120_v45  ;;  %v10068_v50 = vsel %vm1722_vm11, %v1754_v47, %v8124_v4  ;;  %v2618_v48 = vmul.f32 %v9829_v55, %v10072_v34  ;;  %vm1728_vm3 = vcmp.gt.f32.partialorder %v10019_v5, 0.0 }
 0x2dc   : > { %v2615_v54 = vmul.f32 %v9829_v55, %v10056_v2  ;;  %8139 = vpow2.f32 %v1825_v20  ;;  %v1762_v32 = vadd.f32 1.0, %v10039_v52  ;;  %vm1730_vm4 = vcmp.gt.f32.partialorder %v10039_v52, 0.0 }
 0x2dd   : > { %7750 = vmatmul.mubr.msk.f32.gmra.mxu0 %vm530_vm0, %v2609_v44  ;;  %v8128_v44 = vpop.eup %8127 }
 0x2de   : > { %7752 = vmatprep.mubr.msk.f32.mxu0 %vm530_vm0, %v2610_v41  ;;  %v8130_v13 = vpop.eup %8129  ;;  %v2617_v41 = vmul.f32 %v9829_v55, %v10068_v50  ;;  %v10083_v53 = vsel %vm1725_vm13, %v1757_v0, %v8128_v44 }
 0x2df   : > { %v8132_v16 = vpop.eup %8131  ;;  %v10086_v24 = vsel %vm1724_vm14, %v1756_v36, %v8130_v13  ;;  %v2620_v9 = vmul.f32 %v9829_v55, %v10083_v53 }
 0x2e0   : > { %v2619_v29 = vmul.f32 %v9829_v55, %v10086_v24 }
 0x2e1   : > { %7753 = vmatmul.mubr.msk.f32.gmra.mxu0 %vm530_vm0, %v2611_v37  ;;  %v8134_v7 = vpop.eup %8133  ;;  %v1758_v37 = vadd.f32 1.0, %v9992_v62 }
 0x2e2   : > { %7755 = vmatprep.mubr.msk.f32.mxu0 %vm530_vm0, %v2612_v60  ;;  %v10099_v42 = vsel %vm1727_vm1, %v1759_v15, %v8134_v7 }
 0x2e3   : > { %v10097_v63 = vsel %vm1726_vm15, %v1758_v37, %v8132_v16  ;;  %v2622_v40 = vmul.f32 %v9829_v55, %v10099_v42 }
 0x2e4   : > { %v2621_v62 = vmul.f32 %v9829_v55, %v10097_v63 }
 0x2e5   : > { %7756 = vmatmul.mubr.msk.f32.gmra.mxu0 %vm530_vm0, %v2613_v59  ;;  %v8136_v35 = vpop.eup %8135  ;;  %v1761_v59 = vadd.f32 1.0, %v10014_v22 }
 0x2e6   : > { %7758 = vmatprep.mubr.msk.f32.mxu0 %vm530_vm0, %v2614_v49  ;;  %v8138_v45 = vpop.eup %8137 }
 0x2e7   : > { %v10111_v20 = vsel %vm1729_vm2, %v1761_v59, %v8136_v35  ;;  %v10114_v4 = vsel %vm1728_vm3, %v1760_v12, %v8138_v45 }
 0x2e8   : > { %v2624_v22 = vmul.f32 %v9829_v55, %v10111_v20 }
 0x2e9   : > { %7759 = vmatmul.mubr.msk.f32.gmra.mxu0 %vm530_vm0, %v2615_v54  ;;  %v8140_v54 = vpop.eup %8139 }
 0x2ea   : > { %7761 = vmatprep.mubr.msk.f32.mxu0 %vm530_vm0, %v2616_v10  ;;  %v2623_v10 = vmul.f32 %v9829_v55, %v10114_v4  ;;  %v10123_v44 = vsel %vm1730_vm4, %v1762_v32, %v8140_v54 }
 0x2ed   : > { %7762 = vmatmul.mubr.msk.f32.gmra.mxu0 %vm530_vm0, %v2617_v41  ;;  %v2625_v41 = vmul.f32 %v9829_v55, %v10123_v44 }
 0x2ee   : > { %7764 = vmatprep.mubr.msk.f32.mxu0 %vm530_vm0, %v2618_v48 }
 0x2ef   : > { %v7865_v1 = vpop.trf.xlu0 }
 0x2f0   : > { %v7869_v60 = vunpack.i.h.bf16 %v7865_v1  ;;  %v7866_v14 = vunpack.i.l.bf16 %v7865_v1 }
 0x2f1   : > { %7765 = vmatmul.mubr.msk.f32.gmra.mxu0 %vm530_vm0, %v2619_v29 }
 0x2f2   : > { %2147 = vmatprep.mubr.f32.mxu1 %v7866_v14  ;;  %7767 = vmatprep.mubr.msk.f32.mxu0 %vm530_vm0, %v2620_v9 }
 0x2f3   : > { %v7870_v51 = vpop.trf.xlu0  ;;  %2148 = vmatmul.mubr.f32.vlgmr.msra.gmra.mxu1 %v7869_v60 }
 0x2f4   : > { %v7871_v49 = vunpack.i.l.bf16 %v7870_v51  ;;  %v7874_v25 = vunpack.i.h.bf16 %v7870_v51 }
 0x2f5   : > { %7768 = vmatmul.mubr.msk.f32.gmra.mxu0 %vm530_vm0, %v2621_v62 }
 0x2f6   : > { %2152 = vmatprep.mubr.f32.mxu1 %v7871_v49  ;;  %7770 = vmatprep.mubr.msk.f32.mxu0 %vm530_vm0, %v2622_v40 }
 0x2f7   : > { %v7875_v47 = vpop.trf.xlu0  ;;  %2153 = vmatmul.mubr.f32.gmra.mxu1 %v7874_v25 }
 0x2f8   : > { %v7876_v5 = vunpack.i.l.bf16 %v7875_v47  ;;  %v7879_v26 = vunpack.i.h.bf16 %v7875_v47 }
 0x2f9   : > { %7771 = vmatmul.mubr.msk.f32.gmra.mxu0 %vm530_vm0, %v2623_v10 }
 0x2fa   : > { %2157 = vmatprep.mubr.f32.mxu1 %v7876_v5  ;;  %7773 = vmatprep.mubr.msk.f32.mxu0 %vm530_vm0, %v2624_v22 }
 0x2fb   : > { %v7880_v13 = vpop.trf.xlu0  ;;  %2158 = vmatmul.mubr.f32.gmra.mxu1 %v7879_v26 }
 0x2fc   : > { %v7881_v0 = vunpack.i.l.bf16 %v7880_v13  ;;  %v7884_v36 = vunpack.i.h.bf16 %v7880_v13 }
 0x2fd   : > { %7774 = vmatmul.mubr.msk.f32.gmra.mxu0 %vm530_vm0, %v2625_v41 }
 0x2fe   : > { %2162 = vmatprep.mubr.f32.mxu1 %v7881_v0 }
 0x2ff   : > { %v7885_v48 = vpop.trf.xlu0  ;;  %2163 = vmatmul.mubr.f32.gmra.mxu1 %v7884_v36 }
 0x300   : > { %v7886_v52 = vunpack.i.l.bf16 %v7885_v48  ;;  %v7889_v16 = vunpack.i.h.bf16 %v7885_v48 }
 0x302   : > { %2167 = vmatprep.mubr.f32.mxu1 %v7886_v52  ;;  %v8526_v52 = vld [vmem:[%s13156_s6 + $0x30] sm:$0xff] }
 0x303   : > { %v7890_v7 = vpop.trf.xlu0  ;;  %2168 = vmatmul.mubr.f32.gmra.mxu1 %v7889_v16 }
 0x304   : > { %v7891_v37 = vunpack.i.l.bf16 %v7890_v7  ;;  %v7894_v15 = vunpack.i.h.bf16 %v7890_v7 }
 0x306   : > { %2172 = vmatprep.mubr.f32.mxu1 %v7891_v37  ;;  %v8527_v37 = vld [vmem:[%s13156_s6 + $0x28] sm:$0xff] }
 0x307   : > { %v7895_v1 = vpop.trf.xlu0  ;;  %2173 = vmatmul.mubr.f32.gmra.mxu1 %v7894_v15 }
 0x308   : > { %v7896_v29 = vunpack.i.l.bf16 %v7895_v1  ;;  %v7899_v9 = vunpack.i.h.bf16 %v7895_v1 }
 0x30a   : > { %2177 = vmatprep.mubr.f32.mxu1 %v7896_v29  ;;  %v8528_v29 = vld [vmem:[%s13156_s6 + $0x20] sm:$0xff] }
 0x30b   : > { %v7900_v55 = vpop.trf.xlu0  ;;  %2178 = vmatmul.mubr.f32.gmra.mxu1 %v7899_v9 }
 0x30c   : > { %v7901_v60 = vunpack.i.l.bf16 %v7900_v55  ;;  %v7904_v14 = vunpack.i.h.bf16 %v7900_v55 }
 0x30e   : > { %2182 = vmatprep.mubr.f32.mxu1 %v7901_v60  ;;  %v8529_v60 = vld [vmem:[%s13156_s6 + $0x18] sm:$0xff] }
 0x30f   : > { %2183 = vmatmul.mubr.f32.gmra.mxu1 %v7904_v14 }
 0x310   : > { %7664 = vmatprep.mubr.msk.f32.mxu1 %vm530_vm0, %v9831_v17  ;;  %v8525_v17 = vld [vmem:[%s13156_s6 + $0x38] sm:$0xff] }
 0x3b3   : > { %v7292_v35 = vpop.f32.mrf.mxu1 }
 0x3b5   : > { %v7293_v45 = vpop.f32.mrf.mxu1 }
 0x3b7   : > { %v7295_v59 = vpop.f32.mrf.mxu1 }
 0x3b9   : > { %v7296_v12 = vpop.f32.mrf.mxu1 }
 0x3ba   : > { %v7297_v55 = vadd.f32 %v7296_v12, %v7295_v59  ;;  %v8532_v12 = vld [vmem:[%s13156_s6] sm:$0xff] }
 0x3bb   : > { %v7298_v51 = vpop.f32.mrf.mxu1 }
 0x3bd   : > { %v7299_v62 = vpop.f32.mrf.mxu1 }
 0x3be   : > { %v7300_v1 = vadd.f32 %v7299_v62, %v7298_v51  ;;  %v8530_v51 = vld [vmem:[%s13156_s6 + $0x10] sm:$0xff] }
 0x3bf   : > { %v7301_v40 = vpop.f32.mrf.mxu1 }
 0x3c0   : > { %v2198_v62 = vmul.f32 %v8530_v51, %v7300_v1 }
 0x3c1   : > { %v7302_v49 = vpop.f32.mrf.mxu1 }
 0x3c2   : > { %v7303_v7 = vadd.f32 %v7302_v49, %v7301_v40  ;;  %v7294_v40 = vadd.f32 %v7293_v45, %v7292_v35  ;;  %v8531_v49 = vld [vmem:[%s13156_s6 + $0x8] sm:$0xff]  ;;  %v7917_v35 = vld [vmem:[%s13157_s7 + $0x18] sm:$0xff]   ;;  %v7918_v45 = vld [vmem:[%s13157_s7 + $0x10] sm:$0xff]  }
 0x3c3   : > { %v7304_v25 = vpop.f32.mrf.mxu1  ;;  %v2197_v59 = vmul.f32 %v8531_v49, %v7297_v55 }
 0x3c4   : > { %v2199_v14 = vmul.f32 %v8529_v60, %v7303_v7 }
 0x3c5   : > { %v7305_v54 = vpop.f32.mrf.mxu1 }
 0x3c6   : > { %v7306_v48 = vadd.f32 %v7305_v54, %v7304_v25  ;;  %v2196_v25 = vmul.f32 %v8532_v12, %v7294_v40  ;;  %v7919_v54 = vld [vmem:[%s13157_s7 + $0x8] sm:$0xff]  }
 0x3c7   : > { %v7307_v32 = vpop.f32.mrf.mxu1 }
 0x3c8   : > { %v2200_v9 = vmul.f32 %v8528_v29, %v7306_v48 }
 0x3c9   : > { %v7308_v47 = vpop.f32.mrf.mxu1 }
 0x3ca   : > { %v7309_v0 = vadd.f32 %v7308_v47, %v7307_v32 }
 0x3cb   : > { %v7310_v10 = vpop.f32.mrf.mxu1 }
 0x3cc   : > { %v2201_v15 = vmul.f32 %v8527_v37, %v7309_v0 }
 0x3cd   : > { %v7311_v22 = vpop.f32.mrf.mxu1 }
 0x3ce   : > { %v7312_v13 = vadd.f32 %v7311_v22, %v7310_v10 }
 0x3cf   : > { %v7313_v5 = vpop.f32.mrf.mxu1 }
 0x3d0   : > { %v2202_v16 = vmul.f32 %v8526_v52, %v7312_v13 }
 0x3d1   : > { %v7314_v26 = vpop.f32.mrf.mxu1 }
 0x3d2   : > { %v7315_v41 = vadd.f32 %v7314_v26, %v7313_v5 }
 0x3d4   : > { %v2203_v36 = vmul.f32 %v8525_v17, %v7315_v41 }
 0x3d6   : > { %7648 = vmatprep.subr.mxu1 %v2203_v36 }
 0x3d7   : > { %7649 = vmatpush3.msra.mxu1 %v2203_v36 }
 0x3d8   : > { %7650 = vmatprep.subr.mxu1 %v2202_v16 }
 0x3d9   : > { %7651 = vmatpush3.msra.mxu1 %v2202_v16 }
 0x3da   : > { %7652 = vmatprep.subr.mxu1 %v2201_v15 }
 0x3db   : > { %7653 = vmatpush3.msra.mxu1 %v2201_v15 }
 0x3dc   : > { %7654 = vmatprep.subr.mxu1 %v2200_v9 }
 0x3dd   : > { %7655 = vmatpush3.msra.mxu1 %v2200_v9 }
 0x3de   : > { %7656 = vmatprep.subr.mxu1 %v2199_v14 }
 0x3df   : > { %7657 = vmatpush3.msra.mxu1 %v2199_v14 }
 0x3e0   : > { %7658 = vmatprep.subr.mxu1 %v2198_v62 }
 0x3e1   : > { %7659 = vmatpush3.msra.mxu1 %v2198_v62 }
 0x3e2   : > { %7660 = vmatprep.subr.mxu1 %v2197_v59 }
 0x3e3   : > { %7661 = vmatpush3.msra.mxu1 %v2197_v59 }
 0x3e4   : > { %7662 = vmatprep.subr.mxu1 %v2196_v25 }
 0x3e5   : > { %7663 = vmatpush3.msra.mxu1 %v2196_v25 }
 0x3e6   : > { %7665 = vmatmul.mubr.msk.f32.vlgmr.msra.gmra.mxu1 %vm530_vm0, %v9833_v23  ;;  %7776 = vmatprep.subr.bf16.mxu1 %v7917_v35  ;;  %v7920_v23 = vld [vmem:[%s13157_s7] sm:$0xff]  }
 0x3e7   : > { %7667 = vmatprep.mubr.msk.f32.mxu1 %vm530_vm0, %v9846_v39  ;;  %7777 = vmatpush3.bf16.msra.mxu1 %v7917_v35  ;;  %v7730_v39 = vpop.f32.mrf.mxu0 }
 0x3e8   : > { %7778 = vmatprep.subr.bf16.mxu1 %v7918_v45 }
 0x3ea   : > { %7668 = vmatmul.mubr.msk.f32.gmra.mxu1 %vm530_vm0, %v9860_v28  ;;  %v2788_v28 = vpop.f32.mrf.mxu0 }
 0x3eb   : > { %7670 = vmatprep.mubr.msk.f32.mxu1 %vm530_vm0, %v9867_v27  ;;  %7779 = vmatpush3.bf16.msra.mxu1 %v7918_v45 }
 0x3ec   : > { %7780 = vmatprep.subr.bf16.mxu1 %v7919_v54  ;;  %v7733_v27 = vpop.f32.mrf.mxu0 }
 0x3ee   : > { %7671 = vmatmul.mubr.msk.f32.gmra.mxu1 %vm530_vm0, %v9889_v61 }
 0x3ef   : > { %7673 = vmatprep.mubr.msk.f32.mxu1 %vm530_vm0, %v9879_v19  ;;  %7781 = vmatpush3.bf16.msra.mxu1 %v7919_v54  ;;  %v2798_v19 = vpop.f32.mrf.mxu0 }
 0x3f0   : > { %7782 = vmatprep.subr.bf16.mxu1 %v7920_v23 }
 0x3f1   : > { %v7736_v61 = vpop.f32.mrf.mxu0 }
 0x3f2   : > { %7674 = vmatmul.mubr.msk.f32.gmra.mxu1 %vm530_vm0, %v9901_v56 }
 0x3f3   : > { %7676 = vmatprep.mubr.msk.f32.mxu1 %vm530_vm0, %v9906_v18  ;;  %7783 = vmatpush3.bf16.msra.mxu1 %v7920_v23  ;;  %v2808_v56 = vpop.f32.mrf.mxu0 }
 0x3f5   : > { %v7739_v18 = vpop.f32.mrf.mxu0 }
 0x3f6   : > { %7677 = vmatmul.mubr.msk.f32.gmra.mxu1 %vm530_vm0, %v9933_v11 }
 0x3f7   : > { %7679 = vmatprep.mubr.msk.f32.mxu1 %vm530_vm0, %v9923_v43  ;;  %v2818_v43 = vpop.f32.mrf.mxu0 }
 0x3f9   : > { %v7742_v11 = vpop.f32.mrf.mxu0 }
 0x3fa   : > { %7680 = vmatmul.mubr.msk.f32.gmra.mxu1 %vm530_vm0, %v9945_v33 }
 0x3fb   : > { %7682 = vmatprep.mubr.msk.f32.mxu1 %vm530_vm0, %v9949_v38  ;;  %v2828_v33 = vpop.f32.mrf.mxu0 }
 0x3fc   : > { %v2829_v10 = vadd.f32 1e-08, %v2828_v33 }
 0x3fd   : > { %v7745_v38 = vpop.f32.mrf.mxu0 }
 0x3fe   : > { %7683 = vmatmul.mubr.msk.f32.gmra.mxu1 %vm530_vm0, %v9977_v6  ;;  %v2844_v0 = vadd.f32 1e-08, %v7745_v38 }
 0x3ff   : > { %7685 = vmatprep.mubr.msk.f32.mxu1 %vm530_vm0, %v9979_v8  ;;  %v2838_v6 = vpop.f32.mrf.mxu0 }
 0x400   : > { %v2839_v48 = vadd.f32 1e-08, %v2838_v6 }
 0x401   : > { %v7748_v8 = vpop.f32.mrf.mxu0 }
 0x402   : > { %7686 = vmatmul.mubr.msk.f32.gmra.mxu1 %vm530_vm0, %v9995_v3  ;;  %v2854_v29 = vadd.f32 1e-08, %v7748_v8 }
 0x403   : > { %7688 = vmatprep.mubr.msk.f32.mxu1 %vm530_vm0, %v10002_v30  ;;  %v2848_v3 = vpop.f32.mrf.mxu0 }
 0x404   : > { %v2849_v60 = vadd.f32 1e-08, %v2848_v3 }
 0x405   : > { %v7751_v30 = vpop.f32.mrf.mxu0 }
 0x406   : > { %7689 = vmatmul.mubr.msk.f32.gmra.mxu1 %vm530_vm0, %v10022_v21  ;;  %v2864_v12 = vadd.f32 1e-08, %v7751_v30 }
 0x407   : > { %7691 = vmatprep.mubr.msk.f32.mxu1 %vm530_vm0, %v10024_v57  ;;  %v2858_v21 = vpop.f32.mrf.mxu0 }
 0x408   : > { %v2859_v45 = vadd.f32 1e-08, %v2858_v21 }
 0x409   : > { %v10229_v57 = vpop.f32.mrf.mxu0 }
 0x40a   : > { %7692 = vmatmul.mubr.msk.f32.gmra.mxu1 %vm530_vm0, %v10036_v58  ;;  %v2794_v58 = vadd.f32 1e-08, %v7730_v39 }
 0x40b   : > { %7694 = vmatprep.mubr.msk.f32.mxu1 %vm530_vm0, %v10043_v31  ;;  %v2789_v31 = vadd.f32 1e-08, %v2788_v28 }
 0x40c   : > { %8141 = vrcp.f32 %v2794_v58 }
 0x40d   : > { %8143 = vrcp.f32 %v2789_v31 }
 0x40e   : > { %7695 = vmatmul.mubr.msk.f32.gmra.mxu1 %vm530_vm0, %v10056_v2  ;;  %v10231_v2 = vpop.f32.mrf.mxu0 }
 0x40f   : > { %7697 = vmatprep.mubr.msk.f32.mxu1 %vm530_vm0, %v10058_v46  ;;  %v2804_v46 = vadd.f32 1e-08, %v7733_v27 }
 0x411   : > { %8145 = vrcp.f32 %v2804_v46 }
 0x412   : > { %7698 = vmatmul.mubr.msk.f32.gmra.mxu1 %vm530_vm0, %v10068_v50  ;;  %v2799_v50 = vadd.f32 1e-08, %v2798_v19 }
 0x413   : > { %7700 = vmatprep.mubr.msk.f32.mxu1 %vm530_vm0, %v10072_v34  ;;  %v10233_v34 = vpop.f32.mrf.mxu0 }
 0x414   : > { %8147 = vrcp.f32 %v2799_v50  ;;  %v2884_v30 = vadd.f32 1e-08, %v10233_v34 }
 0x416   : > { %7701 = vmatmul.mubr.msk.f32.gmra.mxu1 %vm530_vm0, %v10086_v24  ;;  %v2809_v24 = vadd.f32 1e-08, %v2808_v56 }
 0x417   : > { %7703 = vmatprep.mubr.msk.f32.mxu1 %vm530_vm0, %v10083_v53  ;;  %v2814_v53 = vadd.f32 1e-08, %v7736_v61  ;;  %v2874_v61 = vadd.f32 1e-08, %v10229_v57 }
 0x419   : > { %8149 = vrcp.f32 %v2814_v53  ;;  %v8142_v47 = vpop.eup %8141 }
 0x41a   : > { %7704 = vmatmul.mubr.msk.f32.gmra.mxu1 %vm530_vm0, %v10097_v63  ;;  %v10235_v63 = vpop.f32.mrf.mxu0  ;;  %8151 = vrcp.f32 %v2809_v24  ;;  %v8144_v22 = vpop.eup %8143 }
 0x41b   : > { %7706 = vmatprep.mubr.msk.f32.mxu1 %vm530_vm0, %v10099_v42  ;;  %v2824_v42 = vadd.f32 1e-08, %v7739_v18  ;;  %v2879_v57 = vadd.f32 1e-08, %v10235_v63 }
 0x41d   : > { %8153 = vrcp.f32 %v2824_v42 }
 0x41e   : > { %7707 = vmatmul.mubr.msk.f32.gmra.mxu1 %vm530_vm0, %v10114_v4  ;;  %v10237_v4 = vpop.f32.mrf.mxu0  ;;  %v8146_v36 = vpop.eup %8145 }
 0x41f   : > { %7709 = vmatprep.mubr.msk.f32.mxu1 %vm530_vm0, %v10111_v20  ;;  %v2819_v20 = vadd.f32 1e-08, %v2818_v43  ;;  %v2869_v43 = vadd.f32 1e-08, %v10231_v2  ;;  %v2894_v42 = vadd.f32 1e-08, %v10237_v4 }
 0x420   : > { %v10239_v5 = vpop.f32.mrf.mxu0 }
 0x421   : > { %8155 = vrcp.f32 %v2819_v20  ;;  %v8148_v16 = vpop.eup %8147  ;;  %v2889_v34 = vadd.f32 1e-08, %v10239_v5 }
 0x422   : > { %7710 = vmatmul.mubr.msk.f32.gmra.mxu1 %vm530_vm0, %v10123_v44  ;;  %v2834_v44 = vadd.f32 1e-08, %v7742_v11  ;;  %v10241_v7 = vpop.f32.mrf.mxu0 }
 0x424   : > { %8157 = vrcp.f32 %v2834_v44  ;;  %v2898_v51 = vpop.f32.mrf.mxu0 }
 0x425   : > { %8159 = vrcp.f32 %v2829_v10  ;;  %v2899_v4 = vadd.f32 1e-08, %v2898_v51 }
 0x426   : > { %8161 = vrcp.f32 %v2844_v0  ;;  %v8150_v55 = vpop.eup %8149  ;;  %v7766_v39 = vpop.f32.mrf.mxu0 }
 0x427   : > { %8163 = vrcp.f32 %v2839_v48  ;;  %v8152_v40 = vpop.eup %8151 }
 0x428   : > { %8165 = vrcp.f32 %v2854_v29  ;;  %v2908_v38 = vpop.f32.mrf.mxu0 }
 0x429   : > { %8167 = vrcp.f32 %v2849_v60  ;;  %v2909_v29 = vadd.f32 1e-08, %v2908_v38 }
 0x42a   : > { %v8154_v35 = vpop.eup %8153  ;;  %8169 = vrcp.f32 %v2864_v12  ;;  %v7769_v50 = vpop.f32.mrf.mxu0 }
 0x42b   : > { %8171 = vrcp.f32 %v2859_v45  ;;  %v2924_v51 = vadd.f32 1e-08, %v7769_v50 }
 0x42c   : > { %8173 = vrcp.f32 %v2874_v61  ;;  %v2918_v10 = vpop.f32.mrf.mxu0 }
 0x42d   : > { %8175 = vrcp.f32 %v2869_v43 }
 0x42e   : > { %v8156_v23 = vpop.eup %8155  ;;  %8177 = vrcp.f32 %v2884_v30  ;;  %v7772_v48 = vpop.f32.mrf.mxu0 }
 0x42f   : > { %8179 = vrcp.f32 %v2879_v57 }
 0x430   : > { %8181 = vrcp.f32 %v2894_v42 }
 0x431   : > { %v8158_v18 = vpop.eup %8157  ;;  %8183 = vrcp.f32 %v2889_v34 }
 0x432   : > { %v8160_v33 = vpop.eup %8159 }
 0x433   : > { %v8162_v58 = vpop.eup %8161 }
 0x434   : > { %v8164_v46 = vpop.eup %8163 }
 0x435   : > { %v8166_v44 = vpop.eup %8165 }
 0x4a6   : > { %v7666_v32 = vpop.f32.mrf.mxu1 }
 0x4a7   : > { %v2980_v13 = vmul.f32 %v8142_v47, %v7666_v32  ;;  %v8168_v47 = vpop.eup %8167 }
 0x4a8   : > { %v2366_v26 = vpop.f32.mrf.mxu1  ;;  %v8170_v0 = vpop.eup %8169 }
 0x4a9   : > { %v2979_v41 = vmul.f32 %v8144_v22, %v2366_v26 }
 0x4aa   : > { %v7669_v17 = vpop.f32.mrf.mxu1 }
 0x4ab   : > { %v3011_v52 = vpack.c.bf16 %v2980_v13, %v2979_v41  ;;  %v2982_v15 = vmul.f32 %v8146_v36, %v7669_v17  ;;  %v2904_v13 = vadd.f32 1e-08, %v10241_v7  ;;  %v8172_v36 = vpop.eup %8171 }
 0x4ac   : > { %v2376_v37 = vpop.f32.mrf.mxu1 }
 0x4ad   : > { %v2981_v1 = vmul.f32 %v8148_v16, %v2376_v37  ;;  %7784 = vmatprep.mubr.msk.bf16.mxu1 %vm530_vm0, %v3011_v52  ;;  %8185 = vrcp.f32 %v2904_v13  ;;  %v2914_v37 = vadd.f32 1e-08, %v7766_v39  ;;  %v2934_v39 = vadd.f32 1e-08, %v7772_v48 }
 0x4ae   : > { %v7672_v9 = vpop.f32.mrf.mxu1  ;;  %8187 = vrcp.f32 %v2899_v4 }
 0x4af   : > { %v3012_v14 = vpack.c.bf16 %v2982_v15, %v2981_v1  ;;  %v2984_v49 = vmul.f32 %v8150_v55, %v7672_v9  ;;  %v8174_v1 = vpop.eup %8173  ;;  %v2928_v55 = vpop.f32.mrf.mxu0  ;;  %8189 = vrcp.f32 %v2914_v37 }
 0x4b0   : > { %v2386_v62 = vpop.f32.mrf.mxu1  ;;  %v8176_v7 = vpop.eup %8175  ;;  %8191 = vrcp.f32 %v2909_v29 }
 0x4b1   : > { %v2983_v59 = vmul.f32 %v8152_v40, %v2386_v62  ;;  %7785 = vmatmul.mubr.msk.bf16.vlgmr.msra.gmra.mxu1 %vm530_vm0, %v3012_v14  ;;  %8193 = vrcp.f32 %v2924_v51 }
 0x4b2   : > { %v7675_v25 = vpop.f32.mrf.mxu1 }
 0x4b3   : > { %v3013_v54 = vpack.c.bf16 %v2984_v49, %v2983_v59  ;;  %v2986_v27 = vmul.f32 %v8154_v35, %v7675_v25  ;;  %v8178_v49 = vpop.eup %8177  ;;  %v2919_v59 = vadd.f32 1e-08, %v2918_v10  ;;  %v7775_v35 = vpop.f32.mrf.mxu0 }
 0x4b4   : > { %v2396_v28 = vpop.f32.mrf.mxu1  ;;  %v8180_v25 = vpop.eup %8179  ;;  %v2944_v38 = vadd.f32 1e-08, %v7775_v35 }
 0x4b5   : > { %v2985_v19 = vmul.f32 %v8156_v23, %v2396_v28  ;;  %7788 = vmatprep.mubr.msk.bf16.mxu1 %vm530_vm0, %v3013_v54  ;;  %8195 = vrcp.f32 %v2919_v59 }
 0x4b6   : > { %v7678_v56 = vpop.f32.mrf.mxu1  ;;  %8197 = vrcp.f32 %v2934_v39 }
 0x4b7   : > { %v3014_v11 = vpack.c.bf16 %v2986_v27, %v2985_v19  ;;  %v2988_v8 = vmul.f32 %v8158_v18, %v7678_v56  ;;  %v8182_v27 = vpop.eup %8181  ;;  %v2929_v19 = vadd.f32 1e-08, %v2928_v55  ;;  %v2938_v18 = vpop.f32.mrf.mxu0 }
 0x4b8   : > { %v2406_v6 = vpop.f32.mrf.mxu1  ;;  %v8184_v56 = vpop.eup %8183 }
 0x4b9   : > { %v2987_v3 = vmul.f32 %v8160_v33, %v2406_v6  ;;  %7789 = vmatmul.mubr.msk.bf16.gmra.mxu1 %vm530_vm0, %v3014_v11  ;;  %8199 = vrcp.f32 %v2929_v19 }
 0x4ba   : > { %v7681_v21 = vpop.f32.mrf.mxu1  ;;  %8201 = vrcp.f32 %v2944_v38  ;;  %v8537_v38 = vld [vmem:[%s8670_s23 + $0x30] sm:$0xff] }
 0x4bb   : > { %v3015_v31 = vpack.c.bf16 %v2988_v8, %v2987_v3  ;;  %v2990_v53 = vmul.f32 %v8162_v58, %v7681_v21  ;;  %v8186_v8 = vpop.eup %8185  ;;  %v2939_v3 = vadd.f32 1e-08, %v2938_v18 }
 0x4bc   : > { %v2416_v2 = vpop.f32.mrf.mxu1  ;;  %v8188_v21 = vpop.eup %8187 }
 0x4bd   : > { %v2989_v24 = vmul.f32 %v8164_v46, %v2416_v2  ;;  %7792 = vmatprep.mubr.msk.bf16.mxu1 %vm530_vm0, %v3015_v31  ;;  %v8190_v50 = vpop.eup %8189  ;;  %8203 = vrcp.f32 %v2939_v3 }
 0x4be   : > { %v7684_v20 = vpop.f32.mrf.mxu1 }
 0x4bf   : > { %v3016_v32 = vpack.c.bf16 %v2990_v53, %v2989_v24  ;;  %v2992_v22 = vmul.f32 %v8166_v44, %v7684_v20  ;;  %v8192_v53 = vpop.eup %8191 }
 0x4c0   : > { %v2426_v63 = vpop.f32.mrf.mxu1  ;;  %v8194_v34 = vpop.eup %8193 }
 0x4c1   : > { %v2991_v26 = vmul.f32 %v8168_v47, %v2426_v63  ;;  %7793 = vmatmul.mubr.msk.bf16.gmra.mxu1 %vm530_vm0, %v3016_v32 }
 0x4c2   : > { %v7687_v41 = vpop.f32.mrf.mxu1  ;;  %v8196_v47 = vpop.eup %8195 }
 0x4c3   : > { %v3017_v17 = vpack.c.bf16 %v2992_v22, %v2991_v26  ;;  %v2994_v5 = vmul.f32 %v8170_v0, %v7687_v41  ;;  %v8198_v13 = vpop.eup %8197 }
 0x4c4   : > { %v2436_v52 = vpop.f32.mrf.mxu1 }
 0x4c5   : > { %v2993_v16 = vmul.f32 %v8172_v36, %v2436_v52  ;;  %7796 = vmatprep.mubr.msk.bf16.mxu1 %vm530_vm0, %v3017_v17 }
 0x4c6   : > { %v7690_v15 = vpop.f32.mrf.mxu1  ;;  %v8200_v0 = vpop.eup %8199 }
 0x4c7   : > { %v3018_v9 = vpack.c.bf16 %v2994_v5, %v2993_v16  ;;  %v2996_v14 = vmul.f32 %v8174_v1, %v7690_v15  ;;  %v8202_v52 = vpop.eup %8201 }
 0x4c8   : > { %v2446_v60 = vpop.f32.mrf.mxu1 }
 0x4c9   : > { %v2995_v40 = vmul.f32 %v8176_v7, %v2446_v60  ;;  %7797 = vmatmul.mubr.msk.bf16.gmra.mxu1 %vm530_vm0, %v3018_v9  ;;  %v10269_v9 = vld [vmem:[%s13158_s8] ss:$0 sm:$0xff] }
 0x4ca   : > { %v7693_v62 = vpop.f32.mrf.mxu1  ;;  %v8204_v16 = vpop.eup %8203 }
 0x4cb   : > { %v3019_v12 = vpack.c.bf16 %v2996_v14, %v2995_v40  ;;  %v2998_v54 = vmul.f32 %v8178_v49, %v7693_v62  ;;  %v8533_v14 = vld [vmem:[%s8670_s23 + $0x10] sm:$0xff]  ;;  %v8534_v49 = vld [vmem:[%s8670_s23] sm:$0xff] }
 0x4cc   : > { %v2456_v45 = vpop.f32.mrf.mxu1 }
 0x4cd   : > { %v2997_v23 = vmul.f32 %v8180_v25, %v2456_v45  ;;  %7800 = vmatprep.mubr.msk.bf16.mxu1 %vm530_vm0, %v3019_v12 }
 0x4ce   : > { %v7696_v28 = vpop.f32.mrf.mxu1 }
 0x4cf   : > { %v3020_v61 = vpack.c.bf16 %v2998_v54, %v2997_v23  ;;  %v3000_v11 = vmul.f32 %v8182_v27, %v7696_v28  ;;  %v8535_v54 = vld [vmem:[%s8670_s23 + $0x18] sm:$0xff] }
 0x4d0   : > { %v2466_v43 = vpop.f32.mrf.mxu1 }
 0x4d1   : > { %v2999_v33 = vmul.f32 %v8184_v56, %v2466_v43  ;;  %7801 = vmatmul.mubr.msk.bf16.gmra.mxu1 %vm530_vm0, %v3020_v61  ;;  %v8536_v61 = vld [vmem:[%s8670_s23 + $0x8] sm:$0xff] }
 0x4d2   : > { %v7699_v6 = vpop.f32.mrf.mxu1 }
 0x4d3   : > { %v3021_v30 = vpack.c.bf16 %v3000_v11, %v2999_v33  ;;  %v3002_v57 = vmul.f32 %v8186_v8, %v7699_v6 }
 0x4d4   : > { %v2476_v58 = vpop.f32.mrf.mxu1 }
 0x4d5   : > { %v3001_v31 = vmul.f32 %v8188_v21, %v2476_v58  ;;  %7804 = vmatprep.mubr.msk.bf16.mxu1 %vm530_vm0, %v3021_v30  ;;  %v8538_v58 = vld [vmem:[%s8670_s23 + $0x20] sm:$0xff] }
 0x4d6   : > { %v7702_v46 = vpop.f32.mrf.mxu1 }
 0x4d7   : > { %v3022_v2 = vpack.c.bf16 %v3002_v57, %v3001_v31  ;;  %v3004_v42 = vmul.f32 %v8190_v50, %v7702_v46 }
 0x4d8   : > { %v2486_v24 = vpop.f32.mrf.mxu1 }
 0x4d9   : > { %v3003_v20 = vmul.f32 %v8192_v53, %v2486_v24  ;;  %7805 = vmatmul.mubr.msk.bf16.gmra.mxu1 %vm530_vm0, %v3022_v2  ;;  %v8539_v53 = vld [vmem:[%s8670_s23 + $0x38] sm:$0xff] }
 0x4da   : > { %v7705_v44 = vpop.f32.mrf.mxu1 }
 0x4db   : > { %v3023_v32 = vpack.c.bf16 %v3004_v42, %v3003_v20  ;;  %v3006_v63 = vmul.f32 %v8194_v34, %v7705_v44 }
 0x4dc   : > { %v2496_v10 = vpop.f32.mrf.mxu1 }
 0x4dd   : > { %v3005_v22 = vmul.f32 %v8196_v47, %v2496_v10  ;;  %7808 = vmatprep.mubr.msk.bf16.mxu1 %vm530_vm0, %v3023_v32  ;;  %v8540_v32 = vld [vmem:[%s8670_s23 + $0x28] sm:$0xff] }
 0x4de   : > { %v7708_v26 = vpop.f32.mrf.mxu1 }
 0x4df   : > { %v3024_v41 = vpack.c.bf16 %v3006_v63, %v3005_v22  ;;  %v3008_v17 = vmul.f32 %v8198_v13, %v7708_v26  ;;  %v8541_v13 = vld [vmem:[%s8670_s23 + $0x50] sm:$0xff] }
 0x4e0   : > { %v2506_v4 = vpop.f32.mrf.mxu1 }
 0x4e1   : > { %v3007_v36 = vmul.f32 %v8200_v0, %v2506_v4  ;;  %7809 = vmatmul.mubr.msk.bf16.gmra.mxu1 %vm530_vm0, %v3024_v41 }
 0x4e2   : > { %v7711_v48 = vpop.f32.mrf.mxu1 }
 0x4e3   : > { %v3025_v5 = vpack.c.bf16 %v3008_v17, %v3007_v36  ;;  %v3010_v15 = vmul.f32 %v8202_v52, %v7711_v48  ;;  %v8542_v48 = vld [vmem:[%s8670_s23 + $0x40] sm:$0xff] }
 0x4e4   : > { %v2516_v37 = vpop.f32.mrf.mxu1 }
 0x4e5   : > { %v3009_v1 = vmul.f32 %v8204_v16, %v2516_v37  ;;  %7812 = vmatprep.mubr.msk.bf16.mxu1 %vm530_vm0, %v3025_v5 }
 0x4e7   : > { %v3026_v29 = vpack.c.bf16 %v3010_v15, %v3009_v1  ;;  %v8543_v1 = vld [vmem:[%s8670_s23 + $0x58] sm:$0xff] }
 0x4e9   : > { %7813 = vmatmul.mubr.msk.bf16.gmra.mxu1 %vm530_vm0, %v3026_v29 }
 0x571   : > { %v7786_v7 = vpop.f32.mrf.mxu1 }
 0x572   : > { %v3157_v55 = vadd.f32 %v7786_v7, %v10269_v9 }
 0x573   : > { %v3148_v60 = vpop.f32.mrf.mxu1 }
 0x574   : > { %v10273_v40 = vadd.f32 %v8533_v14, %v3157_v55  ;;  %v3149_v51 = vadd.f32 %v10269_v9, %v3148_v60 }
 0x575   : > { %v7787_v62 = vpop.f32.mrf.mxu1 }
 0x576   : > { %13304 = vst [vmem:[#allocation3_spill] sm:$0xff] %v10273_v40  ;;  %v10277_v59 = vadd.f32 %v8534_v49, %v3149_v51  ;;  %v3160_v12 = vadd.f32 %v7787_v62, %v10269_v9  ;;  %v3315_v25 = vsel %vm530_vm0, %v10273_v40, 0.0  ;;  %v8544_v62 = vld [vmem:[%s8670_s23 + $0x48] sm:$0xff] }
 0x577   : > { %3316 = vadd.xlane.f32.xlu1 %v3315_v25  ;;  %v3151_v35 = vpop.f32.mrf.mxu1 }
 0x578   : > { %13305 = vst [vmem:[#allocation33_spill] sm:$0xff] %v10277_v59  ;;  %v10283_v23 = vadd.f32 %v8535_v54, %v3160_v12  ;;  %v3152_v39 = vadd.f32 %v10269_v9, %v3151_v35  ;;  %v3309_v28 = vsel %vm530_vm0, %v10277_v59, 0.0 }
 0x579   : > { %v7790_v45 = vpop.f32.mrf.mxu1 }
 0x57a   : > { %13306 = vst [vmem:[#allocation2_spill] sm:$0xff] %v10283_v23  ;;  %v10289_v56 = vadd.f32 %v8536_v61, %v3152_v39  ;;  %v3173_v18 = vadd.f32 %v7790_v45, %v10269_v9  ;;  %v3318_v43 = vsel %vm530_vm0, %v10283_v23, 0.0  ;;  %v8545_v45 = vld [vmem:[%s8670_s23 + $0xb8] sm:$0xff]  ;;  %v8546_v39 = vld [vmem:[%s8670_s23 + $0x70] sm:$0xff] }
 0x57b   : > { %v3164_v27 = vpop.f32.mrf.mxu1  ;;  %3310 = vadd.xlane.f32.xlu1 %v3309_v28 }
 0x57c   : > { %13307 = vst [vmem:[#allocation32_spill] sm:$0xff] %v10289_v56  ;;  %v10295_v6 = vadd.f32 %v8537_v38, %v3173_v18  ;;  %v3165_v8 = vadd.f32 %v10269_v9, %v3164_v27  ;;  %v3312_v3 = vsel %vm530_vm0, %v10289_v56, 0.0  ;;  %v8547_v38 = vld [vmem:[%s8670_s23 + $0x60] sm:$0xff] }
 0x57d   : > { %v7791_v19 = vpop.f32.mrf.mxu1 }
 0x57e   : > { %13308 = vst [vmem:[#allocation5_spill] sm:$0xff] %v10295_v6  ;;  %v10301_v57 = vadd.f32 %v8538_v58, %v3165_v8  ;;  %v3176_v31 = vadd.f32 %v7791_v19, %v10269_v9  ;;  %v3327_v46 = vsel %vm530_vm0, %v10295_v6, 0.0 }
 0x57f   : > { %v3167_v11 = vpop.f32.mrf.mxu1  ;;  %3319 = vadd.xlane.f32.xlu1 %v3318_v43 }
 0x580   : > { %13309 = vst [vmem:[#allocation30_spill] sm:$0xff] %v10301_v57  ;;  %v10307_v24 = vadd.f32 %v8539_v53, %v3176_v31  ;;  %v3168_v42 = vadd.f32 %v10269_v9, %v3167_v11  ;;  %v3321_v20 = vsel %vm530_vm0, %v10301_v57, 0.0 }
 0x581   : > { %v7794_v33 = vpop.f32.mrf.mxu1 }
 0x582   : > { %13310 = vst [vmem:[#allocation4_spill] sm:$0xff] %v10307_v24  ;;  %v10313_v47 = vadd.f32 %v8540_v32, %v3168_v42  ;;  %v3189_v10 = vadd.f32 %v7794_v33, %v10269_v9  ;;  %v3330_v63 = vsel %vm530_vm0, %v10307_v24, 0.0  ;;  %v8549_v32 = vld [vmem:[%s8670_s23 + $0x68] sm:$0xff] }
 0x583   : > { %v3180_v30 = vpop.f32.mrf.mxu1  ;;  %3313 = vadd.xlane.f32.xlu1 %v3312_v3 }
 0x584   : > { %13311 = vst [vmem:[#allocation7_spill] sm:$0xff] %v10313_v47  ;;  %v10319_v41 = vadd.f32 %v8541_v13, %v3189_v10  ;;  %v3181_v0 = vadd.f32 %v10269_v9, %v3180_v30  ;;  %v3324_v4 = vsel %vm530_vm0, %v10313_v47, 0.0 }
 0x585   : > { %v7795_v21 = vpop.f32.mrf.mxu1 }
 0x586   : > { %13312 = vst [vmem:[#allocation28_spill] sm:$0xff] %v10319_v41  ;;  %v10329_v52 = vadd.f32 %v8542_v48, %v3181_v0  ;;  %v3192_v5 = vadd.f32 %v7795_v21, %v10269_v9  ;;  %v3339_v16 = vsel %vm530_vm0, %v10319_v41, 0.0  ;;  %v8550_v48 = vld [vmem:[%s8670_s23 + $0x90] sm:$0xff] }
 0x587   : > { %v3183_v50 = vpop.f32.mrf.mxu1  ;;  %3328 = vadd.xlane.f32.xlu1 %v3327_v46  ;;  %v8548_v46 = vld [vmem:[%s8670_s23 + $0x78] sm:$0xff] }
 0x588   : > { %13313 = vst [vmem:[#allocation31_spill] sm:$0xff] %v10329_v52  ;;  %v10339_v29 = vadd.f32 %v8543_v1, %v3192_v5  ;;  %v3184_v7 = vadd.f32 %v10269_v9, %v3183_v50  ;;  %v3333_v55 = vsel %vm530_vm0, %v10329_v52, 0.0  ;;  %v8551_v1 = vld [vmem:[%s8670_s23 + $0xe8] sm:$0xff] }
 0x589   : > { %v7798_v2 = vpop.f32.mrf.mxu1 }
 0x58a   : > { %13314 = vst [vmem:[#allocation6_spill] sm:$0xff] %v10339_v29  ;;  %v3205_v14 = vadd.f32 %v7798_v2, %v10269_v9  ;;  %v10348_v49 = vadd.f32 %v8544_v62, %v3184_v7  ;;  %v3342_v25 = vsel %vm530_vm0, %v10339_v29, 0.0 }
 0x58b   : > { %v3196_v44 = vpop.f32.mrf.mxu1  ;;  %3322 = vadd.xlane.f32.xlu1 %v3321_v20 }
 0x58c   : > { %13315 = vst [vmem:[#allocation29_spill] sm:$0xff] %v10348_v49  ;;  %v10359_v28 = vadd.f32 %v8546_v39, %v3205_v14  ;;  %v3197_v19 = vadd.f32 %v10269_v9, %v3196_v44  ;;  %v3336_v43 = vsel %vm530_vm0, %v10348_v49, 0.0  ;;  %v8552_v14 = vld [vmem:[%s8670_s23 + $0x80] sm:$0xff] }
 0x58d   : > { %v7799_v34 = vpop.f32.mrf.mxu1 }
 0x58e   : > { %13317 = vst [vmem:[#allocation11_spill] sm:$0xff] %v10359_v28  ;;  %v10372_v8 = vadd.f32 %v8547_v38, %v3197_v19  ;;  %v3208_v3 = vadd.f32 %v7799_v34, %v10269_v9  ;;  %v3351_v21 = vsel %vm530_vm0, %v10359_v28, 0.0 }
 0x58f   : > { %v3199_v22 = vpop.f32.mrf.mxu1  ;;  %3331 = vadd.xlane.f32.xlu1 %v3330_v63 }
 0x590   : > { %13318 = vst [vmem:[#allocation8_spill] sm:$0xff] %v10372_v8  ;;  %v10381_v50 = vadd.f32 %v8548_v46, %v3208_v3  ;;  %v3200_v2 = vadd.f32 %v10269_v9, %v3199_v22  ;;  %v3345_v42 = vsel %vm530_vm0, %v10372_v8, 0.0  ;;  %v8556_v3 = vld [vmem:[%s8670_s23 + $0xa0] sm:$0xff]  ;;  %v8557_v46 = vld [vmem:[%s8670_s23 + $0xa8] sm:$0xff] }
 0x591   : > { %v7802_v26 = vpop.f32.mrf.mxu1 }
 0x592   : > { %13319 = vst [vmem:[#allocation10_spill] sm:$0xff] %v10381_v50  ;;  %v10393_v10 = vadd.f32 %v8549_v32, %v3200_v2  ;;  %v3221_v63 = vadd.f32 %v7802_v26, %v10269_v9  ;;  %v3354_v13 = vsel %vm530_vm0, %v10381_v50, 0.0 }
 0x593   : > { %v10324_v17 = vpop.f32.mrf.mxu1  ;;  %3325 = vadd.xlane.f32.xlu1 %v3324_v4 }
 0x594   : > { %13320 = vst [vmem:[#allocation13_spill] sm:$0xff] %v10393_v10  ;;  %v10403_v5 = vadd.f32 %v8550_v48, %v3221_v63  ;;  %v3348_v7 = vsel %vm530_vm0, %v10393_v10, 0.0  ;;  %v8559_v63 = vld [vmem:[%s8670_s23 + $0xc8] sm:$0xff] }
 0x595   : > { %v10326_v36 = vpop.f32.mrf.mxu1 }
 0x596   : > { %13321 = vst [vmem:[#allocation15_spill] sm:$0xff] %v10403_v5  ;;  %v3224_v62 = vadd.f32 %v10326_v36, %v10269_v9 }
 0x597   : > { %v10334_v37 = vpop.f32.mrf.mxu1  ;;  %3340 = vadd.xlane.f32.xlu1 %v3339_v16  ;;  %v3213_v16 = vadd.f32 %v10269_v9, %v10324_v17  ;;  %v3363_v17 = vsel %vm530_vm0, %v10403_v5, 0.0 }
 0x599   : > { %v10336_v15 = vpop.f32.mrf.mxu1 }
 0x59a   : > { %v3237_v36 = vadd.f32 %v10336_v15, %v10269_v9 }
 0x59b   : > { %v10344_v60 = vpop.f32.mrf.mxu1  ;;  %3334 = vadd.xlane.f32.xlu1 %v3333_v55 }
 0x59d   : > { %v7807_v51 = vpop.f32.mrf.mxu1 }
 0x59e   : > { %v3240_v12 = vadd.f32 %v7807_v51, %v10269_v9  ;;  %v10415_v51 = vadd.f32 %v8552_v14, %v3213_v16 }
 0x59f   : > { %v10353_v35 = vpop.f32.mrf.mxu1  ;;  %3343 = vadd.xlane.f32.xlu1 %v3342_v25 }
 0x5a0   : > { %v10356_v54 = vadd.f32 %v8545_v45, %v3240_v12  ;;  %13323 = vst [vmem:[#allocation14_spill] sm:$0xff] %v10415_v51  ;;  %v8553_v12 = vld [vmem:[%s8670_s23 + $0x98] sm:$0xff]  ;;  %v3216_v45 = vadd.f32 %v10269_v9, %v10334_v37  ;;  %v3357_v39 = vsel %vm530_vm0, %v10415_v51, 0.0  ;;  %v3229_v37 = vadd.f32 %v10269_v9, %v10344_v60 }
 0x5a1   : > { %v7810_v27 = vpop.f32.mrf.mxu1  ;;  %v10422_v25 = vadd.f32 %v8553_v12, %v3224_v62  ;;  %v3232_v15 = vadd.f32 %v10269_v9, %v10353_v35 }
 0x5a2   : > { %13316 = vst [vmem:[#allocation9_spill] sm:$0xff] %v10356_v54  ;;  %v10363_v61 = vadd.f32 %v7810_v27, %v10269_v9  ;;  %v3378_v18 = vsel %vm530_vm0, %v10356_v54, 0.0  ;;  %v8554_v27 = vld [vmem:[%s8670_s23 + $0x88] sm:$0xff] }
 0x5a3   : > { %3379 = vadd.xlane.f32.xlu0 %v3378_v18  ;;  %v10369_v11 = vpop.f32.mrf.mxu1  ;;  %3337 = vadd.xlane.f32.xlu1 %v3336_v43  ;;  %13324 = vst [vmem:[#allocation17_spill] sm:$0xff] %v10422_v25  ;;  %v10429_v19 = vadd.f32 %v8554_v27, %v3216_v45  ;;  %v3366_v18 = vsel %vm530_vm0, %v10422_v25, 0.0  ;;  %v8555_v43 = vld [vmem:[%s8670_s23 + $0xb0] sm:$0xff]  ;;  %v10450_v2 = vadd.f32 %v8557_v46, %v3232_v15 }
 0x5a4   : > { %v3245_v60 = vadd.f32 %v10269_v9, %v10369_v11 }
 0x5a5   : > { %v7811_v33 = vpop.f32.mrf.mxu1  ;;  %13325 = vst [vmem:[#allocation19_spill] sm:$0xff] %v10429_v19  ;;  %v3360_v38 = vsel %vm530_vm0, %v10429_v19, 0.0  ;;  %13328 = vst [vmem:[#allocation21_spill] sm:$0xff] %v10450_v2  ;;  %v3372_v35 = vsel %vm530_vm0, %v10450_v2, 0.0 }
 0x5a6   : > { %v10376_v30 = vadd.f32 %v7811_v33, %v10269_v9  ;;  %v10436_v33 = vadd.f32 %v8555_v43, %v3237_v36 }
 0x5a7   : > { %v3247_v58 = vpop.f32.mrf.mxu1  ;;  %3352 = vadd.xlane.f32.xlu1 %v3351_v21  ;;  %v10443_v21 = vadd.f32 %v8556_v3, %v3229_v37 }
 0x5a8   : > { %13326 = vst [vmem:[#allocation16_spill] sm:$0xff] %v10436_v33  ;;  %v3248_v32 = vadd.f32 %v10269_v9, %v3247_v58 }
 0x5a9   : > { %v7814_v31 = vpop.f32.mrf.mxu1  ;;  %13327 = vst [vmem:[#allocation18_spill] sm:$0xff] %v10443_v21 }
 0x5aa   : > { %v10385_v53 = vadd.f32 %v7814_v31, %v10269_v9  ;;  %v3375_v31 = vsel %vm530_vm0, %v10436_v33, 0.0 }
 0x5ab   : > { %3346 = vadd.xlane.f32.xlu1 %v3345_v42  ;;  %v3260_v20 = vpop.f32.mrf.mxu1  ;;  %v3369_v42 = vsel %vm530_vm0, %v10443_v21, 0.0 }
 0x5ac   : > { %v10390_v44 = vadd.f32 %v10269_v9, %v3260_v20  ;;  %v8558_v20 = vld [vmem:[%s8670_s23 + $0xc0] sm:$0xff] }
 0x5ad   : > { %v7815_v34 = vpop.f32.mrf.mxu1 }
 0x5ae   : > { %v10397_v22 = vadd.f32 %v7815_v34, %v10269_v9  ;;  %v10457_v34 = vadd.f32 %v8558_v20, %v3245_v60 }
 0x5af   : > { %3355 = vadd.xlane.f32.xlu1 %v3354_v13  ;;  %v3263_v0 = vpop.f32.mrf.mxu1  ;;  %v10463_v13 = vadd.f32 %v8559_v63, %v3248_v32 }
 0x5b0   : > { %v3264_v4 = vadd.f32 %v10269_v9, %v3263_v0  ;;  %13329 = vst [vmem:[#allocation20_spill] sm:$0xff] %v10457_v34  ;;  %v3381_v0 = vsel %vm530_vm0, %v10457_v34, 0.0 }
 0x5b1   : > { %13330 = vst [vmem:[#allocation23_spill] sm:$0xff] %v10463_v13  ;;  %v3384_v11 = vsel %vm530_vm0, %v10463_v13, 0.0 }
 0x5b2   : > { %v10408_v26 = vadd.f32 %v8551_v1, %v3264_v4 }
 0x5b3   : > { %3349 = vadd.xlane.f32.xlu1 %v3348_v7 }
 0x5b4   : > { %13322 = vst [vmem:[#allocation12_spill] sm:$0xff] %v10408_v26  ;;  %v3396_v55 = vsel %vm530_vm0, %v10408_v26, 0.0 }
 0x5b5   : > { %3397 = vadd.xlane.f32.xlu0 %v3396_v55 }
 0x5b7   : > { %3364 = vadd.xlane.f32.xlu1 %v3363_v17 }
 0x5bb   : > { %3358 = vadd.xlane.f32.xlu1 %v3357_v39 }
 0x5bf   : > { %3367 = vadd.xlane.f32.xlu1 %v3366_v18 }
 0x5c3   : > { %3361 = vadd.xlane.f32.xlu1 %v3360_v38 }
 0x5c7   : > { %3376 = vadd.xlane.f32.xlu1 %v3375_v31 }
 0x5cb   : > { %3370 = vadd.xlane.f32.xlu1 %v3369_v42 }
 0x5cf   : > { %3373 = vadd.xlane.f32.xlu1 %v3372_v35 }
 0x5d3   : > { %3382 = vadd.xlane.f32.xlu1 %v3381_v0 }
 0x5d7   : > { %3385 = vadd.xlane.f32.xlu1 %v3384_v11 }
 0x600   : > { %v3317_v4 = vpop.xlane.xlu1 %3316 }
 0x601   : > { %v3407_v48 = vmul.f32 0.015625, %v3317_v4 }
 0x603   : > { %v10470_v16 = vsub.f32 %v10273_v40, %v3407_v48 }
 0x604   : > { %v3311_v9 = vpop.xlane.xlu1 %3310 }
 0x605   : > { %v3405_v58 = vmul.f32 0.015625, %v3311_v9  ;;  %v3471_v1 = vmul.f32 %v10470_v16, %v10470_v16 }
 0x607   : > { %v10475_v7 = vsub.f32 %v10277_v59, %v3405_v58  ;;  %v3507_v55 = vsel %vm530_vm0, %v3471_v1, 0.0 }
 0x608   : > { %3508 = vadd.xlane.f32.xlu1 %v3507_v55  ;;  %v3320_v14 = vpop.xlane.xlu1 %3319 }
 0x609   : > { %v3408_v62 = vmul.f32 0.015625, %v3320_v14  ;;  %v3469_v17 = vmul.f32 %v10475_v7, %v10475_v7 }
 0x60b   : > { %v10481_v12 = vsub.f32 %v10283_v23, %v3408_v62  ;;  %v3501_v45 = vsel %vm530_vm0, %v3469_v17, 0.0  ;;  %v8560_v17 = vld [vmem:[%s8670_s23 + $0xd0] sm:$0xff] }
 0x60c   : > { %3502 = vadd.xlane.f32.xlu1 %v3501_v45  ;;  %v3314_v39 = vpop.xlane.xlu1 %3313  ;;  %v10518_v45 = vadd.f32 %v8560_v17, %v10363_v61  ;;  %v8563_v17 = vld [vmem:[%s8670_s23 + $0xe0] sm:$0xff] }
 0x60d   : > { %v3406_v27 = vmul.f32 0.015625, %v3314_v39  ;;  %v3472_v36 = vmul.f32 %v10481_v12, %v10481_v12 }
 0x60e   : > { %13331 = vst [vmem:[#allocation22_spill] sm:$0xff] %v10518_v45 }
 0x60f   : > { %v10487_v18 = vsub.f32 %v10289_v56, %v3406_v27  ;;  %v3510_v43 = vsel %vm530_vm0, %v3472_v36, 0.0 }
 0x610   : > { %3511 = vadd.xlane.f32.xlu1 %v3510_v43  ;;  %v3329_v37 = vpop.xlane.xlu1 %3328  ;;  %v8561_v43 = vld [vmem:[%s8670_s23 + $0xd8] sm:$0xff] }
 0x611   : > { %v3411_v38 = vmul.f32 0.015625, %v3329_v37  ;;  %v3470_v3 = vmul.f32 %v10487_v18, %v10487_v18  ;;  %v10523_v37 = vadd.f32 %v8561_v43, %v10376_v30 }
 0x613   : > { %v10493_v15 = vsub.f32 %v10295_v6, %v3411_v38  ;;  %v3504_v31 = vsel %vm530_vm0, %v3470_v3, 0.0  ;;  %13332 = vst [vmem:[#allocation25_spill] sm:$0xff] %v10523_v37  ;;  %v3387_v3 = vsel %vm530_vm0, %v10518_v45, 0.0 }
 0x614   : > { %3505 = vadd.xlane.f32.xlu1 %v3504_v31  ;;  %v3323_v46 = vpop.xlane.xlu1 %3322 }
 0x615   : > { %v3409_v60 = vmul.f32 0.015625, %v3323_v46  ;;  %v3475_v42 = vmul.f32 %v10493_v15, %v10493_v15 }
 0x617   : > { %v10499_v20 = vsub.f32 %v10301_v57, %v3409_v60  ;;  %v3519_v32 = vsel %vm530_vm0, %v3475_v42, 0.0  ;;  %v3390_v60 = vsel %vm530_vm0, %v10523_v37, 0.0 }
 0x618   : > { %3520 = vadd.xlane.f32.xlu1 %v3519_v32  ;;  %v3332_v35 = vpop.xlane.xlu1 %3331 }
 0x619   : > { %v3412_v63 = vmul.f32 0.015625, %v3332_v35  ;;  %v3473_v0 = vmul.f32 %v10499_v20, %v10499_v20 }
 0x61b   : > { %v10505_v11 = vsub.f32 %v10307_v24, %v3412_v63  ;;  %v3513_v4 = vsel %vm530_vm0, %v3473_v0, 0.0  ;;  %v8562_v63 = vld [vmem:[%s8670_s23 + $0xf8] sm:$0xff] }
 0x61c   : > { %3514 = vadd.xlane.f32.xlu1 %v3513_v4  ;;  %v3326_v48 = vpop.xlane.xlu1 %3325  ;;  %v10541_v0 = vadd.f32 %v8562_v63, %v10397_v22 }
 0x61d   : > { %v3410_v9 = vmul.f32 0.015625, %v3326_v48  ;;  %v3476_v58 = vmul.f32 %v10505_v11, %v10505_v11 }
 0x61e   : > { %13333 = vst [vmem:[#allocation24_spill] sm:$0xff] %v10541_v0 }
 0x61f   : > { %v10511_v1 = vsub.f32 %v10313_v47, %v3410_v9  ;;  %v3522_v55 = vsel %vm530_vm0, %v3476_v58, 0.0 }
 0x620   : > { %3523 = vadd.xlane.f32.xlu1 %v3522_v55  ;;  %v3341_v14 = vpop.xlane.xlu1 %3340 }
 0x621   : > { %v3474_v62 = vmul.f32 %v10511_v1, %v10511_v1  ;;  %v3415_v4 = vmul.f32 0.015625, %v3341_v14 }
 0x623   : > { %v3516_v39 = vsel %vm530_vm0, %v3474_v62, 0.0  ;;  %v10555_v22 = vsub.f32 %v10319_v41, %v3415_v4 }
 0x624   : > { %3517 = vadd.xlane.f32.xlu1 %v3516_v39  ;;  %v3335_v27 = vpop.xlane.xlu1 %3334  ;;  %v10552_v39 = vadd.f32 %v8563_v17, %v10390_v44 }
 0x625   : > { %v3413_v36 = vmul.f32 0.015625, %v3335_v27  ;;  %v3402_v27 = vsel %vm530_vm0, %v10541_v0, 0.0  ;;  %v3479_v44 = vmul.f32 %v10555_v22, %v10555_v22 }
 0x626   : > { %13334 = vst [vmem:[#allocation27_spill] sm:$0xff] %v10552_v39 }
 0x627   : > { %v10526_v38 = vsub.f32 %v10329_v52, %v3413_v36  ;;  %v3531_v4 = vsel %vm530_vm0, %v3479_v44, 0.0  ;;  %v7929_v44 = vld [vmem:[%s13161_s11 + $0x14] ss:$8 sps:$4 sm:$0xff]  }
 0x628   : > { %3388 = vadd.xlane.f32.xlu1 %v3387_v3  ;;  %v3344_v31 = vpop.xlane.xlu1 %3343  ;;  %v3393_v3 = vsel %vm530_vm0, %v10552_v39, 0.0 }
 0x629   : > { %v3416_v61 = vmul.f32 0.015625, %v3344_v31  ;;  %v3477_v30 = vmul.f32 %v10526_v38, %v10526_v38 }
 0x62b   : > { %v10531_v46 = vsub.f32 %v10339_v29, %v3416_v61  ;;  %v3525_v9 = vsel %vm530_vm0, %v3477_v30, 0.0  ;;  %v7921_v61 = vld [vmem:[%s13161_s11 + $0x30] ss:$8 sps:$4 sm:$0xff]  }
 0x62c   : > { %3391 = vadd.xlane.f32.xlu1 %v3390_v60  ;;  %v3338_v42 = vpop.xlane.xlu1 %3337  ;;  %v7923_v60 = vld [vmem:[%s13161_s11 + $0x34] ss:$8 sps:$4 sm:$0xff]  }
 0x62d   : > { %v3414_v32 = vmul.f32 0.015625, %v3338_v42  ;;  %v3480_v35 = vmul.f32 %v10531_v46, %v10531_v46  ;;  %3933 = vmatprep.subr.bf16.mxu0 %v7923_v60  ;;  %v8564_v42 = vld [vmem:[%s8670_s23 + $0xf0] sm:$0xff] }
 0x62e   : > { %3934 = vmatpush1.bf16.msra.mxu0 %v7921_v61  ;;  %v7932_v61 = vld [vmem:[%s13161_s11 + $0x4] ss:$8 sps:$4 sm:$0xff]  }
 0x62f   : > { %v10544_v48 = vsub.f32 %v10348_v49, %v3414_v32  ;;  %v3534_v58 = vsel %vm530_vm0, %v3480_v35, 0.0  ;;  %v10572_v32 = vadd.f32 %v8564_v42, %v10385_v53 }
 0x630   : > { %3526 = vadd.xlane.f32.xlu1 %v3525_v9  ;;  %v3353_v55 = vpop.xlane.xlu1 %3352  ;;  %3535 = vadd.xlane.f32.xlu0 %v3534_v58  ;;  %v7924_v58 = vld [vmem:[%s13161_s11 + $0x20] ss:$8 sps:$4 sm:$0xff]  }
 0x631   : > { %v3478_v62 = vmul.f32 %v10544_v48, %v10544_v48  ;;  %v3419_v30 = vmul.f32 0.015625, %v3353_v55  ;;  %13335 = vst [vmem:[#allocation26_spill] sm:$0xff] %v10572_v32  ;;  %v7926_v55 = vld [vmem:[%s13161_s11 + $0x24] ss:$8 sps:$4 sm:$0xff]  }
 0x632   : > { %3935 = vmatprep.subr.bf16.mxu0 %v7926_v55 }
 0x633   : > { %v3528_v14 = vsel %vm530_vm0, %v3478_v62, 0.0  ;;  %v10585_v53 = vsub.f32 %v10359_v28, %v3419_v30  ;;  %3936 = vmatpush1.bf16.msra.mxu0 %v7924_v58  ;;  %v13166_v30 = vmov 0   ;;  %v7930_v58 = vld [vmem:[%s13161_s11] ss:$8 sps:$4 sm:$0xff]  }
 0x634   : > { %3529 = vadd.xlane.f32.xlu1 %v3528_v14  ;;  %v3347_v36 = vpop.xlane.xlu1 %3346  ;;  %3403 = vadd.xlane.f32.xlu0 %v3402_v27  ;;  %v3399_v27 = vsel %vm530_vm0, %v10572_v32, 0.0 }
 0x635   : > { %v3417_v43 = vmul.f32 0.015625, %v3347_v36  ;;  %v3483_v60 = vmul.f32 %v10585_v53, %v10585_v53  ;;  %3937 = vmatprep.subr.bf16.mxu0 %v7929_v44  ;;  %3957 = vmatprep.mubr.bf16.mxu0 %v13166_v30 }
 0x637   : > { %v10575_v35 = vsub.f32 %v10372_v8, %v3417_v43  ;;  %v3543_v44 = vsel %vm530_vm0, %v3483_v60, 0.0 }
 0x638   : > { %v3356_v31 = vpop.xlane.xlu1 %3355  ;;  %3394 = vadd.xlane.f32.xlu1 %v3393_v3  ;;  %v7927_v3 = vld [vmem:[%s13161_s11 + $0x10] ss:$8 sps:$4 sm:$0xff]  }
 0x639   : > { %v3420_v63 = vmul.f32 0.015625, %v3356_v31  ;;  %v3481_v36 = vmul.f32 %v10575_v35, %v10575_v35  ;;  %3938 = vmatpush1.bf16.msra.mxu0 %v7927_v3 }
 0x63a   : > { %3939 = vmatprep.subr.bf16.mxu0 %v7932_v61 }
 0x63b   : > { %v10588_v17 = vsub.f32 %v10381_v50, %v3420_v63 }
 0x63c   : > { %v3350_v9 = vpop.xlane.xlu1 %3349  ;;  %3532 = vadd.xlane.f32.xlu1 %v3531_v4  ;;  %v3537_v4 = vsel %vm530_vm0, %v3481_v36, 0.0 }
 0x63d   : > { %v3418_v62 = vmul.f32 0.015625, %v3350_v9  ;;  %v3484_v9 = vmul.f32 %v10588_v17, %v10588_v17  ;;  %3940 = vmatpush1.bf16.msra.mxu0 %v7930_v58 }
 0x63f   : > { %v10591_v14 = vsub.f32 %v10393_v10, %v3418_v62  ;;  %v3546_v36 = vsel %vm530_vm0, %v3484_v9, 0.0 }
 0x640   : > { %v3365_v43 = vpop.xlane.xlu1 %3364  ;;  %3400 = vadd.xlane.f32.xlu1 %v3399_v27 }
 0x641   : > { %v3482_v31 = vmul.f32 %v10591_v14, %v10591_v14  ;;  %v3423_v42 = vmul.f32 0.015625, %v3365_v43 }
 0x643   : > { %v3540_v63 = vsel %vm530_vm0, %v3482_v31, 0.0  ;;  %v10619_v27 = vsub.f32 %v10403_v5, %v3423_v42 }
 0x644   : > { %v3359_v55 = vpop.xlane.xlu1 %3358  ;;  %3541 = vadd.xlane.f32.xlu0 %v3540_v63  ;;  %3538 = vadd.xlane.f32.xlu1 %v3537_v4 }
 0x645   : > { %v3421_v62 = vmul.f32 0.015625, %v3359_v55  ;;  %v3487_v42 = vmul.f32 %v10619_v27, %v10619_v27 }
 0x647   : > { %v10622_v43 = vsub.f32 %v10415_v51, %v3421_v62  ;;  %v3555_v58 = vsel %vm530_vm0, %v3487_v42, 0.0 }
 0x648   : > { %v3368_v3 = vpop.xlane.xlu1 %3367  ;;  %3547 = vadd.xlane.f32.xlu0 %v3546_v36  ;;  %3544 = vadd.xlane.f32.xlu1 %v3543_v44 }
 0x649   : > { %v3485_v31 = vmul.f32 %v10622_v43, %v10622_v43  ;;  %v3424_v63 = vmul.f32 0.015625, %v3368_v3 }
 0x64b   : > { %v3549_v61 = vsel %vm530_vm0, %v3485_v31, 0.0  ;;  %v10632_v9 = vsub.f32 %v10422_v25, %v3424_v63 }
 0x64c   : > { %v3362_v4 = vpop.xlane.xlu1 %3361  ;;  %3550 = vadd.xlane.f32.xlu1 %v3549_v61  ;;  %v3380_v61 = vpop.xlane.xlu0 %3379 }
 0x64d   : > { %v3422_v55 = vmul.f32 0.015625, %v3362_v4  ;;  %v3488_v31 = vmul.f32 %v10632_v9, %v10632_v9  ;;  %v3428_v30 = vmul.f32 0.015625, %v3380_v61 }
 0x64f   : > { %v10635_v60 = vsub.f32 %v10429_v19, %v3422_v55  ;;  %v10653_v5 = vsub.f32 %v10356_v54, %v3428_v30 }
 0x650   : > { %v3377_v62 = vpop.xlane.xlu1 %3376  ;;  %3556 = vadd.xlane.f32.xlu1 %v3555_v58  ;;  %v3558_v58 = vsel %vm530_vm0, %v3488_v31, 0.0 }
 0x651   : > { %v3486_v36 = vmul.f32 %v10635_v60, %v10635_v60  ;;  %v3427_v44 = vmul.f32 0.015625, %v3377_v62 }
 0x653   : > { %v3552_v3 = vsel %vm530_vm0, %v3486_v36, 0.0  ;;  %v10644_v55 = vsub.f32 %v10436_v33, %v3427_v44 }
 0x654   : > { %v3371_v4 = vpop.xlane.xlu1 %3370  ;;  %3553 = vadd.xlane.f32.xlu0 %v3552_v3 }
 0x655   : > { %v3425_v63 = vmul.f32 0.015625, %v3371_v4  ;;  %v3491_v61 = vmul.f32 %v10644_v55, %v10644_v55 }
 0x657   : > { %v10647_v42 = vsub.f32 %v10443_v21, %v3425_v63 }
 0x658   : > { %v3374_v25 = vpop.xlane.xlu1 %3373  ;;  %3559 = vadd.xlane.f32.xlu0 %v3558_v58  ;;  %v3567_v58 = vsel %vm530_vm0, %v3491_v61, 0.0 }
 0x659   : > { %v3426_v62 = vmul.f32 0.015625, %v3374_v25  ;;  %v3489_v36 = vmul.f32 %v10647_v42, %v10647_v42 }
 0x65b   : > { %v10656_v3 = vsub.f32 %v10450_v2, %v3426_v62  ;;  %v3561_v44 = vsel %vm530_vm0, %v3489_v36, 0.0  ;;  %v3492_v62 = vmul.f32 %v10653_v5, %v10653_v5 }
 0x65c   : > { %v3383_v4 = vpop.xlane.xlu1 %3382  ;;  %3562 = vadd.xlane.f32.xlu1 %v3561_v44 }
 0x65d   : > { %v3429_v31 = vmul.f32 0.015625, %v3383_v4  ;;  %v3490_v25 = vmul.f32 %v10656_v3, %v10656_v3 }
 0x65f   : > { %v10664_v63 = vsub.f32 %v10457_v34, %v3429_v31  ;;  %v3564_v30 = vsel %vm530_vm0, %v3490_v25, 0.0  ;;  %v3570_v31 = vsel %vm530_vm0, %v3492_v62, 0.0 }
 0x660   : > { %v3386_v36 = vpop.xlane.xlu1 %3385  ;;  %3565 = vadd.xlane.f32.xlu0 %v3564_v30  ;;  %3568 = vadd.xlane.f32.xlu1 %v3567_v58 }
 0x661   : > { %v3430_v54 = vmul.f32 0.015625, %v3386_v36  ;;  %v3493_v44 = vmul.f32 %v10664_v63, %v10664_v63 }
 0x663   : > { %v10673_v4 = vsub.f32 %v10463_v13, %v3430_v54  ;;  %v3573_v34 = vsel %vm530_vm0, %v3493_v44, 0.0 }
 0x664   : > { %3571 = vadd.xlane.f32.xlu0 %v3570_v31  ;;  %3574 = vadd.xlane.f32.xlu1 %v3573_v34 }
 0x665   : > { %v3494_v61 = vmul.f32 %v10673_v4, %v10673_v4 }
 0x667   : > { %v3576_v25 = vsel %vm530_vm0, %v3494_v61, 0.0 }
 0x668   : > { %3577 = vadd.xlane.f32.xlu0 %v3576_v25 }
 0x691   : > { %v3509_v30 = vpop.xlane.xlu1 %3508 }
 0x692   : > { %v3599_v54 = vmul.f32 0.015625, %v3509_v30 }
 0x694   : > { %v3631_v44 = vadd.f32 1e-05, %v3599_v54 }
 0x695   : > { %v3503_v58 = vpop.xlane.xlu1 %3502 }
 0x696   : > { %v3597_v36 = vmul.f32 0.015625, %v3503_v58 }
 0x698   : > { %v3629_v33 = vadd.f32 1e-05, %v3597_v36 }
 0x699   : > { %v3512_v2 = vpop.xlane.xlu1 %3511 }
 0x69a   : > { %v3600_v21 = vmul.f32 0.015625, %v3512_v2  ;;  %8205 = vrsqrt.f32 %v3629_v33 }
 0x69c   : > { %v3632_v13 = vadd.f32 1e-05, %v3600_v21 }
 0x69d   : > { %v3506_v62 = vpop.xlane.xlu1 %3505 }
 0x69e   : > { %v3598_v19 = vmul.f32 0.015625, %v3506_v62  ;;  %8207 = vrsqrt.f32 %v3632_v13 }
 0x6a0   : > { %v3630_v31 = vadd.f32 1e-05, %v3598_v19  ;;  %v10684_v19 = vld [vmem:[%s13159_s9] ss:$0 sm:$0xff] }
 0x6a1   : > { %v3521_v34 = vpop.xlane.xlu1 %3520 }
 0x6a2   : > { %8209 = vrsqrt.f32 %v3630_v31  ;;  %v3603_v36 = vmul.f32 0.015625, %v3521_v34 }
 0x6a3   : > { %8211 = vrsqrt.f32 %v3631_v44 }
 0x6a4   : > { %v3635_v13 = vadd.f32 1e-05, %v3603_v36  ;;  %v10693_v36 = vld [vmem:[%s13160_s10] ss:$0 sm:$0xff] }
 0x6a5   : > { %v3515_v51 = vpop.xlane.xlu1 %3514 }
 0x6a6   : > { %v3601_v61 = vmul.f32 0.015625, %v3515_v51  ;;  %v3398_v51 = vpop.xlane.xlu0 %3397 }
 0x6a7   : > { %v8206_v50 = vpop.eup %8205 }
 0x6a8   : > { %v3633_v25 = vadd.f32 1e-05, %v3601_v61  ;;  %v3693_v2 = vmul.f32 %v8206_v50, %v10475_v7 }
 0x6a9   : > { %v3524_v28 = vpop.xlane.xlu1 %3523 }
 0x6aa   : > { %v3604_v58 = vmul.f32 0.015625, %v3524_v28  ;;  %8213 = vrsqrt.f32 %v3633_v25  ;;  %v3731_v44 = vmul.f32 %v10684_v19, %v3693_v2 }
 0x6ab   : > { %v8208_v30 = vpop.eup %8207 }
 0x6ac   : > { %v3636_v33 = vadd.f32 1e-05, %v3604_v58  ;;  %v3696_v25 = vmul.f32 %v8208_v30, %v10481_v12  ;;  %v3434_v58 = vmul.f32 0.015625, %v3398_v51 }
 0x6ad   : > { %v3518_v21 = vpop.xlane.xlu1 %3517 }
 0x6ae   : > { %v3602_v62 = vmul.f32 0.015625, %v3518_v21  ;;  %8215 = vrsqrt.f32 %v3636_v33  ;;  %v3734_v30 = vmul.f32 %v10684_v19, %v3696_v25 }
 0x6af   : > { %v8210_v54 = vpop.eup %8209 }
 0x6b0   : > { %v3694_v28 = vmul.f32 %v8210_v54, %v10487_v18  ;;  %v3634_v31 = vadd.f32 1e-05, %v3602_v62  ;;  %v8212_v34 = vpop.eup %8211  ;;  %v3769_v18 = vadd.f32 %v10693_v36, %v3731_v44 }
 0x6b1   : > { %v3389_v50 = vpop.xlane.xlu1 %3388  ;;  %v3695_v21 = vmul.f32 %v8212_v34, %v10470_v16 }
 0x6b2   : > { %v3732_v7 = vmul.f32 %v10684_v19, %v3694_v28  ;;  %8217 = vrsqrt.f32 %v3634_v31  ;;  %v3431_v61 = vmul.f32 0.015625, %v3389_v50 }
 0x6b3   : > { %8219 = vrsqrt.f32 %v3635_v13  ;;  %v10705_v13 = vsub.f32 %v10408_v26, %v3434_v58  ;;  %v3733_v16 = vmul.f32 %v10684_v19, %v3695_v21  ;;  %v3772_v58 = vadd.f32 %v10693_v36, %v3734_v30 }
 0x6b4   : > { %v10696_v2 = vsub.f32 %v10518_v45, %v3431_v61  ;;  %v3770_v33 = vadd.f32 %v10693_v36, %v3732_v7  ;;  %v13336_v7 = vmov 0  }
 0x6b5   : > { %v3392_v62 = vpop.xlane.xlu1 %3391 }
 0x6b6   : > { %v3432_v54 = vmul.f32 0.015625, %v3392_v62  ;;  %v3801_v28 = vpack.c.bf16 %v3770_v33, %v3769_v18  ;;  %v3495_v12 = vmul.f32 %v10696_v2, %v10696_v2  ;;  %v3498_v33 = vmul.f32 %v10705_v13, %v10705_v13 }
 0x6b7   : > { %v8214_v31 = vpop.eup %8213 }
 0x6b8   : > { %v10708_v51 = vsub.f32 %v10523_v37, %v3432_v54  ;;  %7099 = vmatmul.mubr.msk.bf16.vlgmr.msra.gmra.mxu0 %vm530_vm0, %v3801_v28  ;;  %v3579_v44 = vsel %vm530_vm0, %v3495_v12, 0.0  ;;  %v3697_v62 = vmul.f32 %v8214_v31, %v10499_v20  ;;  %v3771_v28 = vadd.f32 %v10693_v36, %v3733_v16 }
 0x6b9   : > { %v3527_v34 = vpop.xlane.xlu1 %3526  ;;  %v3536_v50 = vpop.xlane.xlu0 %3535  ;;  %3580 = vadd.xlane.f32.xlu1 %v3579_v44  ;;  %3967 = vmatprep.mubr.bf16.mxu0 %v13336_v7  ;;  %v3588_v10 = vsel %vm530_vm0, %v3498_v33, 0.0 }
 0x6ba   : > { %v3605_v61 = vmul.f32 0.015625, %v3527_v34  ;;  %v3496_v25 = vmul.f32 %v10708_v51, %v10708_v51  ;;  %v3608_v18 = vmul.f32 0.015625, %v3536_v50  ;;  %v3802_v45 = vpack.c.bf16 %v3772_v58, %v3771_v28 }
 0x6bb   : > { %v8216_v34 = vpop.eup %8215  ;;  %v3735_v16 = vmul.f32 %v10684_v19, %v3697_v62 }
 0x6bc   : > { %v3637_v54 = vadd.f32 1e-05, %v3605_v61  ;;  %v3582_v21 = vsel %vm530_vm0, %v3496_v25, 0.0  ;;  %v3640_v50 = vadd.f32 1e-05, %v3608_v18  ;;  %v3700_v25 = vmul.f32 %v8216_v34, %v10505_v11 }
 0x6bd   : > { %v3530_v12 = vpop.xlane.xlu1 %3529  ;;  %3583 = vadd.xlane.f32.xlu0 %v3582_v21  ;;  %v3404_v44 = vpop.xlane.xlu0 %3403 }
 0x6be   : > { %8221 = vrsqrt.f32 %v3637_v54  ;;  %v3606_v26 = vmul.f32 0.015625, %v3530_v12  ;;  %v3436_v37 = vmul.f32 0.015625, %v3404_v44  ;;  %v3738_v12 = vmul.f32 %v10684_v19, %v3700_v25 }
 0x6bf   : > { %v8218_v30 = vpop.eup %8217 }
 0x6c0   : > { %v8220_v8 = vpop.eup %8219  ;;  %v3698_v20 = vmul.f32 %v8218_v30, %v10511_v1  ;;  %v3638_v31 = vadd.f32 1e-05, %v3606_v26  ;;  %v10725_v61 = vsub.f32 %v10541_v0, %v3436_v37  ;;  %7100 = vmatmul.mubr.msk.bf16.gmra.mxu0 %vm530_vm0, %v3802_v45 }
 0x6c1   : > { %3589 = vadd.xlane.f32.xlu0 %v3588_v10  ;;  %v3395_v54 = vpop.xlane.xlu1 %3394  ;;  %3977 = vmatprep.mubr.bf16.mxu0 %v13336_v7  ;;  %v3699_v1 = vmul.f32 %v8220_v8, %v10493_v15  ;;  %v3773_v10 = vadd.f32 %v10693_v36, %v3735_v16 }
 0x6c2   : > { %8223 = vrsqrt.f32 %v3638_v31  ;;  %v3433_v58 = vmul.f32 0.015625, %v3395_v54  ;;  %v3500_v18 = vmul.f32 %v10725_v61, %v10725_v61  ;;  %v3736_v26 = vmul.f32 %v10684_v19, %v3698_v20 }
 0x6c3   : > { %8225 = vrsqrt.f32 %v3640_v50  ;;  %v3737_v44 = vmul.f32 %v10684_v19, %v3699_v1  ;;  %v3776_v50 = vadd.f32 %v10693_v36, %v3738_v12 }
 0x6c4   : > { %v10736_v45 = vsub.f32 %v10552_v39, %v3433_v58  ;;  %v3594_v37 = vsel %vm530_vm0, %v3500_v18, 0.0  ;;  %v3774_v11 = vadd.f32 %v10693_v36, %v3736_v26 }
 0x6c5   : > { %3595 = vadd.xlane.f32.xlu0 %v3594_v37  ;;  %v3533_v33 = vpop.xlane.xlu1 %3532  ;;  %v3775_v25 = vadd.f32 %v10693_v36, %v3737_v44 }
 0x6c6   : > { %v3607_v62 = vmul.f32 0.015625, %v3533_v33  ;;  %v3803_v21 = vpack.c.bf16 %v3774_v11, %v3773_v10  ;;  %v3497_v28 = vmul.f32 %v10736_v45, %v10736_v45 }
 0x6c7   : > { %v3804_v1 = vpack.c.bf16 %v3776_v50, %v3775_v25 }
 0x6c8   : > { %v3639_v8 = vadd.f32 1e-05, %v3607_v62  ;;  %7101 = vmatmul.mubr.msk.bf16.gmra.mxu0 %vm530_vm0, %v3803_v21  ;;  %v3585_v15 = vsel %vm530_vm0, %v3497_v28, 0.0 }
 0x6c9   : > { %3586 = vadd.xlane.f32.xlu1 %v3585_v15  ;;  %v3401_v34 = vpop.xlane.xlu1 %3400  ;;  %3987 = vmatprep.mubr.bf16.mxu0 %v13336_v7 }
 0x6ca   : > { %8227 = vrsqrt.f32 %v3639_v8  ;;  %v3435_v30 = vmul.f32 0.015625, %v3401_v34 }
 0x6cb   : > { %v8222_v20 = vpop.eup %8221 }
 0x6cc   : > { %v3701_v31 = vmul.f32 %v8222_v20, %v10526_v38  ;;  %v10751_v16 = vsub.f32 %v10572_v32, %v3435_v30 }
 0x6cd   : > { %v3542_v54 = vpop.xlane.xlu0 %3541  ;;  %v3539_v58 = vpop.xlane.xlu1 %3538 }
 0x6ce   : > { %v3610_v18 = vmul.f32 0.015625, %v3542_v54  ;;  %v3609_v26 = vmul.f32 0.015625, %v3539_v58  ;;  %v3499_v37 = vmul.f32 %v10751_v16, %v10751_v16  ;;  %v3739_v11 = vmul.f32 %v10684_v19, %v3701_v31 }
 0x6cf   : > { %v8224_v10 = vpop.eup %8223 }
 0x6d0   : > { %v8226_v33 = vpop.eup %8225  ;;  %v3702_v62 = vmul.f32 %v8224_v10, %v10544_v48  ;;  %v3642_v38 = vadd.f32 1e-05, %v3610_v18  ;;  %v3641_v21 = vadd.f32 1e-05, %v3609_v26  ;;  %7102 = vmatmul.mubr.msk.bf16.gmra.mxu0 %vm530_vm0, %v3804_v1  ;;  %v3591_v28 = vsel %vm530_vm0, %v3499_v37, 0.0 }
 0x6d1   : > { %v3548_v12 = vpop.xlane.xlu0 %3547  ;;  %3592 = vadd.xlane.f32.xlu1 %v3591_v28  ;;  %v3545_v8 = vpop.xlane.xlu1 %3544  ;;  %3997 = vmatprep.mubr.bf16.mxu0 %v13336_v7  ;;  %v3704_v30 = vmul.f32 %v8226_v33, %v10531_v46  ;;  %v3777_v20 = vadd.f32 %v10693_v36, %v3739_v11 }
 0x6d2   : > { %8229 = vrsqrt.f32 %v3642_v38  ;;  %v3612_v15 = vmul.f32 0.015625, %v3548_v12  ;;  %v3611_v44 = vmul.f32 0.015625, %v3545_v8  ;;  %v3740_v34 = vmul.f32 %v10684_v19, %v3702_v62 }
 0x6d3   : > { %8231 = vrsqrt.f32 %v3641_v21  ;;  %v3742_v46 = vmul.f32 %v10684_v19, %v3704_v30 }
 0x6d4   : > { %v3644_v48 = vadd.f32 1e-05, %v3612_v15  ;;  %v3643_v50 = vadd.f32 1e-05, %v3611_v44  ;;  %v3778_v31 = vadd.f32 %v10693_v36, %v3740_v34 }
 0x6d5   : > { %v3551_v25 = vpop.xlane.xlu1 %3550  ;;  %v3780_v33 = vadd.f32 %v10693_v36, %v3742_v46 }
 0x6d6   : > { %8233 = vrsqrt.f32 %v3644_v48  ;;  %v3613_v54 = vmul.f32 0.015625, %v3551_v25  ;;  %v3805_v58 = vpack.c.bf16 %v3778_v31, %v3777_v20 }
 0x6d7   : > { %v8228_v18 = vpop.eup %8227  ;;  %8235 = vrsqrt.f32 %v3643_v50 }
 0x6d8   : > { %v3703_v26 = vmul.f32 %v8228_v18, %v10555_v22  ;;  %v3645_v1 = vadd.f32 1e-05, %v3613_v54  ;;  %7103 = vmatmul.mubr.msk.bf16.gmra.mxu0 %vm530_vm0, %v3805_v58 }
 0x6d9   : > { %4007 = vmatprep.mubr.bf16.mxu0 %v13336_v7  ;;  %v3557_v37 = vpop.xlane.xlu1 %3556 }
 0x6da   : > { %v3741_v10 = vmul.f32 %v10684_v19, %v3703_v26  ;;  %8237 = vrsqrt.f32 %v3645_v1  ;;  %v3615_v62 = vmul.f32 0.015625, %v3557_v37 }
 0x6dc   : > { %v3779_v11 = vadd.f32 %v10693_v36, %v3741_v10  ;;  %v3647_v34 = vadd.f32 1e-05, %v3615_v62 }
 0x6dd   : > { %v3554_v38 = vpop.xlane.xlu0 %3553 }
 0x6de   : > { %v3614_v21 = vmul.f32 0.015625, %v3554_v38  ;;  %v3806_v28 = vpack.c.bf16 %v3780_v33, %v3779_v11 }
 0x6df   : > { %v8230_v22 = vpop.eup %8229 }
 0x6e0   : > { %v8232_v12 = vpop.eup %8231  ;;  %v3706_v8 = vmul.f32 %v8230_v22, %v10591_v14  ;;  %v3646_v15 = vadd.f32 1e-05, %v3614_v21  ;;  %7104 = vmatmul.mubr.msk.bf16.gmra.mxu0 %vm530_vm0, %v3806_v28 }
 0x6e1   : > { %v3705_v44 = vmul.f32 %v8232_v12, %v10575_v35  ;;  %v3560_v30 = vpop.xlane.xlu0 %3559  ;;  %4017 = vmatprep.mubr.bf16.mxu0 %v13336_v7 }
 0x6e2   : > { %8239 = vrsqrt.f32 %v3646_v15  ;;  %v3616_v48 = vmul.f32 0.015625, %v3560_v30  ;;  %v3744_v50 = vmul.f32 %v10684_v19, %v3706_v8 }
 0x6e3   : > { %v8234_v20 = vpop.eup %8233  ;;  %v3743_v31 = vmul.f32 %v10684_v19, %v3705_v44  ;;  %8241 = vrsqrt.f32 %v3647_v34 }
 0x6e4   : > { %v8236_v25 = vpop.eup %8235  ;;  %v3708_v54 = vmul.f32 %v8234_v20, %v10588_v17  ;;  %v3648_v14 = vadd.f32 1e-05, %v3616_v48  ;;  %v3782_v58 = vadd.f32 %v10693_v36, %v3744_v50 }
 0x6e5   : > { %v3707_v18 = vmul.f32 %v8236_v25, %v10585_v53  ;;  %v3563_v35 = vpop.xlane.xlu1 %3562  ;;  %v3781_v26 = vadd.f32 %v10693_v36, %v3743_v31 }
 0x6e6   : > { %8243 = vrsqrt.f32 %v3648_v14  ;;  %v3617_v1 = vmul.f32 0.015625, %v3563_v35  ;;  %v3746_v10 = vmul.f32 %v10684_v19, %v3708_v54 }
 0x6e7   : > { %v3807_v46 = vpack.c.bf16 %v3782_v58, %v3781_v26  ;;  %v3745_v37 = vmul.f32 %v10684_v19, %v3707_v18  ;;  %v8238_v11 = vpop.eup %8237 }
 0x6e8   : > { %v3649_v33 = vadd.f32 1e-05, %v3617_v1  ;;  %v3784_v21 = vadd.f32 %v10693_v36, %v3746_v10  ;;  %v3709_v28 = vmul.f32 %v8238_v11, %v10622_v43 }
 0x6e9   : > { %7105 = vmatmul.mubr.msk.bf16.gmra.mxu0 %vm530_vm0, %v3807_v46  ;;  %v3566_v17 = vpop.xlane.xlu0 %3565  ;;  %v3569_v38 = vpop.xlane.xlu1 %3568  ;;  %v3783_v53 = vadd.f32 %v10693_v36, %v3745_v37 }
 0x6ea   : > { %v3618_v62 = vmul.f32 0.015625, %v3566_v17  ;;  %4027 = vmatprep.mubr.bf16.mxu0 %v13336_v7  ;;  %8245 = vrsqrt.f32 %v3649_v33  ;;  %v3619_v12 = vmul.f32 0.015625, %v3569_v38  ;;  %v3747_v50 = vmul.f32 %v10684_v19, %v3709_v28 }
 0x6eb   : > { %v3808_v34 = vpack.c.bf16 %v3784_v21, %v3783_v53 }
 0x6ec   : > { %v3650_v22 = vadd.f32 1e-05, %v3618_v62  ;;  %v3651_v20 = vadd.f32 1e-05, %v3619_v12 }
 0x6ed   : > { %v3572_v8 = vpop.xlane.xlu0 %3571  ;;  %v3575_v54 = vpop.xlane.xlu1 %3574 }
 0x6ee   : > { %8247 = vrsqrt.f32 %v3650_v22  ;;  %v3620_v15 = vmul.f32 0.015625, %v3572_v8  ;;  %v3621_v1 = vmul.f32 0.015625, %v3575_v54 }
 0x6ef   : > { %v8240_v44 = vpop.eup %8239 }
 0x6f0   : > { %v3710_v30 = vmul.f32 %v8240_v44, %v10635_v60  ;;  %v3652_v48 = vadd.f32 1e-05, %v3620_v15  ;;  %v8242_v25 = vpop.eup %8241  ;;  %v3785_v60 = vadd.f32 %v10693_v36, %v3747_v50  ;;  %v3653_v11 = vadd.f32 1e-05, %v3621_v1 }
 0x6f1   : > { %7106 = vmatmul.mubr.msk.bf16.gmra.mxu0 %vm530_vm0, %v3808_v34  ;;  %v3578_v31 = vpop.xlane.xlu0 %3577  ;;  %v3711_v26 = vmul.f32 %v8242_v25, %v10619_v27 }
 0x6f2   : > { %4037 = vmatprep.mubr.bf16.mxu0 %v13336_v7  ;;  %v3748_v43 = vmul.f32 %v10684_v19, %v3710_v30  ;;  %8249 = vrsqrt.f32 %v3652_v48  ;;  %v3622_v58 = vmul.f32 0.015625, %v3578_v31 }
 0x6f3   : > { %v8244_v14 = vpop.eup %8243  ;;  %8251 = vrsqrt.f32 %v3651_v20  ;;  %v3749_v33 = vmul.f32 %v10684_v19, %v3711_v26 }
 0x6f4   : > { %v3712_v18 = vmul.f32 %v8244_v14, %v10632_v9  ;;  %v3786_v35 = vadd.f32 %v10693_v36, %v3748_v43  ;;  %v3654_v37 = vadd.f32 1e-05, %v3622_v58 }
 0x6f5   : > { %v3787_v53 = vadd.f32 %v10693_v36, %v3749_v33 }
 0x6f6   : > { %v3809_v46 = vpack.c.bf16 %v3786_v35, %v3785_v60  ;;  %v3750_v10 = vmul.f32 %v10684_v19, %v3712_v18  ;;  %8253 = vrsqrt.f32 %v3654_v37 }
 0x6f7   : > { %v8246_v17 = vpop.eup %8245  ;;  %8255 = vrsqrt.f32 %v3653_v11 }
 0x6f8   : > { %v3788_v62 = vadd.f32 %v10693_v36, %v3750_v10  ;;  %v3713_v38 = vmul.f32 %v8246_v17, %v10647_v42 }
 0x6f9   : > { %7107 = vmatmul.mubr.msk.bf16.gmra.mxu0 %vm530_vm0, %v3809_v46 }
 0x6fa   : > { %4047 = vmatprep.mubr.bf16.mxu0 %v13336_v7  ;;  %v3810_v21 = vpack.c.bf16 %v3788_v62, %v3787_v53  ;;  %v3751_v12 = vmul.f32 %v10684_v19, %v3713_v38 }
 0x6fb   : > { %v8248_v9 = vpop.eup %8247 }
 0x6fc   : > { %v3714_v27 = vmul.f32 %v8248_v9, %v10656_v3  ;;  %v3789_v44 = vadd.f32 %v10693_v36, %v3751_v12 }
 0x6fe   : > { %v3752_v28 = vmul.f32 %v10684_v19, %v3714_v27 }
 0x6ff   : > { %v8250_v22 = vpop.eup %8249 }
 0x700   : > { %v8252_v8 = vpop.eup %8251  ;;  %v3716_v15 = vmul.f32 %v8250_v22, %v10653_v5  ;;  %v3790_v3 = vadd.f32 %v10693_v36, %v3752_v28 }
 0x701   : > { %7108 = vmatmul.mubr.msk.bf16.gmra.mxu0 %vm530_vm0, %v3810_v21  ;;  %v3715_v42 = vmul.f32 %v8252_v8, %v10644_v55 }
 0x702   : > { %4057 = vmatprep.mubr.bf16.mxu0 %v13336_v7  ;;  %v3811_v34 = vpack.c.bf16 %v3790_v3, %v3789_v44  ;;  %v3754_v30 = vmul.f32 %v10684_v19, %v3716_v15 }
 0x703   : > { %v8254_v48 = vpop.eup %8253  ;;  %v3753_v50 = vmul.f32 %v10684_v19, %v3715_v42 }
 0x704   : > { %v8256_v20 = vpop.eup %8255  ;;  %v3718_v31 = vmul.f32 %v8254_v48, %v10673_v4  ;;  %v3792_v5 = vadd.f32 %v10693_v36, %v3754_v30 }
 0x705   : > { %v3717_v25 = vmul.f32 %v8256_v20, %v10664_v63  ;;  %v3791_v55 = vadd.f32 %v10693_v36, %v3753_v50 }
 0x706   : > { %v3756_v43 = vmul.f32 %v10684_v19, %v3718_v31 }
 0x707   : > { %v3812_v54 = vpack.c.bf16 %v3792_v5, %v3791_v55  ;;  %v3755_v14 = vmul.f32 %v10684_v19, %v3717_v25 }
 0x708   : > { %v3794_v58 = vadd.f32 %v10693_v36, %v3756_v43  ;;  %v3827_v43 = vlaneseq }
 0x709   : > { %7109 = vmatmul.mubr.msk.bf16.gmra.mxu0 %vm530_vm0, %v3811_v34  ;;  %v3793_v18 = vadd.f32 %v10693_v36, %v3755_v14 }
 0x70a   : > { %4067 = vmatprep.mubr.bf16.mxu0 %v13336_v7 }
 0x70b   : > { %v3813_v4 = vpack.c.bf16 %v3794_v58, %v3793_v18  ;;  %v3828_v18 = vshrl.u32 %v3827_v43, 7 }
 0x711   : > { %7110 = vmatmul.mubr.msk.bf16.gmra.mxu0 %vm530_vm0, %v3812_v54 }
 0x712   : > { %4077 = vmatprep.mubr.bf16.mxu0 %v13336_v7 }
 0x719   : > { %7111 = vmatmul.mubr.msk.bf16.gmra.mxu0 %vm530_vm0, %v3813_v4 }
 0x71a   : > { %4087 = vmatprep.mubr.bf16.mxu0 %v13336_v7 }
 0x742   : > { %v3581_v63 = vpop.xlane.xlu1 %3580 }
 0x743   : > { %v3623_v60 = vmul.f32 0.015625, %v3581_v63 }
 0x745   : > { %v3655_v35 = vadd.f32 1e-05, %v3623_v60  ;;  %v3829_v60 = vsub.s32 0, %v3828_v18 }
 0x746   : > { %v3584_v26 = vpop.xlane.xlu0 %3583 }
 0x747   : > { %8257 = vrsqrt.f32 %v3655_v35  ;;  %v3624_v1 = vmul.f32 0.015625, %v3584_v26  ;;  %v3825_v35 = vld [vmem:[%s13162_s12] sm:$0x3] }
 0x749   : > { %v3656_v46 = vadd.f32 1e-05, %v3624_v1  ;;  %v10856_v1 = vrot.slane %v3825_v35, %v3829_v60 }
 0x74a   : > { %v3590_v37 = vpop.xlane.xlu0 %3589 }
 0x74b   : > { %8259 = vrsqrt.f32 %v3656_v46  ;;  %v3626_v10 = vmul.f32 0.015625, %v3590_v37 }
 0x74d   : > { %v3658_v11 = vadd.f32 1e-05, %v3626_v10 }
 0x74e   : > { %v3596_v33 = vpop.xlane.xlu0 %3595 }
 0x74f   : > { %8261 = vrsqrt.f32 %v3658_v11  ;;  %v3628_v17 = vmul.f32 0.015625, %v3596_v33 }
 0x751   : > { %v3660_v53 = vadd.f32 1e-05, %v3628_v17 }
 0x752   : > { %v3587_v9 = vpop.xlane.xlu1 %3586 }
 0x753   : > { %v3625_v62 = vmul.f32 0.015625, %v3587_v9 }
 0x754   : > { %v8258_v27 = vpop.eup %8257 }
 0x755   : > { %v3719_v38 = vmul.f32 %v8258_v27, %v10696_v2  ;;  %v3657_v21 = vadd.f32 1e-05, %v3625_v62 }
 0x757   : > { %8263 = vrsqrt.f32 %v3657_v21  ;;  %v3757_v12 = vmul.f32 %v10684_v19, %v3719_v38 }
 0x758   : > { %v8260_v28 = vpop.eup %8259  ;;  %8265 = vrsqrt.f32 %v3660_v53 }
 0x759   : > { %v3720_v22 = vmul.f32 %v8260_v28, %v10708_v51  ;;  %v3795_v44 = vadd.f32 %v10693_v36, %v3757_v12 }
 0x75a   : > { %v3593_v8 = vpop.xlane.xlu1 %3592 }
 0x75b   : > { %v3627_v15 = vmul.f32 0.015625, %v3593_v8  ;;  %v3758_v3 = vmul.f32 %v10684_v19, %v3720_v22 }
 0x75c   : > { %v8262_v30 = vpop.eup %8261 }
 0x75d   : > { %v3659_v42 = vadd.f32 1e-05, %v3627_v15  ;;  %v3796_v34 = vadd.f32 %v10693_v36, %v3758_v3  ;;  %v3722_v48 = vmul.f32 %v8262_v30, %v10705_v13 }
 0x75f   : > { %8267 = vrsqrt.f32 %v3659_v42  ;;  %v3814_v2 = vpack.c.bf16 %v3796_v34, %v3795_v44  ;;  %v3760_v20 = vmul.f32 %v10684_v19, %v3722_v48 }
 0x761   : > { %7112 = vmatmul.mubr.msk.bf16.gmra.mxu0 %vm530_vm0, %v3814_v2  ;;  %v3798_v54 = vadd.f32 %v10693_v36, %v3760_v20 }
 0x762   : > { %4097 = vmatprep.mubr.bf16.mxu0 %v13336_v7 }
 0x764   : > { %v8264_v51 = vpop.eup %8263 }
 0x765   : > { %v3721_v50 = vmul.f32 %v8264_v51, %v10736_v45  ;;  %v8266_v31 = vpop.eup %8265 }
 0x766   : > { %v3724_v25 = vmul.f32 %v8266_v31, %v10725_v61 }
 0x767   : > { %v3759_v5 = vmul.f32 %v10684_v19, %v3721_v50 }
 0x768   : > { %v3762_v45 = vmul.f32 %v10684_v19, %v3724_v25 }
 0x769   : > { %v3797_v55 = vadd.f32 %v10693_v36, %v3759_v5 }
 0x76a   : > { %v3800_v63 = vadd.f32 %v10693_v36, %v3762_v45 }
 0x76b   : > { %v3815_v13 = vpack.c.bf16 %v3798_v54, %v3797_v55 }
 0x76c   : > { %v8268_v14 = vpop.eup %8267 }
 0x76d   : > { %v3723_v58 = vmul.f32 %v8268_v14, %v10751_v16  ;;  %7113 = vmatmul.mubr.msk.bf16.gmra.mxu0 %vm530_vm0, %v3815_v13  ;;  %v3833_v16 = vsub.s32 1, %v3828_v18 }
 0x76e   : > { %4107 = vmatprep.mubr.bf16.mxu0 %v13336_v7 }
 0x76f   : > { %v3761_v4 = vmul.f32 %v10684_v19, %v3723_v58  ;;  %v10858_v46 = vrot.slane %v3825_v35, %v3833_v16 }
 0x771   : > { %v3799_v61 = vadd.f32 %v10693_v36, %v3761_v4 }
 0x773   : > { %v3816_v26 = vpack.c.bf16 %v3800_v63, %v3799_v61 }
 0x775   : > { %7114 = vmatmul.mubr.msk.bf16.gmra.mxu0 %vm530_vm0, %v3816_v26 }
 0x778   : > { %v3959_v7 = vpop.f32.mrf.mxu0 }
 0x779   : > { %v3960_v19 = vadd.f32 %v3959_v7, %v10856_v1 }
 0x77a   : > { %v3961_v37 = vpop.f32.mrf.mxu0 }
 0x77b   : > { %v10861_v10 = vmul.f32 0.70710677, %v3960_v19  ;;  %v3962_v36 = vadd.f32 %v3961_v37, %v10858_v46  ;;  %v10908_v63 = vmul.f32 0.5, %v3960_v19 }
 0x77c   : > { %v3963_v11 = vpop.f32.mrf.mxu0 }
 0x77d   : > { %v4246_v33 = vand.u32 2147483647, %v10861_v10  ;;  %v10865_v17 = vmul.f32 0.70710677, %v3962_v36  ;;  %v3964_v9 = vadd.f32 %v3963_v11, %v10856_v1  ;;  %v10919_v11 = vmul.f32 0.5, %v3962_v36 }
 0x77e   : > { %v3965_v62 = vpop.f32.mrf.mxu0  ;;  %vm6102_vm5 = vcmp.ge.f32.partialorder %v10861_v10, 0.0 }
 0x77f   : > { %v4310_v27 = vmul.f32 0.5, %v4246_v33  ;;  %v4247_v38 = vand.u32 2147483647, %v10865_v17  ;;  %v10869_v53 = vmul.f32 0.70710677, %v3964_v9  ;;  %v3966_v21 = vadd.f32 %v3965_v62, %v10858_v46 }
 0x780   : > { %v3969_v28 = vpop.f32.mrf.mxu0  ;;  %v5718_v18 = vsub.f32 0.0, %v4246_v33  ;;  %v10921_v62 = vmul.f32 0.5, %v3964_v9  ;;  %vm6103_vm6 = vcmp.ge.f32.partialorder %v10865_v17, 0.0 }
 0x781   : > { %v4374_v22 = vadd.f32 1.0, %v4310_v27  ;;  %v4311_v12 = vmul.f32 0.5, %v4247_v38  ;;  %v10873_v8 = vand.u32 2147483647, %v10869_v53  ;;  %v10875_v15 = vmul.f32 0.70710677, %v3966_v21 }
 0x782   : > { %v3971_v3 = vpop.f32.mrf.mxu0  ;;  %v3970_v44 = vadd.f32 %v3969_v28, %v10856_v1  ;;  %v5719_v16 = vsub.f32 0.0, %v4247_v38  ;;  %v10927_v28 = vmul.f32 %v5718_v18, %v4246_v33  ;;  %v10938_v9 = vmul.f32 0.5, %v3966_v21 }
 0x783   : > { %8269 = vrcp.f32 %v4374_v22  ;;  %v4375_v42 = vadd.f32 1.0, %v4311_v12  ;;  %v4312_v34 = vmul.f32 0.5, %v10873_v8  ;;  %v10880_v30 = vand.u32 2147483647, %v10875_v15 }
 0x784   : > { %v3973_v2 = vpop.f32.mrf.mxu0  ;;  %v10882_v48 = vmul.f32 0.70710677, %v3970_v44  ;;  %v10885_v51 = vadd.f32 %v3971_v3, %v10858_v46  ;;  %v5720_v36 = vsub.f32 0.0, %v10873_v8  ;;  %v10942_v33 = vmul.f32 %v5719_v16, %v4247_v38 }
 0x785   : > { %8271 = vrcp.f32 %v4375_v42  ;;  %v4376_v50 = vadd.f32 1.0, %v4312_v34  ;;  %v4313_v20 = vmul.f32 0.5, %v10880_v30  ;;  %v10895_v54 = vadd.f32 %v3973_v2, %v10856_v1 }
 0x786   : > { %v3975_v31 = vpop.f32.mrf.mxu0  ;;  %v10889_v5 = vand.u32 2147483647, %v10882_v48  ;;  %v10892_v25 = vmul.f32 0.70710677, %v10885_v51  ;;  %vm6104_vm7 = vcmp.ge.f32.partialorder %v10869_v53, 0.0  ;;  %vm6105_vm8 = vcmp.ge.f32.partialorder %v10875_v15, 0.0 }
 0x787   : > { %8273 = vrcp.f32 %v4376_v50  ;;  %v4377_v55 = vadd.f32 1.0, %v4313_v20  ;;  %v10902_v58 = vmul.f32 0.70710677, %v10895_v54  ;;  %v10905_v45 = vadd.f32 %v3975_v31, %v10858_v46 }
 0x788   : > { %v3979_v43 = vpop.f32.mrf.mxu0  ;;  %v4314_v13 = vmul.f32 0.5, %v10889_v5  ;;  %v10899_v14 = vand.u32 2147483647, %v10892_v25  ;;  %v5721_v50 = vsub.f32 0.0, %v10880_v30  ;;  %v5722_v38 = vsub.f32 0.0, %v10889_v5 }
 0x789   : > { %8275 = vrcp.f32 %v4377_v55  ;;  %v10911_v60 = vand.u32 2147483647, %v10902_v58  ;;  %v10914_v35 = vmul.f32 0.70710677, %v10905_v45  ;;  %v10917_v37 = vadd.f32 %v3979_v43, %v10856_v1 }
 0x78a   : > { %v4378_v4 = vadd.f32 1.0, %v4314_v13  ;;  %v4315_v61 = vmul.f32 0.5, %v10899_v14  ;;  %v3981_v26 = vpop.f32.mrf.mxu0  ;;  %v10950_v43 = vmul.f32 0.5, %v3970_v44  ;;  %vm6106_vm9 = vcmp.ge.f32.partialorder %v10882_v48, 0.0 }
 0x78b   : > { %v4316_v19 = vmul.f32 0.5, %v10911_v60  ;;  %v10925_v27 = vand.u32 2147483647, %v10914_v35  ;;  %v10930_v22 = vmul.f32 0.70710677, %v10917_v37  ;;  %v10933_v12 = vadd.f32 %v3981_v26, %v10858_v46 }
 0x78c   : > { %8277 = vrcp.f32 %v4378_v4  ;;  %v4379_v7 = vadd.f32 1.0, %v4315_v61  ;;  %v3983_v31 = vpop.f32.mrf.mxu0  ;;  %v10959_v26 = vmul.f32 %v5720_v36, %v10873_v8  ;;  %v5724_v36 = vsub.f32 0.0, %v10911_v60 }
 0x78d   : > { %13337 = vst [vmem:[#allocation34_spill] sm:$0xff] %v10930_v22  ;;  %13338 = vst [vmem:[#allocation35_spill] sm:$0xff] %v10933_v12  ;;  %v4380_v42 = vadd.f32 1.0, %v4316_v19  ;;  %v4317_v34 = vmul.f32 0.5, %v10925_v27  ;;  %v10946_v20 = vand.u32 2147483647, %v10930_v22  ;;  %v10965_v44 = vadd.f32 %v3983_v31, %v10856_v1 }
 0x78e   : > { %8279 = vrcp.f32 %v4379_v7  ;;  %v10953_v13 = vmul.f32 0.70710677, %v10933_v12  ;;  %v5725_v29 = vsub.f32 0.0, %v10925_v27  ;;  %vm6107_vm10 = vcmp.ge.f32.partialorder %v10892_v25, 0.0 }
 0x78f   : > { %8281 = vrcp.f32 %v4380_v42  ;;  %v4381_v21 = vadd.f32 1.0, %v4317_v34  ;;  %v4318_v61 = vmul.f32 0.5, %v10946_v20  ;;  %13340 = vst [vmem:[#allocation37_spill] sm:$0xff] %v10965_v44  ;;  %v10971_v34 = vmul.f32 %v5721_v50, %v10880_v30 }
 0x790   : > { %v10935_v3 = vpop.eup %8269  ;;  %13339 = vst [vmem:[#allocation36_spill] sm:$0xff] %v10953_v13  ;;  %v10962_v16 = vand.u32 2147483647, %v10953_v13  ;;  %v10984_v30 = vmul.f32 0.70710677, %v10965_v44  ;;  %vm6108_vm11 = vcmp.ge.f32.partialorder %v10902_v58, 0.0 }
 0x791   : > { %v4566_v2 = vmul.f32 0.17087276, %v10935_v3  ;;  %8283 = vrcp.f32 %v4381_v21  ;;  %v4382_v21 = vadd.f32 1.0, %v4318_v61  ;;  %vm6109_vm12 = vcmp.ge.f32.partialorder %v10914_v35, 0.0 }
 0x792   : > { %v10948_v55 = vpop.eup %8271  ;;  %v4319_v0 = vmul.f32 0.5, %v10962_v16  ;;  %13341 = vst [vmem:[#allocation38_spill] sm:$0xff] %v10984_v30 }
 0x793   : > { %v4630_v18 = vadd.f32 -0.82215226, %v4566_v2  ;;  %v4567_v4 = vmul.f32 0.17087276, %v10948_v55  ;;  %v5723_v2 = vsub.f32 0.0, %v10899_v14  ;;  %8285 = vrcp.f32 %v4382_v21 }
 0x794   : > { %v10967_v7 = vpop.eup %8273  ;;  %v4383_v41 = vadd.f32 1.0, %v4319_v0 }
 0x795   : > { %v4694_v19 = vmul.f32 %v10935_v3, %v4630_v18  ;;  %v4631_v42 = vadd.f32 -0.82215226, %v4567_v4  ;;  %v4568_v8 = vmul.f32 0.17087276, %v10967_v7  ;;  %v10981_v18 = vmul.f32 %v5722_v38, %v10889_v5 }
 0x796   : > { %v10977_v32 = vpop.eup %8275  ;;  %v10990_v52 = vmul.f32 %v5723_v2, %v10899_v14  ;;  %v3985_v2 = vpop.f32.mrf.mxu0  ;;  %8287 = vrcp.f32 %v4383_v41 }
 0x797   : > { %v4758_v31 = vadd.f32 1.4885159, %v4694_v19  ;;  %v4695_v39 = vmul.f32 %v10948_v55, %v4631_v42  ;;  %v4632_v50 = vadd.f32 -0.82215226, %v4568_v8  ;;  %v4569_v4 = vmul.f32 0.17087276, %v10977_v32 }
 0x798   : > { %v10993_v19 = vand.u32 2147483647, %v10984_v30  ;;  %v10999_v8 = vmul.f32 %v5724_v36, %v10911_v60  ;;  %v11014_v23 = vadd.f32 %v3985_v2, %v10858_v46 }
 0x799   : > { %v4822_v61 = vmul.f32 %v10935_v3, %v4758_v31  ;;  %v4759_v49 = vadd.f32 1.4885159, %v4695_v39  ;;  %v10995_v5 = vpop.eup %8277  ;;  %v4696_v38 = vmul.f32 %v10967_v7, %v4632_v50  ;;  %v4633_v42 = vadd.f32 -0.82215226, %v4569_v4 }
 0x79a   : > { %v4570_v39 = vmul.f32 0.17087276, %v10995_v5  ;;  %v4320_v14 = vmul.f32 0.5, %v10993_v19  ;;  %v11008_v50 = vmul.f32 %v5725_v29, %v10925_v27 }
 0x79b   : > { %v4886_v24 = vadd.f32 -1.135204, %v4822_v61  ;;  %v4823_v0 = vmul.f32 %v10948_v55, %v4759_v49  ;;  %v11004_v31 = vpop.eup %8279  ;;  %v4760_v6 = vadd.f32 1.4885159, %v4696_v38  ;;  %v4697_v47 = vmul.f32 %v10977_v32, %v4633_v42 }
 0x79c   : > { %v4634_v21 = vadd.f32 -0.82215226, %v4570_v39  ;;  %v4571_v49 = vmul.f32 0.17087276, %v11004_v31  ;;  %v4384_v57 = vadd.f32 1.0, %v4320_v14  ;;  %v11016_v38 = vpop.eup %8281 }
 0x79d   : > { %v4950_v60 = vmul.f32 %v10935_v3, %v4886_v24  ;;  %v4887_v36 = vadd.f32 -1.135204, %v4823_v0  ;;  %v4824_v4 = vmul.f32 %v10967_v7, %v4760_v6  ;;  %v4761_v61 = vadd.f32 1.4885159, %v4697_v47 }
 0x79e   : > { %v4698_v41 = vmul.f32 %v10995_v5, %v4634_v21  ;;  %v4635_v27 = vadd.f32 -0.82215226, %v4571_v49  ;;  %v4572_v39 = vmul.f32 0.17087276, %v11016_v38  ;;  %8289 = vrcp.f32 %v4384_v57  ;;  %v11022_v6 = vpop.eup %8283 }
 0x79f   : > { %v5014_v42 = vadd.f32 0.27886808, %v4950_v60  ;;  %v4951_v29 = vmul.f32 %v10948_v55, %v4887_v36  ;;  %v4888_v24 = vadd.f32 -1.135204, %v4824_v4  ;;  %v4825_v0 = vmul.f32 %v10977_v32, %v4761_v61 }
 0x7a0   : > { %v4762_v2 = vadd.f32 1.4885159, %v4698_v41  ;;  %v4699_v40 = vmul.f32 %v11004_v31, %v4635_v27  ;;  %v4636_v56 = vadd.f32 -0.82215226, %v4572_v39  ;;  %v4573_v21 = vmul.f32 0.17087276, %v11022_v6 }
 0x7a1   : > { %v5078_v47 = vmul.f32 %v10935_v3, %v5014_v42  ;;  %v5015_v14 = vadd.f32 0.27886808, %v4951_v29  ;;  %v4952_v60 = vmul.f32 %v10967_v7, %v4888_v24  ;;  %v4889_v36 = vadd.f32 -1.135204, %v4825_v0 }
 0x7a2   : > { %v4826_v61 = vmul.f32 %v10995_v5, %v4762_v2  ;;  %v4763_v57 = vadd.f32 1.4885159, %v4699_v40  ;;  %v4700_v42 = vmul.f32 %v11016_v38, %v4636_v56  ;;  %v4637_v29 = vadd.f32 -0.82215226, %v4573_v21  ;;  %v11036_v2 = vpop.eup %8285 }
 0x7a3   : > { %v5142_v49 = vadd.f32 -0.18628806, %v5078_v47  ;;  %v5079_v4 = vmul.f32 %v10948_v55, %v5015_v14  ;;  %v5016_v59 = vadd.f32 0.27886808, %v4952_v60  ;;  %v4953_v30 = vmul.f32 %v10977_v32, %v4889_v36 }
 0x7a4   : > { %v4890_v24 = vadd.f32 -1.135204, %v4826_v61  ;;  %v4827_v0 = vmul.f32 %v11004_v31, %v4763_v57  ;;  %v4764_v44 = vadd.f32 1.4885159, %v4700_v42  ;;  %v4701_v14 = vmul.f32 %v11022_v6, %v4637_v29  ;;  %v11042_v57 = vpop.eup %8287 }
 0x7a5   : > { %v5206_v41 = vmul.f32 %v10935_v3, %v5142_v49  ;;  %v5143_v27 = vadd.f32 -0.18628806, %v5079_v4  ;;  %v5080_v39 = vmul.f32 %v10967_v7, %v5016_v59  ;;  %v5017_v47 = vadd.f32 0.27886808, %v4953_v30 }
 0x7a6   : > { %v4954_v56 = vmul.f32 %v10995_v5, %v4890_v24  ;;  %v4891_v36 = vadd.f32 -1.135204, %v4827_v0  ;;  %v4828_v4 = vmul.f32 %v11016_v38, %v4764_v44  ;;  %v4765_v61 = vadd.f32 1.4885159, %v4701_v14 }
 0x7a7   : > { %v5270_v40 = vadd.f32 0.09678418, %v5206_v41  ;;  %v5207_v60 = vmul.f32 %v10948_v55, %v5143_v27  ;;  %v5144_v21 = vadd.f32 -0.18628806, %v5080_v39  ;;  %v5081_v49 = vmul.f32 %v10977_v32, %v5017_v47 }
 0x7a8   : > { %v5018_v42 = vadd.f32 0.27886808, %v4954_v56  ;;  %v4955_v29 = vmul.f32 %v11004_v31, %v4891_v36  ;;  %v4892_v13 = vadd.f32 -1.135204, %v4828_v4  ;;  %v4829_v24 = vmul.f32 %v11022_v6, %v4765_v61 }
 0x7a9   : > { %v5334_v59 = vmul.f32 %v10935_v3, %v5270_v40  ;;  %v5271_v30 = vadd.f32 0.09678418, %v5207_v60  ;;  %v5208_v41 = vmul.f32 %v10967_v7, %v5144_v21  ;;  %v5145_v27 = vadd.f32 -0.18628806, %v5081_v49 }
 0x7aa   : > { %v5082_v44 = vmul.f32 %v10995_v5, %v5018_v42  ;;  %v5019_v47 = vadd.f32 0.27886808, %v4955_v29  ;;  %v4956_v40 = vmul.f32 %v11016_v38, %v4892_v13  ;;  %v4893_v60 = vadd.f32 -1.135204, %v4829_v24 }
 0x7ab   : > { %v5398_v0 = vadd.f32 0.37409195, %v5334_v59  ;;  %v5335_v39 = vmul.f32 %v10948_v55, %v5271_v30  ;;  %v5272_v14 = vadd.f32 0.09678418, %v5208_v41  ;;  %v5209_v12 = vmul.f32 %v10977_v32, %v5145_v27  ;;  %v11052_v56 = vpop.eup %8289 }
 0x7ac   : > { %v5146_v49 = vadd.f32 -0.18628806, %v5082_v44  ;;  %v5083_v4 = vmul.f32 %v11004_v31, %v5019_v47  ;;  %v5020_v30 = vadd.f32 0.27886808, %v4956_v40  ;;  %v4957_v42 = vmul.f32 %v11022_v6, %v4893_v60 }
 0x7ad   : > { %v5462_v36 = vmul.f32 %v10935_v3, %v5398_v0  ;;  %v5399_v21 = vadd.f32 0.37409195, %v5335_v39  ;;  %v5336_v61 = vmul.f32 %v10967_v7, %v5272_v14  ;;  %v5273_v59 = vadd.f32 0.09678418, %v5209_v12 }
 0x7ae   : > { %v5210_v13 = vmul.f32 %v10995_v5, %v5146_v49  ;;  %v5147_v27 = vadd.f32 -0.18628806, %v5083_v4  ;;  %v5084_v0 = vmul.f32 %v11016_v38, %v5020_v30  ;;  %v5021_v39 = vadd.f32 0.27886808, %v4957_v42 }
 0x7af   : > { %v5526_v29 = vadd.f32 1.0000237, %v5462_v36  ;;  %v5463_v41 = vmul.f32 %v10948_v55, %v5399_v21  ;;  %v5400_v24 = vadd.f32 0.37409195, %v5336_v61  ;;  %v5337_v22 = vmul.f32 %v10977_v32, %v5273_v59 }
 0x7b0   : > { %v5274_v14 = vadd.f32 0.09678418, %v5210_v13  ;;  %v5211_v12 = vmul.f32 %v11004_v31, %v5147_v27  ;;  %v5148_v36 = vadd.f32 -0.18628806, %v5084_v0  ;;  %v5085_v21 = vmul.f32 %v11022_v6, %v5021_v39 }
 0x7b1   : > { %v5590_v44 = vmul.f32 %v10935_v3, %v5526_v29  ;;  %v5527_v47 = vadd.f32 1.0000237, %v5463_v41  ;;  %v5464_v40 = vmul.f32 %v10967_v7, %v5400_v24  ;;  %v5401_v60 = vadd.f32 0.37409195, %v5337_v22 }
 0x7b2   : > { %v5338_v61 = vmul.f32 %v10995_v5, %v5274_v14  ;;  %v5275_v59 = vadd.f32 0.09678418, %v5211_v12  ;;  %v5212_v29 = vmul.f32 %v11016_v38, %v5148_v36  ;;  %v5149_v41 = vadd.f32 -0.18628806, %v5085_v21 }
 0x7b3   : > { %v5654_v49 = vadd.f32 -1.2655122, %v5590_v44  ;;  %v5591_v4 = vmul.f32 %v10948_v55, %v5527_v47  ;;  %v5528_v30 = vadd.f32 1.0000237, %v5464_v40  ;;  %v5465_v42 = vmul.f32 %v10977_v32, %v5401_v60 }
 0x7b4   : > { %v5402_v24 = vadd.f32 0.37409195, %v5338_v61  ;;  %v5339_v22 = vmul.f32 %v11004_v31, %v5275_v59  ;;  %v5276_v44 = vadd.f32 0.09678418, %v5212_v29  ;;  %v5213_v47 = vmul.f32 %v11022_v6, %v5149_v41 }
 0x7b5   : > { %v5846_v13 = vadd.f32 %v10927_v28, %v5654_v49  ;;  %v5655_v27 = vadd.f32 -1.2655122, %v5591_v4  ;;  %v5592_v0 = vmul.f32 %v10967_v7, %v5528_v30  ;;  %v5529_v39 = vadd.f32 1.0000237, %v5465_v42 }
 0x7b6   : > { %v5466_v40 = vmul.f32 %v10995_v5, %v5402_v24  ;;  %v5403_v60 = vadd.f32 0.37409195, %v5339_v22  ;;  %v5340_v28 = vmul.f32 %v11016_v38, %v5276_v44  ;;  %v5277_v49 = vadd.f32 0.09678418, %v5213_v47 }
 0x7b7   : > { %v5910_v14 = vmul.f32 1.442695, %v5846_v13  ;;  %v5847_v12 = vadd.f32 %v10942_v33, %v5655_v27  ;;  %v5656_v36 = vadd.f32 -1.2655122, %v5592_v0  ;;  %v5593_v21 = vmul.f32 %v10977_v32, %v5529_v39 }
 0x7b8   : > { %v5530_v61 = vadd.f32 1.0000237, %v5466_v40  ;;  %v5467_v59 = vmul.f32 %v11004_v31, %v5403_v60  ;;  %v5404_v29 = vadd.f32 0.37409195, %v5340_v28  ;;  %v5341_v33 = vmul.f32 %v11022_v6, %v5277_v49 }
 0x7b9   : > { %8291 = vpow2.f32 %v5910_v14  ;;  %v5912_v4 = vmul.f32 1.442695, %v5847_v12  ;;  %v5848_v30 = vadd.f32 %v10959_v26, %v5656_v36  ;;  %v5657_v42 = vadd.f32 -1.2655122, %v5593_v21 }
 0x7ba   : > { %v5594_v41 = vmul.f32 %v10995_v5, %v5530_v61  ;;  %v5531_v13 = vadd.f32 1.0000237, %v5467_v59  ;;  %v4574_v27 = vmul.f32 0.17087276, %v11036_v2  ;;  %v5468_v0 = vmul.f32 %v11016_v38, %v5404_v29 }
 0x7bb   : > { %8293 = vpow2.f32 %v5912_v4  ;;  %v5914_v24 = vmul.f32 1.442695, %v5848_v30  ;;  %v5849_v22 = vadd.f32 %v10971_v34, %v5657_v42  ;;  %v5405_v39 = vadd.f32 0.37409195, %v5341_v33 }
 0x7bc   : > { %v5658_v44 = vadd.f32 -1.2655122, %v5594_v41  ;;  %v5595_v47 = vmul.f32 %v11004_v31, %v5531_v13  ;;  %v4638_v26 = vadd.f32 -0.82215226, %v4574_v27  ;;  %v4575_v14 = vmul.f32 0.17087276, %v11042_v57 }
 0x7bd   : > { %8295 = vpow2.f32 %v5914_v24  ;;  %v5916_v12 = vmul.f32 1.442695, %v5849_v22  ;;  %v5532_v40 = vadd.f32 1.0000237, %v5468_v0  ;;  %v5469_v60 = vmul.f32 %v11022_v6, %v5405_v39 }
 0x7be   : > { %v5850_v36 = vadd.f32 %v10981_v18, %v5658_v44  ;;  %v5659_v21 = vadd.f32 -1.2655122, %v5595_v47  ;;  %v4702_v28 = vmul.f32 %v11036_v2, %v4638_v26  ;;  %v4639_v34 = vadd.f32 -0.82215226, %v4575_v14 }
 0x7bf   : > { %8297 = vpow2.f32 %v5916_v12  ;;  %v5596_v49 = vmul.f32 %v11016_v38, %v5532_v40  ;;  %v5533_v4 = vadd.f32 1.0000237, %v5469_v60  ;;  %v4576_v61 = vmul.f32 0.17087276, %v11052_v56 }
 0x7c0   : > { %v5918_v59 = vmul.f32 1.442695, %v5850_v36  ;;  %v5851_v30 = vadd.f32 %v10990_v52, %v5659_v21  ;;  %v4766_v42 = vadd.f32 1.4885159, %v4702_v28  ;;  %v4703_v29 = vmul.f32 %v11042_v57, %v4639_v34 }
 0x7c1   : > { %v5660_v33 = vadd.f32 -1.2655122, %v5596_v49  ;;  %v5597_v18 = vmul.f32 %v11022_v6, %v5533_v4  ;;  %v4640_v41 = vadd.f32 -0.82215226, %v4576_v61  ;;  %v11097_v13 = vmul.f32 0.70710677, %v11014_v23 }
 0x7c2   : > { %8299 = vpow2.f32 %v5918_v59  ;;  %v5920_v27 = vmul.f32 1.442695, %v5851_v30  ;;  %v4830_v24 = vmul.f32 %v11036_v2, %v4766_v42  ;;  %v4767_v22 = vadd.f32 1.4885159, %v4703_v29 }
 0x7c3   : > { %v5852_v52 = vadd.f32 %v10999_v8, %v5660_v33  ;;  %v5661_v0 = vadd.f32 -1.2655122, %v5597_v18  ;;  %v4704_v39 = vmul.f32 %v11052_v56, %v4640_v41  ;;  %v11104_v44 = vand.u32 2147483647, %v11097_v13  ;;  %v3989_v18 = vpop.f32.mrf.mxu0 }
 0x7c4   : > { %v11107_v47 = vmul.f32 0.5, %v10885_v51  ;;  %8301 = vpow2.f32 %v5920_v27  ;;  %v4894_v26 = vadd.f32 -1.135204, %v4830_v24  ;;  %v4831_v14 = vmul.f32 %v11042_v57, %v4767_v22 }
 0x7c5   : > { %v5922_v40 = vmul.f32 1.442695, %v5852_v52  ;;  %v5853_v60 = vadd.f32 %v11008_v50, %v5661_v0  ;;  %v4768_v36 = vadd.f32 1.4885159, %v4704_v39  ;;  %v4321_v8 = vmul.f32 0.5, %v11104_v44 }
 0x7c6   : > { %v8292_v12 = vpop.eup %8291  ;;  %v11115_v28 = vmul.f32 0.5, %v10895_v54  ;;  %v4958_v51 = vmul.f32 %v11036_v2, %v4894_v26  ;;  %v4895_v34 = vadd.f32 -1.135204, %v4831_v14  ;;  %v11134_v10 = vadd.f32 %v3989_v18, %v10856_v1 }
 0x7c7   : > { %v6038_v21 = vmul.f32 %v8292_v12, %v10935_v3  ;;  %8303 = vpow2.f32 %v5922_v40  ;;  %v5924_v4 = vmul.f32 1.442695, %v5853_v60  ;;  %v4832_v61 = vmul.f32 %v11052_v56, %v4768_v36 }
 0x7c8   : > { %v8294_v49 = vpop.eup %8293  ;;  %v4385_v59 = vadd.f32 1.0, %v4321_v8  ;;  %v5022_v29 = vadd.f32 0.27886808, %v4958_v51  ;;  %v11122_v3 = vmul.f32 0.5, %v10905_v45  ;;  %v4959_v54 = vmul.f32 %v11042_v57, %v4895_v34 }
 0x7c9   : > { %v6166_v50 = vsub.f32 1.0, %v6038_v21  ;;  %v7115_v30 = vadd.f32 -1.0, %v6038_v21  ;;  %v6039_v42 = vmul.f32 %v8294_v49, %v10948_v55  ;;  %8305 = vpow2.f32 %v5924_v4 }
 0x7ca   : > { %v4896_v33 = vadd.f32 -1.135204, %v4832_v61  ;;  %v8296_v41 = vpop.eup %8295  ;;  %v5086_v52 = vmul.f32 %v11036_v2, %v5022_v29  ;;  %v5023_v45 = vadd.f32 0.27886808, %v4959_v54  ;;  %8307 = vrcp.f32 %v4385_v59 }
 0x7cb   : > { %v6294_v27 = vsel %vm6102_vm5, %v6166_v50, %v7115_v30  ;;  %v6167_v24 = vsub.f32 1.0, %v6039_v42  ;;  %v7116_v22 = vadd.f32 -1.0, %v6039_v42  ;;  %v6040_v0 = vmul.f32 %v8296_v41, %v10967_v7 }
 0x7cc   : > { %v6358_v55 = vadd.f32 1.0, %v6294_v27  ;;  %v4960_v39 = vmul.f32 %v11052_v56, %v4896_v33  ;;  %v8298_v26 = vpop.eup %8297  ;;  %v5150_v12 = vadd.f32 -0.18628806, %v5086_v52  ;;  %v5087_v17 = vmul.f32 %v11042_v57, %v5023_v45 }
 0x7cd   : > { %v6295_v14 = vsel %vm6103_vm6, %v6167_v24, %v7116_v22  ;;  %v6168_v36 = vsub.f32 1.0, %v6040_v0  ;;  %v7117_v7 = vadd.f32 -1.0, %v6040_v0  ;;  %v6041_v8 = vmul.f32 %v8298_v26, %v10977_v32 }
 0x7ce   : > { %v11137_v40 = vmul.f32 %v6358_v55, %v10908_v63  ;;  %v6359_v60 = vadd.f32 1.0, %v6295_v14  ;;  %v5214_v21 = vmul.f32 %v11036_v2, %v5150_v12  ;;  %v5024_v51 = vadd.f32 0.27886808, %v4960_v39 }
 0x7cf   : > { %v8300_v34 = vpop.eup %8299  ;;  %v6296_v63 = vsel %vm6104_vm7, %v6168_v36, %v7117_v7  ;;  %v5726_v4 = vsub.f32 0.0, %v10946_v20  ;;  %v11150_v61 = vmul.f32 0.70710677, %v11134_v10  ;;  %v6169_v59 = vsub.f32 1.0, %v6041_v8 }
 0x7d0   : > { %v11144_v49 = vmul.f32 %v6359_v60, %v10919_v11  ;;  %v6360_v32 = vadd.f32 1.0, %v6296_v63  ;;  %v7118_v50 = vadd.f32 -1.0, %v6041_v8  ;;  %v6042_v30 = vmul.f32 %v8300_v34, %v10995_v5 }
 0x7d1   : > { %v8302_v42 = vpop.eup %8301  ;;  %v5278_v29 = vadd.f32 0.09678418, %v5214_v21  ;;  %v5151_v54 = vadd.f32 -0.18628806, %v5087_v17  ;;  %v5088_v11 = vmul.f32 %v11052_v56, %v5024_v51  ;;  %v11156_v53 = vand.u32 2147483647, %v11150_v61  ;;  %v3991_v21 = vpop.f32.mrf.mxu0 }
 0x7d2   : > { %v11159_v33 = vmul.f32 %v6360_v32, %v10921_v62  ;;  %v6297_v18 = vsel %vm6105_vm8, %v6169_v59, %v7118_v50  ;;  %v6170_v41 = vsub.f32 1.0, %v6042_v30  ;;  %v7119_v27 = vadd.f32 -1.0, %v6042_v30 }
 0x7d3   : > { %v6361_v5 = vadd.f32 1.0, %v6297_v18  ;;  %v6043_v24 = vmul.f32 %v8302_v42, %v11004_v31  ;;  %v5342_v22 = vmul.f32 %v11036_v2, %v5278_v29  ;;  %v5215_v52 = vmul.f32 %v11042_v57, %v5151_v54 }
 0x7d4   : > { %v8304_v55 = vpop.eup %8303  ;;  %v6298_v62 = vsel %vm6106_vm9, %v6170_v41, %v7119_v27  ;;  %v5152_v15 = vadd.f32 -0.18628806, %v5088_v11  ;;  %v4322_v45 = vmul.f32 0.5, %v11156_v53  ;;  %v3993_v11 = vpop.f32.mrf.mxu0  ;;  %v5790_v35 = vmul.f32 %v5726_v4, %v10946_v20 }
 0x7d5   : > { %v11173_v39 = vmul.f32 %v6361_v5, %v10938_v9  ;;  %v6362_v26 = vadd.f32 1.0, %v6298_v62  ;;  %v6171_v14 = vsub.f32 1.0, %v6043_v24  ;;  %v7120_v31 = vadd.f32 -1.0, %v6043_v24 }
 0x7d6   : > { %v8306_v12 = vpop.eup %8305  ;;  %v6044_v60 = vmul.f32 %v8304_v55, %v11016_v38  ;;  %v5406_v36 = vadd.f32 0.37409195, %v5342_v22  ;;  %v5279_v7 = vadd.f32 0.09678418, %v5215_v52  ;;  %v5216_v8 = vmul.f32 %v11052_v56, %v5152_v15 }
 0x7d7   : > { %v11178_v48 = vmul.f32 %v6362_v26, %v10950_v43  ;;  %v6299_v17 = vsel %vm6107_vm10, %v6171_v14, %v7120_v31  ;;  %v6045_v9 = vmul.f32 %v8306_v12, %v11022_v6  ;;  %v4386_v51 = vadd.f32 1.0, %v4322_v45  ;;  %v11184_v38 = vpop.eup %8307  ;;  %v3995_v26 = vpop.f32.mrf.mxu0 }
 0x7d8   : > { %v6363_v34 = vadd.f32 1.0, %v6299_v17  ;;  %v6172_v63 = vsub.f32 1.0, %v6044_v60  ;;  %v7121_v32 = vadd.f32 -1.0, %v6044_v60  ;;  %v5470_v59 = vmul.f32 %v11036_v2, %v5406_v36 }
 0x7d9   : > { %13342 = vst [vmem:[#allocation39_spill] sm:$0xff] %v11178_v48  ;;  %v6173_v50 = vsub.f32 1.0, %v6045_v9  ;;  %v7122_v30 = vadd.f32 -1.0, %v6045_v9  ;;  %v5343_v42 = vmul.f32 %v11042_v57, %v5279_v7  ;;  %v5280_v29 = vadd.f32 0.09678418, %v5216_v8 }
 0x7da   : > { %v11188_v43 = vmul.f32 %v6363_v34, %v11107_v47  ;;  %v6300_v25 = vsel %vm6108_vm11, %v6172_v63, %v7121_v32  ;;  %v5534_v6 = vadd.f32 1.0000237, %v5470_v59  ;;  %v4577_v54 = vmul.f32 0.17087276, %v11184_v38 }
 0x7db   : > { %v6364_v18 = vadd.f32 1.0, %v6300_v25  ;;  %v6301_v41 = vsel %vm6109_vm12, %v6173_v50, %v7122_v30  ;;  %v5407_v27 = vadd.f32 0.37409195, %v5343_v42  ;;  %v5344_v5 = vmul.f32 %v11052_v56, %v5280_v29 }
 0x7dc   : > { %13343 = vst [vmem:[#allocation40_spill] sm:$0xff] %v11188_v43  ;;  %v6365_v24 = vadd.f32 1.0, %v6301_v41  ;;  %v5598_v22 = vmul.f32 %v11036_v2, %v5534_v6  ;;  %v4641_v52 = vadd.f32 -0.82215226, %v4577_v54  ;;  %8309 = vrcp.f32 %v4386_v51 }
 0x7dd   : > { %v11198_v47 = vmul.f32 %v6364_v18, %v11115_v28  ;;  %v5471_v58 = vmul.f32 %v11042_v57, %v5407_v27  ;;  %v5408_v55 = vadd.f32 0.37409195, %v5344_v5  ;;  %v5727_v31 = vsub.f32 0.0, %v10962_v16 }
 0x7de   : > { %v11202_v62 = vmul.f32 %v6365_v24, %v11122_v3  ;;  %v5662_v15 = vadd.f32 -1.2655122, %v5598_v22  ;;  %v4705_v45 = vmul.f32 %v11184_v38, %v4641_v52  ;;  %v11211_v12 = vadd.f32 %v3991_v21, %v10858_v46  ;;  %v3999_v21 = vpop.f32.mrf.mxu0 }
 0x7df   : > { %13344 = vst [vmem:[#allocation41_spill] sm:$0xff] %v11198_v47  ;;  %v5535_v14 = vadd.f32 1.0000237, %v5471_v58  ;;  %v5472_v28 = vmul.f32 %v11052_v56, %v5408_v55  ;;  %v11214_v3 = vadd.f32 %v3993_v11, %v10856_v1  ;;  %v5728_v20 = vsub.f32 0.0, %v10993_v19 }
 0x7e0   : > { %13345 = vst [vmem:[#allocation42_spill] sm:$0xff] %v11202_v62  ;;  %v5854_v60 = vadd.f32 %v5790_v35, %v5662_v15  ;;  %v4769_v36 = vadd.f32 1.4885159, %v4705_v45  ;;  %v11219_v4 = vmul.f32 0.70710677, %v11211_v12  ;;  %v5791_v63 = vmul.f32 %v5727_v31, %v10962_v16  ;;  %v4001_v18 = vpop.f32.mrf.mxu0 }
 0x7e1   : > { %v5599_v7 = vmul.f32 %v11042_v57, %v5535_v14  ;;  %v5536_v8 = vadd.f32 1.0000237, %v5472_v28  ;;  %v11223_v51 = vmul.f32 0.70710677, %v11214_v3  ;;  %v11234_v42 = vadd.f32 %v3995_v26, %v10858_v46 }
 0x7e2   : > { %v5926_v17 = vmul.f32 1.442695, %v5854_v60  ;;  %v4833_v9 = vmul.f32 %v11184_v38, %v4769_v36  ;;  %v11228_v59 = vand.u32 2147483647, %v11219_v4  ;;  %v5792_v6 = vmul.f32 %v5728_v20, %v10993_v19  ;;  %v4003_v36 = vpop.f32.mrf.mxu0 }
 0x7e3   : > { %v5663_v34 = vadd.f32 -1.2655122, %v5599_v7  ;;  %v5600_v32 = vmul.f32 %v11052_v56, %v5536_v8  ;;  %v11231_v30 = vand.u32 2147483647, %v11223_v51  ;;  %v11241_v52 = vmul.f32 0.70710677, %v11234_v42 }
 0x7e4   : > { %8311 = vpow2.f32 %v5926_v17  ;;  %v4897_v50 = vadd.f32 -1.135204, %v4833_v9  ;;  %v4323_v54 = vmul.f32 0.5, %v11228_v59  ;;  %v11246_v19 = vadd.f32 %v3999_v21, %v10856_v1 }
 0x7e5   : > { %v5855_v29 = vadd.f32 %v5791_v63, %v5663_v34  ;;  %v5664_v25 = vadd.f32 -1.2655122, %v5600_v32  ;;  %v4324_v11 = vmul.f32 0.5, %v11231_v30  ;;  %v11249_v15 = vadd.f32 %v4001_v18, %v10858_v46  ;;  %v13346_v34 = vld [vmem:[#allocation34_spill] sm:$0xff] }
 0x7e6   : > { %v4961_v16 = vmul.f32 %v11184_v38, %v4897_v50  ;;  %v4387_v5 = vadd.f32 1.0, %v4323_v54  ;;  %v11254_v26 = vand.u32 2147483647, %v11241_v52  ;;  %v11257_v14 = vmul.f32 0.70710677, %v11246_v19  ;;  %v13347_v54 = vld [vmem:[#allocation35_spill] sm:$0xff] }
 0x7e7   : > { %v5928_v41 = vmul.f32 1.442695, %v5855_v29  ;;  %v5856_v27 = vadd.f32 %v5792_v6, %v5664_v25  ;;  %v4388_v22 = vadd.f32 1.0, %v4324_v11  ;;  %v11266_v9 = vmul.f32 0.70710677, %v11249_v15 }
 0x7e8   : > { %v5025_v24 = vadd.f32 0.27886808, %v4961_v16  ;;  %v4325_v60 = vmul.f32 0.5, %v11254_v26  ;;  %v11261_v7 = vand.u32 2147483647, %v11257_v14  ;;  %v4126_v21 = vmul.f32 0.5, %v10917_v37 }
 0x7e9   : > { %v11243_v58 = vpop.eup %8309  ;;  %8313 = vpow2.f32 %v5928_v41  ;;  %v5930_v55 = vmul.f32 1.442695, %v5856_v27  ;;  %vm6110_vm13 = vcmp.ge.f32.partialorder %v13346_v34, 0.0  ;;  %v11272_v32 = vadd.f32 %v4003_v36, %v10856_v1  ;;  %v13348_v27 = vld [vmem:[#allocation36_spill] sm:$0xff] }
 0x7ea   : > { %v5089_v35 = vmul.f32 %v11184_v38, %v5025_v24  ;;  %v4578_v45 = vmul.f32 0.17087276, %v11243_v58  ;;  %8315 = vrcp.f32 %v4387_v5  ;;  %v4389_v17 = vadd.f32 1.0, %v4325_v60 }
 0x7eb   : > { %8317 = vpow2.f32 %v5930_v55  ;;  %v4326_v63 = vmul.f32 0.5, %v11261_v7  ;;  %v11275_v25 = vand.u32 2147483647, %v11266_v9  ;;  %v4127_v16 = vmul.f32 0.5, %v13347_v54  ;;  %v13349_v55 = vld [vmem:[#allocation37_spill] sm:$0xff] }
 0x7ec   : > { %v5153_v31 = vadd.f32 -0.18628806, %v5089_v35  ;;  %v4642_v28 = vadd.f32 -0.82215226, %v4578_v45  ;;  %8319 = vrcp.f32 %v4388_v22  ;;  %v5729_v11 = vsub.f32 0.0, %v11104_v44 }
 0x7ed   : > { %8321 = vrcp.f32 %v4389_v17  ;;  %v5730_v37 = vsub.f32 0.0, %v11156_v53  ;;  %v4390_v18 = vadd.f32 1.0, %v4326_v63  ;;  %vm6111_vm14 = vcmp.ge.f32.partialorder %v13348_v27, 0.0 }
 0x7ee   : > { %v5217_v8 = vmul.f32 %v11184_v38, %v5153_v31  ;;  %v4706_v20 = vmul.f32 %v11243_v58, %v4642_v28  ;;  %v4327_v22 = vmul.f32 0.5, %v11275_v25  ;;  %v4128_v35 = vmul.f32 0.5, %v13349_v55 }
 0x7ef   : > { %v11287_v45 = vmul.f32 0.5, %v11014_v23  ;;  %8323 = vrcp.f32 %v4390_v18  ;;  %v11290_v31 = vmul.f32 0.70710677, %v11272_v32  ;;  %v11295_v17 = vmul.f32 0.5, %v11134_v10  ;;  %v4005_v23 = vpop.f32.mrf.mxu0 }
 0x7f0   : > { %v5281_v50 = vadd.f32 0.09678418, %v5217_v8  ;;  %v4770_v29 = vadd.f32 1.4885159, %v4706_v20  ;;  %v5793_v20 = vmul.f32 %v5729_v11, %v11104_v44  ;;  %v4391_v63 = vadd.f32 1.0, %v4327_v22 }
 0x7f1   : > { %v8312_v6 = vpop.eup %8311  ;;  %vm6113_vm1 = vcmp.ge.f32.partialorder %v11097_v13, 0.0  ;;  %vm6114_vm2 = vcmp.ge.f32.partialorder %v11150_v61, 0.0  ;;  %vm6115_vm3 = vcmp.ge.f32.partialorder %v11219_v4, 0.0  ;;  %vm6116_vm4 = vcmp.ge.f32.partialorder %v11223_v51, 0.0 }
 0x7f2   : > { %v6046_v41 = vmul.f32 %v8312_v6, %v11036_v2  ;;  %v5345_v5 = vmul.f32 %v11184_v38, %v5281_v50  ;;  %v4834_v24 = vmul.f32 %v11243_v58, %v4770_v29  ;;  %v13350_v2 = vld [vmem:[#allocation38_spill] sm:$0xff]  ;;  %v11298_v50 = vand.u32 2147483647, %v11290_v31 }
 0x7f3   : > { %vm6112_vm15 = vcmp.ge.f32.partialorder %v13350_v2, 0.0  ;;  %8325 = vrcp.f32 %v4391_v63  ;;  %vm6117_vm5 = vcmp.ge.f32.partialorder %v11241_v52, 0.0  ;;  %vm6118_vm6 = vcmp.ge.f32.partialorder %v11257_v14, 0.0 }
 0x7f4   : > { %v6174_v28 = vsub.f32 1.0, %v6046_v41  ;;  %v7123_v60 = vadd.f32 -1.0, %v6046_v41  ;;  %v5409_v36 = vadd.f32 0.37409195, %v5345_v5  ;;  %v4898_v8 = vadd.f32 -1.135204, %v4834_v24 }
 0x7f5   : > { %v11305_v41 = vmul.f32 %v5730_v37, %v11156_v53  ;;  %v4328_v5 = vmul.f32 0.5, %v11298_v50  ;;  %vm6119_vm7 = vcmp.ge.f32.partialorder %v11266_v9, 0.0  ;;  %v7940_v9 = vld [vmem:[%s13163_s13 + $0x20] sm:$0xff]   ;;  %vm6120_vm8 = vcmp.ge.f32.partialorder %v11290_v31, 0.0 }
 0x7f6   : > { %v8314_v29 = vpop.eup %8313  ;;  %v6302_v6 = vsel %vm6110_vm13, %v6174_v28, %v7123_v60  ;;  %v5473_v54 = vmul.f32 %v11184_v38, %v5409_v36  ;;  %v4962_v18 = vmul.f32 %v11243_v58, %v4898_v8  ;;  %v11313_v28 = vadd.f32 %v4005_v23, %v10858_v46 }
 0x7f7   : > { %v11307_v44 = vpop.eup %8315  ;;  %v6366_v10 = vadd.f32 1.0, %v6302_v6  ;;  %v6047_v11 = vmul.f32 %v8314_v29, %v11042_v57  ;;  %v4392_v0 = vadd.f32 1.0, %v4328_v5 }
 0x7f8   : > { %v8318_v24 = vpop.eup %8317  ;;  %v5537_v22 = vadd.f32 1.0000237, %v5473_v54  ;;  %v5026_v55 = vadd.f32 0.27886808, %v4962_v18  ;;  %v4579_v34 = vmul.f32 0.17087276, %v11307_v44 }
 0x7f9   : > { %v11315_v60 = vpop.eup %8319  ;;  %v11317_v53 = vmul.f32 %v6366_v10, %v4126_v21  ;;  %v6175_v37 = vsub.f32 1.0, %v6047_v11  ;;  %v7124_v36 = vadd.f32 -1.0, %v6047_v11  ;;  %v6048_v8 = vmul.f32 %v8318_v24, %v11052_v56 }
 0x7fa   : > { %v5601_v57 = vmul.f32 %v11184_v38, %v5537_v22  ;;  %v5090_v63 = vmul.f32 %v11243_v58, %v5026_v55  ;;  %v4643_v29 = vadd.f32 -0.82215226, %v4579_v34  ;;  %v4580_v6 = vmul.f32 0.17087276, %v11315_v60  ;;  %v11326_v48 = vpop.eup %8321 }
 0x7fb   : > { %13351 = vst [vmem:[#allocation34_spill] sm:$0xff] %v11317_v53  ;;  %v6303_v54 = vsel %vm6111_vm14, %v6175_v37, %v7124_v36  ;;  %v6176_v23 = vsub.f32 1.0, %v6048_v8  ;;  %v7125_v18 = vadd.f32 -1.0, %v6048_v8  ;;  %v5731_v24 = vsub.f32 0.0, %v11228_v59 }
 0x7fc   : > { %v6367_v47 = vadd.f32 1.0, %v6303_v54  ;;  %v5665_v21 = vadd.f32 -1.2655122, %v5601_v57  ;;  %v5154_v10 = vadd.f32 -0.18628806, %v5090_v63  ;;  %v4707_v11 = vmul.f32 %v11307_v44, %v4643_v29  ;;  %v11337_v63 = vpop.eup %8323 }
 0x7fd   : > { %v6304_v56 = vsel %vm6112_vm15, %v6176_v23, %v7125_v18  ;;  %v4644_v22 = vadd.f32 -0.82215226, %v4580_v6  ;;  %8327 = vrcp.f32 %v4392_v0  ;;  %v5732_v8 = vsub.f32 0.0, %v11231_v30 }
 0x7fe   : > { %v11331_v55 = vmul.f32 %v6367_v47, %v4127_v16  ;;  %v6368_v27 = vadd.f32 1.0, %v6304_v56  ;;  %v5857_v34 = vadd.f32 %v5793_v20, %v5665_v21  ;;  %v5218_v5 = vmul.f32 %v11243_v58, %v5154_v10 }
 0x7ff   : > { %v4771_v37 = vadd.f32 1.4885159, %v4707_v11  ;;  %v4708_v36 = vmul.f32 %v11315_v60, %v4644_v22  ;;  %v4581_v57 = vmul.f32 0.17087276, %v11326_v48  ;;  %v11342_v0 = vmul.f32 0.70710677, %v11313_v28  ;;  %v4009_v22 = vpop.f32.mrf.mxu0 }
 0x800   : > { %13352 = vst [vmem:[#allocation35_spill] sm:$0xff] %v11331_v55  ;;  %v11339_v2 = vmul.f32 %v6368_v27, %v4128_v35  ;;  %v5932_v29 = vmul.f32 1.442695, %v5857_v34  ;;  %v5282_v6 = vadd.f32 0.09678418, %v5218_v5  ;;  %v11354_v27 = vpop.eup %8325  ;;  %v11357_v5 = vmul.f32 %v5731_v24, %v11228_v59 }
 0x801   : > { %v4835_v47 = vmul.f32 %v11307_v44, %v4771_v37  ;;  %v4772_v16 = vadd.f32 1.4885159, %v4708_v36  ;;  %v4645_v20 = vadd.f32 -0.82215226, %v4581_v57  ;;  %v4582_v54 = vmul.f32 0.17087276, %v11337_v63 }
 0x802   : > { %13353 = vst [vmem:[#allocation36_spill] sm:$0xff] %v11339_v2  ;;  %8329 = vpow2.f32 %v5932_v29  ;;  %v5346_v18 = vmul.f32 %v11243_v58, %v5282_v6  ;;  %v11350_v35 = vand.u32 2147483647, %v11342_v0  ;;  %v11369_v24 = vadd.f32 %v4009_v22, %v10856_v1 }
 0x803   : > { %v4899_v21 = vadd.f32 -1.135204, %v4835_v47  ;;  %v4836_v10 = vmul.f32 %v11315_v60, %v4772_v16  ;;  %v4709_v11 = vmul.f32 %v11326_v48, %v4645_v20  ;;  %v4646_v56 = vadd.f32 -0.82215226, %v4582_v54  ;;  %v7933_v16 = vld [vmem:[%s13163_s13 + $0x78] sm:$0xff]  }
 0x804   : > { %v5410_v34 = vadd.f32 0.37409195, %v5346_v18  ;;  %v4329_v36 = vmul.f32 0.5, %v11350_v35  ;;  %v4583_v54 = vmul.f32 0.17087276, %v11354_v27  ;;  %7416 = vmatprep.subr.bf16.mxu1 %v7933_v16  ;;  %v7934_v16 = vld [vmem:[%s13163_s13 + $0x38] sm:$0xff]  }
 0x805   : > { %v4963_v57 = vmul.f32 %v11307_v44, %v4899_v21  ;;  %v4900_v29 = vadd.f32 -1.135204, %v4836_v10  ;;  %v4773_v6 = vadd.f32 1.4885159, %v4709_v11  ;;  %v4710_v47 = vmul.f32 %v11337_v63, %v4646_v56  ;;  %7417 = vmatpush3.bf16.msra.mxu1 %v7934_v16 }
 0x806   : > { %v5474_v20 = vmul.f32 %v11243_v58, %v5410_v34  ;;  %v4393_v59 = vadd.f32 1.0, %v4329_v36  ;;  %v4647_v37 = vadd.f32 -0.82215226, %v4583_v54  ;;  %vm6121_vm9 = vcmp.ge.f32.partialorder %v11342_v0, 0.0 }
 0x807   : > { %v5027_v18 = vadd.f32 0.27886808, %v4963_v57  ;;  %v4964_v23 = vmul.f32 %v11315_v60, %v4900_v29  ;;  %v4837_v21 = vmul.f32 %v11326_v48, %v4773_v6  ;;  %v4774_v10 = vadd.f32 1.4885159, %v4710_v47 }
 0x808   : > { %v5538_v11 = vadd.f32 1.0000237, %v5474_v20  ;;  %8331 = vrcp.f32 %v4393_v59  ;;  %v4711_v29 = vmul.f32 %v11354_v27, %v4647_v37  ;;  %v11382_v47 = vmul.f32 0.70710677, %v11369_v24 }
 0x809   : > { %v5091_v34 = vmul.f32 %v11307_v44, %v5027_v18  ;;  %v5028_v53 = vadd.f32 0.27886808, %v4964_v23  ;;  %v4901_v2 = vadd.f32 -1.135204, %v4837_v21  ;;  %v4838_v36 = vmul.f32 %v11337_v63, %v4774_v10 }
 0x80a   : > { %v11376_v22 = vpop.eup %8327  ;;  %v5602_v57 = vmul.f32 %v11243_v58, %v5538_v11  ;;  %v11391_v37 = vmul.f32 %v5732_v8, %v11231_v30  ;;  %v4775_v21 = vadd.f32 1.4885159, %v4711_v29  ;;  %vm6122_vm10 = vcmp.ge.f32.partialorder %v11382_v47, 0.0 }
 0x80b   : > { %v5155_v23 = vadd.f32 -0.18628806, %v5091_v34  ;;  %v5092_v20 = vmul.f32 %v11315_v60, %v5028_v53  ;;  %v4965_v54 = vmul.f32 %v11326_v48, %v4901_v2  ;;  %v4902_v59 = vadd.f32 -1.135204, %v4838_v36 }
 0x80c   : > { %v5666_v18 = vadd.f32 -1.2655122, %v5602_v57  ;;  %v4584_v10 = vmul.f32 0.17087276, %v11376_v22  ;;  %v4839_v53 = vmul.f32 %v11354_v27, %v4775_v21  ;;  %v11399_v36 = vand.u32 2147483647, %v11382_v47 }
 0x80d   : > { %v5219_v11 = vmul.f32 %v11307_v44, %v5155_v23  ;;  %v5156_v6 = vadd.f32 -0.18628806, %v5092_v20  ;;  %v5029_v56 = vadd.f32 0.27886808, %v4965_v54  ;;  %v4966_v55 = vmul.f32 %v11337_v63, %v4902_v59 }
 0x80e   : > { %v5858_v34 = vadd.f32 %v11305_v41, %v5666_v18  ;;  %v4648_v2 = vadd.f32 -0.82215226, %v4584_v10  ;;  %v4903_v54 = vadd.f32 -1.135204, %v4839_v53 }
 0x80f   : > { %v8330_v30 = vpop.eup %8329  ;;  %v5283_v8 = vadd.f32 0.09678418, %v5219_v11  ;;  %v5220_v57 = vmul.f32 %v11315_v60, %v5156_v6  ;;  %v5093_v29 = vmul.f32 %v11326_v48, %v5029_v56  ;;  %v5030_v16 = vadd.f32 0.27886808, %v4966_v55  ;;  %v7935_v55 = vld [vmem:[%s13163_s13 + $0x70] sm:$0xff]  }
 0x810   : > { %v6049_v23 = vmul.f32 %v8330_v30, %v11184_v38  ;;  %v5934_v20 = vmul.f32 1.442695, %v5858_v34  ;;  %v4712_v59 = vmul.f32 %v11376_v22, %v4648_v2  ;;  %v4967_v6 = vmul.f32 %v11354_v27, %v4903_v54  ;;  %7418 = vmatprep.subr.bf16.mxu1 %v7935_v55 }
 0x811   : > { %v5347_v41 = vmul.f32 %v11307_v44, %v5283_v8  ;;  %v5284_v18 = vadd.f32 0.09678418, %v5220_v57  ;;  %v5157_v21 = vadd.f32 -0.18628806, %v5093_v29  ;;  %v5094_v10 = vmul.f32 %v11337_v63, %v5030_v16 }
 0x812   : > { %v6177_v62 = vsub.f32 1.0, %v6049_v23  ;;  %v7126_v43 = vadd.f32 -1.0, %v6049_v23  ;;  %8333 = vpow2.f32 %v5934_v20  ;;  %v5031_v2 = vadd.f32 0.27886808, %v4967_v6 }
 0x813   : > { %v5411_v38 = vadd.f32 0.37409195, %v5347_v41  ;;  %v5348_v56 = vmul.f32 %v11315_v60, %v5284_v18  ;;  %v5221_v11 = vmul.f32 %v11326_v48, %v5157_v21  ;;  %v5158_v34 = vadd.f32 -0.18628806, %v5094_v10 }
 0x814   : > { %v6305_v53 = vsel %vm6113_vm1, %v6177_v62, %v7126_v43  ;;  %v4776_v30 = vadd.f32 1.4885159, %v4712_v59  ;;  %v4330_v8 = vmul.f32 0.5, %v11399_v36  ;;  %v5095_v41 = vmul.f32 %v11354_v27, %v5031_v2 }
 0x815   : > { %v11416_v57 = vpop.eup %8331  ;;  %v6369_v29 = vadd.f32 1.0, %v6305_v53  ;;  %v5475_v16 = vmul.f32 %v11307_v44, %v5411_v38  ;;  %v5412_v23 = vadd.f32 0.37409195, %v5348_v56  ;;  %v5285_v20 = vadd.f32 0.09678418, %v5221_v11 }
 0x816   : > { %v5222_v54 = vmul.f32 %v11337_v63, %v5158_v34  ;;  %v4840_v18 = vmul.f32 %v11376_v22, %v4776_v30  ;;  %v4585_v13 = vmul.f32 0.17087276, %v11416_v57  ;;  %v13355_v10 = vsub.f32 0.0, %v11254_v26 }
 0x817   : > { %v11424_v43 = vmul.f32 %v6369_v29, %v11287_v45  ;;  %v5539_v62 = vadd.f32 1.0000237, %v5475_v16  ;;  %v5476_v59 = vmul.f32 %v11315_v60, %v5412_v23  ;;  %v5349_v21 = vmul.f32 %v11326_v48, %v5285_v20 }
 0x818   : > { %v5797_v6 = vmul.f32 %v13355_v10, %v11254_v26  ;;  %v5286_v55 = vadd.f32 0.09678418, %v5222_v54  ;;  %v5159_v38 = vadd.f32 -0.18628806, %v5095_v41  ;;  %v4904_v56 = vadd.f32 -1.135204, %v4840_v18  ;;  %v4011_v41 = vpop.f32.mrf.mxu0 }
 0x819   : > { %13354 = vst [vmem:[#allocation37_spill] sm:$0xff] %v11424_v43  ;;  %v5603_v11 = vmul.f32 %v11307_v44, %v5539_v62  ;;  %v5540_v34 = vadd.f32 1.0000237, %v5476_v59  ;;  %v5413_v53 = vadd.f32 0.37409195, %v5349_v21  ;;  %v4394_v16 = vadd.f32 1.0, %v4330_v8 }
 0x81a   : > { %v4649_v2 = vadd.f32 -0.82215226, %v4585_v13  ;;  %v5350_v45 = vmul.f32 %v11337_v63, %v5286_v55  ;;  %v5223_v30 = vmul.f32 %v11354_v27, %v5159_v38  ;;  %v4968_v29 = vmul.f32 %v11376_v22, %v4904_v56 }
 0x81b   : > { %v5667_v23 = vadd.f32 -1.2655122, %v5603_v11  ;;  %v5604_v26 = vmul.f32 %v11315_v60, %v5540_v34  ;;  %v5477_v20 = vmul.f32 %v11326_v48, %v5413_v53  ;;  %8335 = vrcp.f32 %v4394_v16  ;;  %v7936_v34 = vld [vmem:[%s13163_s13 + $0x30] sm:$0xff]  }
 0x81c   : > { %v4713_v54 = vmul.f32 %v11416_v57, %v4649_v2  ;;  %v5414_v18 = vadd.f32 0.37409195, %v5350_v45  ;;  %v5287_v62 = vadd.f32 0.09678418, %v5223_v30  ;;  %v5032_v13 = vadd.f32 0.27886808, %v4968_v29  ;;  %7419 = vmatpush3.bf16.msra.mxu1 %v7936_v34 }
 0x81d   : > { %v5859_v59 = vadd.f32 %v11357_v5, %v5667_v23  ;;  %v5668_v21 = vadd.f32 -1.2655122, %v5604_v26  ;;  %v5541_v10 = vadd.f32 1.0000237, %v5477_v20  ;;  %v11444_v11 = vadd.f32 %v4011_v41, %v10858_v46 }
 0x81e   : > { %v4777_v55 = vadd.f32 1.4885159, %v4713_v54  ;;  %v5478_v8 = vmul.f32 %v11337_v63, %v5414_v18  ;;  %v5351_v38 = vmul.f32 %v11354_v27, %v5287_v62  ;;  %v5096_v56 = vmul.f32 %v11376_v22, %v5032_v13  ;;  %v4013_v18 = vpop.f32.mrf.mxu0 }
 0x81f   : > { %v8334_v53 = vpop.eup %8333  ;;  %v5936_v2 = vmul.f32 1.442695, %v5859_v59  ;;  %v5860_v5 = vadd.f32 %v11391_v37, %v5668_v21  ;;  %v5605_v45 = vmul.f32 %v11326_v48, %v5541_v10  ;;  %v11467_v61 = vadd.f32 %v4013_v18, %v10856_v1 }
 0x820   : > { %v4841_v30 = vmul.f32 %v11416_v57, %v4777_v55  ;;  %v6050_v29 = vmul.f32 %v8334_v53, %v11243_v58  ;;  %v5542_v16 = vadd.f32 1.0000237, %v5478_v8  ;;  %v5415_v23 = vadd.f32 0.37409195, %v5351_v38 }
 0x821   : > { %v5160_v26 = vadd.f32 -0.18628806, %v5096_v56  ;;  %8337 = vpow2.f32 %v5936_v2  ;;  %v5938_v20 = vmul.f32 1.442695, %v5860_v5  ;;  %v5669_v54 = vadd.f32 -1.2655122, %v5605_v45 }
 0x822   : > { %v4905_v41 = vadd.f32 -1.135204, %v4841_v30  ;;  %v6178_v62 = vsub.f32 1.0, %v6050_v29  ;;  %v7127_v13 = vadd.f32 -1.0, %v6050_v29  ;;  %v5606_v59 = vmul.f32 %v11337_v63, %v5542_v16  ;;  %v4015_v30 = vpop.f32.mrf.mxu0 }
 0x823   : > { %v5479_v37 = vmul.f32 %v11354_v27, %v5415_v23  ;;  %8339 = vpow2.f32 %v5938_v20  ;;  %v5861_v21 = vadd.f32 %v5797_v6, %v5669_v54  ;;  %v5224_v10 = vmul.f32 %v11376_v22, %v5160_v26 }
 0x824   : > { %v4969_v58 = vmul.f32 %v11416_v57, %v4905_v41  ;;  %v6306_v55 = vsel %vm6114_vm2, %v6178_v62, %v7127_v13  ;;  %v5670_v8 = vadd.f32 -1.2655122, %v5606_v59  ;;  %v13356_v38 = vsub.f32 0.0, %v11261_v7 }
 0x825   : > { %v5543_v34 = vadd.f32 1.0000237, %v5479_v37  ;;  %v6370_v53 = vadd.f32 1.0, %v6306_v55  ;;  %v5940_v2 = vmul.f32 1.442695, %v5861_v21  ;;  %v13357_v5 = vsub.f32 0.0, %v11275_v25 }
 0x826   : > { %v5798_v56 = vmul.f32 %v13356_v38, %v11261_v7  ;;  %v5288_v6 = vadd.f32 0.09678418, %v5224_v10  ;;  %v5033_v23 = vadd.f32 0.27886808, %v4969_v58  ;;  %v11474_v20 = vmul.f32 0.70710677, %v11444_v11 }
 0x827   : > { %v5799_v45 = vmul.f32 %v13357_v5, %v11275_v25  ;;  %v5607_v16 = vmul.f32 %v11354_v27, %v5543_v34  ;;  %v11470_v26 = vmul.f32 %v6370_v53, %v11295_v17  ;;  %8341 = vpow2.f32 %v5940_v2  ;;  %v7937_v55 = vld [vmem:[%s13163_s13 + $0x68] sm:$0xff]  }
 0x828   : > { %v5862_v29 = vadd.f32 %v5798_v56, %v5670_v8  ;;  %v5352_v7 = vmul.f32 %v11376_v22, %v5288_v6  ;;  %v5097_v41 = vmul.f32 %v11416_v57, %v5033_v23  ;;  %v11478_v62 = vadd.f32 %v4015_v30, %v10858_v46  ;;  %v11480_v13 = vpop.eup %8335  ;;  %7420 = vmatprep.subr.bf16.mxu1 %v7937_v55 }
 0x829   : > { %13358 = vst [vmem:[#allocation38_spill] sm:$0xff] %v11470_v26  ;;  %v5671_v25 = vadd.f32 -1.2655122, %v5607_v16  ;;  %v4131_v18 = vmul.f32 0.5, %v11211_v12  ;;  %v11484_v17 = vmul.f32 0.5, %v11214_v3  ;;  %v5736_v3 = vsub.f32 0.0, %v11298_v50 }
 0x82a   : > { %v5942_v54 = vmul.f32 1.442695, %v5862_v29  ;;  %v5416_v59 = vadd.f32 0.37409195, %v5352_v7  ;;  %v11487_v37 = vand.u32 2147483647, %v11474_v20 }
 0x82b   : > { %v5863_v21 = vadd.f32 %v5799_v45, %v5671_v25  ;;  %v5161_v10 = vadd.f32 -0.18628806, %v5097_v41  ;;  %v4586_v58 = vmul.f32 0.17087276, %v11480_v13  ;;  %v11498_v38 = vmul.f32 0.70710677, %v11467_v61 }
 0x82c   : > { %8343 = vpow2.f32 %v5942_v54  ;;  %v5480_v12 = vmul.f32 %v11376_v22, %v5416_v59  ;;  %v4331_v8 = vmul.f32 0.5, %v11487_v37  ;;  %v11502_v2 = vmul.f32 0.70710677, %v11478_v62 }
 0x82d   : > { %v5944_v56 = vmul.f32 1.442695, %v5863_v21  ;;  %v5225_v34 = vmul.f32 %v11416_v57, %v5161_v10  ;;  %v4650_v53 = vadd.f32 -0.82215226, %v4586_v58  ;;  %v11506_v6 = vand.u32 2147483647, %v11498_v38 }
 0x82e   : > { %v5544_v5 = vadd.f32 1.0000237, %v5480_v12  ;;  %v4395_v45 = vadd.f32 1.0, %v4331_v8  ;;  %v8338_v30 = vpop.eup %8337  ;;  %v11509_v29 = vmul.f32 0.5, %v11234_v42  ;;  %v5800_v59 = vmul.f32 %v5736_v3, %v11298_v50  ;;  %v7938_v8 = vld [vmem:[%s13163_s13 + $0x28] sm:$0xff]  }
 0x82f   : > { %8345 = vpow2.f32 %v5944_v56  ;;  %v5289_v16 = vadd.f32 0.09678418, %v5225_v34  ;;  %v4714_v23 = vmul.f32 %v11480_v13, %v4650_v53  ;;  %v6051_v7 = vmul.f32 %v8338_v30, %v11307_v44  ;;  %7421 = vmatpush3.bf16.msra.mxu1 %v7938_v8 }
 0x830   : > { %v5608_v54 = vmul.f32 %v11376_v22, %v5544_v5  ;;  %8347 = vrcp.f32 %v4395_v45  ;;  %v4332_v25 = vmul.f32 0.5, %v11506_v6  ;;  %v8340_v41 = vpop.eup %8339  ;;  %v11519_v10 = vand.u32 2147483647, %v11502_v2 }
 0x831   : > { %v5353_v21 = vmul.f32 %v11416_v57, %v5289_v16  ;;  %v4778_v42 = vadd.f32 1.4885159, %v4714_v23  ;;  %v6179_v58 = vsub.f32 1.0, %v6051_v7  ;;  %v7128_v55 = vadd.f32 -1.0, %v6051_v7 }
 0x832   : > { %v6052_v44 = vmul.f32 %v8340_v41, %v11315_v60  ;;  %v5672_v12 = vadd.f32 -1.2655122, %v5608_v54  ;;  %v5737_v34 = vsub.f32 0.0, %v11350_v35  ;;  %v4396_v3 = vadd.f32 1.0, %v4332_v25 }
 0x833   : > { %v5417_v56 = vadd.f32 0.37409195, %v5353_v21  ;;  %v4842_v50 = vmul.f32 %v11480_v13, %v4778_v42  ;;  %v6307_v53 = vsel %vm6115_vm3, %v6179_v58, %v7128_v55  ;;  %v4333_v25 = vmul.f32 0.5, %v11519_v10 }
 0x834   : > { %v6180_v5 = vsub.f32 1.0, %v6052_v44  ;;  %v7129_v45 = vadd.f32 -1.0, %v6052_v44  ;;  %v5864_v30 = vadd.f32 %v5800_v59, %v5672_v12  ;;  %v8342_v16 = vpop.eup %8341  ;;  %v6371_v60 = vadd.f32 1.0, %v6307_v53 }
 0x835   : > { %v5481_v23 = vmul.f32 %v11416_v57, %v5417_v56  ;;  %v4906_v7 = vadd.f32 -1.135204, %v4842_v50  ;;  %8349 = vrcp.f32 %v4396_v3  ;;  %v6053_v41 = vmul.f32 %v8342_v16, %v11326_v48  ;;  %v4019_v56 = vpop.f32.mrf.mxu0 }
 0x836   : > { %v6308_v54 = vsel %vm6116_vm4, %v6180_v5, %v7129_v45  ;;  %v5946_v21 = vmul.f32 1.442695, %v5864_v30  ;;  %v11534_v4 = vmul.f32 %v6371_v60, %v4131_v18  ;;  %v4397_v8 = vadd.f32 1.0, %v4333_v25  ;;  %v7939_v5 = vld [vmem:[%s13163_s13 + $0x60] sm:$0xff]  }
 0x837   : > { %v6372_v42 = vadd.f32 1.0, %v6308_v54  ;;  %v5545_v58 = vadd.f32 1.0000237, %v5481_v23  ;;  %v4970_v59 = vmul.f32 %v11480_v13, %v4906_v7  ;;  %v6181_v44 = vsub.f32 1.0, %v6053_v41  ;;  %v4021_v7 = vpop.f32.mrf.mxu0  ;;  %7422 = vmatprep.subr.bf16.mxu1 %v7939_v5 }
 0x838   : > { %13359 = vst [vmem:[#allocation43_spill] sm:$0xff] %v11534_v4  ;;  %v7130_v12 = vadd.f32 -1.0, %v6053_v41  ;;  %8351 = vpow2.f32 %v5946_v21  ;;  %v4134_v53 = vmul.f32 0.5, %v11246_v19  ;;  %v5801_v52 = vmul.f32 %v5737_v34, %v11350_v35  ;;  %7423 = vmatpush3.bf16.msra.mxu1 %v7940_v9 }
 0x839   : > { %v8344_v55 = vpop.eup %8343  ;;  %v11538_v51 = vmul.f32 %v6372_v42, %v11484_v17  ;;  %v5609_v50 = vmul.f32 %v11416_v57, %v5545_v58  ;;  %v5034_v3 = vadd.f32 0.27886808, %v4970_v59  ;;  %8353 = vrcp.f32 %v4397_v8 }
 0x83a   : > { %v6054_v48 = vmul.f32 %v8344_v55, %v11337_v63  ;;  %v6309_v18 = vsel %vm6117_vm5, %v6181_v44, %v7130_v12  ;;  %v11554_v19 = vadd.f32 %v4019_v56, %v10856_v1  ;;  %v4135_v56 = vmul.f32 0.5, %v11249_v15 }
 0x83b   : > { %13360 = vst [vmem:[#allocation44_spill] sm:$0xff] %v11538_v51  ;;  %v6373_v45 = vadd.f32 1.0, %v6309_v18  ;;  %v5673_v60 = vadd.f32 -1.2655122, %v5609_v50  ;;  %v5098_v23 = vmul.f32 %v11480_v13, %v5034_v3  ;;  %vm6123_vm11 = vcmp.ge.f32.partialorder %v11474_v20, 0.0 }
 0x83c   : > { %v6182_v63 = vsub.f32 1.0, %v6054_v48  ;;  %v7131_v30 = vadd.f32 -1.0, %v6054_v48  ;;  %v8346_v16 = vpop.eup %8345  ;;  %v11567_v44 = vmul.f32 0.70710677, %v11554_v19  ;;  %vm6124_vm12 = vcmp.ge.f32.partialorder %v11498_v38, 0.0 }
 0x83d   : > { %v11556_v54 = vpop.eup %8347  ;;  %v11559_v41 = vmul.f32 %v6373_v45, %v11509_v29  ;;  %v6055_v25 = vmul.f32 %v8346_v16, %v11354_v27  ;;  %v5865_v34 = vadd.f32 %v5801_v52, %v5673_v60  ;;  %v5162_v42 = vadd.f32 -0.18628806, %v5098_v23  ;;  %v4023_v52 = vpop.f32.mrf.mxu0 }
 0x83e   : > { %v6310_v21 = vsel %vm6118_vm6, %v6182_v63, %v7131_v30  ;;  %v4587_v58 = vmul.f32 0.17087276, %v11556_v54  ;;  %v11570_v29 = vadd.f32 %v4021_v7, %v10858_v46  ;;  %v11580_v50 = vand.u32 2147483647, %v11567_v44 }
 0x83f   : > { %13361 = vst [vmem:[#allocation45_spill] sm:$0xff] %v11559_v41  ;;  %v6374_v35 = vadd.f32 1.0, %v6310_v21  ;;  %v6183_v59 = vsub.f32 1.0, %v6055_v25  ;;  %v7132_v55 = vadd.f32 -1.0, %v6055_v25  ;;  %v5948_v14 = vmul.f32 1.442695, %v5865_v34 }
 0x840   : > { %v5226_v27 = vmul.f32 %v11480_v13, %v5162_v42  ;;  %v4651_v8 = vadd.f32 -0.82215226, %v4587_v58  ;;  %v4334_v63 = vmul.f32 0.5, %v11580_v50  ;;  %v11588_v30 = vmul.f32 0.70710677, %v11570_v29 }
 0x841   : > { %v11572_v12 = vmul.f32 %v6374_v35, %v4134_v53  ;;  %v6311_v48 = vsel %vm6119_vm7, %v6183_v59, %v7132_v55  ;;  %8355 = vpow2.f32 %v5948_v14  ;;  %v4136_v35 = vmul.f32 0.5, %v11272_v32 }
 0x842   : > { %v11582_v3 = vpop.eup %8349  ;;  %v6375_v18 = vadd.f32 1.0, %v6311_v48  ;;  %v5290_v53 = vadd.f32 0.09678418, %v5226_v27  ;;  %v4715_v5 = vmul.f32 %v11556_v54, %v4651_v8  ;;  %v4398_v21 = vadd.f32 1.0, %v4334_v63 }
 0x843   : > { %13362 = vst [vmem:[#allocation46_spill] sm:$0xff] %v11572_v12  ;;  %v4588_v45 = vmul.f32 0.17087276, %v11582_v3  ;;  %v11594_v25 = vand.u32 2147483647, %v11588_v30  ;;  %v11604_v27 = vadd.f32 %v4023_v52, %v10856_v1  ;;  %vm6125_vm13 = vcmp.ge.f32.partialorder %v11502_v2, 0.0 }
 0x844   : > { %v11590_v15 = vmul.f32 %v6375_v18, %v4135_v56  ;;  %v5354_v16 = vmul.f32 %v11480_v13, %v5290_v53  ;;  %v4779_v60 = vadd.f32 1.4885159, %v4715_v5  ;;  %8357 = vrcp.f32 %v4398_v21 }
 0x845   : > { %v8352_v23 = vpop.eup %8351  ;;  %v4652_v7 = vadd.f32 -0.82215226, %v4588_v45  ;;  %v4335_v14 = vmul.f32 0.5, %v11594_v25  ;;  %v5738_v45 = vsub.f32 0.0, %v11399_v36  ;;  %v11614_v31 = vmul.f32 0.70710677, %v11604_v27 }
 0x846   : > { %13363 = vst [vmem:[#allocation47_spill] sm:$0xff] %v11590_v15  ;;  %v6056_v34 = vmul.f32 %v8352_v23, %v11376_v22  ;;  %v5418_v42 = vadd.f32 0.37409195, %v5354_v16  ;;  %v4843_v58 = vmul.f32 %v11556_v54, %v4779_v60  ;;  %v11599_v59 = vpop.eup %8353  ;;  %v4025_v16 = vpop.f32.mrf.mxu0  ;;  %vm6126_vm14 = vcmp.ge.f32.partialorder %v11567_v44, 0.0 }
 0x847   : > { %v4716_v55 = vmul.f32 %v11582_v3, %v4652_v7  ;;  %v4589_v48 = vmul.f32 0.17087276, %v11599_v59  ;;  %v4399_v18 = vadd.f32 1.0, %v4335_v14  ;;  %vm6127_vm15 = vcmp.ge.f32.partialorder %v11588_v30, 0.0 }
 0x848   : > { %v6184_v8 = vsub.f32 1.0, %v6056_v34  ;;  %v7133_v9 = vadd.f32 -1.0, %v6056_v34  ;;  %v5482_v56 = vmul.f32 %v11480_v13, %v5418_v42  ;;  %v4907_v32 = vadd.f32 -1.135204, %v4843_v58 }
 0x849   : > { %v4780_v22 = vadd.f32 1.4885159, %v4716_v55  ;;  %v4653_v23 = vadd.f32 -0.82215226, %v4589_v48  ;;  %8359 = vrcp.f32 %v4399_v18  ;;  %v11620_v55 = vadd.f32 %v4025_v16, %v10858_v46 }
 0x84a   : > { %v6312_v53 = vsel %vm6120_vm8, %v6184_v8, %v7133_v9  ;;  %v5546_v5 = vadd.f32 1.0000237, %v5482_v56  ;;  %v4971_v63 = vmul.f32 %v11556_v54, %v4907_v32  ;;  %v5802_v8 = vmul.f32 %v5738_v45, %v11399_v36  ;;  %v7941_v32 = vld [vmem:[%s13163_s13 + $0x58] sm:$0xff]  }
 0x84b   : > { %v6376_v60 = vadd.f32 1.0, %v6312_v53  ;;  %v4844_v52 = vmul.f32 %v11582_v3, %v4780_v22  ;;  %v4717_v58 = vmul.f32 %v11599_v59, %v4653_v23  ;;  %v11625_v56 = vand.u32 2147483647, %v11614_v31  ;;  %7424 = vmatprep.subr.bf16.mxu1 %v7941_v32 }
 0x84c   : > { %v5610_v7 = vmul.f32 %v11480_v13, %v5546_v5  ;;  %v5035_v21 = vadd.f32 0.27886808, %v4971_v63  ;;  %v4137_v63 = vmul.f32 0.5, %v11313_v28  ;;  %v4143_v30 = vmul.f32 0.5, %v11570_v29 }
 0x84d   : > { %v11616_v34 = vmul.f32 %v6376_v60, %v4136_v35  ;;  %v4908_v42 = vadd.f32 -1.135204, %v4844_v52  ;;  %v4781_v18 = vadd.f32 1.4885159, %v4717_v58  ;;  %v4336_v45 = vmul.f32 0.5, %v11625_v56 }
 0x84e   : > { %v5674_v14 = vadd.f32 -1.2655122, %v5610_v7  ;;  %v5099_v9 = vmul.f32 %v11556_v54, %v5035_v21  ;;  %v8356_v35 = vpop.eup %8355  ;;  %v11638_v52 = vmul.f32 0.70710677, %v11620_v55  ;;  %vm6128_vm1 = vcmp.ge.f32.partialorder %v11614_v31, 0.0 }
 0x84f   : > { %13364 = vst [vmem:[#allocation48_spill] sm:$0xff] %v11616_v34  ;;  %v4972_v48 = vmul.f32 %v11582_v3, %v4908_v42  ;;  %v6057_v53 = vmul.f32 %v8356_v35, %v11416_v57  ;;  %v4845_v60 = vmul.f32 %v11599_v59, %v4781_v18 }
 0x850   : > { %v5866_v5 = vadd.f32 %v5802_v8, %v5674_v14  ;;  %v5163_v36 = vadd.f32 -0.18628806, %v5099_v9  ;;  %v4400_v14 = vadd.f32 1.0, %v4336_v45  ;;  %v4029_v8 = vpop.f32.mrf.mxu0  ;;  %v11646_v35 = vand.u32 2147483647, %v11638_v52 }
 0x851   : > { %v5036_v16 = vadd.f32 0.27886808, %v4972_v48  ;;  %v6185_v23 = vsub.f32 1.0, %v6057_v53  ;;  %v7134_v7 = vadd.f32 -1.0, %v6057_v53  ;;  %v4909_v58 = vadd.f32 -1.135204, %v4845_v60  ;;  %v11643_v9 = vpop.eup %8357 }
 0x852   : > { %v5950_v21 = vmul.f32 1.442695, %v5866_v5  ;;  %v5227_v42 = vmul.f32 %v11556_v54, %v5163_v36  ;;  %v7942_v48 = vld [vmem:[%s13163_s13 + $0x18] sm:$0xff]   ;;  %v4590_v5 = vmul.f32 0.17087276, %v11643_v9  ;;  %v4337_v45 = vmul.f32 0.5, %v11646_v35 }
 0x853   : > { %v5100_v57 = vmul.f32 %v11582_v3, %v5036_v16  ;;  %v6313_v28 = vsel %vm6121_vm9, %v6185_v23, %v7134_v7  ;;  %v4973_v0 = vmul.f32 %v11599_v59, %v4909_v58  ;;  %v11656_v16 = vadd.f32 %v4029_v8, %v10856_v1  ;;  %7425 = vmatpush3.bf16.msra.mxu1 %v7942_v48 }
 0x854   : > { %8361 = vpow2.f32 %v5950_v21  ;;  %v5291_v32 = vadd.f32 0.09678418, %v5227_v42  ;;  %v6377_v18 = vadd.f32 1.0, %v6313_v28  ;;  %v4654_v21 = vadd.f32 -0.82215226, %v4590_v5 }
 0x855   : > { %v5164_v53 = vadd.f32 -0.18628806, %v5100_v57  ;;  %8363 = vrcp.f32 %v4400_v14  ;;  %v5037_v7 = vadd.f32 0.27886808, %v4973_v0  ;;  %v11664_v57 = vmul.f32 0.5, %v11369_v24 }
 0x856   : > { %v5355_v36 = vmul.f32 %v11556_v54, %v5291_v32  ;;  %v11658_v60 = vmul.f32 %v6377_v18, %v4137_v63  ;;  %v11661_v42 = vpop.eup %8359  ;;  %v4401_v28 = vadd.f32 1.0, %v4337_v45  ;;  %v4718_v8 = vmul.f32 %v11643_v9, %v4654_v21  ;;  %v4031_v63 = vpop.f32.mrf.mxu0 }
 0x857   : > { %v5228_v23 = vmul.f32 %v11582_v3, %v5164_v53  ;;  %v5101_v32 = vmul.f32 %v11599_v59, %v5037_v7  ;;  %v4591_v48 = vmul.f32 0.17087276, %v11661_v42  ;;  %v5739_v53 = vsub.f32 0.0, %v11487_v37 }
 0x858   : > { %13365 = vst [vmem:[#allocation49_spill] sm:$0xff] %v11658_v60  ;;  %v5419_v58 = vadd.f32 0.37409195, %v5355_v36  ;;  %8365 = vrcp.f32 %v4401_v28  ;;  %v11672_v0 = vmul.f32 0.70710677, %v11656_v16  ;;  %v5740_v7 = vsub.f32 0.0, %v11506_v6 }
 0x859   : > { %v5292_v14 = vadd.f32 0.09678418, %v5228_v23  ;;  %v5165_v5 = vadd.f32 -0.18628806, %v5101_v32  ;;  %v4782_v36 = vadd.f32 1.4885159, %v4718_v8  ;;  %v11680_v22 = vadd.f32 %v4031_v63, %v10858_v46 }
 0x85a   : > { %v5483_v18 = vmul.f32 %v11556_v54, %v5419_v58  ;;  %v4655_v45 = vadd.f32 -0.82215226, %v4591_v48  ;;  %v11677_v21 = vand.u32 2147483647, %v11672_v0  ;;  %v5803_v8 = vmul.f32 %v5739_v53, %v11487_v37  ;;  %v7943_v37 = vld [vmem:[%s13163_s13 + $0x50] sm:$0xff]  }
 0x85b   : > { %v5356_v24 = vmul.f32 %v11582_v3, %v5292_v14  ;;  %v5229_v28 = vmul.f32 %v11599_v59, %v5165_v5  ;;  %v4846_v17 = vmul.f32 %v11643_v9, %v4782_v36  ;;  %v5741_v48 = vsub.f32 0.0, %v11519_v10  ;;  %7426 = vmatprep.subr.bf16.mxu1 %v7943_v37 }
 0x85c   : > { %v5547_v23 = vadd.f32 1.0000237, %v5483_v18  ;;  %v4719_v14 = vmul.f32 %v11661_v42, %v4655_v45  ;;  %v4338_v18 = vmul.f32 0.5, %v11677_v21  ;;  %v5804_v5 = vmul.f32 %v5740_v7, %v11506_v6 }
 0x85d   : > { %v5420_v58 = vadd.f32 0.37409195, %v5356_v24  ;;  %v5293_v12 = vadd.f32 0.09678418, %v5229_v28  ;;  %v4910_v34 = vadd.f32 -1.135204, %v4846_v17 }
 0x85e   : > { %v5611_v32 = vmul.f32 %v11556_v54, %v5547_v23  ;;  %v4783_v26 = vadd.f32 1.4885159, %v4719_v14  ;;  %v4402_v51 = vadd.f32 1.0, %v4338_v18  ;;  %v11693_v36 = vmul.f32 0.70710677, %v11680_v22 }
 0x85f   : > { %v5484_v63 = vmul.f32 %v11582_v3, %v5420_v58  ;;  %v5357_v23 = vmul.f32 %v11599_v59, %v5293_v12  ;;  %v4974_v58 = vmul.f32 %v11643_v9, %v4910_v34  ;;  %vm6129_vm2 = vcmp.ge.f32.partialorder %v11638_v52, 0.0 }
 0x860   : > { %v5675_v24 = vadd.f32 -1.2655122, %v5611_v32  ;;  %v4847_v17 = vmul.f32 %v11661_v42, %v4783_v26  ;;  %8367 = vrcp.f32 %v4402_v51  ;;  %v11703_v6 = vand.u32 2147483647, %v11693_v36 }
 0x861   : > { %v8362_v53 = vpop.eup %8361  ;;  %v5548_v45 = vadd.f32 1.0000237, %v5484_v63  ;;  %v5421_v18 = vadd.f32 0.37409195, %v5357_v23  ;;  %v5038_v63 = vadd.f32 0.27886808, %v4974_v58 }
 0x862   : > { %v6058_v28 = vmul.f32 %v8362_v53, %v11480_v13  ;;  %v5867_v14 = vadd.f32 %v5803_v8, %v5675_v24  ;;  %v11705_v7 = vpop.eup %8363  ;;  %v4911_v60 = vadd.f32 -1.135204, %v4847_v17  ;;  %v4339_v53 = vmul.f32 0.5, %v11703_v6 }
 0x863   : > { %v5612_v32 = vmul.f32 %v11582_v3, %v5548_v45  ;;  %v4592_v26 = vmul.f32 0.17087276, %v11705_v7  ;;  %v5485_v13 = vmul.f32 %v11599_v59, %v5421_v18  ;;  %v5102_v51 = vmul.f32 %v11643_v9, %v5038_v63 }
 0x864   : > { %v6186_v12 = vsub.f32 1.0, %v6058_v28  ;;  %v7135_v15 = vadd.f32 -1.0, %v6058_v28  ;;  %v5952_v34 = vmul.f32 1.442695, %v5867_v14  ;;  %v4975_v8 = vmul.f32 %v11661_v42, %v4911_v60 }
 0x865   : > { %v5676_v41 = vadd.f32 -1.2655122, %v5612_v32  ;;  %v4656_v37 = vadd.f32 -0.82215226, %v4592_v26  ;;  %v11715_v45 = vpop.eup %8365  ;;  %v5549_v17 = vadd.f32 1.0000237, %v5485_v13 }
 0x866   : > { %v6314_v24 = vsel %vm6122_vm10, %v6186_v12, %v7135_v15  ;;  %8369 = vpow2.f32 %v5952_v34  ;;  %v5166_v28 = vadd.f32 -0.18628806, %v5102_v51  ;;  %v5039_v14 = vadd.f32 0.27886808, %v4975_v8 }
 0x867   : > { %v6378_v23 = vadd.f32 1.0, %v6314_v24  ;;  %v5868_v58 = vadd.f32 %v5804_v5, %v5676_v41  ;;  %v4720_v32 = vmul.f32 %v11705_v7, %v4656_v37  ;;  %v4593_v18 = vmul.f32 0.17087276, %v11715_v45  ;;  %v4033_v5 = vpop.f32.mrf.mxu0 }
 0x868   : > { %v4403_v63 = vadd.f32 1.0, %v4339_v53  ;;  %v5613_v15 = vmul.f32 %v11599_v59, %v5549_v17  ;;  %v5230_v12 = vmul.f32 %v11643_v9, %v5166_v28  ;;  %v5103_v34 = vmul.f32 %v11661_v42, %v5039_v14 }
 0x869   : > { %v11720_v60 = vmul.f32 %v6378_v23, %v11664_v57  ;;  %v5954_v47 = vmul.f32 1.442695, %v5868_v58  ;;  %v4784_v26 = vadd.f32 1.4885159, %v4720_v32  ;;  %v4657_v41 = vadd.f32 -0.82215226, %v4593_v18 }
 0x86a   : > { %8371 = vrcp.f32 %v4403_v63  ;;  %v5677_v13 = vadd.f32 -1.2655122, %v5613_v15  ;;  %v5805_v51 = vmul.f32 %v5741_v48, %v11519_v10  ;;  %v5294_v8 = vadd.f32 0.09678418, %v5230_v12  ;;  %v7944_v23 = vld [vmem:[%s13163_s13 + $0x10] sm:$0xff]  }
 0x86b   : > { %13366 = vst [vmem:[#allocation50_spill] sm:$0xff] %v11720_v60  ;;  %8373 = vpow2.f32 %v5954_v47  ;;  %v11727_v24 = vmul.f32 0.5, %v11444_v11  ;;  %v5167_v57 = vadd.f32 -0.18628806, %v5103_v34  ;;  %v4848_v37 = vmul.f32 %v11705_v7, %v4784_v26  ;;  %7427 = vmatpush3.bf16.msra.mxu1 %v7944_v23 }
 0x86c   : > { %v4721_v53 = vmul.f32 %v11715_v45, %v4657_v41  ;;  %v5869_v58 = vadd.f32 %v5805_v51, %v5677_v13  ;;  %v5358_v17 = vmul.f32 %v11643_v9, %v5294_v8  ;;  %v5742_v28 = vsub.f32 0.0, %v11580_v50 }
 0x86d   : > { %v11737_v10 = vadd.f32 %v4033_v5, %v10856_v1  ;;  %v11740_v11 = vmul.f32 0.5, %v11467_v61  ;;  %v5231_v48 = vmul.f32 %v11661_v42, %v5167_v57  ;;  %v4912_v14 = vadd.f32 -1.135204, %v4848_v37  ;;  %v11743_v18 = vpop.eup %8367  ;;  %v4035_v5 = vpop.f32.mrf.mxu0 }
 0x86e   : > { %v4785_v32 = vadd.f32 1.4885159, %v4721_v53  ;;  %v11747_v63 = vmul.f32 0.5, %v11478_v62  ;;  %v5956_v47 = vmul.f32 1.442695, %v5869_v58  ;;  %v5743_v12 = vsub.f32 0.0, %v11594_v25 }
 0x86f   : > { %v5422_v15 = vadd.f32 0.37409195, %v5358_v17  ;;  %v5295_v34 = vadd.f32 0.09678418, %v5231_v48  ;;  %v4976_v61 = vmul.f32 %v11705_v7, %v4912_v14  ;;  %v4594_v41 = vmul.f32 0.17087276, %v11743_v18 }
 0x870   : > { %v4849_v26 = vmul.f32 %v11715_v45, %v4785_v32  ;;  %8375 = vpow2.f32 %v5956_v47  ;;  %v5806_v51 = vmul.f32 %v5742_v28, %v11580_v50  ;;  %v11756_v62 = vmul.f32 0.70710677, %v11737_v10 }
 0x871   : > { %v5486_v13 = vmul.f32 %v11643_v9, %v5422_v15  ;;  %v5359_v8 = vmul.f32 %v11661_v42, %v5295_v34  ;;  %v5040_v57 = vadd.f32 0.27886808, %v4976_v61  ;;  %v4658_v53 = vadd.f32 -0.82215226, %v4594_v41  ;;  %v4039_v15 = vpop.f32.mrf.mxu0 }
 0x872   : > { %v4913_v37 = vadd.f32 -1.135204, %v4849_v26  ;;  %v5807_v17 = vmul.f32 %v5743_v12, %v11594_v25  ;;  %v11762_v14 = vand.u32 2147483647, %v11756_v62  ;;  %v11772_v12 = vadd.f32 %v4035_v5, %v10858_v46 }
 0x873   : > { %v8370_v23 = vpop.eup %8369  ;;  %v5550_v58 = vadd.f32 1.0000237, %v5486_v13  ;;  %v5423_v50 = vadd.f32 0.37409195, %v5359_v8  ;;  %v5104_v28 = vmul.f32 %v11705_v7, %v5040_v57  ;;  %v4722_v61 = vmul.f32 %v11743_v18, %v4658_v53 }
 0x874   : > { %v6059_v32 = vmul.f32 %v8370_v23, %v11556_v54  ;;  %v4977_v47 = vmul.f32 %v11715_v45, %v4913_v37  ;;  %v4340_v25 = vmul.f32 0.5, %v11762_v14  ;;  %v11778_v48 = vadd.f32 %v4039_v15, %v10856_v1 }
 0x875   : > { %v5614_v34 = vmul.f32 %v11643_v9, %v5550_v58  ;;  %v5487_v54 = vmul.f32 %v11661_v42, %v5423_v50  ;;  %v5168_v13 = vadd.f32 -0.18628806, %v5104_v28  ;;  %v4786_v37 = vadd.f32 1.4885159, %v4722_v61  ;;  %v7945_v50 = vld [vmem:[%s13163_s13 + $0x48] sm:$0xff]  }
 0x876   : > { %v6187_v26 = vsub.f32 1.0, %v6059_v32  ;;  %v7136_v41 = vadd.f32 -1.0, %v6059_v32  ;;  %v5041_v23 = vadd.f32 0.27886808, %v4977_v47  ;;  %7428 = vmatprep.subr.bf16.mxu1 %v7945_v50  ;;  %v4146_v52 = vmul.f32 0.5, %v11656_v16 }
 0x877   : > { %v11775_v8 = vpop.eup %8371  ;;  %v5678_v57 = vadd.f32 -1.2655122, %v5614_v34  ;;  %v5551_v4 = vadd.f32 1.0000237, %v5487_v54  ;;  %v5232_v5 = vmul.f32 %v11705_v7, %v5168_v13  ;;  %vm6130_vm3 = vcmp.ge.f32.partialorder %v11672_v0, 0.0 }
 0x878   : > { %v8374_v58 = vpop.eup %8373  ;;  %v6315_v53 = vsel %vm6123_vm11, %v6187_v26, %v7136_v41  ;;  %v4595_v32 = vmul.f32 0.17087276, %v11775_v8  ;;  %v5105_v15 = vmul.f32 %v11715_v45, %v5041_v23  ;;  %v4850_v26 = vmul.f32 %v11743_v18, %v4786_v37 }
 0x879   : > { %v6379_v28 = vadd.f32 1.0, %v6315_v53  ;;  %v6060_v47 = vmul.f32 %v8374_v58, %v11582_v3  ;;  %v5870_v34 = vadd.f32 %v5806_v51, %v5678_v57  ;;  %v5615_v20 = vmul.f32 %v11661_v42, %v5551_v4  ;;  %v7946_v3 = vld [vmem:[%s13163_s13 + $0x8] sm:$0xff]  }
 0x87a   : > { %v5296_v61 = vadd.f32 0.09678418, %v5232_v5  ;;  %v4659_v41 = vadd.f32 -0.82215226, %v4595_v32  ;;  %v5169_v23 = vadd.f32 -0.18628806, %v5105_v15  ;;  %7429 = vmatpush3.bf16.msra.mxu1 %v7946_v3 }
 0x87b   : > { %v11793_v54 = vmul.f32 %v6379_v28, %v11727_v24  ;;  %v6188_v13 = vsub.f32 1.0, %v6060_v47  ;;  %v7137_v43 = vadd.f32 -1.0, %v6060_v47  ;;  %v5958_v53 = vmul.f32 1.442695, %v5870_v34 }
 0x87c   : > { %v5679_v51 = vadd.f32 -1.2655122, %v5615_v20  ;;  %v5360_v57 = vmul.f32 %v11705_v7, %v5296_v61  ;;  %v4914_v4 = vadd.f32 -1.135204, %v4850_v26  ;;  %v4723_v58 = vmul.f32 %v11775_v8, %v4659_v41 }
 0x87d   : > { %v6316_v37 = vsel %vm6124_vm12, %v6188_v13, %v7137_v43  ;;  %8377 = vpow2.f32 %v5958_v53  ;;  %v4404_v24 = vadd.f32 1.0, %v4340_v25  ;;  %v8376_v5 = vpop.eup %8375  ;;  %v5233_v47 = vmul.f32 %v11715_v45, %v5169_v23 }
 0x87e   : > { %v6380_v32 = vadd.f32 1.0, %v6316_v37  ;;  %v5871_v50 = vadd.f32 %v5807_v17, %v5679_v51  ;;  %v5424_v28 = vadd.f32 0.37409195, %v5360_v57  ;;  %v6061_v34 = vmul.f32 %v8376_v5, %v11599_v59 }
 0x87f   : > { %v4978_v20 = vmul.f32 %v11743_v18, %v4914_v4  ;;  %v4787_v15 = vadd.f32 1.4885159, %v4723_v58  ;;  %8379 = vrcp.f32 %v4404_v24  ;;  %v5297_v25 = vadd.f32 0.09678418, %v5233_v47 }
 0x880   : > { %v11806_v38 = vmul.f32 %v6380_v32, %v11740_v11  ;;  %v5960_v43 = vmul.f32 1.442695, %v5871_v50  ;;  %v5488_v61 = vmul.f32 %v11705_v7, %v5424_v28  ;;  %v6189_v26 = vsub.f32 1.0, %v6061_v34  ;;  %v7947_v11 = vld [vmem:[%s13163_s13 + $0x40] sm:$0xff]  }
 0x881   : > { %v7138_v41 = vadd.f32 -1.0, %v6061_v34  ;;  %v5042_v13 = vadd.f32 0.27886808, %v4978_v20  ;;  %v4851_v17 = vmul.f32 %v11775_v8, %v4787_v15  ;;  %v5361_v3 = vmul.f32 %v11715_v45, %v5297_v25  ;;  %7430 = vmatprep.subr.bf16.mxu1 %v7947_v11 }
 0x882   : > { %13367 = vst [vmem:[#allocation51_spill] sm:$0xff] %v11806_v38  ;;  %8381 = vpow2.f32 %v5960_v43  ;;  %v5552_v59 = vadd.f32 1.0000237, %v5488_v61  ;;  %v11820_v4 = vmul.f32 0.70710677, %v11772_v12  ;;  %v13368_v32 = vsub.f32 0.0, %v11625_v56 }
 0x883   : > { %v6317_v51 = vsel %vm6125_vm13, %v6189_v26, %v7138_v41  ;;  %v5106_v57 = vmul.f32 %v11743_v18, %v5042_v13  ;;  %v4915_v23 = vadd.f32 -1.135204, %v4851_v17  ;;  %v5425_v24 = vadd.f32 0.37409195, %v5361_v3 }
 0x884   : > { %v6381_v37 = vadd.f32 1.0, %v6317_v51  ;;  %v5616_v58 = vmul.f32 %v11705_v7, %v5552_v59  ;;  %v11824_v5 = vmul.f32 0.70710677, %v11778_v48  ;;  %v5808_v50 = vmul.f32 %v13368_v32, %v11625_v56  ;;  %v4041_v51 = vpop.f32.mrf.mxu0 }
 0x885   : > { %v5170_v2 = vadd.f32 -0.18628806, %v5106_v57  ;;  %v4979_v28 = vmul.f32 %v11775_v8, %v4915_v23  ;;  %v11831_v47 = vand.u32 2147483647, %v11820_v4  ;;  %v5489_v15 = vmul.f32 %v11715_v45, %v5425_v24 }
 0x886   : > { %v11834_v34 = vmul.f32 %v6381_v37, %v11747_v63  ;;  %v5680_v20 = vadd.f32 -1.2655122, %v5616_v58  ;;  %v11838_v43 = vand.u32 2147483647, %v11824_v5  ;;  %v5745_v13 = vsub.f32 0.0, %v11646_v35 }
 0x887   : > { %v5234_v61 = vmul.f32 %v11743_v18, %v5170_v2  ;;  %v5043_v25 = vadd.f32 0.27886808, %v4979_v28  ;;  %v4341_v56 = vmul.f32 0.5, %v11831_v47  ;;  %v5553_v41 = vadd.f32 1.0000237, %v5489_v15 }
 0x888   : > { %v5872_v26 = vadd.f32 %v5808_v50, %v5680_v20  ;;  %v4342_v17 = vmul.f32 0.5, %v11838_v43  ;;  %v4142_v63 = vmul.f32 0.5, %v11554_v19  ;;  %v7948_v19 = vld [vmem:[%s13163_s13] sm:$0xff]   ;;  %v5809_v20 = vmul.f32 %v5745_v13, %v11646_v35 }
 0x889   : > { %v5298_v59 = vadd.f32 0.09678418, %v5234_v61  ;;  %v5107_v3 = vmul.f32 %v11775_v8, %v5043_v25  ;;  %v4405_v11 = vadd.f32 1.0, %v4341_v56  ;;  %v5617_v37 = vmul.f32 %v11715_v45, %v5553_v41  ;;  %7431 = vmatpush3.bf16.msra.mxu1 %v7948_v19 }
 0x88a   : > { %v8378_v57 = vpop.eup %8377  ;;  %v5962_v23 = vmul.f32 1.442695, %v5872_v26  ;;  %v4406_v58 = vadd.f32 1.0, %v4342_v17  ;;  %v11857_v15 = vadd.f32 %v4041_v51, %v10858_v46  ;;  %v5746_v41 = vsub.f32 0.0, %v11677_v21  ;;  %v4043_v51 = vpop.f32.mrf.mxu0 }
 0x88b   : > { %v6062_v24 = vmul.f32 %v8378_v57, %v11643_v9  ;;  %v5362_v32 = vmul.f32 %v11743_v18, %v5298_v59  ;;  %v5171_v50 = vadd.f32 -0.18628806, %v5107_v3  ;;  %8383 = vrcp.f32 %v4405_v11 }
 0x88c   : > { %v11853_v2 = vpop.eup %8379  ;;  %8385 = vpow2.f32 %v5962_v23  ;;  %v5681_v28 = vadd.f32 -1.2655122, %v5617_v37  ;;  %v11866_v11 = vmul.f32 0.70710677, %v11857_v15  ;;  %vm6131_vm4 = vcmp.ge.f32.partialorder %v11693_v36, 0.0 }
 0x88d   : > { %v6190_v61 = vsub.f32 1.0, %v6062_v24  ;;  %v7139_v25 = vadd.f32 -1.0, %v6062_v24  ;;  %v5426_v9 = vadd.f32 0.37409195, %v5362_v32  ;;  %v5235_v56 = vmul.f32 %v11775_v8, %v5171_v50 }
 0x88e   : > { %v5873_v26 = vadd.f32 %v5809_v20, %v5681_v28  ;;  %v4596_v17 = vmul.f32 0.17087276, %v11853_v2  ;;  %8387 = vrcp.f32 %v4406_v58  ;;  %v11872_v44 = vand.u32 2147483647, %v11866_v11 }
 0x88f   : > { %v8382_v59 = vpop.eup %8381  ;;  %v6318_v3 = vsel %vm6126_vm14, %v6190_v61, %v7139_v25  ;;  %v5490_v35 = vmul.f32 %v11743_v18, %v5426_v9  ;;  %v5299_v13 = vadd.f32 0.09678418, %v5235_v56  ;;  %v4045_v9 = vpop.f32.mrf.mxu0  ;;  %vm6132_vm5 = vcmp.ge.f32.partialorder %v11756_v62, 0.0 }
 0x890   : > { %v6382_v57 = vadd.f32 1.0, %v6318_v3  ;;  %v6063_v23 = vmul.f32 %v8382_v59, %v11661_v42  ;;  %v5964_v37 = vmul.f32 1.442695, %v5873_v26  ;;  %v4660_v24 = vadd.f32 -0.82215226, %v4596_v17 }
 0x891   : > { %v5554_v32 = vadd.f32 1.0000237, %v5490_v35  ;;  %v5363_v58 = vmul.f32 %v11775_v8, %v5299_v13  ;;  %v4343_v25 = vmul.f32 0.5, %v11872_v44  ;;  %v5810_v26 = vmul.f32 %v5746_v41, %v11677_v21 }
 0x892   : > { %v11874_v50 = vmul.f32 %v6382_v57, %v4142_v63  ;;  %v6191_v19 = vsub.f32 1.0, %v6063_v23  ;;  %v7140_v28 = vadd.f32 -1.0, %v6063_v23  ;;  %8389 = vpow2.f32 %v5964_v37 }
 0x893   : > { %v5618_v20 = vmul.f32 %v11743_v18, %v5554_v32  ;;  %v5427_v61 = vadd.f32 0.37409195, %v5363_v58  ;;  %v4724_v42 = vmul.f32 %v11853_v2, %v4660_v24  ;;  %v11882_v17 = vadd.f32 %v4043_v51, %v10856_v1 }
 0x894   : > { %13369 = vst [vmem:[#allocation52_spill] sm:$0xff] %v11874_v50  ;;  %v6319_v56 = vsel %vm6127_vm15, %v6191_v19, %v7140_v28  ;;  %v5747_v13 = vsub.f32 0.0, %v11703_v6  ;;  %v4407_v57 = vadd.f32 1.0, %v4343_v25  ;;  %v11890_v37 = vadd.f32 %v4045_v9, %v10858_v46 }
 0x895   : > { %v6383_v63 = vadd.f32 1.0, %v6319_v56  ;;  %v5682_v59 = vadd.f32 -1.2655122, %v5618_v20  ;;  %v5491_v3 = vmul.f32 %v11775_v8, %v5427_v61  ;;  %v4788_v35 = vadd.f32 1.4885159, %v4724_v42 }
 0x896   : > { %v11887_v23 = vmul.f32 0.70710677, %v11882_v17  ;;  %v4144_v32 = vmul.f32 0.5, %v11604_v27  ;;  %8391 = vrcp.f32 %v4407_v57  ;;  %v5811_v9 = vmul.f32 %v5747_v13, %v11703_v6 }
 0x897   : > { %v11892_v29 = vmul.f32 %v6383_v63, %v4143_v30  ;;  %v5874_v21 = vadd.f32 %v5810_v26, %v5682_v59  ;;  %v5555_v41 = vadd.f32 1.0000237, %v5491_v3  ;;  %v4852_v51 = vmul.f32 %v11853_v2, %v4788_v35 }
 0x898   : > { %v11895_v24 = vpop.eup %8383  ;;  %v11899_v58 = vand.u32 2147483647, %v11887_v23  ;;  %v11907_v56 = vmul.f32 0.70710677, %v11890_v37  ;;  %vm6133_vm6 = vcmp.ge.f32.partialorder %v11820_v4, 0.0  ;;  %vm6134_vm7 = vcmp.ge.f32.partialorder %v11824_v5, 0.0 }
 0x899   : > { %v8386_v19 = vpop.eup %8385  ;;  %v5966_v28 = vmul.f32 1.442695, %v5874_v21  ;;  %v5619_v20 = vmul.f32 %v11775_v8, %v5555_v41  ;;  %v4916_v61 = vadd.f32 -1.135204, %v4852_v51  ;;  %v4597_v42 = vmul.f32 0.17087276, %v11895_v24 }
 0x89a   : > { %v6064_v25 = vmul.f32 %v8386_v19, %v11705_v7  ;;  %v4344_v30 = vmul.f32 0.5, %v11899_v58  ;;  %v11916_v19 = vand.u32 2147483647, %v11907_v56  ;;  %vm6135_vm8 = vcmp.ge.f32.partialorder %v11866_v11, 0.0 }
 0x89b   : > { %v11909_v27 = vpop.eup %8387  ;;  %8393 = vpow2.f32 %v5966_v28  ;;  %v5683_v26 = vadd.f32 -1.2655122, %v5619_v20  ;;  %v4980_v63 = vmul.f32 %v11853_v2, %v4916_v61  ;;  %v4661_v59 = vadd.f32 -0.82215226, %v4597_v42 }
 0x89c   : > { %v6192_v3 = vsub.f32 1.0, %v6064_v25  ;;  %v7141_v35 = vadd.f32 -1.0, %v6064_v25  ;;  %v4598_v57 = vmul.f32 0.17087276, %v11909_v27  ;;  %v4408_v21 = vadd.f32 1.0, %v4344_v30 }
 0x89d   : > { %v5875_v6 = vadd.f32 %v5811_v9, %v5683_v26  ;;  %v5044_v7 = vadd.f32 0.27886808, %v4980_v63  ;;  %v4725_v13 = vmul.f32 %v11895_v24, %v4661_v59  ;;  %v4345_v9 = vmul.f32 0.5, %v11916_v19 }
 0x89e   : > { %v6320_v41 = vsel %vm6128_vm1, %v6192_v3, %v7141_v35  ;;  %v4662_v51 = vadd.f32 -0.82215226, %v4598_v57  ;;  %8395 = vrcp.f32 %v4408_v21  ;;  %vm6136_vm9 = vcmp.ge.f32.partialorder %v11887_v23, 0.0 }
 0x89f   : > { %v8390_v28 = vpop.eup %8389  ;;  %v6384_v20 = vadd.f32 1.0, %v6320_v41  ;;  %v5968_v61 = vmul.f32 1.442695, %v5875_v6  ;;  %v5108_v42 = vmul.f32 %v11853_v2, %v5044_v7  ;;  %v4789_v25 = vadd.f32 1.4885159, %v4725_v13  ;;  %v4049_v6 = vpop.f32.mrf.mxu0 }
 0x8a0   : > { %v6065_v30 = vmul.f32 %v8390_v28, %v11715_v45  ;;  %v4726_v31 = vmul.f32 %v11909_v27, %v4662_v51  ;;  %v4409_v21 = vadd.f32 1.0, %v4345_v9  ;;  %vm6137_vm10 = vcmp.ge.f32.partialorder %v11907_v56, 0.0 }
 0x8a1   : > { %v11922_v26 = vmul.f32 %v6384_v20, %v4144_v32  ;;  %8397 = vpow2.f32 %v5968_v61  ;;  %v5172_v63 = vadd.f32 -0.18628806, %v5108_v42  ;;  %v4853_v59 = vmul.f32 %v11895_v24, %v4789_v25  ;;  %v4051_v9 = vpop.f32.mrf.mxu0 }
 0x8a2   : > { %v6193_v3 = vsub.f32 1.0, %v6065_v30  ;;  %v7142_v35 = vadd.f32 -1.0, %v6065_v30  ;;  %v4790_v57 = vadd.f32 1.4885159, %v4726_v31  ;;  %v4145_v32 = vmul.f32 0.5, %v11620_v55 }
 0x8a3   : > { %13370 = vst [vmem:[#allocation53_spill] sm:$0xff] %v11922_v26  ;;  %v5236_v45 = vmul.f32 %v11853_v2, %v5172_v63  ;;  %v4917_v13 = vadd.f32 -1.135204, %v4853_v59  ;;  %8399 = vrcp.f32 %v4409_v21  ;;  %v11931_v28 = vpop.eup %8391  ;;  %v11935_v25 = vadd.f32 %v4049_v6, %v10856_v1 }
 0x8a4   : > { %v6321_v41 = vsel %vm6129_vm2, %v6193_v3, %v7142_v35  ;;  %v4854_v51 = vmul.f32 %v11909_v27, %v4790_v57  ;;  %v5748_v30 = vsub.f32 0.0, %v11762_v14  ;;  %v4599_v55 = vmul.f32 0.17087276, %v11931_v28 }
 0x8a5   : > { %v6385_v20 = vadd.f32 1.0, %v6321_v41  ;;  %v5300_v61 = vadd.f32 0.09678418, %v5236_v45  ;;  %v4981_v42 = vmul.f32 %v11895_v24, %v4917_v13  ;;  %v4147_v57 = vmul.f32 0.5, %v11680_v22 }
 0x8a6   : > { %v4918_v31 = vadd.f32 -1.135204, %v4854_v51  ;;  %v4663_v6 = vadd.f32 -0.82215226, %v4599_v55  ;;  %v11947_v16 = vmul.f32 0.70710677, %v11935_v25  ;;  %v11952_v41 = vadd.f32 %v4051_v9, %v10858_v46 }
 0x8a7   : > { %v11940_v63 = vmul.f32 %v6385_v20, %v4145_v32  ;;  %v5364_v59 = vmul.f32 %v11853_v2, %v5300_v61  ;;  %v5045_v3 = vadd.f32 0.27886808, %v4981_v42  ;;  %v5812_v51 = vmul.f32 %v5748_v30, %v11762_v14 }
 0x8a8   : > { %v8394_v35 = vpop.eup %8393  ;;  %v4982_v21 = vmul.f32 %v11909_v27, %v4918_v31  ;;  %v4727_v22 = vmul.f32 %v11931_v28, %v4663_v6  ;;  %v11958_v61 = vand.u32 2147483647, %v11947_v16  ;;  %v11970_v7 = vmul.f32 0.70710677, %v11952_v41 }
 0x8a9   : > { %13371 = vst [vmem:[#allocation54_spill] sm:$0xff] %v11940_v63  ;;  %v6066_v45 = vmul.f32 %v8394_v35, %v11743_v18  ;;  %v5428_v13 = vadd.f32 0.37409195, %v5364_v59  ;;  %v5109_v32 = vmul.f32 %v11895_v24, %v5045_v3  ;;  %vm6138_vm11 = vcmp.ge.f32.partialorder %v11947_v16, 0.0 }
 0x8aa   : > { %v5046_v20 = vadd.f32 0.27886808, %v4982_v21  ;;  %v4791_v3 = vadd.f32 1.4885159, %v4727_v22  ;;  %v4346_v14 = vmul.f32 0.5, %v11958_v61  ;;  %vm6139_vm12 = vcmp.ge.f32.partialorder %v11970_v7, 0.0 }
 0x8ab   : > { %v11960_v42 = vpop.eup %8395  ;;  %v6194_v31 = vsub.f32 1.0, %v6066_v45  ;;  %v7143_v18 = vadd.f32 -1.0, %v6066_v45  ;;  %v5492_v55 = vmul.f32 %v11853_v2, %v5428_v13  ;;  %v5173_v59 = vadd.f32 -0.18628806, %v5109_v32 }
 0x8ac   : > { %v5110_v9 = vmul.f32 %v11909_v27, %v5046_v20  ;;  %v4600_v35 = vmul.f32 0.17087276, %v11960_v42  ;;  %v4855_v32 = vmul.f32 %v11931_v28, %v4791_v3  ;;  %v4410_v60 = vadd.f32 1.0, %v4346_v14 }
 0x8ad   : > { %v6322_v30 = vsel %vm6130_vm3, %v6194_v31, %v7143_v18  ;;  %v5556_v21 = vadd.f32 1.0000237, %v5492_v55  ;;  %v5237_v6 = vmul.f32 %v11895_v24, %v5173_v59 }
 0x8ae   : > { %v8398_v45 = vpop.eup %8397  ;;  %v6386_v53 = vadd.f32 1.0, %v6322_v30  ;;  %v5174_v13 = vadd.f32 -0.18628806, %v5110_v9  ;;  %v4664_v20 = vadd.f32 -0.82215226, %v4600_v35  ;;  %8401 = vrcp.f32 %v4410_v60 }
 0x8af   : > { %v6067_v22 = vmul.f32 %v8398_v45, %v11775_v8  ;;  %v5620_v50 = vmul.f32 %v11853_v2, %v5556_v21  ;;  %v5301_v26 = vadd.f32 0.09678418, %v5237_v6  ;;  %v4919_v18 = vadd.f32 -1.135204, %v4855_v32 }
 0x8b0   : > { %v11975_v0 = vmul.f32 %v6386_v53, %v4146_v52  ;;  %v5238_v31 = vmul.f32 %v11909_v27, %v5174_v13  ;;  %v4728_v55 = vmul.f32 %v11960_v42, %v4664_v20  ;;  %v11979_v59 = vpop.eup %8399 }
 0x8b1   : > { %v6195_v30 = vsub.f32 1.0, %v6067_v22  ;;  %v7144_v9 = vadd.f32 -1.0, %v6067_v22  ;;  %v5684_v38 = vadd.f32 -1.2655122, %v5620_v50  ;;  %v5365_v3 = vmul.f32 %v11895_v24, %v5301_v26 }
 0x8b2   : > { %13372 = vst [vmem:[#allocation55_spill] sm:$0xff] %v11975_v0  ;;  %v5302_v35 = vadd.f32 0.09678418, %v5238_v31  ;;  %v4983_v8 = vmul.f32 %v11931_v28, %v4919_v18  ;;  %v4792_v21 = vadd.f32 1.4885159, %v4728_v55  ;;  %v5749_v22 = vsub.f32 0.0, %v11831_v47  ;;  %v4053_v18 = vpop.f32.mrf.mxu0 }
 0x8b3   : > { %v4601_v14 = vmul.f32 0.17087276, %v11979_v59  ;;  %v6323_v53 = vsel %vm6131_vm4, %v6195_v30, %v7144_v9  ;;  %v5876_v52 = vadd.f32 %v5812_v51, %v5684_v38  ;;  %v5429_v6 = vadd.f32 0.37409195, %v5365_v3 }
 0x8b4   : > { %v6387_v45 = vadd.f32 1.0, %v6323_v53  ;;  %v5366_v13 = vmul.f32 %v11909_v27, %v5302_v35  ;;  %v5047_v32 = vadd.f32 0.27886808, %v4983_v8  ;;  %v4856_v50 = vmul.f32 %v11960_v42, %v4792_v21 }
 0x8b5   : > { %v5970_v20 = vmul.f32 1.442695, %v5876_v52  ;;  %v5493_v26 = vmul.f32 %v11895_v24, %v5429_v6  ;;  %v4665_v31 = vadd.f32 -0.82215226, %v4601_v14  ;;  %v11995_v9 = vand.u32 2147483647, %v11970_v7 }
 0x8b6   : > { %v11990_v55 = vmul.f32 %v6387_v45, %v4147_v57  ;;  %v5430_v36 = vadd.f32 0.37409195, %v5366_v13  ;;  %v5111_v38 = vmul.f32 %v11931_v28, %v5047_v32  ;;  %v4920_v51 = vadd.f32 -1.135204, %v4856_v50 }
 0x8b7   : > { %8403 = vpow2.f32 %v5970_v20  ;;  %v5557_v60 = vadd.f32 1.0000237, %v5493_v26  ;;  %v4729_v30 = vmul.f32 %v11979_v59, %v4665_v31  ;;  %v12000_v21 = vadd.f32 %v4053_v18, %v10856_v1 }
 0x8b8   : > { %13373 = vst [vmem:[#allocation56_spill] sm:$0xff] %v11990_v55  ;;  %v5494_v3 = vmul.f32 %v11909_v27, %v5430_v36  ;;  %v5175_v35 = vadd.f32 -0.18628806, %v5111_v38  ;;  %v4984_v8 = vmul.f32 %v11960_v42, %v4920_v51  ;;  %v5750_v14 = vsub.f32 0.0, %v11838_v43 }
 0x8b9   : > { %v5621_v57 = vmul.f32 %v11895_v24, %v5557_v60  ;;  %v4793_v53 = vadd.f32 1.4885159, %v4729_v30  ;;  %v4347_v52 = vmul.f32 0.5, %v11995_v9  ;;  %v12006_v6 = vmul.f32 0.5, %v11737_v10  ;;  %v4055_v10 = vpop.f32.mrf.mxu0 }
 0x8ba   : > { %v5558_v45 = vadd.f32 1.0000237, %v5494_v3  ;;  %v5239_v13 = vmul.f32 %v11931_v28, %v5175_v35  ;;  %v5048_v32 = vadd.f32 0.27886808, %v4984_v8  ;;  %v5813_v20 = vmul.f32 %v5749_v22, %v11831_v47 }
 0x8bb   : > { %v5685_v50 = vadd.f32 -1.2655122, %v5621_v57  ;;  %v4857_v26 = vmul.f32 %v11979_v59, %v4793_v53  ;;  %v4411_v31 = vadd.f32 1.0, %v4347_v52  ;;  %v12014_v51 = vmul.f32 0.70710677, %v12000_v21 }
 0x8bc   : > { %v5622_v18 = vmul.f32 %v11909_v27, %v5558_v45  ;;  %v5303_v36 = vadd.f32 0.09678418, %v5239_v13  ;;  %v5112_v38 = vmul.f32 %v11960_v42, %v5048_v32  ;;  %v5814_v30 = vmul.f32 %v5750_v14, %v11838_v43  ;;  %v12028_v13 = vpop.eup %8401 }
 0x8bd   : > { %v5877_v60 = vadd.f32 %v5813_v20, %v5685_v50  ;;  %v4921_v3 = vadd.f32 -1.135204, %v4857_v26  ;;  %8405 = vrcp.f32 %v4411_v31  ;;  %v12019_v8 = vand.u32 2147483647, %v12014_v51 }
 0x8be   : > { %v5686_v35 = vadd.f32 -1.2655122, %v5622_v18  ;;  %v5367_v47 = vmul.f32 %v11931_v28, %v5303_v36  ;;  %v5176_v22 = vadd.f32 -0.18628806, %v5112_v38  ;;  %v12022_v57 = vmul.f32 0.5, %v11772_v12 }
 0x8bf   : > { %v5972_v53 = vmul.f32 1.442695, %v5877_v60  ;;  %v4985_v52 = vmul.f32 %v11979_v59, %v4921_v3  ;;  %v12026_v45 = vadd.f32 %v4055_v10, %v10858_v46  ;;  %v4348_v50 = vmul.f32 0.5, %v12019_v8 }
 0x8c0   : > { %v5878_v43 = vadd.f32 %v5814_v30, %v5686_v35  ;;  %v5431_v14 = vadd.f32 0.37409195, %v5367_v47  ;;  %v5240_v32 = vmul.f32 %v11960_v42, %v5176_v22  ;;  %v5751_v20 = vsub.f32 0.0, %v11872_v44 }
 0x8c1   : > { %8407 = vpow2.f32 %v5972_v53  ;;  %v5049_v26 = vadd.f32 0.27886808, %v4985_v52  ;;  %v4602_v12 = vmul.f32 0.17087276, %v12028_v13  ;;  %v4412_v38 = vadd.f32 1.0, %v4348_v50 }
 0x8c2   : > { %v5974_v31 = vmul.f32 1.442695, %v5878_v43  ;;  %v5495_v18 = vmul.f32 %v11931_v28, %v5431_v14  ;;  %v5304_v36 = vadd.f32 0.09678418, %v5240_v32  ;;  %v12038_v30 = vmul.f32 0.70710677, %v12026_v45 }
 0x8c3   : > { %v5113_v10 = vmul.f32 %v11979_v59, %v5049_v26  ;;  %v4666_v60 = vadd.f32 -0.82215226, %v4602_v12  ;;  %v12041_v35 = vmul.f32 0.5, %v11778_v48  ;;  %v5815_v32 = vmul.f32 %v5751_v20, %v11872_v44  ;;  %v4059_v48 = vpop.f32.mrf.mxu0 }
 0x8c4   : > { %v8404_v3 = vpop.eup %8403  ;;  %8409 = vpow2.f32 %v5974_v31  ;;  %v5559_v47 = vadd.f32 1.0000237, %v5495_v18  ;;  %v5368_v22 = vmul.f32 %v11960_v42, %v5304_v36  ;;  %v12049_v26 = vand.u32 2147483647, %v12038_v30 }
 0x8c5   : > { %v6068_v53 = vmul.f32 %v8404_v3, %v11853_v2  ;;  %v5177_v52 = vadd.f32 -0.18628806, %v5113_v10  ;;  %v4730_v43 = vmul.f32 %v12028_v13, %v4666_v60  ;;  %8411 = vrcp.f32 %v4412_v38 }
 0x8c6   : > { %v5623_v14 = vmul.f32 %v11931_v28, %v5559_v47  ;;  %v5432_v50 = vadd.f32 0.37409195, %v5368_v22  ;;  %v5752_v10 = vsub.f32 0.0, %v11899_v58  ;;  %v4349_v38 = vmul.f32 0.5, %v12049_v26 }
 0x8c7   : > { %v6196_v12 = vsub.f32 1.0, %v6068_v53  ;;  %v7145_v31 = vadd.f32 -1.0, %v6068_v53  ;;  %v5241_v18 = vmul.f32 %v11979_v59, %v5177_v52  ;;  %v4794_v36 = vadd.f32 1.4885159, %v4730_v43 }
 0x8c8   : > { %v5687_v55 = vadd.f32 -1.2655122, %v5623_v14  ;;  %v5496_v2 = vmul.f32 %v11960_v42, %v5432_v50  ;;  %v12059_v3 = vadd.f32 %v4059_v48, %v10856_v1  ;;  %v4413_v43 = vadd.f32 1.0, %v4349_v38  ;;  %v4061_v38 = vpop.f32.mrf.mxu0 }
 0x8c9   : > { %v6324_v44 = vsel %vm6132_vm5, %v6196_v12, %v7145_v31  ;;  %v5305_v20 = vadd.f32 0.09678418, %v5241_v18  ;;  %v4858_v60 = vmul.f32 %v12028_v13, %v4794_v36  ;;  %v5753_v50 = vsub.f32 0.0, %v11916_v19 }
 0x8ca   : > { %v12061_v47 = vpop.eup %8405  ;;  %v6388_v22 = vadd.f32 1.0, %v6324_v44  ;;  %v5879_v53 = vadd.f32 %v5815_v32, %v5687_v55  ;;  %v5560_v52 = vadd.f32 1.0000237, %v5496_v2  ;;  %8413 = vrcp.f32 %v4413_v43  ;;  %v4063_v5 = vpop.f32.mrf.mxu0 }
 0x8cb   : > { %v5369_v14 = vmul.f32 %v11979_v59, %v5305_v20  ;;  %v4922_v62 = vadd.f32 -1.135204, %v4858_v60  ;;  %v4603_v12 = vmul.f32 0.17087276, %v12061_v47  ;;  %v12074_v2 = vmul.f32 0.70710677, %v12059_v3 }
 0x8cc   : > { %v12068_v31 = vmul.f32 %v6388_v22, %v12006_v6  ;;  %v5976_v48 = vmul.f32 1.442695, %v5879_v53  ;;  %v5624_v18 = vmul.f32 %v11960_v42, %v5560_v52  ;;  %v5816_v60 = vmul.f32 %v5752_v10, %v11899_v58 }
 0x8cd   : > { %v5433_v36 = vadd.f32 0.37409195, %v5369_v14  ;;  %v4986_v55 = vmul.f32 %v12028_v13, %v4922_v62  ;;  %v4667_v32 = vadd.f32 -0.82215226, %v4603_v12  ;;  %v5817_v62 = vmul.f32 %v5753_v50, %v11916_v19 }
 0x8ce   : > { %13374 = vst [vmem:[#allocation57_spill] sm:$0xff] %v12068_v31  ;;  %v8408_v44 = vpop.eup %8407  ;;  %8415 = vpow2.f32 %v5976_v48  ;;  %v5688_v6 = vadd.f32 -1.2655122, %v5624_v18  ;;  %v12084_v12 = vand.u32 2147483647, %v12074_v2  ;;  %v12087_v63 = vadd.f32 %v4061_v38, %v10858_v46 }
 0x8cf   : > { %v6069_v22 = vmul.f32 %v8408_v44, %v11895_v24  ;;  %v5497_v53 = vmul.f32 %v11979_v59, %v5433_v36  ;;  %v5050_v52 = vadd.f32 0.27886808, %v4986_v55  ;;  %v4731_v43 = vmul.f32 %v12061_v47, %v4667_v32 }
 0x8d0   : > { %v5880_v14 = vadd.f32 %v5816_v60, %v5688_v6  ;;  %v4350_v19 = vmul.f32 0.5, %v12084_v12  ;;  %vm6140_vm13 = vcmp.ge.f32.partialorder %v12014_v51, 0.0  ;;  %vm6141_vm14 = vcmp.ge.f32.partialorder %v12038_v30, 0.0 }
 0x8d1   : > { %v8410_v48 = vpop.eup %8409  ;;  %v6197_v18 = vsub.f32 1.0, %v6069_v22  ;;  %v7146_v20 = vadd.f32 -1.0, %v6069_v22  ;;  %v5561_v58 = vadd.f32 1.0000237, %v5497_v53  ;;  %v5114_v24 = vmul.f32 %v12028_v13, %v5050_v52 }
 0x8d2   : > { %v12090_v10 = vpop.eup %8411  ;;  %v6070_v36 = vmul.f32 %v8410_v48, %v11909_v27  ;;  %v5978_v55 = vmul.f32 1.442695, %v5880_v14  ;;  %v4795_v32 = vadd.f32 1.4885159, %v4731_v43  ;;  %v4414_v48 = vadd.f32 1.0, %v4350_v19 }
 0x8d3   : > { %v6325_v50 = vsel %vm6133_vm6, %v6197_v18, %v7146_v20  ;;  %v5625_v38 = vmul.f32 %v11979_v59, %v5561_v58  ;;  %v5178_v44 = vadd.f32 -0.18628806, %v5114_v24  ;;  %v4604_v6 = vmul.f32 0.17087276, %v12090_v10 }
 0x8d4   : > { %v6389_v60 = vadd.f32 1.0, %v6325_v50  ;;  %v6198_v22 = vsub.f32 1.0, %v6070_v36  ;;  %v7147_v53 = vadd.f32 -1.0, %v6070_v36  ;;  %8417 = vpow2.f32 %v5978_v55 }
 0x8d5   : > { %v5689_v52 = vadd.f32 -1.2655122, %v5625_v38  ;;  %v5242_v0 = vmul.f32 %v12028_v13, %v5178_v44  ;;  %v4859_v27 = vmul.f32 %v12061_v47, %v4795_v32  ;;  %v4668_v43 = vadd.f32 -0.82215226, %v4604_v6 }
 0x8d6   : > { %v12101_v14 = vmul.f32 %v6389_v60, %v12022_v57  ;;  %v6326_v4 = vsel %vm6134_vm7, %v6198_v22, %v7147_v53  ;;  %v4151_v20 = vmul.f32 0.5, %v11857_v15  ;;  %v12108_v55 = vmul.f32 0.5, %v11882_v17 }
 0x8d7   : > { %v6390_v18 = vadd.f32 1.0, %v6326_v4  ;;  %v5881_v58 = vadd.f32 %v5817_v62, %v5689_v52  ;;  %v5306_v24 = vadd.f32 0.09678418, %v5242_v0  ;;  %v4923_v36 = vadd.f32 -1.135204, %v4859_v27  ;;  %v12114_v50 = vpop.eup %8413 }
 0x8d8   : > { %v4732_v32 = vmul.f32 %v12090_v10, %v4668_v43  ;;  %8419 = vrcp.f32 %v4414_v48  ;;  %v12112_v57 = vmul.f32 0.70710677, %v12087_v63  ;;  %v4605_v17 = vmul.f32 0.17087276, %v12114_v50 }
 0x8d9   : > { %v12117_v15 = vmul.f32 %v6390_v18, %v12041_v35  ;;  %v5980_v19 = vmul.f32 1.442695, %v5881_v58  ;;  %v5370_v62 = vmul.f32 %v12028_v13, %v5306_v24  ;;  %v4987_v0 = vmul.f32 %v12061_v47, %v4923_v36 }
 0x8da   : > { %v4796_v38 = vadd.f32 1.4885159, %v4732_v32  ;;  %v12123_v44 = vand.u32 2147483647, %v12112_v57  ;;  %v12126_v53 = vadd.f32 %v4063_v5, %v10856_v1  ;;  %v4669_v27 = vadd.f32 -0.82215226, %v4605_v17 }
 0x8db   : > { %13375 = vst [vmem:[#allocation58_spill] sm:$0xff] %v12117_v15  ;;  %v8416_v6 = vpop.eup %8415  ;;  %8421 = vpow2.f32 %v5980_v19  ;;  %v5434_v60 = vadd.f32 0.37409195, %v5370_v62  ;;  %v5051_v22 = vadd.f32 0.27886808, %v4987_v0  ;;  %v12133_v4 = vmul.f32 0.5, %v11890_v37 }
 0x8dc   : > { %v6071_v35 = vmul.f32 %v8416_v6, %v11931_v28  ;;  %v4860_v52 = vmul.f32 %v12090_v10, %v4796_v38  ;;  %v4351_v43 = vmul.f32 0.5, %v12123_v44  ;;  %v4733_v32 = vmul.f32 %v12114_v50, %v4669_v27 }
 0x8dd   : > { %v5498_v48 = vmul.f32 %v12028_v13, %v5434_v60  ;;  %v5115_v18 = vmul.f32 %v12061_v47, %v5051_v22  ;;  %v5754_v5 = vsub.f32 0.0, %v11958_v61  ;;  %v12143_v17 = vmul.f32 0.70710677, %v12126_v53 }
 0x8de   : > { %v6199_v58 = vsub.f32 1.0, %v6071_v35  ;;  %v7148_v24 = vadd.f32 -1.0, %v6071_v35  ;;  %v4924_v36 = vadd.f32 -1.135204, %v4860_v52  ;;  %v4415_v62 = vadd.f32 1.0, %v4351_v43 }
 0x8df   : > { %v5562_v28 = vadd.f32 1.0000237, %v5498_v48  ;;  %v5179_v19 = vadd.f32 -0.18628806, %v5115_v18  ;;  %v4797_v38 = vadd.f32 1.4885159, %v4733_v32 }
 0x8e0   : > { %v6327_v0 = vsel %vm6135_vm8, %v6199_v58, %v7148_v24  ;;  %v4988_v37 = vmul.f32 %v12090_v10, %v4924_v36  ;;  %8423 = vrcp.f32 %v4415_v62  ;;  %v12150_v11 = vand.u32 2147483647, %v12143_v17 }
 0x8e1   : > { %v8418_v6 = vpop.eup %8417  ;;  %v6391_v60 = vadd.f32 1.0, %v6327_v0  ;;  %v5626_v22 = vmul.f32 %v12028_v13, %v5562_v28  ;;  %v5243_v35 = vmul.f32 %v12061_v47, %v5179_v19  ;;  %v4861_v43 = vmul.f32 %v12114_v50, %v4797_v38 }
 0x8e2   : > { %v6072_v52 = vmul.f32 %v8418_v6, %v11960_v42  ;;  %v5052_v27 = vadd.f32 0.27886808, %v4988_v37  ;;  %v5818_v58 = vmul.f32 %v5754_v5, %v11958_v61  ;;  %v4352_v37 = vmul.f32 0.5, %v12150_v11  ;;  %v4065_v6 = vpop.f32.mrf.mxu0 }
 0x8e3   : > { %v12152_v48 = vmul.f32 %v6391_v60, %v4151_v20  ;;  %v5690_v18 = vadd.f32 -1.2655122, %v5626_v22  ;;  %v5307_v24 = vadd.f32 0.09678418, %v5243_v35  ;;  %v4925_v19 = vadd.f32 -1.135204, %v4861_v43 }
 0x8e4   : > { %v6200_v36 = vsub.f32 1.0, %v6072_v52  ;;  %v7149_v32 = vadd.f32 -1.0, %v6072_v52  ;;  %v5116_v28 = vmul.f32 %v12090_v10, %v5052_v27  ;;  %v4416_v52 = vadd.f32 1.0, %v4352_v37 }
 0x8e5   : > { %v12156_v62 = vpop.eup %8419  ;;  %v5882_v42 = vadd.f32 %v5818_v58, %v5690_v18  ;;  %v5371_v0 = vmul.f32 %v12061_v47, %v5307_v24  ;;  %v4989_v61 = vmul.f32 %v12114_v50, %v4925_v19  ;;  %v5755_v43 = vsub.f32 0.0, %v11995_v9 }
 0x8e6   : > { %v6328_v20 = vsel %vm6136_vm9, %v6200_v36, %v7149_v32  ;;  %v5180_v38 = vadd.f32 -0.18628806, %v5116_v28  ;;  %v4606_v5 = vmul.f32 0.17087276, %v12156_v62  ;;  %vm6142_vm15 = vcmp.ge.f32.partialorder %v12074_v2, 0.0 }
 0x8e7   : > { %v6392_v60 = vadd.f32 1.0, %v6328_v20  ;;  %v5982_v22 = vmul.f32 1.442695, %v5882_v42  ;;  %v5435_v35 = vadd.f32 0.37409195, %v5371_v0  ;;  %v4069_v0 = vpop.f32.mrf.mxu0  ;;  %v5819_v56 = vmul.f32 %v5755_v43, %v11995_v9 }
 0x8e8   : > { %v8422_v27 = vpop.eup %8421  ;;  %v5244_v18 = vmul.f32 %v12090_v10, %v5180_v38  ;;  %v5053_v58 = vadd.f32 0.27886808, %v4989_v61  ;;  %v4670_v24 = vadd.f32 -0.82215226, %v4606_v5  ;;  %vm6143_vm1 = vcmp.ge.f32.partialorder %v12112_v57, 0.0 }
 0x8e9   : > { %v12168_v23 = vmul.f32 %v6392_v60, %v12108_v55  ;;  %v6073_v36 = vmul.f32 %v8422_v27, %v11979_v59  ;;  %8425 = vpow2.f32 %v5982_v22  ;;  %v5499_v32 = vmul.f32 %v12061_v47, %v5435_v35 }
 0x8ea   : > { %v5308_v28 = vadd.f32 0.09678418, %v5244_v18  ;;  %v5117_v19 = vmul.f32 %v12114_v50, %v5053_v58  ;;  %v4734_v42 = vmul.f32 %v12156_v62, %v4670_v24  ;;  %8427 = vrcp.f32 %v4416_v52 }
 0x8eb   : > { %13376 = vst [vmem:[#allocation59_spill] sm:$0xff] %v12168_v23  ;;  %v6201_v20 = vsub.f32 1.0, %v6073_v36  ;;  %v7150_v38 = vadd.f32 -1.0, %v6073_v36  ;;  %v5563_v61 = vadd.f32 1.0000237, %v5499_v32  ;;  %v12177_v55 = vmul.f32 0.5, %v11935_v25  ;;  %v4071_v23 = vpop.f32.mrf.mxu0 }
 0x8ec   : > { %v5372_v59 = vmul.f32 %v12090_v10, %v5308_v28  ;;  %v5181_v5 = vadd.f32 -0.18628806, %v5117_v19  ;;  %v4798_v60 = vadd.f32 1.4885159, %v4734_v42  ;;  %v12184_v52 = vadd.f32 %v4065_v6, %v10858_v46 }
 0x8ed   : > { %v6329_v22 = vsel %vm6137_vm10, %v6201_v20, %v7150_v38  ;;  %v5627_v35 = vmul.f32 %v12061_v47, %v5563_v61  ;;  %v12187_v27 = vadd.f32 %v4069_v0, %v10856_v1  ;;  %v12189_v18 = vpop.eup %8423  ;;  %v5756_v28 = vsub.f32 0.0, %v12019_v8 }
 0x8ee   : > { %v6393_v58 = vadd.f32 1.0, %v6329_v22  ;;  %v5436_v25 = vadd.f32 0.37409195, %v5372_v59  ;;  %v5245_v24 = vmul.f32 %v12114_v50, %v5181_v5  ;;  %v4862_v36 = vmul.f32 %v12156_v62, %v4798_v60 }
 0x8ef   : > { %v5691_v32 = vadd.f32 -1.2655122, %v5627_v35  ;;  %v4607_v19 = vmul.f32 0.17087276, %v12189_v18  ;;  %v12201_v59 = vmul.f32 0.70710677, %v12184_v52 }
 0x8f0   : > { %v12197_v6 = vmul.f32 %v6393_v58, %v12133_v4  ;;  %v5500_v42 = vmul.f32 %v12090_v10, %v5436_v25  ;;  %v5309_v0 = vadd.f32 0.09678418, %v5245_v24  ;;  %v4926_v20 = vadd.f32 -1.135204, %v4862_v36 }
 0x8f1   : > { %v5883_v38 = vadd.f32 %v5819_v56, %v5691_v32  ;;  %v4671_v61 = vadd.f32 -0.82215226, %v4607_v19  ;;  %v12204_v5 = vmul.f32 0.70710677, %v12187_v27  ;;  %v5757_v60 = vsub.f32 0.0, %v12049_v26 }
 0x8f2   : > { %v5564_v9 = vadd.f32 1.0000237, %v5500_v42  ;;  %v5373_v43 = vmul.f32 %v12114_v50, %v5309_v0  ;;  %v4990_v4 = vmul.f32 %v12156_v62, %v4926_v20  ;;  %v12212_v58 = vand.u32 2147483647, %v12201_v59 }
 0x8f3   : > { %v5984_v22 = vmul.f32 1.442695, %v5883_v38  ;;  %v4735_v35 = vmul.f32 %v12189_v18, %v4671_v61  ;;  %v12216_v32 = vand.u32 2147483647, %v12204_v5  ;;  %v5820_v56 = vmul.f32 %v5756_v28, %v12019_v8 }
 0x8f4   : > { %v5628_v25 = vmul.f32 %v12090_v10, %v5564_v9  ;;  %v5437_v24 = vadd.f32 0.37409195, %v5373_v43  ;;  %v5054_v36 = vadd.f32 0.27886808, %v4990_v4  ;;  %v4353_v42 = vmul.f32 0.5, %v12212_v58 }
 0x8f5   : > { %8429 = vpow2.f32 %v5984_v22  ;;  %v4799_v19 = vadd.f32 1.4885159, %v4735_v35  ;;  %v5821_v61 = vmul.f32 %v5757_v60, %v12049_v26  ;;  %v4354_v8 = vmul.f32 0.5, %v12216_v32 }
 0x8f6   : > { %v8426_v0 = vpop.eup %8425  ;;  %v5692_v20 = vadd.f32 -1.2655122, %v5628_v25  ;;  %v5501_v38 = vmul.f32 %v12114_v50, %v5437_v24  ;;  %v5118_v37 = vmul.f32 %v12156_v62, %v5054_v36  ;;  %v4417_v22 = vadd.f32 1.0, %v4353_v42 }
 0x8f7   : > { %v12223_v9 = vpop.eup %8427  ;;  %v6074_v43 = vmul.f32 %v8426_v0, %v12028_v13  ;;  %v4863_v4 = vmul.f32 %v12189_v18, %v4799_v19  ;;  %v4418_v42 = vadd.f32 1.0, %v4354_v8  ;;  %vm6144_vm2 = vcmp.ge.f32.partialorder %v12143_v17, 0.0 }
 0x8f8   : > { %v5884_v28 = vadd.f32 %v5820_v56, %v5692_v20  ;;  %v5565_v35 = vadd.f32 1.0000237, %v5501_v38  ;;  %v5182_v15 = vadd.f32 -0.18628806, %v5118_v37  ;;  %v4608_v25 = vmul.f32 0.17087276, %v12223_v9 }
 0x8f9   : > { %v6202_v24 = vsub.f32 1.0, %v6074_v43  ;;  %v7151_v31 = vadd.f32 -1.0, %v6074_v43  ;;  %v4927_v26 = vadd.f32 -1.135204, %v4863_v4  ;;  %8431 = vrcp.f32 %v4417_v22  ;;  %v4073_v4 = vpop.f32.mrf.mxu0 }
 0x8fa   : > { %v5986_v60 = vmul.f32 1.442695, %v5884_v28  ;;  %v5629_v36 = vmul.f32 %v12114_v50, %v5565_v35  ;;  %v5246_v13 = vmul.f32 %v12156_v62, %v5182_v15  ;;  %v4672_v0 = vadd.f32 -0.82215226, %v4608_v25 }
 0x8fb   : > { %v6330_v19 = vsel %vm6138_vm11, %v6202_v24, %v7151_v31  ;;  %v4991_v56 = vmul.f32 %v12189_v18, %v4927_v26  ;;  %v12235_v37 = vadd.f32 %v4071_v23, %v10858_v46  ;;  %v12247_v25 = vadd.f32 %v4073_v4, %v10856_v1 }
 0x8fc   : > { %v6394_v20 = vadd.f32 1.0, %v6330_v19  ;;  %8433 = vpow2.f32 %v5986_v60  ;;  %v5693_v38 = vadd.f32 -1.2655122, %v5629_v36  ;;  %v5310_v43 = vadd.f32 0.09678418, %v5246_v13 }
 0x8fd   : > { %v5055_v22 = vadd.f32 0.27886808, %v4991_v56  ;;  %v4736_v28 = vmul.f32 %v12223_v9, %v4672_v0  ;;  %8435 = vrcp.f32 %v4418_v42  ;;  %v12244_v23 = vmul.f32 0.70710677, %v12235_v37  ;;  %13379 = vst [vmem:[#allocation62_spill] sm:$0xff] %v12247_v25 }
 0x8fe   : > { %v12239_v15 = vmul.f32 %v6394_v20, %v12177_v55  ;;  %v5885_v16 = vadd.f32 %v5821_v61, %v5693_v38  ;;  %v5374_v31 = vmul.f32 %v12156_v62, %v5310_v43  ;;  %v4155_v24 = vmul.f32 0.5, %v11952_v41 }
 0x8ff   : > { %v5119_v8 = vmul.f32 %v12189_v18, %v5055_v22  ;;  %v4800_v35 = vadd.f32 1.4885159, %v4736_v28  ;;  %13378 = vst [vmem:[#allocation61_spill] sm:$0xff] %v12244_v23  ;;  %v12252_v55 = vmul.f32 0.5, %v12000_v21  ;;  %v12256_v13 = vand.u32 2147483647, %v12244_v23 }
 0x900   : > { %13377 = vst [vmem:[#allocation60_spill] sm:$0xff] %v12239_v15  ;;  %v5988_v26 = vmul.f32 1.442695, %v5885_v16  ;;  %v5438_v60 = vadd.f32 0.37409195, %v5374_v31  ;;  %v5758_v56 = vsub.f32 0.0, %v12084_v12 }
 0x901   : > { %v5183_v61 = vadd.f32 -0.18628806, %v5119_v8  ;;  %v4864_v36 = vmul.f32 %v12223_v9, %v4800_v35  ;;  %v12261_v41 = vmul.f32 0.70710677, %v12247_v25  ;;  %v4355_v38 = vmul.f32 0.5, %v12256_v13 }
 0x902   : > { %v8430_v0 = vpop.eup %8429  ;;  %8437 = vpow2.f32 %v5988_v26  ;;  %v5502_v19 = vmul.f32 %v12156_v62, %v5438_v60  ;;  %v12267_v43 = vmul.f32 0.5, %v12026_v45  ;;  %v12270_v4 = vmul.f32 0.5, %v12059_v3 }
 0x903   : > { %13380 = vst [vmem:[#allocation63_spill] sm:$0xff] %v12261_v41  ;;  %v6075_v42 = vmul.f32 %v8430_v0, %v12061_v47  ;;  %v5247_v21 = vmul.f32 %v12189_v18, %v5183_v61  ;;  %v4928_v20 = vadd.f32 -1.135204, %v4864_v36  ;;  %v12273_v28 = vand.u32 2147483647, %v12261_v41  ;;  %v4075_v61 = vpop.f32.mrf.mxu0 }
 0x904   : > { %v5566_v22 = vadd.f32 1.0000237, %v5502_v19  ;;  %v5822_v45 = vmul.f32 %v5758_v56, %v12084_v12  ;;  %v4419_v60 = vadd.f32 1.0, %v4355_v38  ;;  %v12288_v38 = vadd.f32 %v4075_v61, %v10858_v46 }
 0x905   : > { %v6203_v16 = vsub.f32 1.0, %v6075_v42  ;;  %v7152_v31 = vadd.f32 -1.0, %v6075_v42  ;;  %v5311_v47 = vadd.f32 0.09678418, %v5247_v21  ;;  %v4992_v8 = vmul.f32 %v12223_v9, %v4928_v20 }
 0x906   : > { %v12277_v35 = vpop.eup %8431  ;;  %v5630_v26 = vmul.f32 %v12156_v62, %v5566_v22  ;;  %v4356_v3 = vmul.f32 0.5, %v12273_v28  ;;  %8439 = vrcp.f32 %v4419_v60  ;;  %vm6145_vm3 = vcmp.ge.f32.partialorder %v12201_v59, 0.0  ;;  %v13396_v59 = vld [vmem:[#allocation56_spill] sm:$0xff] }
 0x907   : > { %v6331_v36 = vsel %vm6139_vm12, %v6203_v16, %v7152_v31  ;;  %v5375_v0 = vmul.f32 %v12189_v18, %v5311_v47  ;;  %v5056_v19 = vadd.f32 0.27886808, %v4992_v8  ;;  %v4609_v42 = vmul.f32 0.17087276, %v12277_v35 }
 0x908   : > { %v6395_v21 = vadd.f32 1.0, %v6331_v36  ;;  %v5694_v20 = vadd.f32 -1.2655122, %v5630_v26  ;;  %v4420_v41 = vadd.f32 1.0, %v4356_v3  ;;  %vm6146_vm4 = vcmp.ge.f32.partialorder %v12204_v5, 0.0 }
 0x909   : > { %v8434_v25 = vpop.eup %8433  ;;  %v5439_v22 = vadd.f32 0.37409195, %v5375_v0  ;;  %v5120_v12 = vmul.f32 %v12223_v9, %v5056_v19  ;;  %v4673_v56 = vadd.f32 -0.82215226, %v4609_v42  ;;  %v5759_v0 = vsub.f32 0.0, %v12123_v44 }
 0x90a   : > { %v12290_v23 = vpop.eup %8435  ;;  %v12292_v7 = vmul.f32 %v6395_v21, %v4155_v24  ;;  %v6076_v16 = vmul.f32 %v8434_v25, %v12090_v10  ;;  %v5886_v31 = vadd.f32 %v5822_v45, %v5694_v20  ;;  %8441 = vrcp.f32 %v4420_v41 }
 0x90b   : > { %v5503_v47 = vmul.f32 %v12189_v18, %v5439_v22  ;;  %v5184_v8 = vadd.f32 -0.18628806, %v5120_v12  ;;  %v4737_v26 = vmul.f32 %v12277_v35, %v4673_v56  ;;  %v4610_v60 = vmul.f32 0.17087276, %v12290_v23 }
 0x90c   : > { %v6204_v3 = vsub.f32 1.0, %v6076_v16  ;;  %v7153_v61 = vadd.f32 -1.0, %v6076_v16  ;;  %v5990_v36 = vmul.f32 1.442695, %v5886_v31  ;;  %v12304_v45 = vmul.f32 0.5, %v12087_v63 }
 0x90d   : > { %v5567_v24 = vadd.f32 1.0000237, %v5503_v47  ;;  %v5248_v19 = vmul.f32 %v12223_v9, %v5184_v8  ;;  %v4801_v10 = vadd.f32 1.4885159, %v4737_v26  ;;  %v4674_v25 = vadd.f32 -0.82215226, %v4610_v60 }
 0x90e   : > { %v6332_v41 = vsel %vm6140_vm13, %v6204_v3, %v7153_v61  ;;  %8443 = vpow2.f32 %v5990_v36  ;;  %v12307_v42 = vmul.f32 0.70710677, %v12288_v38  ;;  %v5823_v31 = vmul.f32 %v5759_v0, %v12123_v44  ;;  %v4079_v3 = vpop.f32.mrf.mxu0 }
 0x90f   : > { %v8438_v21 = vpop.eup %8437  ;;  %v6396_v20 = vadd.f32 1.0, %v6332_v41  ;;  %v5631_v22 = vmul.f32 %v12189_v18, %v5567_v24  ;;  %v5312_v12 = vadd.f32 0.09678418, %v5248_v19  ;;  %v4865_v56 = vmul.f32 %v12277_v35, %v4801_v10 }
 0x910   : > { %v6077_v16 = vmul.f32 %v8438_v21, %v12114_v50  ;;  %v4738_v51 = vmul.f32 %v12290_v23, %v4674_v25  ;;  %v12315_v47 = vand.u32 2147483647, %v12307_v42  ;;  %v12329_v21 = vadd.f32 %v4079_v3, %v10856_v1 }
 0x911   : > { %v12318_v63 = vmul.f32 %v6396_v20, %v12252_v55  ;;  %v5695_v8 = vadd.f32 -1.2655122, %v5631_v22  ;;  %v5376_v26 = vmul.f32 %v12223_v9, %v5312_v12  ;;  %v4929_v60 = vadd.f32 -1.135204, %v4865_v56 }
 0x912   : > { %v6205_v61 = vsub.f32 1.0, %v6077_v16  ;;  %v7154_v36 = vadd.f32 -1.0, %v6077_v16  ;;  %v4802_v24 = vadd.f32 1.4885159, %v4738_v51  ;;  %v4357_v50 = vmul.f32 0.5, %v12315_v47 }
 0x913   : > { %v5887_v0 = vadd.f32 %v5823_v31, %v5695_v8  ;;  %v5440_v19 = vadd.f32 0.37409195, %v5376_v26  ;;  %v4993_v10 = vmul.f32 %v12277_v35, %v4929_v60  ;;  %v12331_v20 = vpop.eup %8439  ;;  %v5760_v31 = vsub.f32 0.0, %v12150_v11 }
 0x914   : > { %v6333_v55 = vsel %vm6141_vm14, %v6205_v61, %v7154_v36  ;;  %v4866_v25 = vmul.f32 %v12290_v23, %v4802_v24  ;;  %v4421_v41 = vadd.f32 1.0, %v4357_v50  ;;  %v4611_v8 = vmul.f32 0.17087276, %v12331_v20 }
 0x915   : > { %v6397_v22 = vadd.f32 1.0, %v6333_v55  ;;  %v5992_v12 = vmul.f32 1.442695, %v5887_v0  ;;  %v5504_v56 = vmul.f32 %v12223_v9, %v5440_v19  ;;  %v5057_v16 = vadd.f32 0.27886808, %v4993_v10 }
 0x916   : > { %v4930_v51 = vadd.f32 -1.135204, %v4866_v25  ;;  %8445 = vrcp.f32 %v4421_v41  ;;  %v12344_v61 = vmul.f32 0.5, %v12126_v53  ;;  %v4675_v24 = vadd.f32 -0.82215226, %v4611_v8 }
 0x917   : > { %v12336_v30 = vpop.eup %8441  ;;  %v12339_v26 = vmul.f32 %v6397_v22, %v12267_v43  ;;  %8447 = vpow2.f32 %v5992_v12  ;;  %v5568_v60 = vadd.f32 1.0000237, %v5504_v56  ;;  %v5121_v3 = vmul.f32 %v12277_v35, %v5057_v16  ;;  %v4081_v22 = vpop.f32.mrf.mxu0 }
 0x918   : > { %v4994_v36 = vmul.f32 %v12290_v23, %v4930_v51  ;;  %v4612_v50 = vmul.f32 0.17087276, %v12336_v30  ;;  %v12350_v43 = vmul.f32 0.70710677, %v12329_v21  ;;  %v6487_v10 = vpack.c.bf16 %v11173_v39, %v11144_v49 }
 0x919   : > { %v5632_v0 = vmul.f32 %v12223_v9, %v5568_v60  ;;  %v5185_v19 = vadd.f32 -0.18628806, %v5121_v3  ;;  %v5824_v55 = vmul.f32 %v5760_v31, %v12150_v11  ;;  %v4739_v53 = vmul.f32 %v12331_v20, %v4675_v24 }
 0x91a   : > { %v5058_v25 = vadd.f32 0.27886808, %v4994_v36  ;;  %v4676_v41 = vadd.f32 -0.82215226, %v4612_v50  ;;  %v12357_v16 = vmul.f32 0.5, %v12184_v52  ;;  %6685 = vmatprep.mubr.bf16.mxu1 %v6487_v10  ;;  %v13381_v60 = vpack.c.bf16 %v11159_v33, %v11137_v40 }
 0x91b   : > { %v8444_v12 = vpop.eup %8443  ;;  %v5696_v56 = vadd.f32 -1.2655122, %v5632_v0  ;;  %v5249_v51 = vmul.f32 %v12277_v35, %v5185_v19  ;;  %v12361_v8 = vand.u32 2147483647, %v12350_v43  ;;  %v4803_v11 = vadd.f32 1.4885159, %v4739_v53 }
 0x91c   : > { %v6078_v49 = vmul.f32 %v8444_v12, %v12156_v62  ;;  %v5122_v39 = vmul.f32 %v12290_v23, %v5058_v25  ;;  %v4740_v31 = vmul.f32 %v12336_v30, %v4676_v41  ;;  %6686 = vmatmul.mubr.bf16.vlgmr.msra.gmra.mxu1 %v13381_v60  ;;  %v12371_v24 = vadd.f32 %v4081_v22, %v10858_v46 }
 0x91d   : > { %v5888_v3 = vadd.f32 %v5824_v55, %v5696_v56  ;;  %v5313_v52 = vadd.f32 0.09678418, %v5249_v51  ;;  %v4358_v36 = vmul.f32 0.5, %v12361_v8  ;;  %v4867_v62 = vmul.f32 %v12331_v20, %v4803_v11 }
 0x91e   : > { %v6206_v50 = vsub.f32 1.0, %v6078_v49  ;;  %v7155_v0 = vadd.f32 -1.0, %v6078_v49  ;;  %v5186_v19 = vadd.f32 -0.18628806, %v5122_v39  ;;  %v4804_v53 = vadd.f32 1.4885159, %v4740_v31 }
 0x91f   : > { %v5994_v10 = vmul.f32 1.442695, %v5888_v3  ;;  %v5377_v25 = vmul.f32 %v12277_v35, %v5313_v52  ;;  %v4422_v41 = vadd.f32 1.0, %v4358_v36  ;;  %v5761_v33 = vsub.f32 0.0, %v12212_v58 }
 0x920   : > { %v6334_v40 = vsel %vm6142_vm15, %v6206_v50, %v7155_v0  ;;  %v5250_v55 = vmul.f32 %v12290_v23, %v5186_v19  ;;  %v4931_v22 = vadd.f32 -1.135204, %v4867_v62  ;;  %v4868_v51 = vmul.f32 %v12336_v30, %v4804_v53 }
 0x921   : > { %v6398_v12 = vadd.f32 1.0, %v6334_v40  ;;  %8449 = vpow2.f32 %v5994_v10  ;;  %v5441_v56 = vadd.f32 0.37409195, %v5377_v25  ;;  %v12382_v49 = vmul.f32 0.5, %v12187_v27 }
 0x922   : > { %v5314_v39 = vadd.f32 0.09678418, %v5250_v55  ;;  %v4995_v11 = vmul.f32 %v12331_v20, %v4931_v22  ;;  %8451 = vrcp.f32 %v4422_v41  ;;  %v4932_v3 = vadd.f32 -1.135204, %v4868_v51 }
 0x923   : > { %v12385_v2 = vpop.eup %8445  ;;  %v12388_v31 = vmul.f32 %v6398_v12, %v12270_v4  ;;  %v5505_v60 = vmul.f32 %v12277_v35, %v5441_v56  ;;  %v12392_v52 = vmul.f32 0.70710677, %v12371_v24  ;;  %v5825_v50 = vmul.f32 %v5761_v33, %v12212_v58  ;;  %v4083_v58 = vpop.f32.mrf.mxu0 }
 0x924   : > { %v8448_v36 = vpop.eup %8447  ;;  %v5378_v27 = vmul.f32 %v12290_v23, %v5314_v39  ;;  %v5059_v0 = vadd.f32 0.27886808, %v4995_v11  ;;  %v4613_v19 = vmul.f32 0.17087276, %v12385_v2  ;;  %v4996_v4 = vmul.f32 %v12336_v30, %v4932_v3 }
 0x925   : > { %13382 = vst [vmem:[#allocation64_spill] sm:$0xff] %v12388_v31  ;;  %v6079_v62 = vmul.f32 %v8448_v36, %v12189_v18  ;;  %v5569_v10 = vadd.f32 1.0000237, %v5505_v60  ;;  %v12400_v25 = vand.u32 2147483647, %v12392_v52  ;;  %v5762_v41 = vsub.f32 0.0, %v12216_v32 }
 0x926   : > { %v5442_v53 = vadd.f32 0.37409195, %v5378_v27  ;;  %v5123_v40 = vmul.f32 %v12331_v20, %v5059_v0  ;;  %v4677_v55 = vadd.f32 -0.82215226, %v4613_v19  ;;  %v5060_v56 = vadd.f32 0.27886808, %v4996_v4 }
 0x927   : > { %v6207_v33 = vsub.f32 1.0, %v6079_v62  ;;  %v7156_v22 = vadd.f32 -1.0, %v6079_v62  ;;  %v5633_v12 = vmul.f32 %v12277_v35, %v5569_v10  ;;  %v4359_v11 = vmul.f32 0.5, %v12400_v25 }
 0x928   : > { %v5506_v18 = vmul.f32 %v12290_v23, %v5442_v53  ;;  %v5187_v51 = vadd.f32 -0.18628806, %v5123_v40  ;;  %v4741_v39 = vmul.f32 %v12385_v2, %v4677_v55  ;;  %v5124_v36 = vmul.f32 %v12336_v30, %v5060_v56 }
 0x929   : > { %v6335_v60 = vsel %vm6143_vm1, %v6207_v33, %v7156_v22  ;;  %v5697_v3 = vadd.f32 -1.2655122, %v5633_v12  ;;  %v12412_v27 = vadd.f32 %v4083_v58, %v10856_v1  ;;  %v5826_v53 = vmul.f32 %v5762_v41, %v12216_v32 }
 0x92a   : > { %v6399_v0 = vadd.f32 1.0, %v6335_v60  ;;  %v5570_v19 = vadd.f32 1.0000237, %v5506_v18  ;;  %v5251_v62 = vmul.f32 %v12331_v20, %v5187_v51  ;;  %v4805_v10 = vadd.f32 1.4885159, %v4741_v39 }
 0x92b   : > { %v5889_v4 = vadd.f32 %v5825_v50, %v5697_v3  ;;  %v5188_v40 = vadd.f32 -0.18628806, %v5124_v36  ;;  %v4423_v55 = vadd.f32 1.0, %v4359_v11  ;;  %v5763_v56 = vsub.f32 0.0, %v12256_v13 }
 0x92c   : > { %v12418_v57 = vmul.f32 %v6399_v0, %v12304_v45  ;;  %v5634_v33 = vmul.f32 %v12290_v23, %v5570_v19  ;;  %v5315_v22 = vadd.f32 0.09678418, %v5251_v62  ;;  %v4869_v58 = vmul.f32 %v12385_v2, %v4805_v10  ;;  %v4085_v10 = vpop.f32.mrf.mxu0 }
 0x92d   : > { %v5996_v12 = vmul.f32 1.442695, %v5889_v4  ;;  %v5252_v18 = vmul.f32 %v12336_v30, %v5188_v40  ;;  %8453 = vrcp.f32 %v4423_v55  ;;  %v12426_v39 = vmul.f32 0.70710677, %v12412_v27 }
 0x92e   : > { %v8450_v51 = vpop.eup %8449  ;;  %v5698_v50 = vadd.f32 -1.2655122, %v5634_v33  ;;  %v5379_v32 = vmul.f32 %v12331_v20, %v5315_v22  ;;  %v4933_v41 = vadd.f32 -1.135204, %v4869_v58  ;;  %v5764_v3 = vsub.f32 0.0, %v12273_v28 }
 0x92f   : > { %v12428_v45 = vpop.eup %8451  ;;  %v6080_v11 = vmul.f32 %v8450_v51, %v12223_v9  ;;  %8455 = vpow2.f32 %v5996_v12  ;;  %v5316_v60 = vadd.f32 0.09678418, %v5252_v18  ;;  %v12436_v33 = vand.u32 2147483647, %v12426_v39 }
 0x930   : > { %v5890_v36 = vadd.f32 %v5826_v53, %v5698_v50  ;;  %v5443_v0 = vadd.f32 0.37409195, %v5379_v32  ;;  %v4997_v19 = vmul.f32 %v12385_v2, %v4933_v41  ;;  %v4614_v62 = vmul.f32 0.17087276, %v12428_v45 }
 0x931   : > { %v6208_v4 = vsub.f32 1.0, %v6080_v11  ;;  %v7157_v40 = vadd.f32 -1.0, %v6080_v11  ;;  %v5380_v55 = vmul.f32 %v12336_v30, %v5316_v60  ;;  %v4360_v51 = vmul.f32 0.5, %v12436_v33 }
 0x932   : > { %v5998_v22 = vmul.f32 1.442695, %v5890_v36  ;;  %v5507_v9 = vmul.f32 %v12331_v20, %v5443_v0  ;;  %v5061_v58 = vadd.f32 0.27886808, %v4997_v19  ;;  %v4678_v12 = vadd.f32 -0.82215226, %v4614_v62 }
 0x933   : > { %v6336_v53 = vsel %vm6144_vm2, %v6208_v4, %v7157_v40  ;;  %v5444_v18 = vadd.f32 0.37409195, %v5380_v55  ;;  %v12443_v50 = vadd.f32 %v4085_v10, %v10858_v46  ;;  %v12447_v60 = vmul.f32 0.5, %v12235_v37 }
 0x934   : > { %v6400_v32 = vadd.f32 1.0, %v6336_v53  ;;  %8457 = vpow2.f32 %v5998_v22  ;;  %v5571_v41 = vadd.f32 1.0000237, %v5507_v9  ;;  %v5125_v11 = vmul.f32 %v12385_v2, %v5061_v58 }
 0x935   : > { %v5508_v36 = vmul.f32 %v12336_v30, %v5444_v18  ;;  %v4742_v0 = vmul.f32 %v12428_v45, %v4678_v12  ;;  %v4424_v17 = vadd.f32 1.0, %v4360_v51  ;;  %v5827_v10 = vmul.f32 %v5763_v56, %v12256_v13  ;;  %v13385_v13 = vld [vmem:[#allocation40_spill] sm:$0xff]  ;;  %v13386_v56 = vld [vmem:[#allocation42_spill] sm:$0xff]  ;;  %v13387_v51 = vld [vmem:[#allocation39_spill] sm:$0xff] }
 0x936   : > { %v12452_v19 = vmul.f32 %v6400_v32, %v12344_v61  ;;  %v5635_v62 = vmul.f32 %v12331_v20, %v5571_v41  ;;  %v5189_v4 = vadd.f32 -0.18628806, %v5125_v11  ;;  %v5828_v55 = vmul.f32 %v5764_v3, %v12273_v28  ;;  %v13388_v28 = vld [vmem:[#allocation41_spill] sm:$0xff] }
 0x937   : > { %v5572_v40 = vadd.f32 1.0000237, %v5508_v36  ;;  %v4806_v22 = vadd.f32 1.4885159, %v4742_v0  ;;  %8459 = vrcp.f32 %v4424_v17  ;;  %v12461_v12 = vmul.f32 0.70710677, %v12443_v50 }
 0x938   : > { %13383 = vst [vmem:[#allocation65_spill] sm:$0xff] %v12452_v19  ;;  %v5699_v9 = vadd.f32 -1.2655122, %v5635_v62  ;;  %v5253_v58 = vmul.f32 %v12385_v2, %v5189_v4  ;;  %v6489_v18 = vpack.c.bf16 %v13386_v56, %v13385_v13  ;;  %v6488_v3 = vpack.c.bf16 %v13388_v28, %v13387_v51 }
 0x939   : > { %13384 = vst [vmem:[#allocation66_spill] sm:$0xff] %v12461_v12  ;;  %v5636_v61 = vmul.f32 %v12336_v30, %v5572_v40  ;;  %v4870_v53 = vmul.f32 %v12428_v45, %v4806_v22  ;;  %v5765_v36 = vsub.f32 0.0, %v12315_v47  ;;  %v12473_v0 = vand.u32 2147483647, %v12461_v12  ;;  %v13389_v40 = vld [vmem:[#allocation35_spill] sm:$0xff]  ;;  %v13390_v22 = vld [vmem:[#allocation37_spill] sm:$0xff] }
 0x93a   : > { %v12469_v32 = vpop.eup %8453  ;;  %v5891_v41 = vadd.f32 %v5827_v10, %v5699_v9  ;;  %v5317_v11 = vadd.f32 0.09678418, %v5253_v58  ;;  %6693 = vmatprep.mubr.bf16.mxu1 %v6489_v18  ;;  %v6491_v13 = vpack.c.bf16 %v13390_v22, %v13389_v40  ;;  %vm6149_vm7 = vcmp.ge.f32.partialorder %v12307_v42, 0.0 }
 0x93b   : > { %v5700_v17 = vadd.f32 -1.2655122, %v5636_v61  ;;  %v4934_v62 = vadd.f32 -1.135204, %v4870_v53  ;;  %v4615_v4 = vmul.f32 0.17087276, %v12469_v32  ;;  %6694 = vmatmul.mubr.bf16.gmra.mxu1 %v6488_v3  ;;  %v5829_v40 = vmul.f32 %v5765_v36, %v12315_v47 }
 0x93c   : > { %v8456_v56 = vpop.eup %8455  ;;  %v6000_v51 = vmul.f32 1.442695, %v5891_v41  ;;  %v5381_v10 = vmul.f32 %v12385_v2, %v5317_v11  ;;  %v4361_v9 = vmul.f32 0.5, %v12473_v0  ;;  %6701 = vmatprep.mubr.bf16.mxu1 %v6491_v13  ;;  %v13393_v36 = vld [vmem:[#allocation47_spill] sm:$0xff]  ;;  %vm6150_vm8 = vcmp.ge.f32.partialorder %v12350_v43, 0.0 }
 0x93d   : > { %v6081_v58 = vmul.f32 %v8456_v56, %v12277_v35  ;;  %v5892_v61 = vadd.f32 %v5828_v55, %v5700_v17  ;;  %v4998_v53 = vmul.f32 %v12428_v45, %v4934_v62  ;;  %v4679_v18 = vadd.f32 -0.82215226, %v4615_v4  ;;  %v13391_v56 = vld [vmem:[#allocation43_spill] sm:$0xff]  ;;  %v13392_v55 = vld [vmem:[#allocation45_spill] sm:$0xff]  ;;  %v4089_v62 = vpop.f32.mrf.mxu0 }
 0x93e   : > { %8461 = vpow2.f32 %v6000_v51  ;;  %v5445_v28 = vadd.f32 0.37409195, %v5381_v10  ;;  %v4425_v22 = vadd.f32 1.0, %v4361_v9  ;;  %v6493_v17 = vpack.c.bf16 %v13392_v55, %v13391_v56  ;;  %v13394_v51 = vld [vmem:[#allocation49_spill] sm:$0xff] }
 0x93f   : > { %v6209_v41 = vsub.f32 1.0, %v6081_v58  ;;  %v7158_v37 = vadd.f32 -1.0, %v6081_v58  ;;  %v6002_v11 = vmul.f32 1.442695, %v5892_v61  ;;  %v5062_v44 = vadd.f32 0.27886808, %v4998_v53 }
 0x940   : > { %v5509_v3 = vmul.f32 %v12385_v2, %v5445_v28  ;;  %v4743_v35 = vmul.f32 %v12469_v32, %v4679_v18  ;;  %8463 = vrcp.f32 %v4425_v22  ;;  %v6495_v10 = vpack.c.bf16 %v13394_v51, %v13393_v36  ;;  %v13395_v22 = vld [vmem:[#allocation54_spill] sm:$0xff]  ;;  %v13409_v28 = vld [vmem:[#allocation63_spill] sm:$0xff] }
 0x941   : > { %v8458_v4 = vpop.eup %8457  ;;  %v6337_v13 = vsel %vm6145_vm3, %v6209_v41, %v7158_v37  ;;  %8465 = vpow2.f32 %v6002_v11  ;;  %v5126_v47 = vmul.f32 %v12428_v45, %v5062_v44  ;;  %vm6148_vm6 = vcmp.ge.f32.partialorder %v13409_v28, 0.0 }
 0x942   : > { %v6401_v9 = vadd.f32 1.0, %v6337_v13  ;;  %v6082_v58 = vmul.f32 %v8458_v4, %v12290_v23  ;;  %v5573_v61 = vadd.f32 1.0000237, %v5509_v3  ;;  %v4807_v53 = vadd.f32 1.4885159, %v4743_v35  ;;  %v13397_v3 = vld [vmem:[#allocation36_spill] sm:$0xff]  ;;  %v4091_v13 = vpop.f32.mrf.mxu0 }
 0x943   : > { %v5190_v18 = vadd.f32 -0.18628806, %v5126_v47  ;;  %v13398_v35 = vld [vmem:[#allocation34_spill] sm:$0xff]  ;;  %v13425_v43 = vpack.c.bf16 %v12197_v6, %v12152_v48  ;;  %vm6151_vm9 = vcmp.ge.f32.partialorder %v12392_v52, 0.0  ;;  %vm6152_vm10 = vcmp.ge.f32.partialorder %v12426_v39, 0.0 }
 0x944   : > { %v12501_v41 = vpop.eup %8459  ;;  %v12504_v44 = vmul.f32 %v6401_v9, %v12357_v16  ;;  %v6210_v11 = vsub.f32 1.0, %v6082_v58  ;;  %v7159_v55 = vadd.f32 -1.0, %v6082_v58  ;;  %v5637_v23 = vmul.f32 %v12385_v2, %v5573_v61 }
 0x945   : > { %v13399_v4 = vpack.c.bf16 %v13397_v3, %v13398_v35  ;;  %v5254_v47 = vmul.f32 %v12428_v45, %v5190_v18  ;;  %v4871_v36 = vmul.f32 %v12469_v32, %v4807_v53  ;;  %v4616_v51 = vmul.f32 0.17087276, %v12501_v41 }
 0x946   : > { %v6338_v9 = vsel %vm6146_vm4, %v6210_v11, %v7159_v55  ;;  %v5701_v58 = vadd.f32 -1.2655122, %v5637_v23  ;;  %v12520_v3 = vadd.f32 %v4089_v62, %v10856_v1  ;;  %v12523_v53 = vadd.f32 %v4091_v13, %v10858_v46  ;;  %v13404_v55 = vld [vmem:[#allocation62_spill] sm:$0xff] }
 0x947   : > { %6702 = vmatmul.mubr.bf16.gmra.mxu1 %v13399_v4  ;;  %v6402_v35 = vadd.f32 1.0, %v6338_v9  ;;  %v5318_v18 = vadd.f32 0.09678418, %v5254_v47  ;;  %v4935_v4 = vadd.f32 -1.135204, %v4871_v36  ;;  %v4164_v23 = vmul.f32 0.5, %v13404_v55 }
 0x948   : > { %6709 = vmatprep.mubr.bf16.mxu1 %v6493_v17  ;;  %13400 = vst [vmem:[#allocation40_spill] sm:$0xff] %v12520_v3  ;;  %13401 = vst [vmem:[#allocation42_spill] sm:$0xff] %v12523_v53  ;;  %v13402_v17 = vld [vmem:[#allocation61_spill] sm:$0xff]  ;;  %v5893_v37 = vadd.f32 %v5829_v40, %v5701_v58  ;;  %v4680_v16 = vadd.f32 -0.82215226, %v4616_v51  ;;  %v5766_v13 = vsub.f32 0.0, %v12361_v8 }
 0x949   : > { %vm6147_vm5 = vcmp.ge.f32.partialorder %v13402_v17, 0.0  ;;  %v12527_v5 = vmul.f32 0.70710677, %v12520_v3  ;;  %v12530_v11 = vmul.f32 %v6402_v35, %v12382_v49  ;;  %v5382_v62 = vmul.f32 %v12428_v45, %v5318_v18  ;;  %v13406_v55 = vld [vmem:[#allocation44_spill] sm:$0xff] }
 0x94a   : > { %v4999_v47 = vmul.f32 %v12469_v32, %v4935_v4  ;;  %v6004_v36 = vmul.f32 1.442695, %v5893_v37  ;;  %v4744_v9 = vmul.f32 %v12501_v41, %v4680_v16  ;;  %v12541_v49 = vmul.f32 0.70710677, %v12523_v53  ;;  %v13407_v4 = vld [vmem:[#allocation38_spill] sm:$0xff] }
 0x94b   : > { %13403 = vst [vmem:[#allocation39_spill] sm:$0xff] %v12527_v5  ;;  %v12538_v40 = vand.u32 2147483647, %v12527_v5  ;;  %v8462_v51 = vpop.eup %8461  ;;  %v5446_v58 = vadd.f32 0.37409195, %v5382_v62  ;;  %v13408_v37 = vpack.c.bf16 %v13406_v55, %v13407_v4 }
 0x94c   : > { %v5063_v61 = vadd.f32 0.27886808, %v4999_v47  ;;  %13405 = vst [vmem:[#allocation41_spill] sm:$0xff] %v12541_v49  ;;  %v6083_v35 = vmul.f32 %v8462_v51, %v12331_v20  ;;  %8467 = vpow2.f32 %v6004_v36  ;;  %v4808_v18 = vadd.f32 1.4885159, %v4744_v9 }
 0x94d   : > { %v4362_v56 = vmul.f32 0.5, %v12538_v40  ;;  %v12548_v16 = vpop.eup %8463  ;;  %v5510_v62 = vmul.f32 %v12428_v45, %v5446_v58  ;;  %v12554_v53 = vand.u32 2147483647, %v12541_v49 }
 0x94e   : > { %v5127_v47 = vmul.f32 %v12469_v32, %v5063_v61  ;;  %v8466_v20 = vpop.eup %8465  ;;  %v6211_v36 = vsub.f32 1.0, %v6083_v35  ;;  %v7160_v9 = vadd.f32 -1.0, %v6083_v35  ;;  %v4872_v51 = vmul.f32 %v12501_v41, %v4808_v18  ;;  %v4093_v18 = vpop.f32.mrf.mxu0 }
 0x94f   : > { %6710 = vmatmul.mubr.bf16.gmra.mxu1 %v13408_v37  ;;  %v4617_v55 = vmul.f32 0.17087276, %v12548_v16  ;;  %v6084_v4 = vmul.f32 %v8466_v20, %v12336_v30  ;;  %v5574_v37 = vadd.f32 1.0000237, %v5510_v62  ;;  %v4426_v3 = vadd.f32 1.0, %v4362_v56 }
 0x950   : > { %6717 = vmatprep.mubr.bf16.mxu1 %v6495_v10  ;;  %v5191_v5 = vadd.f32 -0.18628806, %v5127_v47  ;;  %v6339_v58 = vsel %vm6147_vm5, %v6211_v36, %v7160_v9  ;;  %v5830_v10 = vmul.f32 %v5766_v13, %v12361_v8  ;;  %v4936_v61 = vadd.f32 -1.135204, %v4872_v51  ;;  %v13410_v9 = vld [vmem:[#allocation48_spill] sm:$0xff]  ;;  %v13411_v51 = vld [vmem:[#allocation46_spill] sm:$0xff]  ;;  %v4095_v28 = vpop.f32.mrf.mxu0 }
 0x951   : > { %v4681_v49 = vadd.f32 -0.82215226, %v4617_v55  ;;  %v6403_v31 = vadd.f32 1.0, %v6339_v58  ;;  %v6212_v19 = vsub.f32 1.0, %v6084_v4  ;;  %v7161_v12 = vadd.f32 -1.0, %v6084_v4 }
 0x952   : > { %v5638_v35 = vmul.f32 %v12428_v45, %v5574_v37  ;;  %v5255_v15 = vmul.f32 %v12469_v32, %v5191_v5  ;;  %v5000_v30 = vmul.f32 %v12501_v41, %v4936_v61  ;;  %8469 = vrcp.f32 %v4426_v3 }
 0x953   : > { %v4745_v62 = vmul.f32 %v12548_v16, %v4681_v49  ;;  %v12567_v56 = vmul.f32 %v6403_v31, %v12447_v60  ;;  %v6340_v8 = vsel %vm6148_vm6, %v6212_v19, %v7161_v12  ;;  %v4363_v13 = vmul.f32 0.5, %v12554_v53 }
 0x954   : > { %v5702_v17 = vadd.f32 -1.2655122, %v5638_v35  ;;  %v6404_v47 = vadd.f32 1.0, %v6340_v8  ;;  %v5319_v20 = vadd.f32 0.09678418, %v5255_v15  ;;  %v13412_v5 = vpack.c.bf16 %v13410_v9, %v13411_v51 }
 0x955   : > { %v5064_v36 = vadd.f32 0.27886808, %v5000_v30  ;;  %v12576_v55 = vadd.f32 %v4093_v18, %v10856_v1  ;;  %v4809_v49 = vadd.f32 1.4885159, %v4745_v62  ;;  %v13413_v31 = vpack.c.bf16 %v11834_v34, %v11793_v54 }
 0x956   : > { %v5894_v3 = vadd.f32 %v5830_v10, %v5702_v17  ;;  %v4427_v60 = vadd.f32 1.0, %v4363_v13  ;;  %v12581_v19 = vmul.f32 %v6404_v47, %v4164_v23  ;;  %v5383_v12 = vmul.f32 %v12469_v32, %v5319_v20 }
 0x957   : > { %6718 = vmatmul.mubr.bf16.gmra.mxu1 %v13412_v5  ;;  %v5128_v15 = vmul.f32 %v12501_v41, %v5064_v36  ;;  %v4873_v37 = vmul.f32 %v12548_v16, %v4809_v49  ;;  %v12589_v54 = vmul.f32 0.70710677, %v12576_v55  ;;  %v12592_v35 = vadd.f32 %v4095_v28, %v10858_v46  ;;  %v4099_v28 = vpop.f32.mrf.mxu0 }
 0x958   : > { %6725 = vmatprep.mubr.bf16.mxu1 %v13413_v31  ;;  %v6006_v4 = vmul.f32 1.442695, %v5894_v3  ;;  %8471 = vrcp.f32 %v4427_v60  ;;  %v6508_v58 = vpack.c.bf16 %v12581_v19, %v12530_v11  ;;  %v5447_v10 = vadd.f32 0.37409195, %v5383_v12  ;;  %v13414_v3 = vld [vmem:[#allocation51_spill] sm:$0xff] }
 0x959   : > { %v5192_v61 = vadd.f32 -0.18628806, %v5128_v15  ;;  %v8468_v34 = vpop.eup %8467  ;;  %v4937_v23 = vadd.f32 -1.135204, %v4873_v37  ;;  %v6507_v18 = vpack.c.bf16 %v12504_v44, %v12418_v57  ;;  %v12600_v17 = vand.u32 2147483647, %v12589_v54 }
 0x95a   : > { %8473 = vpow2.f32 %v6006_v4  ;;  %v6085_v30 = vmul.f32 %v8468_v34, %v12385_v2  ;;  %v5511_v62 = vmul.f32 %v12469_v32, %v5447_v10  ;;  %v5767_v13 = vsub.f32 0.0, %v12400_v25  ;;  %v13415_v2 = vld [vmem:[#allocation50_spill] sm:$0xff] }
 0x95b   : > { %v5256_v8 = vmul.f32 %v12501_v41, %v5192_v61  ;;  %v5001_v47 = vmul.f32 %v12548_v16, %v4937_v23  ;;  %v12605_v20 = vmul.f32 0.70710677, %v12592_v35  ;;  %v13416_v49 = vpack.c.bf16 %v13414_v3, %v13415_v2  ;;  %v13432_v57 = vld [vmem:[#allocation66_spill] sm:$0xff] }
 0x95c   : > { %v6213_v36 = vsub.f32 1.0, %v6085_v30  ;;  %v7162_v9 = vadd.f32 -1.0, %v6085_v30  ;;  %v5575_v51 = vadd.f32 1.0000237, %v5511_v62  ;;  %v13417_v60 = vpack.c.bf16 %v13395_v22, %v11892_v29 }
 0x95d   : > { %v5320_v5 = vadd.f32 0.09678418, %v5256_v8  ;;  %v5065_v31 = vadd.f32 0.27886808, %v5001_v47  ;;  %v4364_v12 = vmul.f32 0.5, %v12600_v17  ;;  %v4165_v4 = vmul.f32 0.5, %v12288_v38 }
 0x95e   : > { %v12616_v15 = vand.u32 2147483647, %v12605_v20  ;;  %v6341_v37 = vsel %vm6149_vm7, %v6213_v36, %v7162_v9  ;;  %v5639_v10 = vmul.f32 %v12469_v32, %v5575_v51  ;;  %v5831_v23 = vmul.f32 %v5767_v13, %v12400_v25 }
 0x95f   : > { %6726 = vmatmul.mubr.bf16.gmra.mxu1 %v13416_v49  ;;  %v5384_v61 = vmul.f32 %v12501_v41, %v5320_v5  ;;  %v12621_v34 = vpop.eup %8469  ;;  %v6405_v42 = vadd.f32 1.0, %v6341_v37  ;;  %v5129_v29 = vmul.f32 %v12548_v16, %v5065_v31  ;;  %v4428_v22 = vadd.f32 1.0, %v4364_v12  ;;  %v13419_v37 = vld [vmem:[#allocation52_spill] sm:$0xff] }
 0x960   : > { %6733 = vmatprep.mubr.bf16.mxu1 %v13417_v60  ;;  %v5703_v30 = vadd.f32 -1.2655122, %v5639_v10  ;;  %v4618_v8 = vmul.f32 0.17087276, %v12621_v34  ;;  %v12627_v47 = vadd.f32 %v4099_v28, %v10856_v1  ;;  %v4365_v9 = vmul.f32 0.5, %v12616_v15 }
 0x961   : > { %v5448_v62 = vadd.f32 0.37409195, %v5384_v61  ;;  %v12629_v38 = vmul.f32 %v6405_v42, %v4165_v4  ;;  %v5193_v36 = vadd.f32 -0.18628806, %v5129_v29  ;;  %8475 = vrcp.f32 %v4428_v22  ;;  %v13418_v4 = vld [vmem:[#allocation53_spill] sm:$0xff]  ;;  %v4101_v22 = vpop.f32.mrf.mxu0 }
 0x962   : > { %v5895_v51 = vadd.f32 %v5831_v23, %v5703_v30  ;;  %v4682_v25 = vadd.f32 -0.82215226, %v4618_v8  ;;  %v4166_v13 = vmul.f32 0.5, %v12329_v21  ;;  %v4429_v2 = vadd.f32 1.0, %v4365_v9 }
 0x963   : > { %v5512_v5 = vmul.f32 %v12501_v41, %v5448_v62  ;;  %v5257_v3 = vmul.f32 %v12548_v16, %v5193_v36  ;;  %v12636_v49 = vmul.f32 0.70710677, %v12627_v47  ;;  %v5768_v28 = vsub.f32 0.0, %v12436_v33 }
 0x964   : > { %v6008_v60 = vmul.f32 1.442695, %v5895_v51  ;;  %v13420_v10 = vpack.c.bf16 %v13418_v4, %v13419_v37  ;;  %v4746_v61 = vmul.f32 %v12621_v34, %v4682_v25  ;;  %v13421_v21 = vpack.c.bf16 %v12101_v14, %v13396_v59 }
 0x965   : > { %v12638_v31 = vpop.eup %8471  ;;  %v5576_v12 = vadd.f32 1.0000237, %v5512_v5  ;;  %v5321_v42 = vadd.f32 0.09678418, %v5257_v3  ;;  %8477 = vrcp.f32 %v4429_v2  ;;  %v12650_v29 = vand.u32 2147483647, %v12636_v49 }
 0x966   : > { %v4619_v23 = vmul.f32 0.17087276, %v12638_v31  ;;  %8479 = vpow2.f32 %v6008_v60  ;;  %v4810_v8 = vadd.f32 1.4885159, %v4746_v61  ;;  %v5832_v5 = vmul.f32 %v5768_v28, %v12436_v33 }
 0x967   : > { %6734 = vmatmul.mubr.bf16.gmra.mxu1 %v13420_v10  ;;  %v8474_v30 = vpop.eup %8473  ;;  %v5640_v62 = vmul.f32 %v12501_v41, %v5576_v12  ;;  %v5385_v9 = vmul.f32 %v12548_v16, %v5321_v42  ;;  %v4366_v59 = vmul.f32 0.5, %v12650_v29  ;;  %v12660_v3 = vadd.f32 %v4101_v22, %v10858_v46 }
 0x968   : > { %6741 = vmatprep.mubr.bf16.mxu1 %v13421_v21  ;;  %v6086_v36 = vmul.f32 %v8474_v30, %v12428_v45  ;;  %v4683_v14 = vadd.f32 -0.82215226, %v4619_v23  ;;  %v4874_v25 = vmul.f32 %v12621_v34, %v4810_v8  ;;  %v12664_v45 = vmul.f32 0.5, %v12371_v24  ;;  %v4103_v23 = vpop.f32.mrf.mxu0  ;;  %v13423_v8 = vld [vmem:[#allocation55_spill] sm:$0xff] }
 0x969   : > { %v5704_v51 = vadd.f32 -1.2655122, %v5640_v62  ;;  %v5449_v4 = vadd.f32 0.37409195, %v5385_v9  ;;  %v4430_v61 = vadd.f32 1.0, %v4366_v59  ;;  %v5769_v28 = vsub.f32 0.0, %v12473_v0 }
 0x96a   : > { %v6214_v2 = vsub.f32 1.0, %v6086_v36  ;;  %v7163_v60 = vadd.f32 -1.0, %v6086_v36  ;;  %v4747_v12 = vmul.f32 %v12638_v31, %v4683_v14  ;;  %v4938_v10 = vadd.f32 -1.135204, %v4874_v25  ;;  %v13422_v62 = vld [vmem:[#allocation57_spill] sm:$0xff] }
 0x96b   : > { %v5896_v37 = vadd.f32 %v5832_v5, %v5704_v51  ;;  %v5513_v33 = vmul.f32 %v12548_v16, %v5449_v4  ;;  %v13424_v36 = vpack.c.bf16 %v13422_v62, %v13423_v8  ;;  %8481 = vrcp.f32 %v4430_v61 }
 0x96c   : > { %v6342_v42 = vsel %vm6150_vm8, %v6214_v2, %v7163_v60  ;;  %v4811_v21 = vadd.f32 1.4885159, %v4747_v12  ;;  %v5002_v24 = vmul.f32 %v12621_v34, %v4938_v10  ;;  %v12679_v59 = vmul.f32 0.70710677, %v12660_v3 }
 0x96d   : > { %v6406_v22 = vadd.f32 1.0, %v6342_v42  ;;  %v6010_v30 = vmul.f32 1.442695, %v5896_v37  ;;  %v5577_v9 = vadd.f32 1.0000237, %v5513_v33  ;;  %v6509_v51 = vpack.c.bf16 %v12629_v38, %v12567_v56 }
 0x96e   : > { %v4875_v14 = vmul.f32 %v12638_v31, %v4811_v21  ;;  %v12683_v5 = vpop.eup %8475  ;;  %v5066_v2 = vadd.f32 0.27886808, %v5002_v24  ;;  %v12688_v60 = vadd.f32 %v4103_v23, %v10856_v1  ;;  %v12693_v12 = vand.u32 2147483647, %v12679_v59 }
 0x96f   : > { %6742 = vmatmul.mubr.bf16.gmra.mxu1 %v13424_v36  ;;  %v12685_v25 = vmul.f32 %v6406_v22, %v4166_v13  ;;  %8483 = vpow2.f32 %v6010_v30  ;;  %v5641_v48 = vmul.f32 %v12548_v16, %v5577_v9  ;;  %v4620_v4 = vmul.f32 0.17087276, %v12683_v5 }
 0x970   : > { %6749 = vmatprep.mubr.bf16.mxu1 %v13425_v43  ;;  %v4939_v6 = vadd.f32 -1.135204, %v4875_v14  ;;  %v5833_v37 = vmul.f32 %v5769_v28, %v12473_v0  ;;  %v5130_v13 = vmul.f32 %v12621_v34, %v5066_v2  ;;  %v12699_v10 = vmul.f32 0.70710677, %v12688_v60  ;;  %v13426_v14 = vld [vmem:[#allocation59_spill] sm:$0xff]  ;;  %v13427_v2 = vld [vmem:[#allocation58_spill] sm:$0xff] }
 0x971   : > { %v5705_v61 = vadd.f32 -1.2655122, %v5641_v48  ;;  %v4684_v33 = vadd.f32 -0.82215226, %v4620_v4  ;;  %v4367_v21 = vmul.f32 0.5, %v12693_v12  ;;  %v12706_v22 = vmul.f32 0.5, %v12412_v27 }
 0x972   : > { %v5003_v42 = vmul.f32 %v12638_v31, %v4939_v6  ;;  %v12703_v23 = vpop.eup %8477  ;;  %v12709_v30 = vmul.f32 0.5, %v12443_v50  ;;  %v5194_v0 = vadd.f32 -0.18628806, %v5130_v13  ;;  %v5770_v28 = vsub.f32 0.0, %v12538_v40 }
 0x973   : > { %v8480_v62 = vpop.eup %8479  ;;  %v5897_v8 = vadd.f32 %v5833_v37, %v5705_v61  ;;  %v4748_v24 = vmul.f32 %v12683_v5, %v4684_v33  ;;  %v4621_v9 = vmul.f32 0.17087276, %v12703_v23  ;;  %v13428_v48 = vpack.c.bf16 %v13426_v14, %v13427_v2 }
 0x974   : > { %v5067_v36 = vadd.f32 0.27886808, %v5003_v42  ;;  %v6087_v43 = vmul.f32 %v8480_v62, %v12469_v32  ;;  %v5258_v27 = vmul.f32 %v12621_v34, %v5194_v0  ;;  %v4431_v50 = vadd.f32 1.0, %v4367_v21 }
 0x975   : > { %v12720_v6 = vand.u32 2147483647, %v12699_v10  ;;  %v6012_v4 = vmul.f32 1.442695, %v5897_v8  ;;  %v13429_v37 = vpack.c.bf16 %v12339_v26, %v12292_v7  ;;  %v4812_v61 = vadd.f32 1.4885159, %v4748_v24 }
 0x976   : > { %v5131_v13 = vmul.f32 %v12638_v31, %v5067_v36  ;;  %v4685_v42 = vadd.f32 -0.82215226, %v4621_v9  ;;  %v6215_v32 = vsub.f32 1.0, %v6087_v43  ;;  %v7164_v33 = vadd.f32 -1.0, %v6087_v43 }
 0x977   : > { %6750 = vmatmul.mubr.bf16.gmra.mxu1 %v13428_v48  ;;  %v5322_v62 = vadd.f32 0.09678418, %v5258_v27  ;;  %8485 = vrcp.f32 %v4431_v50  ;;  %v4876_v0 = vmul.f32 %v12683_v5, %v4812_v61  ;;  %v5834_v36 = vmul.f32 %v5770_v28, %v12538_v40 }
 0x978   : > { %6757 = vmatprep.mubr.bf16.mxu1 %v13429_v37  ;;  %8487 = vpow2.f32 %v6012_v4  ;;  %v5195_v21 = vadd.f32 -0.18628806, %v5131_v13  ;;  %v4749_v8 = vmul.f32 %v12703_v23, %v4685_v42  ;;  %v6343_v7 = vsel %vm6151_vm9, %v6215_v32, %v7164_v33  ;;  %v12734_v9 = vpop.eup %8481  ;;  %v4105_v37 = vpop.f32.mrf.mxu0 }
 0x979   : > { %v5386_v26 = vmul.f32 %v12621_v34, %v5322_v62  ;;  %v4368_v24 = vmul.f32 0.5, %v12720_v6  ;;  %v6407_v43 = vadd.f32 1.0, %v6343_v7  ;;  %v4940_v2 = vadd.f32 -1.135204, %v4876_v0  ;;  %v13430_v62 = vld [vmem:[#allocation60_spill] sm:$0xff] }
 0x97a   : > { %v5259_v14 = vmul.f32 %v12638_v31, %v5195_v21  ;;  %v4813_v48 = vadd.f32 1.4885159, %v4749_v8  ;;  %v5771_v50 = vsub.f32 0.0, %v12554_v53  ;;  %v4622_v4 = vmul.f32 0.17087276, %v12734_v9 }
 0x97b   : > { %v5450_v27 = vadd.f32 0.37409195, %v5386_v26  ;;  %v4432_v52 = vadd.f32 1.0, %v4368_v24  ;;  %v12740_v61 = vmul.f32 %v6407_v43, %v12664_v45  ;;  %v5004_v28 = vmul.f32 %v12683_v5, %v4940_v2 }
 0x97c   : > { %v8484_v13 = vpop.eup %8483  ;;  %v5323_v40 = vadd.f32 0.09678418, %v5259_v14  ;;  %v4877_v42 = vmul.f32 %v12703_v23, %v4813_v48  ;;  %v13431_v21 = vpack.c.bf16 %v12318_v63, %v13430_v62  ;;  %v4686_v0 = vadd.f32 -0.82215226, %v4622_v4 }
 0x97d   : > { %v6088_v32 = vmul.f32 %v8484_v13, %v12501_v41  ;;  %v5514_v33 = vmul.f32 %v12621_v34, %v5450_v27  ;;  %8489 = vrcp.f32 %v4432_v52  ;;  %v5068_v7 = vadd.f32 0.27886808, %v5004_v28 }
 0x97e   : > { %v5387_v8 = vmul.f32 %v12638_v31, %v5323_v40  ;;  %v4941_v45 = vadd.f32 -1.135204, %v4877_v42  ;;  %v12754_v26 = vadd.f32 %v4105_v37, %v10858_v46  ;;  %v4750_v14 = vmul.f32 %v12734_v9, %v4686_v0 }
 0x97f   : > { %6758 = vmatmul.mubr.bf16.gmra.mxu1 %v13431_v21  ;;  %v6216_v41 = vsub.f32 1.0, %v6088_v32  ;;  %v7165_v24 = vadd.f32 -1.0, %v6088_v32  ;;  %v5578_v43 = vadd.f32 1.0000237, %v5514_v33  ;;  %v5835_v2 = vmul.f32 %v5771_v50, %v12554_v53 }
 0x980   : > { %6765 = vmatprep.mubr.bf16.mxu1 %v6507_v18  ;;  %v5451_v63 = vadd.f32 0.37409195, %v5387_v8  ;;  %v5132_v48 = vmul.f32 %v12683_v5, %v5068_v7  ;;  %v5005_v27 = vmul.f32 %v12703_v23, %v4941_v45  ;;  %vm6153_vm11 = vcmp.ge.f32.partialorder %v13432_v57, 0.0  ;;  %v13433_v45 = vld [vmem:[#allocation65_spill] sm:$0xff] }
 0x981   : > { %v6344_v4 = vsel %vm6152_vm10, %v6216_v41, %v7165_v24  ;;  %v5642_v44 = vmul.f32 %v12621_v34, %v5578_v43  ;;  %v4814_v18 = vadd.f32 1.4885159, %v4750_v14  ;;  %v12765_v52 = vmul.f32 0.70710677, %v12754_v26  ;;  %v13434_v41 = vld [vmem:[#allocation64_spill] sm:$0xff] }
 0x982   : > { %v6408_v37 = vadd.f32 1.0, %v6344_v4  ;;  %v5515_v13 = vmul.f32 %v12638_v31, %v5451_v63  ;;  %v5196_v40 = vadd.f32 -0.18628806, %v5132_v48  ;;  %v5069_v53 = vadd.f32 0.27886808, %v5005_v27 }
 0x983   : > { %v5706_v50 = vadd.f32 -1.2655122, %v5642_v44  ;;  %v5772_v28 = vsub.f32 0.0, %v12600_v17  ;;  %v4878_v42 = vmul.f32 %v12734_v9, %v4814_v18  ;;  %v12771_v39 = vand.u32 2147483647, %v12765_v52 }
 0x984   : > { %v12773_v32 = vpop.eup %8485  ;;  %v12776_v33 = vmul.f32 %v6408_v37, %v12706_v22  ;;  %v5579_v62 = vadd.f32 1.0000237, %v5515_v13  ;;  %v5260_v21 = vmul.f32 %v12683_v5, %v5196_v40  ;;  %v5133_v0 = vmul.f32 %v12703_v23, %v5069_v53 }
 0x985   : > { %v8488_v8 = vpop.eup %8487  ;;  %v5898_v7 = vadd.f32 %v5834_v36, %v5706_v50  ;;  %v13435_v24 = vpack.c.bf16 %v13433_v45, %v13434_v41  ;;  %v4942_v43 = vadd.f32 -1.135204, %v4878_v42  ;;  %v4623_v14 = vmul.f32 0.17087276, %v12773_v32 }
 0x986   : > { %v4369_v63 = vmul.f32 0.5, %v12771_v39  ;;  %v6510_v22 = vpack.c.bf16 %v12776_v33, %v12685_v25  ;;  %v6089_v48 = vmul.f32 %v8488_v8, %v12548_v16  ;;  %v5643_v27 = vmul.f32 %v12638_v31, %v5579_v62  ;;  %v4109_v8 = vpop.f32.mrf.mxu0 }
 0x987   : > { %6766 = vmatmul.mubr.bf16.gmra.mxu1 %v13435_v24  ;;  %v5324_v4 = vadd.f32 0.09678418, %v5260_v21  ;;  %v6014_v36 = vmul.f32 1.442695, %v5898_v7  ;;  %v5197_v44 = vadd.f32 -0.18628806, %v5133_v0  ;;  %v5006_v18 = vmul.f32 %v12734_v9, %v4942_v43 }
 0x988   : > { %6773 = vmatprep.mubr.bf16.mxu1 %v6509_v51  ;;  %v4687_v37 = vadd.f32 -0.82215226, %v4623_v14  ;;  %v6217_v13 = vsub.f32 1.0, %v6089_v48  ;;  %v7166_v40 = vadd.f32 -1.0, %v6089_v48  ;;  %v5707_v53 = vadd.f32 -1.2655122, %v5643_v27 }
 0x989   : > { %v5388_v50 = vmul.f32 %v12683_v5, %v5324_v4  ;;  %8491 = vpow2.f32 %v6014_v36  ;;  %v5261_v16 = vmul.f32 %v12703_v23, %v5197_v44  ;;  %v5070_v42 = vadd.f32 0.27886808, %v5006_v18 }
 0x98a   : > { %v4751_v62 = vmul.f32 %v12773_v32, %v4687_v37  ;;  %v12796_v21 = vpop.eup %8489  ;;  %v6345_v56 = vsel %vm6153_vm11, %v6217_v13, %v7166_v40  ;;  %v5899_v38 = vadd.f32 %v5835_v2, %v5707_v53  ;;  %v4433_v0 = vadd.f32 1.0, %v4369_v63  ;;  %v13436_v63 = vld [vmem:[#allocation40_spill] sm:$0xff]  ;;  %v4111_v37 = vpop.f32.mrf.mxu0 }
 0x98b   : > { %v5452_v51 = vadd.f32 0.37409195, %v5388_v50  ;;  %v6409_v7 = vadd.f32 1.0, %v6345_v56  ;;  %v5325_v45 = vadd.f32 0.09678418, %v5261_v16  ;;  %v5134_v41 = vmul.f32 %v12734_v9, %v5070_v42 }
 0x98c   : > { %v4815_v24 = vadd.f32 1.4885159, %v4751_v62  ;;  %v6016_v43 = vmul.f32 1.442695, %v5899_v38  ;;  %v4624_v48 = vmul.f32 0.17087276, %v12796_v21  ;;  %8493 = vrcp.f32 %v4433_v0 }
 0x98d   : > { %v5516_v14 = vmul.f32 %v12683_v5, %v5452_v51  ;;  %v6473_v27 = vmul.f32 %v6409_v7, %v12709_v30  ;;  %v5389_v57 = vmul.f32 %v12703_v23, %v5325_v45  ;;  %v5198_v4 = vadd.f32 -0.18628806, %v5134_v41 }
 0x98e   : > { %v4879_v2 = vmul.f32 %v12773_v32, %v4815_v24  ;;  %v12810_v36 = vmul.f32 0.5, %v13436_v63  ;;  %8495 = vpow2.f32 %v6016_v43  ;;  %v4688_v18 = vadd.f32 -0.82215226, %v4624_v48 }
 0x98f   : > { %6774 = vmatmul.mubr.bf16.gmra.mxu1 %v6508_v58  ;;  %v5580_v44 = vadd.f32 1.0000237, %v5516_v14  ;;  %v5453_v13 = vadd.f32 0.37409195, %v5389_v57  ;;  %v5262_v40 = vmul.f32 %v12734_v9, %v5198_v4  ;;  %v12814_v53 = vadd.f32 %v4109_v8, %v10856_v1 }
 0x990   : > { %v4943_v30 = vadd.f32 -1.135204, %v4879_v2  ;;  %v5836_v16 = vmul.f32 %v5772_v28, %v12600_v17  ;;  %v5773_v11 = vsub.f32 0.0, %v12616_v15  ;;  %v4752_v19 = vmul.f32 %v12796_v21, %v4688_v18  ;;  %v13437_v17 = vld [vmem:[#allocation39_spill] sm:$0xff] }
 0x991   : > { %v5644_v50 = vmul.f32 %v12683_v5, %v5580_v44  ;;  %v5517_v58 = vmul.f32 %v12703_v23, %v5453_v13  ;;  %v5326_v42 = vadd.f32 0.09678418, %v5262_v40  ;;  %v12823_v56 = vadd.f32 %v4111_v37, %v10858_v46  ;;  %v13438_v13 = vld [vmem:[#allocation41_spill] sm:$0xff] }
 0x992   : > { %v5007_v62 = vmul.f32 %v12773_v32, %v4943_v30  ;;  %v4816_v51 = vadd.f32 1.4885159, %v4752_v19  ;;  %v12826_v0 = vmul.f32 0.70710677, %v12814_v53  ;;  %v6511_v8 = vpack.c.bf16 %v6473_v27, %v12740_v61 }
 0x993   : > { %v5708_v38 = vadd.f32 -1.2655122, %v5644_v50  ;;  %vm6154_vm12 = vcmp.ge.f32.partialorder %v13437_v17, 0.0  ;;  %v5581_v28 = vadd.f32 1.0000237, %v5517_v58  ;;  %v5390_v7 = vmul.f32 %v12734_v9, %v5326_v42 }
 0x994   : > { %v5071_v45 = vadd.f32 0.27886808, %v5007_v62  ;;  %v5774_v24 = vsub.f32 0.0, %v12650_v29  ;;  %v4880_v43 = vmul.f32 %v12796_v21, %v4816_v51  ;;  %v12834_v14 = vand.u32 2147483647, %v12826_v0  ;;  %6781 = vmatprep.mubr.bf16.mxu1 %v6511_v8 }
 0x995   : > { %v5900_v41 = vadd.f32 %v5836_v16, %v5708_v38  ;;  %v5645_v48 = vmul.f32 %v12703_v23, %v5581_v28  ;;  %v5454_v57 = vadd.f32 0.37409195, %v5390_v7  ;;  %v12839_v27 = vmul.f32 0.70710677, %v12823_v56 }
 0x996   : > { %v5135_v61 = vmul.f32 %v12773_v32, %v5071_v45  ;;  %v8492_v4 = vpop.eup %8491  ;;  %v5837_v63 = vmul.f32 %v5773_v11, %v12616_v15  ;;  %v4944_v44 = vadd.f32 -1.135204, %v4880_v43  ;;  %v4370_v18 = vmul.f32 0.5, %v12834_v14 }
 0x997   : > { %6782 = vmatmul.mubr.bf16.gmra.mxu1 %v6510_v22  ;;  %v6018_v2 = vmul.f32 1.442695, %v5900_v41  ;;  %v6090_v37 = vmul.f32 %v8492_v4, %v12621_v34  ;;  %vm6155_vm13 = vcmp.ge.f32.partialorder %v13438_v13, 0.0  ;;  %v5709_v40 = vadd.f32 -1.2655122, %v5645_v48 }
 0x998   : > { %v5518_v30 = vmul.f32 %v12734_v9, %v5454_v57  ;;  %v5199_v50 = vadd.f32 -0.18628806, %v5135_v61  ;;  %v5838_v16 = vmul.f32 %v5774_v24, %v12650_v29  ;;  %v5008_v25 = vmul.f32 %v12796_v21, %v4944_v44  ;;  %v4113_v61 = vpop.f32.mrf.mxu0 }
 0x999   : > { %8497 = vpow2.f32 %v6018_v2  ;;  %v4434_v33 = vadd.f32 1.0, %v4370_v18  ;;  %v12851_v22 = vpop.eup %8493  ;;  %v6218_v15 = vsub.f32 1.0, %v6090_v37  ;;  %v7167_v11 = vadd.f32 -1.0, %v6090_v37 }
 0x99a   : > { %v5901_v19 = vadd.f32 %v5837_v63, %v5709_v40  ;;  %v5582_v58 = vadd.f32 1.0000237, %v5518_v30  ;;  %v5263_v34 = vmul.f32 %v12773_v32, %v5199_v50  ;;  %v5072_v42 = vadd.f32 0.27886808, %v5008_v25  ;;  %v13439_v40 = vld [vmem:[#allocation42_spill] sm:$0xff] }
 0x99b   : > { %v4625_v62 = vmul.f32 0.17087276, %v12851_v22  ;;  %8499 = vrcp.f32 %v4434_v33  ;;  %v8496_v38 = vpop.eup %8495  ;;  %v6346_v51 = vsel %vm6154_vm12, %v6218_v15, %v7167_v11  ;;  %v12859_v28 = vand.u32 2147483647, %v12839_v27 }
 0x99c   : > { %v6020_v29 = vmul.f32 1.442695, %v5901_v19  ;;  %v5646_v8 = vmul.f32 %v12734_v9, %v5582_v58  ;;  %v6410_v7 = vadd.f32 1.0, %v6346_v51  ;;  %v6091_v45 = vmul.f32 %v8496_v38, %v12638_v31  ;;  %v4115_v19 = vpop.f32.mrf.mxu0 }
 0x99d   : > { %v5327_v41 = vadd.f32 0.09678418, %v5263_v34  ;;  %v5136_v24 = vmul.f32 %v12796_v21, %v5072_v42  ;;  %v4689_v48 = vadd.f32 -0.82215226, %v4625_v62  ;;  %v4371_v57 = vmul.f32 0.5, %v12859_v28 }
 0x99e   : > { %8501 = vpow2.f32 %v6020_v29  ;;  %v5710_v43 = vadd.f32 -1.2655122, %v5646_v8  ;;  %v12865_v17 = vmul.f32 %v6410_v7, %v12810_v36  ;;  %v6219_v4 = vsub.f32 1.0, %v6091_v45 }
 0x99f   : > { %v7168_v2 = vadd.f32 -1.0, %v6091_v45  ;;  %v5391_v63 = vmul.f32 %v12773_v32, %v5327_v41  ;;  %v5200_v18 = vadd.f32 -0.18628806, %v5136_v24  ;;  %v4753_v31 = vmul.f32 %v12851_v22, %v4689_v48 }
 0x9a0   : > { %v5902_v44 = vadd.f32 %v5838_v16, %v5710_v43  ;;  %v4435_v37 = vadd.f32 1.0, %v4371_v57  ;;  %v4171_v30 = vmul.f32 0.5, %v13439_v40  ;;  %v5775_v16 = vsub.f32 0.0, %v12693_v12 }
 0x9a1   : > { %v6347_v50 = vsel %vm6155_vm13, %v6219_v4, %v7168_v2  ;;  %v5455_v25 = vadd.f32 0.37409195, %v5391_v63  ;;  %v5264_v36 = vmul.f32 %v12796_v21, %v5200_v18  ;;  %v4817_v11 = vadd.f32 1.4885159, %v4753_v31 }
 0x9a2   : > { %v6411_v33 = vadd.f32 1.0, %v6347_v50  ;;  %v6022_v15 = vmul.f32 1.442695, %v5902_v44  ;;  %8503 = vrcp.f32 %v4435_v37  ;;  %v12876_v34 = vadd.f32 %v4113_v61, %v10856_v1 }
 0x9a3   : > { %v5519_v58 = vmul.f32 %v12773_v32, %v5455_v25  ;;  %v5328_v13 = vadd.f32 0.09678418, %v5264_v36  ;;  %v4881_v62 = vmul.f32 %v12851_v22, %v4817_v11  ;;  %v4172_v38 = vmul.f32 0.5, %v12576_v55 }
 0x9a4   : > { %v12878_v42 = vmul.f32 %v6411_v33, %v4171_v30  ;;  %8505 = vpow2.f32 %v6022_v15  ;;  %v12883_v29 = vmul.f32 0.70710677, %v12876_v34  ;;  %v12886_v8 = vadd.f32 %v4115_v19, %v10858_v46 }
 0x9a5   : > { %v5583_v51 = vadd.f32 1.0000237, %v5519_v58  ;;  %vm6156_vm14 = vcmp.ge.f32.partialorder %v12589_v54, 0.0  ;;  %v4173_v1 = vmul.f32 0.5, %v12592_v35  ;;  %v5392_v45 = vmul.f32 %v12796_v21, %v5328_v13 }
 0x9a6   : > { %v8498_v7 = vpop.eup %8497  ;;  %v4945_v41 = vadd.f32 -1.135204, %v4881_v62  ;;  %v5839_v55 = vmul.f32 %v5775_v16, %v12693_v12  ;;  %v12895_v48 = vand.u32 2147483647, %v12883_v29  ;;  %v5776_v61 = vsub.f32 0.0, %v12720_v6 }
 0x9a7   : > { %v6092_v24 = vmul.f32 %v8498_v7, %v12683_v5  ;;  %v5647_v43 = vmul.f32 %v12773_v32, %v5583_v51  ;;  %v5456_v46 = vadd.f32 0.37409195, %v5392_v45  ;;  %v12902_v35 = vmul.f32 0.70710677, %v12886_v8 }
 0x9a8   : > { %v12897_v57 = vpop.eup %8499  ;;  %v5009_v4 = vmul.f32 %v12851_v22, %v4945_v41  ;;  %vm6157_vm15 = vcmp.ge.f32.partialorder %v12605_v20, 0.0  ;;  %v4372_v31 = vmul.f32 0.5, %v12895_v48  ;;  %v5840_v58 = vmul.f32 %v5776_v61, %v12720_v6 }
 0x9a9   : > { %v6220_v2 = vsub.f32 1.0, %v6092_v24  ;;  %v7169_v63 = vadd.f32 -1.0, %v6092_v24  ;;  %v5711_v5 = vadd.f32 -1.2655122, %v5647_v43  ;;  %v4626_v44 = vmul.f32 0.17087276, %v12897_v57 }
 0x9aa   : > { %v5520_v12 = vmul.f32 %v12796_v21, %v5456_v46  ;;  %v5073_v18 = vadd.f32 0.27886808, %v5009_v4  ;;  %v12911_v25 = vand.u32 2147483647, %v12902_v35  ;;  %v4436_v13 = vadd.f32 1.0, %v4372_v31 }
 0x9ab   : > { %v8502_v37 = vpop.eup %8501  ;;  %v6348_v40 = vsel %vm6156_vm14, %v6220_v2, %v7169_v63  ;;  %v5903_v30 = vadd.f32 %v5839_v55, %v5711_v5  ;;  %v4690_v50 = vadd.f32 -0.82215226, %v4626_v44  ;;  %vm6158_vm1 = vcmp.ge.f32.partialorder %v12636_v49, 0.0 }
 0x9ac   : > { %v6412_v33 = vadd.f32 1.0, %v6348_v40  ;;  %v6093_v15 = vmul.f32 %v8502_v37, %v12703_v23  ;;  %v5584_v36 = vadd.f32 1.0000237, %v5520_v12  ;;  %v5137_v11 = vmul.f32 %v12851_v22, %v5073_v18 }
 0x9ad   : > { %v6024_v19 = vmul.f32 1.442695, %v5903_v30  ;;  %v4754_v16 = vmul.f32 %v12897_v57, %v4690_v50  ;;  %v4373_v24 = vmul.f32 0.5, %v12911_v25  ;;  %vm6159_vm2 = vcmp.ge.f32.partialorder %v12679_v59, 0.0 }
 0x9ae   : > { %v6476_v62 = vmul.f32 %v6412_v33, %v4172_v38  ;;  %v6221_v54 = vsub.f32 1.0, %v6093_v15  ;;  %v7170_v51 = vadd.f32 -1.0, %v6093_v15  ;;  %v5648_v7 = vmul.f32 %v12796_v21, %v5584_v36 }
 0x9af   : > { %8507 = vpow2.f32 %v6024_v19  ;;  %v5201_v45 = vadd.f32 -0.18628806, %v5137_v11  ;;  %v4818_v41 = vadd.f32 1.4885159, %v4754_v16  ;;  %v12919_v23 = vpop.eup %8503  ;;  %v4437_v44 = vadd.f32 1.0, %v4373_v24 }
 0x9b0   : > { %v6512_v43 = vpack.c.bf16 %v6476_v62, %v12865_v17  ;;  %v6349_v6 = vsel %vm6157_vm15, %v6221_v54, %v7170_v51  ;;  %v5712_v55 = vadd.f32 -1.2655122, %v5648_v7  ;;  %8509 = vrcp.f32 %v4436_v13 }
 0x9b1   : > { %v8506_v46 = vpop.eup %8505  ;;  %v6413_v38 = vadd.f32 1.0, %v6349_v6  ;;  %v5265_v61 = vmul.f32 %v12851_v22, %v5201_v45  ;;  %v4882_v4 = vmul.f32 %v12897_v57, %v4818_v41  ;;  %v4627_v2 = vmul.f32 0.17087276, %v12919_v23 }
 0x9b2   : > { %v6094_v63 = vmul.f32 %v8506_v46, %v12734_v9  ;;  %v5904_v5 = vadd.f32 %v5840_v58, %v5712_v55  ;;  %8511 = vrcp.f32 %v4437_v44  ;;  %v5777_v62 = vsub.f32 0.0, %v12771_v39 }
 0x9b3   : > { %v6477_v12 = vmul.f32 %v6413_v38, %v4173_v1  ;;  %v5329_v18 = vadd.f32 0.09678418, %v5265_v61  ;;  %v4946_v17 = vadd.f32 -1.135204, %v4882_v4  ;;  %v4691_v31 = vadd.f32 -0.82215226, %v4627_v2 }
 0x9b4   : > { %v6222_v20 = vsub.f32 1.0, %v6094_v63  ;;  %v7171_v37 = vadd.f32 -1.0, %v6094_v63  ;;  %v6026_v40 = vmul.f32 1.442695, %v5904_v5  ;;  %v4174_v1 = vmul.f32 0.5, %v12627_v47 }
 0x9b5   : > { %v5393_v30 = vmul.f32 %v12851_v22, %v5329_v18  ;;  %v5010_v50 = vmul.f32 %v12897_v57, %v4946_v17  ;;  %v4755_v33 = vmul.f32 %v12919_v23, %v4691_v31  ;;  %v6513_v9 = vpack.c.bf16 %v6477_v12, %v12878_v42 }
 0x9b6   : > { %v6350_v15 = vsel %vm6158_vm1, %v6222_v20, %v7171_v37  ;;  %8513 = vpow2.f32 %v6026_v40  ;;  %v5841_v55 = vmul.f32 %v5777_v62, %v12771_v39  ;;  %vm6160_vm3 = vcmp.ge.f32.partialorder %v12699_v10, 0.0 }
 0x9b7   : > { %v6414_v36 = vadd.f32 1.0, %v6350_v15  ;;  %v5457_v11 = vadd.f32 0.37409195, %v5393_v30  ;;  %v5074_v19 = vadd.f32 0.27886808, %v5010_v50  ;;  %6789 = vmatprep.mubr.bf16.mxu1 %v6513_v9  ;;  %vm6161_vm4 = vcmp.ge.f32.partialorder %v12765_v52, 0.0 }
 0x9b8   : > { %v4819_v58 = vadd.f32 1.4885159, %v4755_v33  ;;  %6790 = vmatmul.mubr.bf16.gmra.mxu1 %v6512_v43  ;;  %v5780_v52 = vsub.f32 0.0, %v12895_v48  ;;  %vm6162_vm5 = vcmp.ge.f32.partialorder %v12826_v0, 0.0  ;;  %vm6163_vm6 = vcmp.ge.f32.partialorder %v12839_v27, 0.0 }
 0x9b9   : > { %v12934_v16 = vmul.f32 %v6414_v36, %v4174_v1  ;;  %v5521_v49 = vmul.f32 %v12851_v22, %v5457_v11  ;;  %v5138_v13 = vmul.f32 %v12897_v57, %v5074_v19  ;;  %vm6164_vm7 = vcmp.ge.f32.partialorder %v12883_v29, 0.0 }
 0x9ba   : > { %v4883_v54 = vmul.f32 %v12919_v23, %v4819_v58  ;;  %vm6165_vm8 = vcmp.ge.f32.partialorder %v12902_v35, 0.0 }
 0x9bb   : > { %v5585_v51 = vadd.f32 1.0000237, %v5521_v49  ;;  %v5202_v42 = vadd.f32 -0.18628806, %v5138_v13  ;;  %v5778_v13 = vsub.f32 0.0, %v12834_v14 }
 0x9bc   : > { %v8508_v7 = vpop.eup %8507  ;;  %v4947_v47 = vadd.f32 -1.135204, %v4883_v54 }
 0x9bd   : > { %v12940_v45 = vpop.eup %8509  ;;  %v6095_v41 = vmul.f32 %v8508_v7, %v12773_v32  ;;  %v5649_v24 = vmul.f32 %v12851_v22, %v5585_v51  ;;  %v5266_v6 = vmul.f32 %v12897_v57, %v5202_v42  ;;  %v4175_v32 = vmul.f32 0.5, %v12660_v3 }
 0x9be   : > { %v5011_v43 = vmul.f32 %v12919_v23, %v4947_v47  ;;  %v4628_v46 = vmul.f32 0.17087276, %v12940_v45  ;;  %v4176_v42 = vmul.f32 0.5, %v12688_v60 }
 0x9bf   : > { %v6223_v38 = vsub.f32 1.0, %v6095_v41  ;;  %v7172_v61 = vadd.f32 -1.0, %v6095_v41  ;;  %v5713_v4 = vadd.f32 -1.2655122, %v5649_v24  ;;  %v5330_v2 = vadd.f32 0.09678418, %v5266_v6  ;;  %v12949_v44 = vpop.eup %8511 }
 0x9c0   : > { %v5075_v63 = vadd.f32 0.27886808, %v5011_v43  ;;  %v4692_v5 = vadd.f32 -0.82215226, %v4628_v46  ;;  %v4629_v37 = vmul.f32 0.17087276, %v12949_v44  ;;  %v5842_v43 = vmul.f32 %v5778_v13, %v12834_v14 }
 0x9c1   : > { %v6351_v12 = vsel %vm6159_vm2, %v6223_v38, %v7172_v61  ;;  %v5905_v18 = vadd.f32 %v5841_v55, %v5713_v4  ;;  %v5394_v39 = vmul.f32 %v12897_v57, %v5330_v2 }
 0x9c2   : > { %v6415_v17 = vadd.f32 1.0, %v6351_v12  ;;  %v5139_v31 = vmul.f32 %v12919_v23, %v5075_v63  ;;  %v4756_v20 = vmul.f32 %v12940_v45, %v4692_v5  ;;  %v4693_v1 = vadd.f32 -0.82215226, %v4629_v37 }
 0x9c3   : > { %v8514_v40 = vpop.eup %8513  ;;  %v6028_v30 = vmul.f32 1.442695, %v5905_v18  ;;  %v5458_v59 = vadd.f32 0.37409195, %v5394_v39  ;;  %v5779_v39 = vsub.f32 0.0, %v12859_v28 }
 0x9c4   : > { %v12956_v50 = vmul.f32 %v6415_v17, %v4175_v32  ;;  %v6096_v33 = vmul.f32 %v8514_v40, %v12796_v21  ;;  %v5203_v15 = vadd.f32 -0.18628806, %v5139_v31  ;;  %v4820_v3 = vadd.f32 1.4885159, %v4756_v20 }
 0x9c5   : > { %8515 = vpow2.f32 %v6028_v30  ;;  %v5522_v9 = vmul.f32 %v12897_v57, %v5458_v59  ;;  %v4757_v62 = vmul.f32 %v12949_v44, %v4693_v1  ;;  %v5843_v59 = vmul.f32 %v5779_v39, %v12859_v28 }
 0x9c6   : > { %v6224_v36 = vsub.f32 1.0, %v6096_v33  ;;  %v7173_v11 = vadd.f32 -1.0, %v6096_v33  ;;  %v5267_v19 = vmul.f32 %v12919_v23, %v5203_v15  ;;  %v4884_v58 = vmul.f32 %v12940_v45, %v4820_v3 }
 0x9c7   : > { %v5586_v49 = vadd.f32 1.0000237, %v5522_v9  ;;  %v4821_v41 = vadd.f32 1.4885159, %v4757_v62 }
 0x9c8   : > { %v6352_v21 = vsel %vm6160_vm3, %v6224_v36, %v7173_v11  ;;  %v5331_v54 = vadd.f32 0.09678418, %v5267_v19  ;;  %v4948_v51 = vadd.f32 -1.135204, %v4884_v58  ;;  %v4177_v58 = vmul.f32 0.5, %v12754_v26 }
 0x9c9   : > { %v6416_v7 = vadd.f32 1.0, %v6352_v21  ;;  %v5650_v47 = vmul.f32 %v12897_v57, %v5586_v49  ;;  %v4885_v46 = vmul.f32 %v12949_v44, %v4821_v41 }
 0x9ca   : > { %v5395_v24 = vmul.f32 %v12919_v23, %v5331_v54  ;;  %v5012_v6 = vmul.f32 %v12940_v45, %v4948_v51 }
 0x9cb   : > { %v6480_v55 = vmul.f32 %v6416_v7, %v4176_v42  ;;  %v5714_v10 = vadd.f32 -1.2655122, %v5650_v47  ;;  %v4949_v60 = vadd.f32 -1.135204, %v4885_v46 }
 0x9cc   : > { %v5459_v38 = vadd.f32 0.37409195, %v5395_v24  ;;  %v5076_v61 = vadd.f32 0.27886808, %v5012_v6 }
 0x9cd   : > { %v6514_v4 = vpack.c.bf16 %v6480_v55, %v12934_v16  ;;  %v5906_v2 = vadd.f32 %v5842_v43, %v5714_v10  ;;  %v5013_v12 = vmul.f32 %v12949_v44, %v4949_v60  ;;  %v5844_v10 = vmul.f32 %v5780_v52, %v12895_v48 }
 0x9ce   : > { %v5523_v63 = vmul.f32 %v12919_v23, %v5459_v38  ;;  %v5140_v5 = vmul.f32 %v12940_v45, %v5076_v61  ;;  %v5781_v43 = vsub.f32 0.0, %v12911_v25 }
 0x9cf   : > { %v6030_v32 = vmul.f32 1.442695, %v5906_v2  ;;  %v5077_v14 = vadd.f32 0.27886808, %v5013_v12 }
 0x9d0   : > { %v5587_v18 = vadd.f32 1.0000237, %v5523_v63  ;;  %v5204_v17 = vadd.f32 -0.18628806, %v5140_v5 }
 0x9d1   : > { %8517 = vpow2.f32 %v6030_v32  ;;  %v5141_v40 = vmul.f32 %v12949_v44, %v5077_v14  ;;  %v4178_v32 = vmul.f32 0.5, %v12814_v53  ;;  %v13440_v14 = vld [vmem:[#allocation33_spill] sm:$0xff] }
 0x9d2   : > { %v8516_v31 = vpop.eup %8515  ;;  %v5651_v20 = vmul.f32 %v12919_v23, %v5587_v18  ;;  %v5268_v16 = vmul.f32 %v12940_v45, %v5204_v17  ;;  %v5845_v17 = vmul.f32 %v5781_v43, %v12911_v25 }
 0x9d3   : > { %v6097_v37 = vmul.f32 %v8516_v31, %v12851_v22  ;;  %v5205_v9 = vadd.f32 -0.18628806, %v5141_v40 }
 0x9d4   : > { %v5715_v30 = vadd.f32 -1.2655122, %v5651_v20  ;;  %v5332_v33 = vadd.f32 0.09678418, %v5268_v16 }
 0x9d5   : > { %v6225_v15 = vsub.f32 1.0, %v6097_v37  ;;  %v7174_v3 = vadd.f32 -1.0, %v6097_v37  ;;  %v5269_v19 = vmul.f32 %v12949_v44, %v5205_v9 }
 0x9d6   : > { %v5907_v1 = vadd.f32 %v5843_v59, %v5715_v30  ;;  %v5396_v36 = vmul.f32 %v12940_v45, %v5332_v33  ;;  %v13441_v33 = vld [vmem:[#allocation32_spill] sm:$0xff] }
 0x9d7   : > { %v6353_v11 = vsel %vm6161_vm4, %v6225_v15, %v7174_v3  ;;  %v5333_v62 = vadd.f32 0.09678418, %v5269_v19 }
 0x9d8   : > { %v6417_v22 = vadd.f32 1.0, %v6353_v11  ;;  %v6032_v49 = vmul.f32 1.442695, %v5907_v1  ;;  %v5460_v13 = vadd.f32 0.37409195, %v5396_v36  ;;  %v4179_v1 = vmul.f32 0.5, %v12823_v56 }
 0x9d9   : > { %v5397_v54 = vmul.f32 %v12949_v44, %v5333_v62  ;;  %v4180_v62 = vmul.f32 0.5, %v12876_v34 }
 0x9da   : > { %v6481_v21 = vmul.f32 %v6417_v22, %v4177_v58  ;;  %8519 = vpow2.f32 %v6032_v49  ;;  %v5524_v28 = vmul.f32 %v12940_v45, %v5460_v13 }
 0x9db   : > { %v5461_v7 = vadd.f32 0.37409195, %v5397_v54 }
 0x9dc   : > { %v5588_v51 = vadd.f32 1.0000237, %v5524_v28  ;;  %v6515_v42 = vpack.c.bf16 %v6481_v21, %v12956_v50  ;;  %v7432_v26 = vpop.f32.mrf.mxu1  ;;  %v12997_v50 = vld [vmem:[%s13164_s14] ss:$0 sm:$0xff] }
 0x9dd   : > { %v5525_v6 = vmul.f32 %v12949_v44, %v5461_v7 }
 0x9de   : > { %v8518_v47 = vpop.eup %8517  ;;  %v5652_v41 = vmul.f32 %v12940_v45, %v5588_v51  ;;  %6797 = vmatprep.mubr.bf16.mxu1 %v6515_v42  ;;  %v7433_v46 = vpop.f32.mrf.mxu1 }
 0x9df   : > { %v6098_v24 = vmul.f32 %v8518_v47, %v12897_v57  ;;  %6798 = vmatmul.mubr.bf16.gmra.mxu1 %v6514_v4  ;;  %v5589_v2 = vadd.f32 1.0000237, %v5525_v6  ;;  %v7434_v60 = vadd.f32 %v7433_v46, %v7432_v26  ;;  %v13442_v6 = vld [vmem:[#allocation3_spill] sm:$0xff]  ;;  %v13443_v46 = vld [vmem:[#allocation2_spill] sm:$0xff] }
 0x9e0   : > { %v5716_v55 = vadd.f32 -1.2655122, %v5652_v41  ;;  %v7435_v4 = vpop.f32.mrf.mxu1 }
 0x9e1   : > { %v6226_v38 = vsub.f32 1.0, %v6098_v24  ;;  %v7175_v61 = vadd.f32 -1.0, %v6098_v24  ;;  %v5653_v48 = vmul.f32 %v12949_v44, %v5589_v2  ;;  %v6688_v5 = vadd.f32 %v7434_v60, %v12997_v50 }
 0x9e2   : > { %v5908_v57 = vadd.f32 %v5844_v10, %v5716_v55  ;;  %v7436_v39 = vpop.f32.mrf.mxu1 }
 0x9e3   : > { %v6354_v63 = vsel %vm6162_vm5, %v6226_v38, %v7175_v61  ;;  %v5717_v0 = vadd.f32 -1.2655122, %v5653_v48  ;;  %v6814_v31 = vadd.f32 %v6688_v5, %v13440_v14  ;;  %v7437_v20 = vadd.f32 %v7436_v39, %v7435_v4  ;;  %v13444_v4 = vld [vmem:[#allocation30_spill] sm:$0xff] }
 0x9e4   : > { %v6418_v12 = vadd.f32 1.0, %v6354_v63  ;;  %v6034_v18 = vmul.f32 1.442695, %v5908_v57 }
 0x9e5   : > { %v5909_v37 = vadd.f32 %v5845_v17, %v5717_v0  ;;  %6846 = vst.msk [vmem:[%s13008_s26] sm:$0xff] %vm530_vm0, %v6814_v31  ;;  %v6691_v40 = vadd.f32 %v7437_v20, %v12997_v50  ;;  %v13446_v20 = vld [vmem:[#allocation5_spill] sm:$0xff] }
 0x9e6   : > { %v6482_v16 = vmul.f32 %v6418_v12, %v4178_v32  ;;  %8521 = vpow2.f32 %v6034_v18  ;;  %v13445_v18 = vld [vmem:[#allocation7_spill] sm:$0xff] }
 0x9e7   : > { %v8520_v53 = vpop.eup %8519  ;;  %v6036_v59 = vmul.f32 1.442695, %v5909_v37  ;;  %v6815_v15 = vadd.f32 %v6691_v40, %v13441_v33 }
 0x9e8   : > { %v6099_v30 = vmul.f32 %v8520_v53, %v12919_v23 }
 0x9e9   : > { %8523 = vpow2.f32 %v6036_v59  ;;  %6847 = vst.msk [vmem:[%s13008_s26 + $0x8] sm:$0xff] %vm530_vm0, %v6815_v15  ;;  %v13447_v59 = vld [vmem:[#allocation4_spill] sm:$0xff] }
 0x9ea   : > { %v6227_v3 = vsub.f32 1.0, %v6099_v30  ;;  %v7176_v9 = vadd.f32 -1.0, %v6099_v30 }
 0x9ec   : > { %v6355_v25 = vsel %vm6163_vm6, %v6227_v3, %v7176_v9 }
 0x9ed   : > { %v6419_v36 = vadd.f32 1.0, %v6355_v25 }
 0x9ef   : > { %v6483_v11 = vmul.f32 %v6419_v36, %v4179_v1  ;;  %v13448_v1 = vld [vmem:[#allocation31_spill] sm:$0xff] }
 0x9f3   : > { %v8522_v19 = vpop.eup %8521 }
 0x9f4   : > { %v6100_v58 = vmul.f32 %v8522_v19, %v12940_v45  ;;  %v4181_v45 = vmul.f32 0.5, %v12886_v8 }
 0x9f6   : > { %v6228_v22 = vsub.f32 1.0, %v6100_v58  ;;  %v7177_v23 = vadd.f32 -1.0, %v6100_v58  ;;  %v8524_v49 = vpop.eup %8523 }
 0x9f7   : > { %v6101_v21 = vmul.f32 %v8524_v49, %v12949_v44 }
 0x9f8   : > { %v6356_v13 = vsel %vm6164_vm7, %v6228_v22, %v7177_v23  ;;  %v13449_v23 = vld [vmem:[#allocation29_spill] sm:$0xff] }
 0x9f9   : > { %v6420_v27 = vadd.f32 1.0, %v6356_v13  ;;  %v6229_v54 = vsub.f32 1.0, %v6101_v21  ;;  %v7178_v51 = vadd.f32 -1.0, %v6101_v21 }
 0x9fb   : > { %v6484_v28 = vmul.f32 %v6420_v27, %v4180_v62  ;;  %v6357_v52 = vsel %vm6165_vm8, %v6229_v54, %v7178_v51  ;;  %v7438_v7 = vpop.f32.mrf.mxu1 }
 0x9fc   : > { %v6421_v42 = vadd.f32 1.0, %v6357_v52 }
 0x9fd   : > { %v6516_v56 = vpack.c.bf16 %v6484_v28, %v6482_v16  ;;  %v7439_v47 = vpop.f32.mrf.mxu1  ;;  %v13450_v28 = vld [vmem:[#allocation28_spill] sm:$0xff] }
 0x9fe   : > { %v6485_v29 = vmul.f32 %v6421_v42, %v4181_v45  ;;  %v7440_v41 = vadd.f32 %v7439_v47, %v7438_v7  ;;  %v13451_v42 = vld [vmem:[#allocation6_spill] sm:$0xff] }
 0x9ff   : > { %v7441_v26 = vpop.f32.mrf.mxu1 }
 0xa00   : > { %v6517_v34 = vpack.c.bf16 %v6485_v29, %v6483_v11  ;;  %v6696_v44 = vadd.f32 %v7440_v41, %v12997_v50 }
 0xa01   : > { %v7442_v24 = vpop.f32.mrf.mxu1 }
 0xa02   : > { %6805 = vmatprep.mubr.bf16.mxu1 %v6517_v34  ;;  %v6816_v35 = vadd.f32 %v6696_v44, %v13442_v6  ;;  %v7443_v55 = vadd.f32 %v7442_v24, %v7441_v26  ;;  %v13452_v26 = vld [vmem:[#allocation8_spill] sm:$0xff] }
 0xa03   : > { %6806 = vmatmul.mubr.bf16.gmra.mxu1 %v6516_v56 }
 0xa04   : > { %6848 = vst.msk [vmem:[%s13008_s26 + $0x10] sm:$0xff] %vm530_vm0, %v6816_v35  ;;  %v6699_v8 = vadd.f32 %v7443_v55, %v12997_v50 }
 0xa06   : > { %v6817_v38 = vadd.f32 %v6699_v8, %v13443_v46 }
 0xa07   : > { %v7444_v10 = vpop.f32.mrf.mxu1 }
 0xa08   : > { %6849 = vst.msk [vmem:[%s13008_s26 + $0x18] sm:$0xff] %vm530_vm0, %v6817_v38 }
 0xa09   : > { %v7445_v43 = vpop.f32.mrf.mxu1 }
 0xa0a   : > { %v7446_v61 = vadd.f32 %v7445_v43, %v7444_v10  ;;  %v13453_v10 = vld [vmem:[#allocation13_spill] sm:$0xff] }
 0xa0b   : > { %v7447_v2 = vpop.f32.mrf.mxu1 }
 0xa0c   : > { %v6704_v60 = vadd.f32 %v7446_v61, %v12997_v50 }
 0xa0d   : > { %v7448_v57 = vpop.f32.mrf.mxu1 }
 0xa0e   : > { %v6818_v63 = vadd.f32 %v6704_v60, %v13444_v4  ;;  %v7449_v48 = vadd.f32 %v7448_v57, %v7447_v2  ;;  %v13454_v2 = vld [vmem:[#allocation11_spill] sm:$0xff] }
 0xa0f   : > { %v7450_v5 = vpop.f32.mrf.mxu1 }
 0xa10   : > { %6850 = vst.msk [vmem:[%s13008_s26 + $0x20] sm:$0xff] %vm530_vm0, %v6818_v63  ;;  %v6707_v32 = vadd.f32 %v7449_v48, %v12997_v50 }
 0xa11   : > { %v7451_v12 = vpop.f32.mrf.mxu1 }
 0xa12   : > { %v6819_v39 = vadd.f32 %v6707_v32, %v13445_v18  ;;  %v7452_v0 = vadd.f32 %v7451_v12, %v7450_v5  ;;  %v13455_v5 = vld [vmem:[#allocation10_spill] sm:$0xff] }
 0xa13   : > { %v7453_v17 = vpop.f32.mrf.mxu1 }
 0xa14   : > { %6851 = vst.msk [vmem:[%s13008_s26 + $0x28] sm:$0xff] %vm530_vm0, %v6819_v39  ;;  %v6712_v14 = vadd.f32 %v7452_v0, %v12997_v50 }
 0xa15   : > { %v7454_v31 = vpop.f32.mrf.mxu1 }
 0xa16   : > { %v6820_v16 = vadd.f32 %v6712_v14, %v13446_v20  ;;  %v7455_v53 = vadd.f32 %v7454_v31, %v7453_v17  ;;  %v13456_v17 = vld [vmem:[#allocation14_spill] sm:$0xff] }
 0xa17   : > { %v7456_v37 = vpop.f32.mrf.mxu1 }
 0xa18   : > { %6852 = vst.msk [vmem:[%s13008_s26 + $0x30] sm:$0xff] %vm530_vm0, %v6820_v16  ;;  %v6715_v40 = vadd.f32 %v7455_v53, %v12997_v50 }
 0xa19   : > { %v7457_v30 = vpop.f32.mrf.mxu1 }
 0xa1a   : > { %v6821_v33 = vadd.f32 %v6715_v40, %v13447_v59  ;;  %v7458_v15 = vadd.f32 %v7457_v30, %v7456_v37  ;;  %v13457_v37 = vld [vmem:[#allocation19_spill] sm:$0xff] }
 0xa1b   : > { %v7459_v3 = vpop.f32.mrf.mxu1 }
 0xa1c   : > { %6853 = vst.msk [vmem:[%s13008_s26 + $0x38] sm:$0xff] %vm530_vm0, %v6821_v33  ;;  %v6720_v9 = vadd.f32 %v7458_v15, %v12997_v50 }
 0xa1d   : > { %v7460_v25 = vpop.f32.mrf.mxu1 }
 0xa1e   : > { %v6822_v36 = vadd.f32 %v6720_v9, %v13448_v1  ;;  %v7461_v11 = vadd.f32 %v7460_v25, %v7459_v3  ;;  %v13458_v3 = vld [vmem:[#allocation15_spill] sm:$0xff] }
 0xa1f   : > { %v7462_v19 = vpop.f32.mrf.mxu1 }
 0xa20   : > { %6854 = vst.msk [vmem:[%s13008_s26 + $0x40] sm:$0xff] %vm530_vm0, %v6822_v36  ;;  %v6723_v58 = vadd.f32 %v7461_v11, %v12997_v50 }
 0xa21   : > { %v7463_v22 = vpop.f32.mrf.mxu1 }
 0xa22   : > { %v6823_v49 = vadd.f32 %v6723_v58, %v13449_v23  ;;  %v7464_v13 = vadd.f32 %v7463_v22, %v7462_v19  ;;  %v13459_v19 = vld [vmem:[#allocation17_spill] sm:$0xff] }
 0xa23   : > { %v7465_v62 = vpop.f32.mrf.mxu1 }
 0xa24   : > { %6855 = vst.msk [vmem:[%s13008_s26 + $0x48] sm:$0xff] %vm530_vm0, %v6823_v49  ;;  %v6728_v27 = vadd.f32 %v7464_v13, %v12997_v50 }
 0xa25   : > { %v7466_v21 = vpop.f32.mrf.mxu1 }
 0xa26   : > { %v6824_v54 = vadd.f32 %v6728_v27, %v13450_v28  ;;  %v7467_v51 = vadd.f32 %v7466_v21, %v7465_v62  ;;  %v13460_v62 = vld [vmem:[#allocation18_spill] sm:$0xff] }
 0xa27   : > { %v7468_v56 = vpop.f32.mrf.mxu1 }
 0xa28   : > { %6856 = vst.msk [vmem:[%s13008_s26 + $0x50] sm:$0xff] %vm530_vm0, %v6824_v54  ;;  %v6731_v52 = vadd.f32 %v7467_v51, %v12997_v50 }
 0xa29   : > { %v7469_v45 = vpop.f32.mrf.mxu1 }
 0xa2a   : > { %v6825_v7 = vadd.f32 %v6731_v52, %v13451_v42  ;;  %v7470_v29 = vadd.f32 %v7469_v45, %v7468_v56  ;;  %v13461_v56 = vld [vmem:[#allocation21_spill] sm:$0xff] }
 0xa2b   : > { %v7471_v47 = vpop.f32.mrf.mxu1 }
 0xa2c   : > { %6857 = vst.msk [vmem:[%s13008_s26 + $0x58] sm:$0xff] %vm530_vm0, %v6825_v7  ;;  %v6736_v41 = vadd.f32 %v7470_v29, %v12997_v50 }
 0xa2d   : > { %v7472_v34 = vpop.f32.mrf.mxu1 }
 0xa2e   : > { %v6826_v44 = vadd.f32 %v6736_v41, %v13452_v26  ;;  %v7473_v24 = vadd.f32 %v7472_v34, %v7471_v47  ;;  %v13462_v47 = vld [vmem:[#allocation16_spill] sm:$0xff] }
 0xa2f   : > { %v7474_v6 = vpop.f32.mrf.mxu1 }
 0xa30   : > { %6858 = vst.msk [vmem:[%s13008_s26 + $0x60] sm:$0xff] %vm530_vm0, %v6826_v44  ;;  %v6739_v35 = vadd.f32 %v7473_v24, %v12997_v50 }
 0xa31   : > { %v7475_v55 = vpop.f32.mrf.mxu1 }
 0xa32   : > { %v6827_v8 = vadd.f32 %v6739_v35, %v13453_v10  ;;  %v7476_v43 = vadd.f32 %v7475_v55, %v7474_v6  ;;  %v13463_v6 = vld [vmem:[#allocation9_spill] sm:$0xff] }
 0xa33   : > { %v7477_v46 = vpop.f32.mrf.mxu1 }
 0xa34   : > { %6859 = vst.msk [vmem:[%s13008_s26 + $0x68] sm:$0xff] %vm530_vm0, %v6827_v8  ;;  %v6744_v38 = vadd.f32 %v7476_v43, %v12997_v50 }
 0xa35   : > { %v7478_v61 = vpop.f32.mrf.mxu1 }
 0xa36   : > { %v6828_v60 = vadd.f32 %v6744_v38, %v13454_v2  ;;  %v7479_v57 = vadd.f32 %v7478_v61, %v7477_v46  ;;  %v13464_v46 = vld [vmem:[#allocation20_spill] sm:$0xff] }
 0xa37   : > { %v7480_v4 = vpop.f32.mrf.mxu1 }
 0xa38   : > { %6860 = vst.msk [vmem:[%s13008_s26 + $0x70] sm:$0xff] %vm530_vm0, %v6828_v60  ;;  %v6747_v63 = vadd.f32 %v7479_v57, %v12997_v50  ;;  %v13465_v60 = vld [vmem:[#allocation23_spill] sm:$0xff] }
 0xa39   : > { %v7481_v48 = vpop.f32.mrf.mxu1 }
 0xa3a   : > { %v6829_v32 = vadd.f32 %v6747_v63, %v13455_v5  ;;  %v7482_v12 = vadd.f32 %v7481_v48, %v7480_v4 }
 0xa3b   : > { %v7483_v18 = vpop.f32.mrf.mxu1 }
 0xa3c   : > { %6861 = vst.msk [vmem:[%s13008_s26 + $0x78] sm:$0xff] %vm530_vm0, %v6829_v32  ;;  %v6752_v39 = vadd.f32 %v7482_v12, %v12997_v50 }
 0xa3d   : > { %v7484_v0 = vpop.f32.mrf.mxu1 }
 0xa3e   : > { %v6830_v14 = vadd.f32 %v6752_v39, %v13456_v17  ;;  %v7485_v31 = vadd.f32 %v7484_v0, %v7483_v18  ;;  %v13466_v18 = vld [vmem:[#allocation22_spill] sm:$0xff] }
 0xa3f   : > { %v7486_v20 = vpop.f32.mrf.mxu1 }
 0xa40   : > { %6862 = vst.msk [vmem:[%s13008_s26 + $0x80] sm:$0xff] %vm530_vm0, %v6830_v14  ;;  %v6755_v16 = vadd.f32 %v7485_v31, %v12997_v50  ;;  %v13467_v14 = vld [vmem:[#allocation25_spill] sm:$0xff] }
 0xa41   : > { %v7487_v53 = vpop.f32.mrf.mxu1 }
 0xa42   : > { %v6831_v40 = vadd.f32 %v6755_v16, %v13457_v37  ;;  %v7488_v30 = vadd.f32 %v7487_v53, %v7486_v20 }
 0xa43   : > { %v7489_v59 = vpop.f32.mrf.mxu1 }
 0xa44   : > { %6863 = vst.msk [vmem:[%s13008_s26 + $0x88] sm:$0xff] %vm530_vm0, %v6831_v40  ;;  %v6760_v33 = vadd.f32 %v7488_v30, %v12997_v50 }
 0xa45   : > { %v7490_v15 = vpop.f32.mrf.mxu1 }
 0xa46   : > { %v6832_v9 = vadd.f32 %v6760_v33, %v13458_v3  ;;  %v7491_v25 = vadd.f32 %v7490_v15, %v7489_v59  ;;  %v13468_v59 = vld [vmem:[#allocation27_spill] sm:$0xff] }
 0xa47   : > { %v7492_v1 = vpop.f32.mrf.mxu1 }
 0xa48   : > { %6864 = vst.msk [vmem:[%s13008_s26 + $0x90] sm:$0xff] %vm530_vm0, %v6832_v9  ;;  %v6763_v36 = vadd.f32 %v7491_v25, %v12997_v50  ;;  %v13469_v9 = vld [vmem:[#allocation12_spill] sm:$0xff] }
 0xa49   : > { %v7493_v11 = vpop.f32.mrf.mxu1 }
 0xa4a   : > { %v6833_v58 = vadd.f32 %v6763_v36, %v13459_v19  ;;  %v7494_v22 = vadd.f32 %v7493_v11, %v7492_v1 }
 0xa4b   : > { %v7495_v23 = vpop.f32.mrf.mxu1 }
 0xa4c   : > { %6865 = vst.msk [vmem:[%s13008_s26 + $0x98] sm:$0xff] %vm530_vm0, %v6833_v58  ;;  %v6768_v49 = vadd.f32 %v7494_v22, %v12997_v50 }
 0xa4d   : > { %v7496_v13 = vpop.f32.mrf.mxu1 }
 0xa4e   : > { %v6834_v27 = vadd.f32 %v6768_v49, %v13460_v62  ;;  %v7497_v21 = vadd.f32 %v7496_v13, %v7495_v23  ;;  %v13470_v23 = vld [vmem:[#allocation26_spill] sm:$0xff] }
 0xa4f   : > { %v7498_v28 = vpop.f32.mrf.mxu1 }
 0xa50   : > { %6866 = vst.msk [vmem:[%s13008_s26 + $0xa0] sm:$0xff] %vm530_vm0, %v6834_v27  ;;  %v6771_v54 = vadd.f32 %v7497_v21, %v12997_v50  ;;  %v13471_v27 = vld [vmem:[#allocation24_spill] sm:$0xff] }
 0xa51   : > { %v7499_v51 = vpop.f32.mrf.mxu1 }
 0xa52   : > { %v6835_v52 = vadd.f32 %v6771_v54, %v13461_v56  ;;  %v7500_v45 = vadd.f32 %v7499_v51, %v7498_v28 }
 0xa53   : > { %v7501_v42 = vpop.f32.mrf.mxu1 }
 0xa54   : > { %6867 = vst.msk [vmem:[%s13008_s26 + $0xa8] sm:$0xff] %vm530_vm0, %v6835_v52  ;;  %v6776_v7 = vadd.f32 %v7500_v45, %v12997_v50 }
 0xa55   : > { %v7502_v29 = vpop.f32.mrf.mxu1 }
 0xa56   : > { %v6836_v41 = vadd.f32 %v6776_v7, %v13462_v47  ;;  %v7503_v34 = vadd.f32 %v7502_v29, %v7501_v42 }
 0xa57   : > { %v7504_v26 = vpop.f32.mrf.mxu1 }
 0xa58   : > { %6868 = vst.msk [vmem:[%s13008_s26 + $0xb0] sm:$0xff] %vm530_vm0, %v6836_v41  ;;  %v6779_v44 = vadd.f32 %v7503_v34, %v12997_v50 }
 0xa59   : > { %v7505_v24 = vpop.f32.mrf.mxu1 }
 0xa5a   : > { %v6837_v35 = vadd.f32 %v6779_v44, %v13463_v6  ;;  %v7506_v55 = vadd.f32 %v7505_v24, %v7504_v26 }
 0xa5b   : > { %v7507_v10 = vpop.f32.mrf.mxu1 }
 0xa5c   : > { %6869 = vst.msk [vmem:[%s13008_s26 + $0xb8] sm:$0xff] %vm530_vm0, %v6837_v35  ;;  %v6784_v8 = vadd.f32 %v7506_v55, %v12997_v50 }
 0xa5d   : > { %v7508_v43 = vpop.f32.mrf.mxu1 }
 0xa5e   : > { %v6838_v38 = vadd.f32 %v6784_v8, %v13464_v46  ;;  %v7509_v61 = vadd.f32 %v7508_v43, %v7507_v10 }
 0xa60   : > { %6870 = vst.msk [vmem:[%s13008_s26 + $0xc0] sm:$0xff] %vm530_vm0, %v6838_v38  ;;  %v6787_v2 = vadd.f32 %v7509_v61, %v12997_v50 }
 0xa62   : > { %v6839_v57 = vadd.f32 %v6787_v2, %v13465_v60 }
 0xa64   : > { %6871 = vst.msk [vmem:[%s13008_s26 + $0xc8] sm:$0xff] %vm530_vm0, %v6839_v57 }
 0xa78   : > { %v7510_v4 = vpop.f32.mrf.mxu1 }
 0xa7a   : > { %v7511_v63 = vpop.f32.mrf.mxu1 }
 0xa7b   : > { %v7512_v48 = vadd.f32 %v7511_v63, %v7510_v4 }
 0xa7c   : > { %v7513_v5 = vpop.f32.mrf.mxu1 }
 0xa7d   : > { %v6792_v32 = vadd.f32 %v7512_v48, %v12997_v50 }
 0xa7e   : > { %v7514_v12 = vpop.f32.mrf.mxu1 }
 0xa7f   : > { %v6840_v39 = vadd.f32 %v6792_v32, %v13466_v18  ;;  %v7515_v0 = vadd.f32 %v7514_v12, %v7513_v5 }
 0xa81   : > { %6872 = vst.msk [vmem:[%s13008_s26 + $0xd0] sm:$0xff] %vm530_vm0, %v6840_v39  ;;  %v6795_v17 = vadd.f32 %v7515_v0, %v12997_v50 }
 0xa83   : > { %v6841_v31 = vadd.f32 %v6795_v17, %v13467_v14 }
 0xa85   : > { %6873 = vst.msk [vmem:[%s13008_s26 + $0xd8] sm:$0xff] %vm530_vm0, %v6841_v31 }
 0xa9f   : > { %v7516_v20 = vpop.f32.mrf.mxu1 }
 0xaa1   : > { %v7517_v16 = vpop.f32.mrf.mxu1 }
 0xaa2   : > { %v7518_v53 = vadd.f32 %v7517_v16, %v7516_v20 }
 0xaa3   : > { %v7519_v37 = vpop.f32.mrf.mxu1 }
 0xaa4   : > { %v6800_v40 = vadd.f32 %v7518_v53, %v12997_v50 }
 0xaa5   : > { %v7520_v30 = vpop.f32.mrf.mxu1 }
 0xaa6   : > { %v6842_v33 = vadd.f32 %v6800_v40, %v13468_v59  ;;  %v7521_v15 = vadd.f32 %v7520_v30, %v7519_v37 }
 0xaa8   : > { %6874 = vst.msk [vmem:[%s13008_s26 + $0xe0] sm:$0xff] %vm530_vm0, %v6842_v33  ;;  %v6803_v3 = vadd.f32 %v7521_v15, %v12997_v50 }
 0xaaa   : > { %v6843_v25 = vadd.f32 %v6803_v3, %v13469_v9 }
 0xaac   : > { %6875 = vst.msk [vmem:[%s13008_s26 + $0xe8] sm:$0xff] %vm530_vm0, %v6843_v25 }
 0xac3   : > { %v7522_v1 = vpop.f32.mrf.mxu1 }
 0xac5   : > { %v7523_v36 = vpop.f32.mrf.mxu1 }
 0xac6   : > { %v7524_v11 = vadd.f32 %v7523_v36, %v7522_v1 }
 0xac7   : > { %v7525_v19 = vpop.f32.mrf.mxu1 }
 0xac8   : > { %v6808_v58 = vadd.f32 %v7524_v11, %v12997_v50 }
 0xac9   : > { %v7526_v22 = vpop.f32.mrf.mxu1 }
 0xaca   : > { %v6844_v49 = vadd.f32 %v6808_v58, %v13470_v23  ;;  %v7527_v13 = vadd.f32 %v7526_v22, %v7525_v19 }
 0xacc   : > { %6876 = vst.msk [vmem:[%s13008_s26 + $0xf0] sm:$0xff] %vm530_vm0, %v6844_v49  ;;  %v6811_v62 = vadd.f32 %v7527_v13, %v12997_v50 }
 0xace   : > { %v6845_v21 = vadd.f32 %v6811_v62, %v13471_v27 }
 0xad0   : > { %6877 = vst.msk [vmem:[%s13008_s26 + $0xf8] sm:$0xff] %vm530_vm0, %v6845_v21 }
 0xad1 PF: > { %s25_s18 = sadd.s32 1, %s8571_s18  }
 0xad2   : > { %p22_p4 = scmp.ge.s32.totalorder %s25_s18, 4  }
 0xad4   :  { %24 = sbr.rel (!%p22_p4) target bundleno = 1 (0x1), region = 110 }

</bundles_post_ra>
